<compile_context>
chip_gen: v7x
topology: tpu7x:2x2x1
jax: 0.10.0
libtpu: 0.0.40
codegen_flags: <defaults>
</compile_context>

<pallas_src>
import jax
import jax.numpy as jnp
from jax import lax
from jax.experimental import pallas as pl
from jax.experimental.pallas import tpu as pltpu

_B_TILE = 128  # batch elements per grid step, mapped onto the lane axis


def _fcn_kernel(x_ref,
                m1, b1, m2, b2, m3, b3, m4, b4, m5, b5, mh, bh,
                out_ref):
    """One grid step = _B_TILE batch elements on the lane (last) axis."""
    h = x_ref[...]                                             # (L0, Bt) bf16
    for m_ref, b_ref in ((m1, b1), (m2, b2), (m3, b3), (m4, b4), (m5, b5)):
        z = jnp.dot(m_ref[...], h, preferred_element_type=jnp.float32) + b_ref[...]
        h = jnp.maximum(z, 0.0).astype(jnp.bfloat16)           # ReLU in f32, bf16 for next matmul
    # TODO(synk): nn.Dropout is identity at inference; training-mode stochastic masking not implemented.
    out_ref[...] = jnp.dot(mh[...], h, preferred_element_type=jnp.float32) + bh[...]


def _conv_operator(w, l_in):
    """torch Conv1d weight (Cout, Cin, K) -> dense VALID-conv operator
    (Cout*Lout, Cin*Lin) acting on the channel-major flattened (C, L) vector."""
    c_out, c_in, k = w.shape
    l_out = l_in - k + 1
    t = jnp.arange(l_out)[:, None, None]
    kk = jnp.arange(k)[None, :, None]
    ll = jnp.arange(l_in)[None, None, :]
    sel = (ll == t + kk).astype(jnp.float32)                   # (Lout, K, Lin)
    m = jnp.einsum('oik,tkl->otil', w.astype(jnp.float32), sel)
    return m.reshape(c_out * l_out, c_in * l_in)


def _pool_operator(c, l_in):
    """AvgPool1d(kernel=2, stride=2) operator (C*Lout, C*Lin), block-diag over channels."""
    l_out = l_in // 2
    rows = jnp.arange(l_out)[:, None]
    cols = jnp.arange(l_in)[None, :]
    p = jnp.where((cols == 2 * rows) | (cols == 2 * rows + 1), 0.5, 0.0).astype(jnp.float32)
    return jnp.kron(jnp.eye(c, dtype=jnp.float32), p)


def _expand_bias(b, l_out):
    """(Cout,) -> (Cout*Lout, 1): each channel bias repeated over its positions."""
    return jnp.repeat(b.astype(jnp.float32), l_out).reshape(-1, 1)


def fully_conv_net_forward(x, params, mean, std):
    (w1, b1), (w2, b2), (w3, b3), (w4, b4), (w5, b5), (wh, bh) = params
    B = x.shape[0]
    l0 = x.shape[-1]
    out_dims = wh.shape[0]
    ks = tuple(int(w.shape[-1]) for w in (w1, w2, w3, w4, w5))
    cs = tuple(int(w.shape[0]) for w in (w1, w2, w3, w4, w5))   # per-layer out channels

    # Static length trace (VALID convs, floor-pooling), matching PyTorch.
    l1 = l0 - ks[0] + 1
    l2 = l1 // 2 - ks[1] + 1
    l3 = l2 // 2 - ks[2] + 1
    l4 = l3 // 2 - ks[3] + 1
    l5 = l4 // 2 - ks[4] + 1

    # Fold normalization into conv1 (valid for scalar mean/std):
    #   conv1((x - mean)/std) == conv1'(x), w1' = w1/std, b1' = b1 - mean*sum(w1')
    w1f = w1.astype(jnp.float32) / std
    b1f = b1.astype(jnp.float32) - mean * jnp.sum(w1f, axis=(1, 2))

    # Fused per-layer operators: M1 = conv1 ; M_i = conv_i ∘ pool_{i-1} (i >= 2).
    m1 = _conv_operator(w1f, l0)
    m2 = _conv_operator(w2, l1 // 2) @ _pool_operator(cs[0], l1)
    m3 = _conv_operator(w3, l2 // 2) @ _pool_operator(cs[1], l2)
    m4 = _conv_operator(w4, l3 // 2) @ _pool_operator(cs[2], l3)
    m5 = _conv_operator(w5, l4 // 2) @ _pool_operator(cs[3], l4)
    # Head (1x1 conv) fused with the final mean over length (scale 1/l5).
    mh = jnp.repeat(wh[:, :, 0].astype(jnp.float32), l5, axis=1) / float(l5)

    eb1 = _expand_bias(b1f, l1)
    eb2 = _expand_bias(b2, l2)
    eb3 = _expand_bias(b3, l3)
    eb4 = _expand_bias(b4, l4)
    eb5 = _expand_bias(b5, l5)
    ebh = bh.astype(jnp.float32).reshape(out_dims, 1)

    # Batch on lanes: (L0, B) bf16, padded to a multiple of _B_TILE.
    xt = x.astype(jnp.float32).reshape(B, l0).T
    b_pad = pl.cdiv(B, _B_TILE) * _B_TILE
    if b_pad != B:
        xt = jnp.pad(xt, ((0, 0), (0, b_pad - B)))
    xt = xt.astype(jnp.bfloat16)

    consts = [m1.astype(jnp.bfloat16), eb1,
              m2.astype(jnp.bfloat16), eb2,
              m3.astype(jnp.bfloat16), eb3,
              m4.astype(jnp.bfloat16), eb4,
              m5.astype(jnp.bfloat16), eb5,
              mh.astype(jnp.bfloat16), ebh]

    def call(single_buffer_consts):
        def const_spec(a):
            kwargs = {}
            if single_buffer_consts and hasattr(pl, "Buffered"):
                kwargs["pipeline_mode"] = pl.Buffered(1)   # invariant -> single-buffered
            return pl.BlockSpec(a.shape, lambda i: (0, 0), **kwargs)

        in_specs = [pl.BlockSpec((l0, _B_TILE), lambda i: (0, i))]
        in_specs += [const_spec(a) for a in consts]
        return pl.pallas_call(
            _fcn_kernel,
            out_shape=jax.ShapeDtypeStruct((out_dims, b_pad), jnp.float32),
            grid=(b_pad // _B_TILE,),
            in_specs=in_specs,
            out_specs=pl.BlockSpec((out_dims, _B_TILE), lambda i: (0, i)),
            compiler_params=pltpu.CompilerParams(
                dimension_semantics=("parallel",),
                vmem_limit_bytes=32 * 1024 * 1024),
        )(xt, *consts)

    try:
        out = call(True)
    except Exception:
        # Fallback for jax versions without BlockSpec.pipeline_mode / pl.Buffered(1).
        out = call(False)

    return out.T[:B]                     # (B, out_dims); kernel store was lane-dense


def init_params(key, out_dims=1):
    # Conv1d shapes from the module __init__; PyTorch-style uniform init.
    specs = [(2, 1, 9), (2, 2, 7), (4, 2, 7), (8, 4, 5), (12, 8, 3), (out_dims, 12, 1)]
    params = []
    for c_out, c_in, k in specs:
        key, kw, kb = jax.random.split(key, 3)
        bound = 1.0 / (c_in * k) ** 0.5
        w = jax.random.uniform(kw, (c_out, c_in, k), jnp.float32, -bound, bound)
        b = jax.random.uniform(kb, (c_out,), jnp.float32, -bound, bound)
        params.append((w, b))
    return params


def reference_forward(x, params, mean, std):
    # Pure-JAX reference mirroring the PyTorch forward (eval mode).
    def conv(h, w, b):
        y = lax.conv_general_dilated(h, w, (1,), 'VALID',
                                     dimension_numbers=('NCH', 'OIH', 'NCH'))
        return y + b[None, :, None]

    def pool(h):
        bsz, c, l = h.shape
        lp = l // 2
        return h[:, :, :2 * lp].reshape(bsz, c, lp, 2).mean(-1)

    (w1, b1), (w2, b2), (w3, b3), (w4, b4), (w5, b5), (wh, bh) = params
    h = (x - mean) / std
    h = pool(jax.nn.relu(conv(h, w1, b1)))
    h = pool(jax.nn.relu(conv(h, w2, b2)))
    h = pool(jax.nn.relu(conv(h, w3, b3)))
    h = pool(jax.nn.relu(conv(h, w4, b4)))
    h = jax.nn.relu(conv(h, w5, b5))
    h = conv(h, wh, bh)
    return h.mean(-1)


if __name__ == "__main__":
    key = jax.random.PRNGKey(0)
    key, kx = jax.random.split(key)

    B, L = 2, 256                 # input (B, 1, L): Conv1d(1, 2, 9) implies 1 input channel
    mean, std = 0.5, 2.0          # deterministic normalization "parameters"
    params = init_params(key, out_dims=1)
    x = jax.random.normal(kx, (B, 1, L), jnp.float32)

    out = jax.block_until_ready(fully_conv_net_forward(x, params, mean, std))
    ref = reference_forward(x, params, mean, std)

    assert out.shape == (B, 1), out.shape
    # bf16 MXU inputs (f32 accumulate) -> small numerical deviation vs f32 reference.
    assert bool(jnp.allclose(out, ref, atol=2e-2, rtol=2e-2)), (out, ref)
    print("KERNEL_OK")
</pallas_src>

<mosaic_0001>
module attributes {stable_mosaic.version = 11 : i64} {
  func.func @_fcn_kernel(%arg0: i32, %arg1: memref<256x128xbf16, #tpu.memory_space<vmem>>, %arg2: memref<496x256xbf16, #tpu.memory_space<vmem>>, %arg3: memref<496x1xf32, #tpu.memory_space<vmem>>, %arg4: memref<236x496xbf16, #tpu.memory_space<vmem>>, %arg5: memref<236x1xf32, #tpu.memory_space<vmem>>, %arg6: memref<212x236xbf16, #tpu.memory_space<vmem>>, %arg7: memref<212x1xf32, #tpu.memory_space<vmem>>, %arg8: memref<176x212xbf16, #tpu.memory_space<vmem>>, %arg9: memref<176x1xf32, #tpu.memory_space<vmem>>, %arg10: memref<108x176xbf16, #tpu.memory_space<vmem>>, %arg11: memref<108x1xf32, #tpu.memory_space<vmem>>, %arg12: memref<1x108xbf16, #tpu.memory_space<vmem>>, %arg13: memref<1x1xf32, #tpu.memory_space<vmem>>, %arg14: memref<1x128xf32, #tpu.memory_space<vmem>>) attributes {dimension_semantics = [#tpu.dimension_semantics<parallel>], iteration_bounds = array<i64: 1>, scalar_prefetch = 0 : i64, scratch_operands = 0 : i64, tpu.core_type = #tpu.core_type<tc>, window_params = [{transform_indices = @transform_0, window_bounds = array<i64: 256, 128>}, {pipeline_mode = #tpu.pipeline_mode<synchronous>, transform_indices = @transform_1, window_bounds = array<i64: 496, 256>}, {pipeline_mode = #tpu.pipeline_mode<synchronous>, transform_indices = @transform_2, window_bounds = array<i64: 496, 1>}, {pipeline_mode = #tpu.pipeline_mode<synchronous>, transform_indices = @transform_3, window_bounds = array<i64: 236, 496>}, {pipeline_mode = #tpu.pipeline_mode<synchronous>, transform_indices = @transform_4, window_bounds = array<i64: 236, 1>}, {pipeline_mode = #tpu.pipeline_mode<synchronous>, transform_indices = @transform_5, window_bounds = array<i64: 212, 236>}, {pipeline_mode = #tpu.pipeline_mode<synchronous>, transform_indices = @transform_6, window_bounds = array<i64: 212, 1>}, {pipeline_mode = #tpu.pipeline_mode<synchronous>, transform_indices = @transform_7, window_bounds = array<i64: 176, 212>}, {pipeline_mode = #tpu.pipeline_mode<synchronous>, transform_indices = @transform_8, window_bounds = array<i64: 176, 1>}, {pipeline_mode = #tpu.pipeline_mode<synchronous>, transform_indices = @transform_9, window_bounds = array<i64: 108, 176>}, {pipeline_mode = #tpu.pipeline_mode<synchronous>, transform_indices = @transform_10, window_bounds = array<i64: 108, 1>}, {pipeline_mode = #tpu.pipeline_mode<synchronous>, transform_indices = @transform_11, window_bounds = array<i64: 1, 108>}, {pipeline_mode = #tpu.pipeline_mode<synchronous>, transform_indices = @transform_12, window_bounds = array<i64: 1, 1>}, {transform_indices = @transform_13, window_bounds = array<i64: 1, 128>}]} {
    %c0 = arith.constant 0 : index
    %c0_0 = arith.constant 0 : index
    %0 = vector.load %arg1[%c0, %c0_0] : memref<256x128xbf16, #tpu.memory_space<vmem>>, vector<256x128xbf16>
    %c0_1 = arith.constant 0 : index
    %c0_2 = arith.constant 0 : index
    %1 = vector.load %arg2[%c0_1, %c0_2] : memref<496x256xbf16, #tpu.memory_space<vmem>>, vector<496x256xbf16>
    %cst = arith.constant dense<0.000000e+00> : vector<496x128xf32>
    %2 = tpu.matmul %1, %0, %cst {dimension_numbers = #tpu.dot_dimension_numbers<[1], [0], [0], [1], [0, 0, 1, 1], [], []>} : vector<496x256xbf16>, vector<256x128xbf16>, vector<496x128xf32> -> vector<496x128xf32>
    %c0_3 = arith.constant 0 : index
    %c0_4 = arith.constant 0 : index
    %3 = vector.load %arg3[%c0_3, %c0_4] : memref<496x1xf32, #tpu.memory_space<vmem>>, vector<496x1xf32>
    %4 = vector.broadcast %3 : vector<496x1xf32> to vector<496x128xf32>
    %5 = arith.addf %2, %4 : vector<496x128xf32>
    %cst_5 = arith.constant 0.000000e+00 : f32
    %6 = vector.broadcast %cst_5 : f32 to vector<496x128xf32>
    %7 = arith.maximumf %5, %6 : vector<496x128xf32>
    %8 = arith.truncf %7 : vector<496x128xf32> to vector<496x128xbf16>
    %c0_6 = arith.constant 0 : index
    %c0_7 = arith.constant 0 : index
    %9 = vector.load %arg4[%c0_6, %c0_7] : memref<236x496xbf16, #tpu.memory_space<vmem>>, vector<236x496xbf16>
    %cst_8 = arith.constant dense<0.000000e+00> : vector<236x128xf32>
    %10 = tpu.matmul %9, %8, %cst_8 {dimension_numbers = #tpu.dot_dimension_numbers<[1], [0], [0], [1], [0, 0, 1, 1], [], []>} : vector<236x496xbf16>, vector<496x128xbf16>, vector<236x128xf32> -> vector<236x128xf32>
    %c0_9 = arith.constant 0 : index
    %c0_10 = arith.constant 0 : index
    %11 = vector.load %arg5[%c0_9, %c0_10] : memref<236x1xf32, #tpu.memory_space<vmem>>, vector<236x1xf32>
    %12 = vector.broadcast %11 : vector<236x1xf32> to vector<236x128xf32>
    %13 = arith.addf %10, %12 : vector<236x128xf32>
    %cst_11 = arith.constant 0.000000e+00 : f32
    %14 = vector.broadcast %cst_11 : f32 to vector<236x128xf32>
    %15 = arith.maximumf %13, %14 : vector<236x128xf32>
    %16 = arith.truncf %15 : vector<236x128xf32> to vector<236x128xbf16>
    %c0_12 = arith.constant 0 : index
    %c0_13 = arith.constant 0 : index
    %17 = vector.load %arg6[%c0_12, %c0_13] : memref<212x236xbf16, #tpu.memory_space<vmem>>, vector<212x236xbf16>
    %cst_14 = arith.constant dense<0.000000e+00> : vector<212x128xf32>
    %18 = tpu.matmul %17, %16, %cst_14 {dimension_numbers = #tpu.dot_dimension_numbers<[1], [0], [0], [1], [0, 0, 1, 1], [], []>} : vector<212x236xbf16>, vector<236x128xbf16>, vector<212x128xf32> -> vector<212x128xf32>
    %c0_15 = arith.constant 0 : index
    %c0_16 = arith.constant 0 : index
    %19 = vector.load %arg7[%c0_15, %c0_16] : memref<212x1xf32, #tpu.memory_space<vmem>>, vector<212x1xf32>
    %20 = vector.broadcast %19 : vector<212x1xf32> to vector<212x128xf32>
    %21 = arith.addf %18, %20 : vector<212x128xf32>
    %cst_17 = arith.constant 0.000000e+00 : f32
    %22 = vector.broadcast %cst_17 : f32 to vector<212x128xf32>
    %23 = arith.maximumf %21, %22 : vector<212x128xf32>
    %24 = arith.truncf %23 : vector<212x128xf32> to vector<212x128xbf16>
    %c0_18 = arith.constant 0 : index
    %c0_19 = arith.constant 0 : index
    %25 = vector.load %arg8[%c0_18, %c0_19] : memref<176x212xbf16, #tpu.memory_space<vmem>>, vector<176x212xbf16>
    %cst_20 = arith.constant dense<0.000000e+00> : vector<176x128xf32>
    %26 = tpu.matmul %25, %24, %cst_20 {dimension_numbers = #tpu.dot_dimension_numbers<[1], [0], [0], [1], [0, 0, 1, 1], [], []>} : vector<176x212xbf16>, vector<212x128xbf16>, vector<176x128xf32> -> vector<176x128xf32>
    %c0_21 = arith.constant 0 : index
    %c0_22 = arith.constant 0 : index
    %27 = vector.load %arg9[%c0_21, %c0_22] : memref<176x1xf32, #tpu.memory_space<vmem>>, vector<176x1xf32>
    %28 = vector.broadcast %27 : vector<176x1xf32> to vector<176x128xf32>
    %29 = arith.addf %26, %28 : vector<176x128xf32>
    %cst_23 = arith.constant 0.000000e+00 : f32
    %30 = vector.broadcast %cst_23 : f32 to vector<176x128xf32>
    %31 = arith.maximumf %29, %30 : vector<176x128xf32>
    %32 = arith.truncf %31 : vector<176x128xf32> to vector<176x128xbf16>
    %c0_24 = arith.constant 0 : index
    %c0_25 = arith.constant 0 : index
    %33 = vector.load %arg10[%c0_24, %c0_25] : memref<108x176xbf16, #tpu.memory_space<vmem>>, vector<108x176xbf16>
    %cst_26 = arith.constant dense<0.000000e+00> : vector<108x128xf32>
    %34 = tpu.matmul %33, %32, %cst_26 {dimension_numbers = #tpu.dot_dimension_numbers<[1], [0], [0], [1], [0, 0, 1, 1], [], []>} : vector<108x176xbf16>, vector<176x128xbf16>, vector<108x128xf32> -> vector<108x128xf32>
    %c0_27 = arith.constant 0 : index
    %c0_28 = arith.constant 0 : index
    %35 = vector.load %arg11[%c0_27, %c0_28] : memref<108x1xf32, #tpu.memory_space<vmem>>, vector<108x1xf32>
    %36 = vector.broadcast %35 : vector<108x1xf32> to vector<108x128xf32>
    %37 = arith.addf %34, %36 : vector<108x128xf32>
    %cst_29 = arith.constant 0.000000e+00 : f32
    %38 = vector.broadcast %cst_29 : f32 to vector<108x128xf32>
    %39 = arith.maximumf %37, %38 : vector<108x128xf32>
    %40 = arith.truncf %39 : vector<108x128xf32> to vector<108x128xbf16>
    %c0_30 = arith.constant 0 : index
    %c0_31 = arith.constant 0 : index
    %41 = vector.load %arg12[%c0_30, %c0_31] : memref<1x108xbf16, #tpu.memory_space<vmem>>, vector<1x108xbf16>
    %cst_32 = arith.constant dense<0.000000e+00> : vector<1x128xf32>
    %42 = tpu.matmul %41, %40, %cst_32 {dimension_numbers = #tpu.dot_dimension_numbers<[1], [0], [0], [1], [0, 0, 1, 1], [], []>} : vector<1x108xbf16>, vector<108x128xbf16>, vector<1x128xf32> -> vector<1x128xf32>
    %c0_33 = arith.constant 0 : index
    %c0_34 = arith.constant 0 : index
    %43 = vector.load %arg13[%c0_33, %c0_34] : memref<1x1xf32, #tpu.memory_space<vmem>>, vector<1x1xf32>
    %44 = vector.broadcast %43 : vector<1x1xf32> to vector<1x128xf32>
    %45 = arith.addf %42, %44 : vector<1x128xf32>
    %c0_35 = arith.constant 0 : index
    %c0_36 = arith.constant 0 : index
    %46 = vector.load %arg14[%c0_35, %c0_36] : memref<1x128xf32, #tpu.memory_space<vmem>>, vector<1x128xf32>
    tpu.vector_store %arg14[%c0_35, %c0_36], %45 {strides = array<i32>} : memref<1x128xf32, #tpu.memory_space<vmem>>, vector<1x128xf32>,
    return
  }
  func.func @transform_0(%arg0: i32) -> (i32, i32) {
    %c0_i32 = arith.constant 0 : i32
    %c0_i32_0 = arith.constant 0 : i32
    return %c0_i32, %arg0 : i32, i32
  }
  func.func @transform_1(%arg0: i32) -> (i32, i32) {
    %c0_i32 = arith.constant 0 : i32
    %c0_i32_0 = arith.constant 0 : i32
    %c0_i32_1 = arith.constant 0 : i32
    return %c0_i32, %c0_i32_0 : i32, i32
  }
  func.func @transform_2(%arg0: i32) -> (i32, i32) {
    %c0_i32 = arith.constant 0 : i32
    %c0_i32_0 = arith.constant 0 : i32
    %c0_i32_1 = arith.constant 0 : i32
    return %c0_i32, %c0_i32_0 : i32, i32
  }
  func.func @transform_3(%arg0: i32) -> (i32, i32) {
    %c0_i32 = arith.constant 0 : i32
    %c0_i32_0 = arith.constant 0 : i32
    %c0_i32_1 = arith.constant 0 : i32
    return %c0_i32, %c0_i32_0 : i32, i32
  }
  func.func @transform_4(%arg0: i32) -> (i32, i32) {
    %c0_i32 = arith.constant 0 : i32
    %c0_i32_0 = arith.constant 0 : i32
    %c0_i32_1 = arith.constant 0 : i32
    return %c0_i32, %c0_i32_0 : i32, i32
  }
  func.func @transform_5(%arg0: i32) -> (i32, i32) {
    %c0_i32 = arith.constant 0 : i32
    %c0_i32_0 = arith.constant 0 : i32
    %c0_i32_1 = arith.constant 0 : i32
    return %c0_i32, %c0_i32_0 : i32, i32
  }
  func.func @transform_6(%arg0: i32) -> (i32, i32) {
    %c0_i32 = arith.constant 0 : i32
    %c0_i32_0 = arith.constant 0 : i32
    %c0_i32_1 = arith.constant 0 : i32
    return %c0_i32, %c0_i32_0 : i32, i32
  }
  func.func @transform_7(%arg0: i32) -> (i32, i32) {
    %c0_i32 = arith.constant 0 : i32
    %c0_i32_0 = arith.constant 0 : i32
    %c0_i32_1 = arith.constant 0 : i32
    return %c0_i32, %c0_i32_0 : i32, i32
  }
  func.func @transform_8(%arg0: i32) -> (i32, i32) {
    %c0_i32 = arith.constant 0 : i32
    %c0_i32_0 = arith.constant 0 : i32
    %c0_i32_1 = arith.constant 0 : i32
    return %c0_i32, %c0_i32_0 : i32, i32
  }
  func.func @transform_9(%arg0: i32) -> (i32, i32) {
    %c0_i32 = arith.constant 0 : i32
    %c0_i32_0 = arith.constant 0 : i32
    %c0_i32_1 = arith.constant 0 : i32
    return %c0_i32, %c0_i32_0 : i32, i32
  }
  func.func @transform_10(%arg0: i32) -> (i32, i32) {
    %c0_i32 = arith.constant 0 : i32
    %c0_i32_0 = arith.constant 0 : i32
    %c0_i32_1 = arith.constant 0 : i32
    return %c0_i32, %c0_i32_0 : i32, i32
  }
  func.func @transform_11(%arg0: i32) -> (i32, i32) {
    %c0_i32 = arith.constant 0 : i32
    %c0_i32_0 = arith.constant 0 : i32
    %c0_i32_1 = arith.constant 0 : i32
    return %c0_i32, %c0_i32_0 : i32, i32
  }
  func.func @transform_12(%arg0: i32) -> (i32, i32) {
    %c0_i32 = arith.constant 0 : i32
    %c0_i32_0 = arith.constant 0 : i32
    %c0_i32_1 = arith.constant 0 : i32
    return %c0_i32, %c0_i32_0 : i32, i32
  }
  func.func @transform_13(%arg0: i32) -> (i32, i32) {
    %c0_i32 = arith.constant 0 : i32
    %c0_i32_0 = arith.constant 0 : i32
    return %c0_i32, %arg0 : i32, i32
  }
}

module attributes {stable_mosaic.version = 11 : i64} {
  func.func @_fcn_kernel(%arg0: i32, %arg1: memref<256x128xbf16, #tpu.memory_space<vmem>>, %arg2: memref<496x256xbf16, #tpu.memory_space<vmem>>, %arg3: memref<496x1xf32, #tpu.memory_space<vmem>>, %arg4: memref<236x496xbf16, #tpu.memory_space<vmem>>, %arg5: memref<236x1xf32, #tpu.memory_space<vmem>>, %arg6: memref<212x236xbf16, #tpu.memory_space<vmem>>, %arg7: memref<212x1xf32, #tpu.memory_space<vmem>>, %arg8: memref<176x212xbf16, #tpu.memory_space<vmem>>, %arg9: memref<176x1xf32, #tpu.memory_space<vmem>>, %arg10: memref<108x176xbf16, #tpu.memory_space<vmem>>, %arg11: memref<108x1xf32, #tpu.memory_space<vmem>>, %arg12: memref<1x108xbf16, #tpu.memory_space<vmem>>, %arg13: memref<1x1xf32, #tpu.memory_space<vmem>>, %arg14: memref<1x128xf32, #tpu.memory_space<vmem>>) attributes {dimension_semantics = [#tpu.dimension_semantics<parallel>], iteration_bounds = array<i64: 1>, scalar_prefetch = 0 : i64, scratch_operands = 0 : i64, tpu.core_type = #tpu.core_type<tc>, window_params = [{transform_indices = @transform_0, window_bounds = array<i64: 256, 128>}, {pipeline_mode = #tpu.pipeline_mode<synchronous>, transform_indices = @transform_1, window_bounds = array<i64: 496, 256>}, {pipeline_mode = #tpu.pipeline_mode<synchronous>, transform_indices = @transform_2, window_bounds = array<i64: 496, 1>}, {pipeline_mode = #tpu.pipeline_mode<synchronous>, transform_indices = @transform_3, window_bounds = array<i64: 236, 496>}, {pipeline_mode = #tpu.pipeline_mode<synchronous>, transform_indices = @transform_4, window_bounds = array<i64: 236, 1>}, {pipeline_mode = #tpu.pipeline_mode<synchronous>, transform_indices = @transform_5, window_bounds = array<i64: 212, 236>}, {pipeline_mode = #tpu.pipeline_mode<synchronous>, transform_indices = @transform_6, window_bounds = array<i64: 212, 1>}, {pipeline_mode = #tpu.pipeline_mode<synchronous>, transform_indices = @transform_7, window_bounds = array<i64: 176, 212>}, {pipeline_mode = #tpu.pipeline_mode<synchronous>, transform_indices = @transform_8, window_bounds = array<i64: 176, 1>}, {pipeline_mode = #tpu.pipeline_mode<synchronous>, transform_indices = @transform_9, window_bounds = array<i64: 108, 176>}, {pipeline_mode = #tpu.pipeline_mode<synchronous>, transform_indices = @transform_10, window_bounds = array<i64: 108, 1>}, {pipeline_mode = #tpu.pipeline_mode<synchronous>, transform_indices = @transform_11, window_bounds = array<i64: 1, 108>}, {pipeline_mode = #tpu.pipeline_mode<synchronous>, transform_indices = @transform_12, window_bounds = array<i64: 1, 1>}, {transform_indices = @transform_13, window_bounds = array<i64: 1, 128>}]} {
    %c0 = arith.constant 0 : index
    %c0_0 = arith.constant 0 : index
    %0 = vector.load %arg1[%c0, %c0_0] : memref<256x128xbf16, #tpu.memory_space<vmem>>, vector<256x128xbf16>
    %c0_1 = arith.constant 0 : index
    %c0_2 = arith.constant 0 : index
    %1 = vector.load %arg2[%c0_1, %c0_2] : memref<496x256xbf16, #tpu.memory_space<vmem>>, vector<496x256xbf16>
    %cst = arith.constant dense<0.000000e+00> : vector<496x128xf32>
    %2 = tpu.matmul %1, %0, %cst {dimension_numbers = #tpu.dot_dimension_numbers<[1], [0], [0], [1], [0, 0, 1, 1], [], []>} : vector<496x256xbf16>, vector<256x128xbf16>, vector<496x128xf32> -> vector<496x128xf32>
    %c0_3 = arith.constant 0 : index
    %c0_4 = arith.constant 0 : index
    %3 = vector.load %arg3[%c0_3, %c0_4] : memref<496x1xf32, #tpu.memory_space<vmem>>, vector<496x1xf32>
    %4 = vector.broadcast %3 : vector<496x1xf32> to vector<496x128xf32>
    %5 = arith.addf %2, %4 : vector<496x128xf32>
    %cst_5 = arith.constant 0.000000e+00 : f32
    %6 = vector.broadcast %cst_5 : f32 to vector<496x128xf32>
    %7 = arith.maximumf %5, %6 : vector<496x128xf32>
    %8 = arith.truncf %7 : vector<496x128xf32> to vector<496x128xbf16>
    %c0_6 = arith.constant 0 : index
    %c0_7 = arith.constant 0 : index
    %9 = vector.load %arg4[%c0_6, %c0_7] : memref<236x496xbf16, #tpu.memory_space<vmem>>, vector<236x496xbf16>
    %cst_8 = arith.constant dense<0.000000e+00> : vector<236x128xf32>
    %10 = tpu.matmul %9, %8, %cst_8 {dimension_numbers = #tpu.dot_dimension_numbers<[1], [0], [0], [1], [0, 0, 1, 1], [], []>} : vector<236x496xbf16>, vector<496x128xbf16>, vector<236x128xf32> -> vector<236x128xf32>
    %c0_9 = arith.constant 0 : index
    %c0_10 = arith.constant 0 : index
    %11 = vector.load %arg5[%c0_9, %c0_10] : memref<236x1xf32, #tpu.memory_space<vmem>>, vector<236x1xf32>
    %12 = vector.broadcast %11 : vector<236x1xf32> to vector<236x128xf32>
    %13 = arith.addf %10, %12 : vector<236x128xf32>
    %cst_11 = arith.constant 0.000000e+00 : f32
    %14 = vector.broadcast %cst_11 : f32 to vector<236x128xf32>
    %15 = arith.maximumf %13, %14 : vector<236x128xf32>
    %16 = arith.truncf %15 : vector<236x128xf32> to vector<236x128xbf16>
    %c0_12 = arith.constant 0 : index
    %c0_13 = arith.constant 0 : index
    %17 = vector.load %arg6[%c0_12, %c0_13] : memref<212x236xbf16, #tpu.memory_space<vmem>>, vector<212x236xbf16>
    %cst_14 = arith.constant dense<0.000000e+00> : vector<212x128xf32>
    %18 = tpu.matmul %17, %16, %cst_14 {dimension_numbers = #tpu.dot_dimension_numbers<[1], [0], [0], [1], [0, 0, 1, 1], [], []>} : vector<212x236xbf16>, vector<236x128xbf16>, vector<212x128xf32> -> vector<212x128xf32>
    %c0_15 = arith.constant 0 : index
    %c0_16 = arith.constant 0 : index
    %19 = vector.load %arg7[%c0_15, %c0_16] : memref<212x1xf32, #tpu.memory_space<vmem>>, vector<212x1xf32>
    %20 = vector.broadcast %19 : vector<212x1xf32> to vector<212x128xf32>
    %21 = arith.addf %18, %20 : vector<212x128xf32>
    %cst_17 = arith.constant 0.000000e+00 : f32
    %22 = vector.broadcast %cst_17 : f32 to vector<212x128xf32>
    %23 = arith.maximumf %21, %22 : vector<212x128xf32>
    %24 = arith.truncf %23 : vector<212x128xf32> to vector<212x128xbf16>
    %c0_18 = arith.constant 0 : index
    %c0_19 = arith.constant 0 : index
    %25 = vector.load %arg8[%c0_18, %c0_19] : memref<176x212xbf16, #tpu.memory_space<vmem>>, vector<176x212xbf16>
    %cst_20 = arith.constant dense<0.000000e+00> : vector<176x128xf32>
    %26 = tpu.matmul %25, %24, %cst_20 {dimension_numbers = #tpu.dot_dimension_numbers<[1], [0], [0], [1], [0, 0, 1, 1], [], []>} : vector<176x212xbf16>, vector<212x128xbf16>, vector<176x128xf32> -> vector<176x128xf32>
    %c0_21 = arith.constant 0 : index
    %c0_22 = arith.constant 0 : index
    %27 = vector.load %arg9[%c0_21, %c0_22] : memref<176x1xf32, #tpu.memory_space<vmem>>, vector<176x1xf32>
    %28 = vector.broadcast %27 : vector<176x1xf32> to vector<176x128xf32>
    %29 = arith.addf %26, %28 : vector<176x128xf32>
    %cst_23 = arith.constant 0.000000e+00 : f32
    %30 = vector.broadcast %cst_23 : f32 to vector<176x128xf32>
    %31 = arith.maximumf %29, %30 : vector<176x128xf32>
    %32 = arith.truncf %31 : vector<176x128xf32> to vector<176x128xbf16>
    %c0_24 = arith.constant 0 : index
    %c0_25 = arith.constant 0 : index
    %33 = vector.load %arg10[%c0_24, %c0_25] : memref<108x176xbf16, #tpu.memory_space<vmem>>, vector<108x176xbf16>
    %cst_26 = arith.constant dense<0.000000e+00> : vector<108x128xf32>
    %34 = tpu.matmul %33, %32, %cst_26 {dimension_numbers = #tpu.dot_dimension_numbers<[1], [0], [0], [1], [0, 0, 1, 1], [], []>} : vector<108x176xbf16>, vector<176x128xbf16>, vector<108x128xf32> -> vector<108x128xf32>
    %c0_27 = arith.constant 0 : index
    %c0_28 = arith.constant 0 : index
    %35 = vector.load %arg11[%c0_27, %c0_28] : memref<108x1xf32, #tpu.memory_space<vmem>>, vector<108x1xf32>
    %36 = vector.broadcast %35 : vector<108x1xf32> to vector<108x128xf32>
    %37 = arith.addf %34, %36 : vector<108x128xf32>
    %cst_29 = arith.constant 0.000000e+00 : f32
    %38 = vector.broadcast %cst_29 : f32 to vector<108x128xf32>
    %39 = arith.maximumf %37, %38 : vector<108x128xf32>
    %40 = arith.truncf %39 : vector<108x128xf32> to vector<108x128xbf16>
    %c0_30 = arith.constant 0 : index
    %c0_31 = arith.constant 0 : index
    %41 = vector.load %arg12[%c0_30, %c0_31] : memref<1x108xbf16, #tpu.memory_space<vmem>>, vector<1x108xbf16>
    %cst_32 = arith.constant dense<0.000000e+00> : vector<1x128xf32>
    %42 = tpu.matmul %41, %40, %cst_32 {dimension_numbers = #tpu.dot_dimension_numbers<[1], [0], [0], [1], [0, 0, 1, 1], [], []>} : vector<1x108xbf16>, vector<108x128xbf16>, vector<1x128xf32> -> vector<1x128xf32>
    %c0_33 = arith.constant 0 : index
    %c0_34 = arith.constant 0 : index
    %43 = vector.load %arg13[%c0_33, %c0_34] : memref<1x1xf32, #tpu.memory_space<vmem>>, vector<1x1xf32>
    %44 = vector.broadcast %43 : vector<1x1xf32> to vector<1x128xf32>
    %45 = arith.addf %42, %44 : vector<1x128xf32>
    %c0_35 = arith.constant 0 : index
    %c0_36 = arith.constant 0 : index
    %46 = vector.load %arg14[%c0_35, %c0_36] : memref<1x128xf32, #tpu.memory_space<vmem>>, vector<1x128xf32>
    tpu.vector_store %arg14[%c0_35, %c0_36], %45 {strides = array<i32>} : memref<1x128xf32, #tpu.memory_space<vmem>>, vector<1x128xf32>,
    return
  }
  func.func @transform_0(%arg0: i32) -> (i32, i32) {
    %c0_i32 = arith.constant 0 : i32
    %c0_i32_0 = arith.constant 0 : i32
    return %c0_i32, %arg0 : i32, i32
  }
  func.func @transform_1(%arg0: i32) -> (i32, i32) {
    %c0_i32 = arith.constant 0 : i32
    %c0_i32_0 = arith.constant 0 : i32
    %c0_i32_1 = arith.constant 0 : i32
    return %c0_i32, %c0_i32_0 : i32, i32
  }
  func.func @transform_2(%arg0: i32) -> (i32, i32) {
    %c0_i32 = arith.constant 0 : i32
    %c0_i32_0 = arith.constant 0 : i32
    %c0_i32_1 = arith.constant 0 : i32
    return %c0_i32, %c0_i32_0 : i32, i32
  }
  func.func @transform_3(%arg0: i32) -> (i32, i32) {
    %c0_i32 = arith.constant 0 : i32
    %c0_i32_0 = arith.constant 0 : i32
    %c0_i32_1 = arith.constant 0 : i32
    return %c0_i32, %c0_i32_0 : i32, i32
  }
  func.func @transform_4(%arg0: i32) -> (i32, i32) {
    %c0_i32 = arith.constant 0 : i32
    %c0_i32_0 = arith.constant 0 : i32
    %c0_i32_1 = arith.constant 0 : i32
    return %c0_i32, %c0_i32_0 : i32, i32
  }
  func.func @transform_5(%arg0: i32) -> (i32, i32) {
    %c0_i32 = arith.constant 0 : i32
    %c0_i32_0 = arith.constant 0 : i32
    %c0_i32_1 = arith.constant 0 : i32
    return %c0_i32, %c0_i32_0 : i32, i32
  }
  func.func @transform_6(%arg0: i32) -> (i32, i32) {
    %c0_i32 = arith.constant 0 : i32
    %c0_i32_0 = arith.constant 0 : i32
    %c0_i32_1 = arith.constant 0 : i32
    return %c0_i32, %c0_i32_0 : i32, i32
  }
  func.func @transform_7(%arg0: i32) -> (i32, i32) {
    %c0_i32 = arith.constant 0 : i32
    %c0_i32_0 = arith.constant 0 : i32
    %c0_i32_1 = arith.constant 0 : i32
    return %c0_i32, %c0_i32_0 : i32, i32
  }
  func.func @transform_8(%arg0: i32) -> (i32, i32) {
    %c0_i32 = arith.constant 0 : i32
    %c0_i32_0 = arith.constant 0 : i32
    %c0_i32_1 = arith.constant 0 : i32
    return %c0_i32, %c0_i32_0 : i32, i32
  }
  func.func @transform_9(%arg0: i32) -> (i32, i32) {
    %c0_i32 = arith.constant 0 : i32
    %c0_i32_0 = arith.constant 0 : i32
    %c0_i32_1 = arith.constant 0 : i32
    return %c0_i32, %c0_i32_0 : i32, i32
  }
  func.func @transform_10(%arg0: i32) -> (i32, i32) {
    %c0_i32 = arith.constant 0 : i32
    %c0_i32_0 = arith.constant 0 : i32
    %c0_i32_1 = arith.constant 0 : i32
    return %c0_i32, %c0_i32_0 : i32, i32
  }
  func.func @transform_11(%arg0: i32) -> (i32, i32) {
    %c0_i32 = arith.constant 0 : i32
    %c0_i32_0 = arith.constant 0 : i32
    %c0_i32_1 = arith.constant 0 : i32
    return %c0_i32, %c0_i32_0 : i32, i32
  }
  func.func @transform_12(%arg0: i32) -> (i32, i32) {
    %c0_i32 = arith.constant 0 : i32
    %c0_i32_0 = arith.constant 0 : i32
    %c0_i32_1 = arith.constant 0 : i32
    return %c0_i32, %c0_i32_0 : i32, i32
  }
  func.func @transform_13(%arg0: i32) -> (i32, i32) {
    %c0_i32 = arith.constant 0 : i32
    %c0_i32_0 = arith.constant 0 : i32
    return %c0_i32, %arg0 : i32, i32
  }
}

</mosaic_0001>

<bundles_post_ra>
// kernel: tpu_custom_call.1
= control target key start
LH: loop header
LB: loop body
LE: loop exit
PB: predicated region body
PF: predicated region fallthrough
CT: control target
= control target key end

     0   :  { %s5864_s0 = inlined_call_operand.hbm [shape: bf16[256,128], index: 0, kind: input, shape index: {}]   ;;  %s5865_s1 = inlined_call_operand.vmem [shape: bf16[496,256], index: 1, kind: input, shape index: {}]   ;;  %s5866_s2 = inlined_call_operand.vmem [shape: f32[496,1], index: 2, kind: input, shape index: {}]   ;;  %s5867_s3 = inlined_call_operand.vmem [shape: bf16[236,496], index: 3, kind: input, shape index: {}]   ;;  %s5868_s4 = inlined_call_operand.vmem [shape: f32[236,1], index: 4, kind: input, shape index: {}]   ;;  %s5869_s5 = inlined_call_operand.vmem [shape: bf16[212,236], index: 5, kind: input, shape index: {}]   ;;  %s5870_s6 = inlined_call_operand.vmem [shape: f32[212,1], index: 6, kind: input, shape index: {}]   ;;  %s5871_s7 = inlined_call_operand.vmem [shape: bf16[176,212], index: 7, kind: input, shape index: {}]   ;;  %s5872_s8 = inlined_call_operand.vmem [shape: f32[176,1], index: 8, kind: input, shape index: {}]   ;;  %s5873_s9 = inlined_call_operand.vmem [shape: bf16[108,176], index: 9, kind: input, shape index: {}]   ;;  %s5874_s10 = inlined_call_operand.vmem [shape: f32[108,1], index: 10, kind: input, shape index: {}]   ;;  %s5875_s11 = inlined_call_operand.vmem [shape: bf16[1,108], index: 11, kind: input, shape index: {}]   ;;  %s5876_s12 = inlined_call_operand.<no memory space> [shape: f32[1,1], index: 12, kind: input, shape index: {}]   ;;  %s5877_s13 = inlined_call_operand.hbm [shape: f32[1,128], index: 13, kind: output, shape index: {}]  }
   0x1   :  { %v18_v0 = vstv %s5876_s12 }
   0x2   :  { %19 = vst [vmem:[#allocation2] sm:$0x1] %v18_v0 }
   0x3   :  { %20 = vsyncpa [#allocation4], 0 }
   0x4   :  { %21 = vsyncpa [#allocation5], 0  ;;  %s4318_s27 = smov [#allocation3]   ;;  %s4270_s14 = scalar_lea.hbm %s5864_s0, 2048 }
   0x5   :  { %s27_s28 = sshll.u32 %s4318_s27, 4  ;;  %p4271_p0 = scmp.ne.s32.totalorder %s5864_s0, %s4270_s14  ;;  %s28_s28 = int_to_ptr.vmem [resolvable:$true] %s27_s28 }
   0x6   :  { %p4274_p1 = scmp.lt.u32.totalorder %s4270_s14, %s5864_s0 }
   0x8   :  { %p4276_p2 = pnand %p4274_p1, %p4271_p0 }
   0xa   :  { %4279 = shalt.err (!%p4276_p2)
}
   0xb   :  { %s4280_s12 = scalar_lea.vmem %s28_s28, 2048  ;;  %p4285_p4 = scmp.lt.s32.totalorder %s28_s28, %s28_s28 }
   0xc   :  { %p4281_p3 = scmp.ne.s32.totalorder %s28_s28, %s4280_s12  ;;  %p4286_p5 = scmp.lt.s32.totalorder %s4280_s12, %s4280_s12 }
   0xe   :  { %p4287_p6 = por %p4286_p5, %p4285_p4 }
  0x10   :  { %p4288_p7 = pnand %p4287_p6, %p4281_p3 }
  0x12   :  { %4291 = shalt.err (!%p4288_p7)
}
  0x13   :  { %s4319_s19 = smov 64   ;;  %s4320_s20 = smov 4  }
  0x14   :  { %33 = dma.hbm_to_vmem [thread:$0]  %s5864_s0, 2048, %s28_s28, [#allocation4], %s4319_s19, %s4319_s19, %s4320_s20  }
  0x15   :  { %4314 = dma.done.wait [#allocation4], 2048  }
  0x16   :  { %4315 = vsyncadd [#allocation4], 4294965248  ;;  %v5878_v1 = vmov 0   ;;  %v172_v2 = vld [vmem:[%s5866_s2 + $0x80] sm:$0xff]  ;;  %v173_v5 = vld [vmem:[%s5866_s2 + $0x88] sm:$0xff]  ;;  %vm1833_vm0 = vcmask 916480  }
  0x17   :  { %3975 = vset.pattern.permute.xlu1 %v5878_v1  ;;  %3974 = vset.pattern.permute.xlu0 %v5878_v1  ;;  %v156_v3 = vld [vmem:[%s5866_s2] sm:$0xff]  ;;  %v157_v6 = vld [vmem:[%s5866_s2 + $0x8] sm:$0xff]  ;;  %v174_v8 = vld [vmem:[%s5866_s2 + $0x90] sm:$0xff]  ;;  %vm2542_vm1 = vcmask 883712   ;;  %vm2585_vm2 = vcmask 1045504   ;;  %vm3027_vm3 = vcmask 687104  }
  0x18   :  { %934 = vmatprep.subr.bf16.mxu0 %v5878_v1  ;;  %300 = vperm.xlu0 %3974, %v172_v2   ;;  %v3976_v4 = vld [vmem:[#allocation3] sm:$0xff]   ;;  %v3977_v7 = vld [vmem:[#allocation3 + $0x8] sm:$0xff]   ;;  %v175_v9 = vld [vmem:[%s5866_s2 + $0x98] sm:$0xff]  ;;  %vm3061_vm4 = vcmask 1041408   ;;  %vm3380_vm5 = vcmask 392192   ;;  %vm4323_vm6 = vmmov 0  }
  0x19   :  { %220 = vperm.xlu1 %3975, %v156_v3   ;;  %935 = vmatpush1.bf16.msra.mxu0 %v3976_v4  ;;  %v3978_v10 = vld [vmem:[#allocation3 + $0x10] sm:$0xff]   ;;  %v3979_v13 = vld [vmem:[#allocation3 + $0x18] sm:$0xff]   ;;  %v177_v15 = vld [vmem:[%s5866_s2 + $0xa8] sm:$0xff]  ;;  %s4324_s20 = smov [#allocation6]  }
  0x1a   :  { %936 = vmatprep.subr.bf16.mxu0 %v5878_v1  ;;  %v158_v11 = vld [vmem:[%s5866_s2 + $0x10] sm:$0xff]  ;;  %v159_v12 = vld [vmem:[%s5866_s2 + $0x18] sm:$0xff]  ;;  %v176_v14 = vld [vmem:[%s5866_s2 + $0xa0] sm:$0xff] }
  0x1b   :  { %v3980_v16 = vld [vmem:[#allocation3 + $0x20] sm:$0xff]   ;;  %v3981_v19 = vld [vmem:[#allocation3 + $0x28] sm:$0xff]   ;;  %v179_v21 = vld [vmem:[%s5866_s2 + $0xb8] sm:$0xff] }
  0x1c   :  { %305 = vperm.xlu0 %3974, %v173_v5   ;;  %v160_v17 = vld [vmem:[%s5866_s2 + $0x20] sm:$0xff]  ;;  %v161_v18 = vld [vmem:[%s5866_s2 + $0x28] sm:$0xff]  ;;  %v178_v20 = vld [vmem:[%s5866_s2 + $0xb0] sm:$0xff] }
  0x1d   :  { %225 = vperm.xlu1 %3975, %v157_v6   ;;  %937 = vmatpush1.bf16.msra.mxu0 %v3977_v7  ;;  %v3982_v22 = vld [vmem:[#allocation3 + $0x30] sm:$0xff]   ;;  %v3983_v25 = vld [vmem:[#allocation3 + $0x38] sm:$0xff]   ;;  %v3994_v26 = vld [vmem:[%s5865_s1 + $0x4] ss:$8 sps:$4 sm:$0xff]  }
  0x1e   :  { %938 = vmatprep.subr.bf16.mxu0 %v5878_v1  ;;  %v162_v23 = vld [vmem:[%s5866_s2 + $0x30] sm:$0xff]  ;;  %v163_v24 = vld [vmem:[%s5866_s2 + $0x38] sm:$0xff]  ;;  %v180_v27 = vld [vmem:[%s5866_s2 + $0xc0] sm:$0xff]  ;;  %966 = vmatprep.mubr.bf16.mxu0 %v3994_v26 }
  0x1f   :  { %v181_v28 = vld [vmem:[%s5866_s2 + $0xc8] sm:$0xff]  ;;  %v164_v30 = vld [vmem:[%s5866_s2 + $0x40] sm:$0xff]  ;;  %v182_v33 = vld [vmem:[%s5866_s2 + $0xd0] sm:$0xff] }
  0x20   :  { %310 = vperm.xlu0 %3974, %v174_v8   ;;  %v3984_v29 = vld [vmem:[#allocation3 + $0x40] sm:$0xff]   ;;  %v3985_v32 = vld [vmem:[#allocation3 + $0x48] sm:$0xff]   ;;  %v183_v34 = vld [vmem:[%s5866_s2 + $0xd8] sm:$0xff] }
  0x21   :  { %315 = vperm.xlu1 %3975, %v175_v9   ;;  %939 = vmatpush1.bf16.msra.mxu0 %v3978_v10  ;;  %v165_v31 = vld [vmem:[%s5866_s2 + $0x48] sm:$0xff]  ;;  %v3986_v35 = vld [vmem:[#allocation3 + $0x50] sm:$0xff]   ;;  %v3987_v38 = vld [vmem:[#allocation3 + $0x58] sm:$0xff]  }
  0x22   :  { %940 = vmatprep.subr.bf16.mxu0 %v5878_v1  ;;  %v166_v36 = vld [vmem:[%s5866_s2 + $0x50] sm:$0xff]  ;;  %v167_v37 = vld [vmem:[%s5866_s2 + $0x58] sm:$0xff]  ;;  %v184_v39 = vld [vmem:[%s5866_s2 + $0xe0] sm:$0xff] }
  0x23   :  { %v185_v40 = vld [vmem:[%s5866_s2 + $0xe8] sm:$0xff]  ;;  %v168_v42 = vld [vmem:[%s5866_s2 + $0x60] sm:$0xff]  ;;  %v186_v45 = vld [vmem:[%s5866_s2 + $0xf0] sm:$0xff] }
  0x24   :  { %230 = vperm.xlu0 %3974, %v158_v11   ;;  %v3988_v41 = vld [vmem:[#allocation3 + $0x60] sm:$0xff]   ;;  %v3989_v44 = vld [vmem:[#allocation3 + $0x68] sm:$0xff]   ;;  %v187_v46 = vld [vmem:[%s5866_s2 + $0xf8] sm:$0xff] }
  0x25   :  { %235 = vperm.xlu1 %3975, %v159_v12   ;;  %941 = vmatpush1.bf16.msra.mxu0 %v3979_v13  ;;  %v169_v43 = vld [vmem:[%s5866_s2 + $0x68] sm:$0xff]  ;;  %v3990_v47 = vld [vmem:[#allocation3 + $0x70] sm:$0xff]   ;;  %v3991_v50 = vld [vmem:[#allocation3 + $0x78] sm:$0xff]  }
  0x26   :  { %942 = vmatprep.subr.bf16.mxu0 %v5878_v1  ;;  %v170_v48 = vld [vmem:[%s5866_s2 + $0x70] sm:$0xff]  ;;  %v171_v49 = vld [vmem:[%s5866_s2 + $0x78] sm:$0xff]  ;;  %v188_v51 = vld [vmem:[%s5866_s2 + $0x100] sm:$0xff] }
  0x27   :  { %v189_v52 = vld [vmem:[%s5866_s2 + $0x108] sm:$0xff]  ;;  %v3995_v54 = vld [vmem:[%s5865_s1 + $0x14] ss:$8 sps:$4 sm:$0xff]   ;;  %v192_v57 = vld [vmem:[%s5866_s2 + $0x120] sm:$0xff] }
  0x28   :  { %320 = vperm.xlu0 %3974, %v176_v14   ;;  %v3992_v53 = vld [vmem:[%s5865_s1] ss:$8 sps:$4 sm:$0xff]   ;;  %v190_v55 = vld [vmem:[%s5866_s2 + $0x110] sm:$0xff]  ;;  %v191_v56 = vld [vmem:[%s5866_s2 + $0x118] sm:$0xff] }
  0x29   :  { %325 = vperm.xlu1 %3975, %v177_v15   ;;  %943 = vmatpush1.bf16.msra.mxu0 %v3980_v16  ;;  %v193_v58 = vld [vmem:[%s5866_s2 + $0x128] sm:$0xff]  ;;  %v3997_v59 = vld [vmem:[%s5865_s1 + $0x10] ss:$8 sps:$4 sm:$0xff]   ;;  %v196_v63 = vld [vmem:[%s5866_s2 + $0x140] sm:$0xff] }
  0x2a   :  { %944 = vmatprep.subr.bf16.mxu0 %v5878_v1  ;;  %v3998_v60 = vld [vmem:[%s5865_s1 + $0x24] ss:$8 sps:$4 sm:$0xff]   ;;  %v194_v61 = vld [vmem:[%s5866_s2 + $0x130] sm:$0xff]  ;;  %v195_v62 = vld [vmem:[%s5866_s2 + $0x138] sm:$0xff] }
  0x2b   :  { %v197_v0 = vld [vmem:[%s5866_s2 + $0x148] sm:$0xff]  ;;  %v4001_v3 = vld [vmem:[%s5865_s1 + $0x34] ss:$8 sps:$4 sm:$0xff]   ;;  %v200_v6 = vld [vmem:[%s5866_s2 + $0x160] sm:$0xff] }
  0x2c   :  { %240 = vperm.xlu0 %3974, %v160_v17   ;;  %v4000_v2 = vld [vmem:[%s5865_s1 + $0x20] ss:$8 sps:$4 sm:$0xff]   ;;  %v198_v4 = vld [vmem:[%s5866_s2 + $0x150] sm:$0xff]  ;;  %v199_v5 = vld [vmem:[%s5866_s2 + $0x158] sm:$0xff] }
  0x2d   :  { %245 = vperm.xlu1 %3975, %v161_v18   ;;  %945 = vmatpush1.bf16.msra.mxu0 %v3981_v19  ;;  %v201_v7 = vld [vmem:[%s5866_s2 + $0x168] sm:$0xff]  ;;  %v4003_v8 = vld [vmem:[%s5865_s1 + $0x30] ss:$8 sps:$4 sm:$0xff]   ;;  %v204_v12 = vld [vmem:[%s5866_s2 + $0x180] sm:$0xff] }
  0x2e   :  { %946 = vmatprep.subr.bf16.mxu0 %v5878_v1  ;;  %v4004_v9 = vld [vmem:[%s5865_s1 + $0x44] ss:$8 sps:$4 sm:$0xff]   ;;  %v202_v10 = vld [vmem:[%s5866_s2 + $0x170] sm:$0xff]  ;;  %v203_v11 = vld [vmem:[%s5866_s2 + $0x178] sm:$0xff] }
  0x2f   :  { %v205_v13 = vld [vmem:[%s5866_s2 + $0x188] sm:$0xff]  ;;  %v4007_v15 = vld [vmem:[%s5865_s1 + $0x54] ss:$8 sps:$4 sm:$0xff]   ;;  %v208_v18 = vld [vmem:[%s5866_s2 + $0x1a0] sm:$0xff] }
  0x30   :  { %330 = vperm.xlu0 %3974, %v178_v20   ;;  %v4006_v14 = vld [vmem:[%s5865_s1 + $0x40] ss:$8 sps:$4 sm:$0xff]   ;;  %v206_v16 = vld [vmem:[%s5866_s2 + $0x190] sm:$0xff]  ;;  %v207_v17 = vld [vmem:[%s5866_s2 + $0x198] sm:$0xff] }
  0x31   :  { %335 = vperm.xlu1 %3975, %v179_v21   ;;  %947 = vmatpush1.bf16.msra.mxu0 %v3982_v22  ;;  %v209_v19 = vld [vmem:[%s5866_s2 + $0x1a8] sm:$0xff]  ;;  %v4009_v20 = vld [vmem:[%s5865_s1 + $0x50] ss:$8 sps:$4 sm:$0xff]  }
  0x32   :  { %948 = vmatprep.subr.bf16.mxu0 %v5878_v1  ;;  %v4010_v21 = vld [vmem:[%s5865_s1 + $0x64] ss:$8 sps:$4 sm:$0xff]   ;;  %v210_v22 = vld [vmem:[%s5866_s2 + $0x1b0] sm:$0xff]  ;;  %v4012_v26 = vld [vmem:[%s5865_s1 + $0x60] ss:$8 sps:$4 sm:$0xff]  }
  0x34   :  { %250 = vperm.xlu0 %3974, %v162_v23   ;;  %v211_v23 = vld [vmem:[%s5866_s2 + $0x1b8] sm:$0xff] }
  0x35   :  { %255 = vperm.xlu1 %3975, %v163_v24   ;;  %949 = vmatpush1.bf16.msra.mxu0 %v3983_v25  ;;  %v212_v24 = vld [vmem:[%s5866_s2 + $0x1c0] sm:$0xff]  ;;  %v213_v25 = vld [vmem:[%s5866_s2 + $0x1c8] sm:$0xff] }
  0x36   :  { %950 = vmatprep.subr.bf16.mxu0 %v5878_v1 }
  0x38   :  { %340 = vperm.xlu0 %3974, %v180_v27   ;;  %v4013_v27 = vld [vmem:[%s5865_s1 + $0x74] ss:$8 sps:$4 sm:$0xff]  }
  0x39   :  { %345 = vperm.xlu1 %3975, %v181_v28   ;;  %951 = vmatpush1.bf16.msra.mxu0 %v3984_v29  ;;  %v214_v28 = vld [vmem:[%s5866_s2 + $0x1d0] sm:$0xff]  ;;  %v215_v29 = vld [vmem:[%s5866_s2 + $0x1d8] sm:$0xff] }
  0x3a   :  { %952 = vmatprep.subr.bf16.mxu0 %v5878_v1 }
  0x3c   :  { %260 = vperm.xlu0 %3974, %v164_v30   ;;  %v216_v30 = vld [vmem:[%s5866_s2 + $0x1e0] sm:$0xff] }
  0x3d   :  { %265 = vperm.xlu1 %3975, %v165_v31   ;;  %953 = vmatpush1.bf16.msra.mxu0 %v3985_v32  ;;  %v217_v31 = vld [vmem:[%s5866_s2 + $0x1e8] sm:$0xff]  ;;  %v4015_v32 = vld [vmem:[%s5865_s1 + $0x70] ss:$8 sps:$4 sm:$0xff]  }
  0x3e   :  { %954 = vmatprep.subr.bf16.mxu0 %v5878_v1 }
  0x40   :  { %350 = vperm.xlu0 %3974, %v182_v33   ;;  %v4016_v33 = vld [vmem:[%s5865_s1 + $0x84] ss:$8 sps:$4 sm:$0xff]  }
  0x41   :  { %355 = vperm.xlu1 %3975, %v183_v34   ;;  %955 = vmatpush1.bf16.msra.mxu0 %v3986_v35  ;;  %v1368_v34 = vld [vmem:[%s5868_s4] sm:$0xff]  ;;  %v1369_v35 = vld [vmem:[%s5868_s4 + $0x8] sm:$0xff] }
  0x42   :  { %956 = vmatprep.subr.bf16.mxu0 %v5878_v1 }
  0x44   :  { %270 = vperm.xlu0 %3974, %v166_v36   ;;  %v1370_v36 = vld [vmem:[%s5868_s4 + $0x10] sm:$0xff] }
  0x45   :  { %275 = vperm.xlu1 %3975, %v167_v37   ;;  %957 = vmatpush1.bf16.msra.mxu0 %v3987_v38  ;;  %v1371_v37 = vld [vmem:[%s5868_s4 + $0x18] sm:$0xff]  ;;  %v4018_v38 = vld [vmem:[%s5865_s1 + $0x80] ss:$8 sps:$4 sm:$0xff]  }
  0x46   :  { %958 = vmatprep.subr.bf16.mxu0 %v5878_v1 }
  0x48   :  { %360 = vperm.xlu0 %3974, %v184_v39   ;;  %v4019_v39 = vld [vmem:[%s5865_s1 + $0x94] ss:$8 sps:$4 sm:$0xff]  }
  0x49   :  { %365 = vperm.xlu1 %3975, %v185_v40   ;;  %959 = vmatpush1.bf16.msra.mxu0 %v3988_v41  ;;  %v1372_v40 = vld [vmem:[%s5868_s4 + $0x20] sm:$0xff]  ;;  %v1373_v41 = vld [vmem:[%s5868_s4 + $0x28] sm:$0xff] }
  0x4a   :  { %960 = vmatprep.subr.bf16.mxu0 %v5878_v1 }
  0x4c   :  { %280 = vperm.xlu0 %3974, %v168_v42   ;;  %v1374_v42 = vld [vmem:[%s5868_s4 + $0x30] sm:$0xff] }
  0x4d   :  { %285 = vperm.xlu1 %3975, %v169_v43   ;;  %961 = vmatpush1.bf16.msra.mxu0 %v3989_v44  ;;  %v1375_v43 = vld [vmem:[%s5868_s4 + $0x38] sm:$0xff] }
  0x4e   :  { %962 = vmatprep.subr.bf16.mxu0 %v5878_v1  ;;  %v4021_v44 = vld [vmem:[%s5865_s1 + $0x90] ss:$8 sps:$4 sm:$0xff]  }
  0x50   :  { %370 = vperm.xlu0 %3974, %v186_v45   ;;  %v4022_v45 = vld [vmem:[%s5865_s1 + $0xa4] ss:$8 sps:$4 sm:$0xff]  }
  0x51   :  { %375 = vperm.xlu1 %3975, %v187_v46   ;;  %963 = vmatpush1.bf16.msra.mxu0 %v3990_v47  ;;  %v1376_v46 = vld [vmem:[%s5868_s4 + $0x40] sm:$0xff]  ;;  %v1377_v47 = vld [vmem:[%s5868_s4 + $0x48] sm:$0xff] }
  0x52   :  { %964 = vmatprep.subr.bf16.mxu0 %v5878_v1 }
  0x54   :  { %290 = vperm.xlu0 %3974, %v170_v48  }
  0x55   :  { %295 = vperm.xlu1 %3975, %v171_v49   ;;  %965 = vmatpush1.bf16.msra.mxu0 %v3991_v50  ;;  %v1378_v50 = vld [vmem:[%s5868_s4 + $0x50] sm:$0xff] }
  0x56   :  { %3065 = vmatprep.subr.bf16.mxu0 %v5878_v1 }
  0x58   :  { %380 = vperm.xlu0 %3974, %v188_v51   ;;  %967 = vmatmul.mubr.bf16.vlgmr.msra.gmra.mrb[0].mxu0 %v3992_v53  ;;  %v1379_v51 = vld [vmem:[%s5868_s4 + $0x58] sm:$0xff] }
  0x59   :  { %385 = vperm.xlu1 %3975, %v189_v52   ;;  %974 = vmatprep.mubr.bf16.mxu0 %v3995_v54  ;;  %v4024_v52 = vld [vmem:[%s5865_s1 + $0xa0] ss:$8 sps:$4 sm:$0xff]   ;;  %v4025_v53 = vld [vmem:[%s5865_s1 + $0xb4] ss:$8 sps:$4 sm:$0xff]  }
  0x5c   :  { %390 = vperm.xlu0 %3974, %v190_v55   ;;  %v1380_v55 = vld [vmem:[%s5868_s4 + $0x60] sm:$0xff] }
  0x5d   :  { %395 = vperm.xlu1 %3975, %v191_v56   ;;  %v1381_v56 = vld [vmem:[%s5868_s4 + $0x68] sm:$0xff] }
  0x60   :  { %400 = vperm.xlu0 %3974, %v192_v57   ;;  %975 = vmatmul.mubr.bf16.gmra.mrb[4].mxu0 %v3997_v59  ;;  %v1383_v59 = vld [vmem:[%s5868_s4 + $0x78] sm:$0xff] }
  0x61   :  { %405 = vperm.xlu1 %3975, %v193_v58   ;;  %982 = vmatprep.mubr.bf16.mxu0 %v3998_v60  ;;  %v1382_v58 = vld [vmem:[%s5868_s4 + $0x70] sm:$0xff] }
  0x62   :  { %v4027_v60 = vld [vmem:[%s5865_s1 + $0xb0] ss:$8 sps:$4 sm:$0xff]  }
  0x64   :  { %410 = vperm.xlu0 %3974, %v194_v61   ;;  %v4028_v61 = vld [vmem:[%s5865_s1 + $0xc4] ss:$8 sps:$4 sm:$0xff]  }
  0x65   :  { %415 = vperm.xlu1 %3975, %v195_v62  }
  0x68   :  { %420 = vperm.xlu0 %3974, %v196_v63   ;;  %983 = vmatmul.mubr.bf16.gmra.mrb[8].mxu0 %v4000_v2  ;;  %v1385_v2 = vld [vmem:[%s5868_s4 + $0x88] sm:$0xff] }
  0x69   :  { %425 = vperm.xlu1 %3975, %v197_v0   ;;  %990 = vmatprep.mubr.bf16.mxu0 %v4001_v3  ;;  %v1384_v0 = vld [vmem:[%s5868_s4 + $0x80] sm:$0xff] }
  0x6c   :  { %430 = vperm.xlu0 %3974, %v198_v4   ;;  %v1386_v4 = vld [vmem:[%s5868_s4 + $0x90] sm:$0xff] }
  0x6d   :  { %435 = vperm.xlu1 %3975, %v199_v5   ;;  %v1387_v5 = vld [vmem:[%s5868_s4 + $0x98] sm:$0xff] }
  0x70   :  { %440 = vperm.xlu0 %3974, %v200_v6   ;;  %991 = vmatmul.mubr.bf16.gmra.mrb[12].mxu0 %v4003_v8  ;;  %v4030_v6 = vld [vmem:[%s5865_s1 + $0xc0] ss:$8 sps:$4 sm:$0xff]   ;;  %v4031_v8 = vld [vmem:[%s5865_s1 + $0xd4] ss:$8 sps:$4 sm:$0xff]  }
  0x71   :  { %445 = vperm.xlu1 %3975, %v201_v7   ;;  %998 = vmatprep.mubr.bf16.mxu0 %v4004_v9  ;;  %v1388_v9 = vld [vmem:[%s5868_s4 + $0xa0] sm:$0xff] }
  0x74   :  { %450 = vperm.xlu0 %3974, %v202_v10   ;;  %v1389_v10 = vld [vmem:[%s5868_s4 + $0xa8] sm:$0xff] }
  0x75   :  { %455 = vperm.xlu1 %3975, %v203_v11  }
  0x78   :  { %460 = vperm.xlu0 %3974, %v204_v12   ;;  %999 = vmatmul.mubr.bf16.gmra.mrb[16].mxu0 %v4006_v14  ;;  %v1391_v14 = vld [vmem:[%s5868_s4 + $0xb8] sm:$0xff] }
  0x79   :  { %465 = vperm.xlu1 %3975, %v205_v13   ;;  %1006 = vmatprep.mubr.bf16.mxu0 %v4007_v15  ;;  %v1390_v13 = vld [vmem:[%s5868_s4 + $0xb0] sm:$0xff] }
  0x7a   :  { %v4033_v15 = vld [vmem:[%s5865_s1 + $0xd0] ss:$8 sps:$4 sm:$0xff]  }
  0x7c   :  { %470 = vperm.xlu0 %3974, %v206_v16   ;;  %v4034_v16 = vld [vmem:[%s5865_s1 + $0xe4] ss:$8 sps:$4 sm:$0xff]  }
  0x7d   :  { %475 = vperm.xlu1 %3975, %v207_v17  }
  0x80   :  { %480 = vperm.xlu0 %3974, %v208_v18   ;;  %1007 = vmatmul.mubr.bf16.gmra.mrb[20].mxu0 %v4009_v20  ;;  %v1392_v18 = vld [vmem:[%s5868_s4 + $0xc0] sm:$0xff] }
  0x81   :  { %485 = vperm.xlu1 %3975, %v209_v19   ;;  %1014 = vmatprep.mubr.bf16.mxu0 %v4010_v21  ;;  %v1393_v19 = vld [vmem:[%s5868_s4 + $0xc8] sm:$0xff]  ;;  %v1394_v21 = vld [vmem:[%s5868_s4 + $0xd0] sm:$0xff] }
  0x84   :  { %490 = vperm.xlu0 %3974, %v210_v22   ;;  %v1395_v22 = vld [vmem:[%s5868_s4 + $0xd8] sm:$0xff] }
  0x85   :  { %495 = vperm.xlu1 %3975, %v211_v23   ;;  %v4036_v23 = vld [vmem:[%s5865_s1 + $0xe0] ss:$8 sps:$4 sm:$0xff]  }
  0x88   :  { %500 = vperm.xlu0 %3974, %v212_v24   ;;  %1015 = vmatmul.mubr.bf16.gmra.mrb[24].mxu0 %v4012_v26  ;;  %v4037_v24 = vld [vmem:[%s5865_s1 + $0xf4] ss:$8 sps:$4 sm:$0xff]  }
  0x89   :  { %505 = vperm.xlu1 %3975, %v213_v25   ;;  %1022 = vmatprep.mubr.bf16.mxu0 %v4013_v27  ;;  %v1396_v27 = vld [vmem:[%s5868_s4 + $0xe0] sm:$0xff] }
  0x8c   :  { %510 = vperm.xlu0 %3974, %v214_v28   ;;  %v1397_v28 = vld [vmem:[%s5868_s4 + $0xe8] sm:$0xf] }
  0x8d   :  { %515 = vperm.xlu1 %3975, %v215_v29  }
  0x90   :  { %520 = vperm.xlu0 %3974, %v216_v30   ;;  %1023 = vmatmul.mubr.bf16.gmra.mrb[28].mxu0 %v4015_v32  ;;  %v2257_v30 = vld [vmem:[%s5870_s6] sm:$0xff]  ;;  %v4039_v32 = vld [vmem:[%s5865_s1 + $0xf0] ss:$8 sps:$4 sm:$0xff]  }
  0x91   :  { %525 = vperm.xlu1 %3975, %v217_v31   ;;  %1030 = vmatprep.mubr.bf16.mxu0 %v4016_v33  ;;  %v2258_v31 = vld [vmem:[%s5870_s6 + $0x8] sm:$0xff] }
  0x94   :  { %1400 = vperm.xlu0 %3974, %v1368_v34   ;;  %v4040_v34 = vld [vmem:[%s5865_s1 + $0x104] ss:$8 sps:$4 sm:$0xff]  }
  0x95   :  { %1405 = vperm.xlu1 %3975, %v1369_v35   ;;  %v2259_v35 = vld [vmem:[%s5870_s6 + $0x10] sm:$0xff] }
  0x97   :  { %v4708_v48 = vpop.permute.xlu0 %300 }
  0x98   :  { %1410 = vperm.xlu0 %3974, %v1370_v36   ;;  %1031 = vmatmul.mubr.bf16.gmra.mrb[32].mxu0 %v4018_v38  ;;  %v4710_v49 = vpop.permute.xlu1 %220  ;;  %v2260_v36 = vld [vmem:[%s5870_s6 + $0x18] sm:$0xff] }
  0x99   :  { %1415 = vperm.xlu1 %3975, %v1371_v37   ;;  %1038 = vmatprep.mubr.bf16.mxu0 %v4019_v39  ;;  %v2261_v39 = vld [vmem:[%s5870_s6 + $0x20] sm:$0xff] }
  0x9b   :  { %v4724_v54 = vpop.permute.xlu0 %305 }
  0x9c   :  { %1420 = vperm.xlu0 %3974, %v1372_v40   ;;  %v4732_v57 = vpop.permute.xlu1 %225  ;;  %v2262_v40 = vld [vmem:[%s5870_s6 + $0x28] sm:$0xff] }
  0x9d   :  { %1425 = vperm.xlu1 %3975, %v1373_v41   ;;  %v4042_v41 = vld [vmem:[%s5865_s1 + $0x100] ss:$8 sps:$4 sm:$0xff]  }
  0x9f   :  { %v4746_v62 = vpop.permute.xlu0 %310 }
  0xa0   :  { %1430 = vperm.xlu0 %3974, %v1374_v42   ;;  %1039 = vmatmul.mubr.bf16.gmra.mrb[36].mxu0 %v4021_v44  ;;  %v4748_v63 = vpop.permute.xlu1 %315  ;;  %v4043_v42 = vld [vmem:[%s5865_s1 + $0x114] ss:$8 sps:$4 sm:$0xff]  }
  0xa1   :  { %1435 = vperm.xlu1 %3975, %v1375_v43   ;;  %1046 = vmatprep.mubr.bf16.mxu0 %v4022_v45  ;;  %v2263_v44 = vld [vmem:[%s5870_s6 + $0x30] sm:$0xff]  ;;  %v2264_v45 = vld [vmem:[%s5870_s6 + $0x38] sm:$0xff] }
  0xa3   :  { %v4756_v3 = vpop.permute.xlu0 %230 }
  0xa4   :  { %1440 = vperm.xlu0 %3974, %v1376_v46   ;;  %v4767_v7 = vpop.permute.xlu1 %235 }
  0xa5   :  { %1445 = vperm.xlu1 %3975, %v1377_v47   ;;  %v2265_v47 = vld [vmem:[%s5870_s6 + $0x40] sm:$0xff] }
  0xa7   :  { %v4778_v11 = vpop.permute.xlu0 %320 }
  0xa8   :  { %1450 = vperm.xlu0 %3974, %v1378_v50   ;;  %1047 = vmatmul.mubr.bf16.gmra.mrb[40].mxu0 %v4024_v52  ;;  %v4780_v12 = vpop.permute.xlu1 %325  ;;  %v2266_v50 = vld [vmem:[%s5870_s6 + $0x48] sm:$0xff] }
  0xa9   :  { %1455 = vperm.xlu1 %3975, %v1379_v51   ;;  %1054 = vmatprep.mubr.bf16.mxu0 %v4025_v53  ;;  %v4045_v51 = vld [vmem:[%s5865_s1 + $0x110] ss:$8 sps:$4 sm:$0xff]   ;;  %v4046_v52 = vld [vmem:[%s5865_s1 + $0x124] ss:$8 sps:$4 sm:$0xff]  }
  0xab   :  { %v4794_v17 = vpop.permute.xlu0 %240 }
  0xac   :  { %1460 = vperm.xlu0 %3974, %v1380_v55   ;;  %v4802_v20 = vpop.permute.xlu1 %245 }
  0xad   :  { %1465 = vperm.xlu1 %3975, %v1381_v56   ;;  %v2267_v56 = vld [vmem:[%s5870_s6 + $0x50] sm:$0xff] }
  0xaf   :  { %v4816_v25 = vpop.permute.xlu0 %330 }
  0xb0   :  { %1470 = vperm.xlu0 %3974, %v1382_v58   ;;  %1055 = vmatmul.mubr.bf16.gmra.mrb[44].mxu0 %v4027_v60  ;;  %v4818_v26 = vpop.permute.xlu1 %335  ;;  %v2268_v58 = vld [vmem:[%s5870_s6 + $0x58] sm:$0xff]  ;;  %v2269_v60 = vld [vmem:[%s5870_s6 + $0x60] sm:$0xff] }
  0xb1   :  { %1475 = vperm.xlu1 %3975, %v1383_v59   ;;  %1062 = vmatprep.mubr.bf16.mxu0 %v4028_v61  ;;  %v2270_v61 = vld [vmem:[%s5870_s6 + $0x68] sm:$0xff] }
  0xb3   :  { %v4826_v29 = vpop.permute.xlu0 %250 }
  0xb4   :  { %1480 = vperm.xlu0 %3974, %v1384_v0   ;;  %v4837_v33 = vpop.permute.xlu1 %255  ;;  %v4048_v0 = vld [vmem:[%s5865_s1 + $0x120] ss:$8 sps:$4 sm:$0xff]  }
  0xb5   :  { %1485 = vperm.xlu1 %3975, %v1385_v2  }
  0xb7   :  { %v4848_v37 = vpop.permute.xlu0 %340 }
  0xb8   :  { %1490 = vperm.xlu0 %3974, %v1386_v4   ;;  %1063 = vmatmul.mubr.bf16.gmra.mrb[48].mxu0 %v4030_v6  ;;  %v4850_v38 = vpop.permute.xlu1 %345  ;;  %v4049_v4 = vld [vmem:[%s5865_s1 + $0x134] ss:$8 sps:$4 sm:$0xff]  }
  0xb9   :  { %1495 = vperm.xlu1 %3975, %v1387_v5   ;;  %1070 = vmatprep.mubr.bf16.mxu0 %v4031_v8  ;;  %v2271_v5 = vld [vmem:[%s5870_s6 + $0x70] sm:$0xff]  ;;  %v2272_v6 = vld [vmem:[%s5870_s6 + $0x78] sm:$0xff] }
  0xbb   :  { %v4864_v43 = vpop.permute.xlu0 %260 }
  0xbc   :  { %1500 = vperm.xlu0 %3974, %v1388_v9   ;;  %v4872_v46 = vpop.permute.xlu1 %265 }
  0xbd   :  { %1505 = vperm.xlu1 %3975, %v1389_v10   ;;  %v2273_v10 = vld [vmem:[%s5870_s6 + $0x80] sm:$0xff] }
  0xbf   :  { %v4886_v53 = vpop.permute.xlu0 %350 }
  0xc0   :  { %1510 = vperm.xlu0 %3974, %v1390_v13   ;;  %1071 = vmatmul.mubr.bf16.gmra.mrb[52].mxu0 %v4033_v15  ;;  %v4888_v55 = vpop.permute.xlu1 %355  ;;  %v2274_v13 = vld [vmem:[%s5870_s6 + $0x88] sm:$0xff] }
  0xc1   :  { %1515 = vperm.xlu1 %3975, %v1391_v14   ;;  %1078 = vmatprep.mubr.bf16.mxu0 %v4034_v16  ;;  %v4051_v14 = vld [vmem:[%s5865_s1 + $0x130] ss:$8 sps:$4 sm:$0xff]   ;;  %v4052_v15 = vld [vmem:[%s5865_s1 + $0x144] ss:$8 sps:$4 sm:$0xff]  }
  0xc3   :  { %v4896_v59 = vpop.permute.xlu0 %270 }
  0xc4   :  { %1520 = vperm.xlu0 %3974, %v1392_v18   ;;  %v4907_v2 = vpop.permute.xlu1 %275  ;;  %v2275_v18 = vld [vmem:[%s5870_s6 + $0x90] sm:$0xff] }
  0xc5   :  { %1525 = vperm.xlu1 %3975, %v1393_v19   ;;  %v2276_v19 = vld [vmem:[%s5870_s6 + $0x98] sm:$0xff] }
  0xc7   :  { %v4918_v8 = vpop.permute.xlu0 %360 }
  0xc8   :  { %1530 = vperm.xlu0 %3974, %v1394_v21   ;;  %1079 = vmatmul.mubr.bf16.gmra.mrb[56].mxu0 %v4036_v23  ;;  %v4920_v9 = vpop.permute.xlu1 %365  ;;  %v2278_v23 = vld [vmem:[%s5870_s6 + $0xa8] sm:$0xff] }
  0xc9   :  { %1535 = vperm.xlu1 %3975, %v1395_v22   ;;  %1086 = vmatprep.mubr.bf16.mxu0 %v4037_v24  ;;  %v2277_v22 = vld [vmem:[%s5870_s6 + $0xa0] sm:$0xff] }
  0xca   :  { %v4054_v24 = vld [vmem:[%s5865_s1 + $0x140] ss:$8 sps:$4 sm:$0xff]  }
  0xcb   :  { %v4934_v16 = vpop.permute.xlu0 %280 }
  0xcc   :  { %1540 = vperm.xlu0 %3974, %v1396_v27   ;;  %v4942_v21 = vpop.permute.xlu1 %285  ;;  %v4055_v27 = vld [vmem:[%s5865_s1 + $0x154] ss:$8 sps:$4 sm:$0xff]  }
  0xcd   :  { %1545 = vperm.xlu1 %3975, %v1397_v28  }
  0xcf   :  { %v4956_v28 = vpop.permute.xlu0 %370 }
  0xd0   :  { %2286 = vperm.xlu0 %3974, %v2257_v30   ;;  %1087 = vmatmul.mubr.bf16.gmra.mrb[60].mxu0 %v4039_v32  ;;  %v4958_v30 = vpop.permute.xlu1 %375  ;;  %v2280_v32 = vld [vmem:[%s5870_s6 + $0xb8] sm:$0xff] }
  0xd1   :  { %2291 = vperm.xlu1 %3975, %v2258_v31   ;;  %1094 = vmatprep.mubr.bf16.mxu0 %v4040_v34  ;;  %v2279_v31 = vld [vmem:[%s5870_s6 + $0xb0] sm:$0xff] }
  0xd3   :  { %v4966_v34 = vpop.permute.xlu0 %290 }
  0xd4   :  { %2296 = vperm.xlu0 %3974, %v2259_v35   ;;  %v2281_v35 = vld [vmem:[%s5870_s6 + $0xc0] sm:$0xff] }
  0xd5   :  { %2301 = vperm.xlu1 %3975, %v2260_v36   ;;  %v2282_v36 = vld [vmem:[%s5870_s6 + $0xc8] sm:$0xff] }
  0xd8   :  { %2306 = vperm.xlu0 %3974, %v2261_v39   ;;  %1095 = vmatmul.mubr.bf16.gmra.mrb[64].mxu0 %v4042_v41  ;;  %v4057_v39 = vld [vmem:[%s5865_s1 + $0x150] ss:$8 sps:$4 sm:$0xff]   ;;  %v4058_v41 = vld [vmem:[%s5865_s1 + $0x164] ss:$8 sps:$4 sm:$0xff]  }
  0xd9   :  { %2311 = vperm.xlu1 %3975, %v2262_v40   ;;  %1102 = vmatprep.mubr.bf16.mxu0 %v4043_v42  ;;  %v4977_v40 = vpop.permute.xlu1 %295  ;;  %v2283_v42 = vld [vmem:[%s5870_s6 + $0xd0] sm:$0xf] }
  0xdc   :  { %2316 = vperm.xlu0 %3974, %v2263_v44   ;;  %v2796_v44 = vld [vmem:[%s5872_s8] sm:$0xff] }
  0xdd   :  { %2321 = vperm.xlu1 %3975, %v2264_v45   ;;  %v4988_v45 = vpop.permute.xlu0 %380 }
  0xe0   :  { %2326 = vperm.xlu0 %3974, %v2265_v47   ;;  %1103 = vmatmul.mubr.bf16.gmra.mrb[68].mxu0 %v4045_v51  ;;  %v4990_v47 = vpop.permute.xlu1 %385  ;;  %v2798_v51 = vld [vmem:[%s5872_s8 + $0x10] sm:$0xff] }
  0xe1   :  { %2331 = vperm.xlu1 %3975, %v2266_v50   ;;  %1110 = vmatprep.mubr.bf16.mxu0 %v4046_v52  ;;  %v2797_v50 = vld [vmem:[%s5872_s8 + $0x8] sm:$0xff] }
  0xe2   :  { %v4060_v52 = vld [vmem:[%s5865_s1 + $0x160] ss:$8 sps:$4 sm:$0xff]  }
  0xe4   :  { %2336 = vperm.xlu0 %3974, %v2267_v56   ;;  %v4061_v56 = vld [vmem:[%s5865_s1 + $0x174] ss:$8 sps:$4 sm:$0xff]  }
  0xe5   :  { %2341 = vperm.xlu1 %3975, %v2268_v58   ;;  %v5004_v58 = vpop.permute.xlu0 %390 }
  0xe8   :  { %2346 = vperm.xlu0 %3974, %v2269_v60   ;;  %1111 = vmatmul.mubr.bf16.gmra.mrb[72].mxu0 %v4048_v0  ;;  %v2799_v60 = vld [vmem:[%s5872_s8 + $0x18] sm:$0xff]  ;;  %v5012_v0 = vpop.permute.xlu1 %395 }
  0xe9   :  { %2351 = vperm.xlu1 %3975, %v2270_v61   ;;  %1118 = vmatprep.mubr.bf16.mxu0 %v4049_v4  ;;  %v2800_v61 = vld [vmem:[%s5872_s8 + $0x20] sm:$0xff]  ;;  %v2801_v4 = vld [vmem:[%s5872_s8 + $0x28] sm:$0xff] }
  0xec   :  { %2356 = vperm.xlu0 %3974, %v2271_v5   ;;  %v2802_v5 = vld [vmem:[%s5872_s8 + $0x30] sm:$0xff] }
  0xed   :  { %2361 = vperm.xlu1 %3975, %v2272_v6   ;;  %v4063_v6 = vld [vmem:[%s5865_s1 + $0x170] ss:$8 sps:$4 sm:$0xff]  }
  0xf0   :  { %2366 = vperm.xlu0 %3974, %v2273_v10   ;;  %1119 = vmatmul.mubr.bf16.gmra.mrb[76].mxu0 %v4051_v14  ;;  %v4064_v10 = vld [vmem:[%s5865_s1 + $0x184] ss:$8 sps:$4 sm:$0xff]   ;;  %v5028_v14 = vpop.permute.xlu1 %405 }
  0xf1   :  { %2371 = vperm.xlu1 %3975, %v2274_v13   ;;  %1126 = vmatprep.mubr.bf16.mxu0 %v4052_v15  ;;  %v5026_v13 = vpop.permute.xlu0 %400  ;;  %v2803_v15 = vld [vmem:[%s5872_s8 + $0x38] sm:$0xff] }
  0xf4   :  { %2376 = vperm.xlu0 %3974, %v2275_v18   ;;  %v2804_v18 = vld [vmem:[%s5872_s8 + $0x40] sm:$0xff] }
  0xf5   :  { %2381 = vperm.xlu1 %3975, %v2276_v19   ;;  %v5036_v19 = vpop.permute.xlu0 %410 }
  0xf8   :  { %2386 = vperm.xlu0 %3974, %v2277_v22   ;;  %1127 = vmatmul.mubr.bf16.gmra.mrb[80].mxu0 %v4054_v24  ;;  %v2805_v22 = vld [vmem:[%s5872_s8 + $0x48] sm:$0xff] }
  0xf9   :  { %2391 = vperm.xlu1 %3975, %v2278_v23   ;;  %1134 = vmatprep.mubr.bf16.mxu0 %v4055_v27  ;;  %v2806_v23 = vld [vmem:[%s5872_s8 + $0x50] sm:$0xff]  ;;  %v4066_v24 = vld [vmem:[%s5865_s1 + $0x180] ss:$8 sps:$4 sm:$0xff]   ;;  %v5047_v27 = vpop.permute.xlu1 %415 }
  0xfc   :  { %2396 = vperm.xlu0 %3974, %v2279_v31   ;;  %v4067_v31 = vld [vmem:[%s5865_s1 + $0x194] ss:$8 sps:$4 sm:$0xff]  }
  0xfd   :  { %2401 = vperm.xlu1 %3975, %v2280_v32   ;;  %v2807_v32 = vld [vmem:[%s5872_s8 + $0x58] sm:$0xff] }
 0x100   :  { %2406 = vperm.xlu0 %3974, %v2281_v35   ;;  %1135 = vmatmul.mubr.bf16.gmra.mrb[84].mxu0 %v4057_v39  ;;  %v2808_v35 = vld [vmem:[%s5872_s8 + $0x60] sm:$0xff]  ;;  %v5060_v39 = vpop.permute.xlu1 %425 }
 0x101   :  { %2411 = vperm.xlu1 %3975, %v2282_v36   ;;  %1142 = vmatprep.mubr.bf16.mxu0 %v4058_v41  ;;  %v5058_v36 = vpop.permute.xlu0 %420  ;;  %v2809_v41 = vld [vmem:[%s5872_s8 + $0x68] sm:$0xff] }
 0x104   :  { %2416 = vperm.xlu0 %3974, %v2283_v42   ;;  %v2810_v42 = vld [vmem:[%s5872_s8 + $0x70] sm:$0xff] }
 0x105   :  { %2820 = vperm.xlu1 %3975, %v2796_v44   ;;  %v4069_v44 = vld [vmem:[%s5865_s1 + $0x190] ss:$8 sps:$4 sm:$0xff]  }
 0x108   :  { %2825 = vperm.xlu0 %3974, %v2797_v50   ;;  %1143 = vmatmul.mubr.bf16.gmra.mrb[88].mxu0 %v4060_v52  ;;  %v4070_v50 = vld [vmem:[%s5865_s1 + $0x1a4] ss:$8 sps:$4 sm:$0xff]   ;;  %v2811_v52 = vld [vmem:[%s5872_s8 + $0x78] sm:$0xff] }
 0x109   :  { %2830 = vperm.xlu1 %3975, %v2798_v51   ;;  %1150 = vmatprep.mubr.bf16.mxu0 %v4061_v56  ;;  %v5074_v51 = vpop.permute.xlu0 %430  ;;  %v2812_v56 = vld [vmem:[%s5872_s8 + $0x80] sm:$0xff] }
 0x10c   :  { %2835 = vperm.xlu0 %3974, %v2799_v60   ;;  %v5082_v60 = vpop.permute.xlu1 %435 }
 0x10d   :  { %2840 = vperm.xlu1 %3975, %v2800_v61   ;;  %v2813_v61 = vld [vmem:[%s5872_s8 + $0x88] sm:$0xff] }
 0x110   :  { %2845 = vperm.xlu0 %3974, %v2801_v4   ;;  %1151 = vmatmul.mubr.bf16.gmra.mrb[92].mxu0 %v4063_v6  ;;  %v2814_v4 = vld [vmem:[%s5872_s8 + $0x90] sm:$0xff] }
 0x111   :  { %2850 = vperm.xlu1 %3975, %v2802_v5   ;;  %1158 = vmatprep.mubr.bf16.mxu0 %v4064_v10  ;;  %v4072_v5 = vld [vmem:[%s5865_s1 + $0x1a0] ss:$8 sps:$4 sm:$0xff]   ;;  %v4073_v6 = vld [vmem:[%s5865_s1 + $0x1b4] ss:$8 sps:$4 sm:$0xff]   ;;  %v5096_v10 = vpop.permute.xlu0 %440 }
 0x114   :  { %2855 = vperm.xlu0 %3974, %v2803_v15   ;;  %v5098_v15 = vpop.permute.xlu1 %445 }
 0x115   :  { %2860 = vperm.xlu1 %3975, %v2804_v18   ;;  %v2815_v18 = vld [vmem:[%s5872_s8 + $0x98] sm:$0xff] }
 0x118   :  { %2865 = vperm.xlu0 %3974, %v2805_v22   ;;  %1159 = vmatmul.mubr.bf16.gmra.mrb[96].mxu0 %v4066_v24  ;;  %v2816_v22 = vld [vmem:[%s5872_s8 + $0xa0] sm:$0xff]  ;;  %v5106_v24 = vpop.permute.xlu0 %450 }
 0x119   :  { %2870 = vperm.xlu1 %3975, %v2806_v23   ;;  %1166 = vmatprep.mubr.bf16.mxu0 %v4067_v31 }
 0x11c   :  { %2875 = vperm.xlu0 %3974, %v2807_v32  }
 0x11d   :  { %2880 = vperm.xlu1 %3975, %v2808_v35   ;;  %v2817_v35 = vld [vmem:[%s5872_s8 + $0xa8] sm:$0xff] }
 0x120   :  { %2885 = vperm.xlu0 %3974, %v2809_v41   ;;  %1167 = vmatmul.mubr.bf16.gmra.mrb[100].mxu0 %v4069_v44  ;;  %v3233_v41 = vld [vmem:[%s5874_s10] sm:$0xff]  ;;  %v5118_v44 = vpop.permute.xlu1 %455 }
 0x121   :  { %2890 = vperm.xlu1 %3975, %v2810_v42   ;;  %1174 = vmatprep.mubr.bf16.mxu0 %v4070_v50  ;;  %v4075_v42 = vld [vmem:[%s5865_s1 + $0x1b0] ss:$8 sps:$4 sm:$0xff]  }
 0x124   :  { %2895 = vperm.xlu0 %3974, %v2811_v52  }
 0x125   :  { %2900 = vperm.xlu1 %3975, %v2812_v56   ;;  %v4087_v56 = vld [vmem:[%s5867_s3 + $0x4] ss:$16 sps:$4 sm:$0xff]  }
 0x126   :  { %1911 = vmatprep.mubr.bf16.mxu1 %v4087_v56 }
 0x128   :  { %2905 = vperm.xlu0 %3974, %v2813_v61   ;;  %1175 = vmatmul.mubr.bf16.gmra.mrb[104].mxu0 %v4072_v5 }
 0x129   :  { %2910 = vperm.xlu1 %3975, %v2814_v4   ;;  %1182 = vmatprep.mubr.bf16.mxu0 %v4073_v6  ;;  %v3234_v6 = vld [vmem:[%s5874_s10 + $0x8] sm:$0xff] }
 0x12b   :  { %v968_v23 = vpop.f32.mrb[0].mxu0 }
 0x12c   :  { %2915 = vperm.xlu0 %3974, %v2815_v18   ;;  %v969_v31 = vadd.f32 %v968_v23, %v4710_v49  ;;  %v970_v32 = vpop.f32.mrb[1].mxu0  ;;  %v4076_v49 = vld [vmem:[%s5865_s1 + $0x1c4] ss:$8 sps:$4 sm:$0xff]   ;;  %v3235_v18 = vld [vmem:[%s5874_s10 + $0x10] sm:$0xff]  ;;  %v5137_v23 = vpop.permute.xlu1 %465 }
 0x12d   :  { %2920 = vperm.xlu1 %3975, %v2816_v22   ;;  %v971_v50 = vpop.f32.mrb[2].mxu0 }
 0x12e   :  { %v972_v52 = vadd.f32 %v971_v50, %v4732_v57  ;;  %v973_v61 = vpop.f32.mrb[3].mxu0  ;;  %v1215_v4 = vmax.f32 %v969_v31, 0.0  ;;  %v5133_v57 = vpop.permute.xlu0 %460  ;;  %v4078_v50 = vld [vmem:[%s5865_s1 + $0x1c0] ss:$8 sps:$4 sm:$0xff]  }
 0x130   :  { %2925 = vperm.xlu0 %3974, %v2817_v35   ;;  %v1216_v5 = vmax.f32 %v972_v52, 0.0  ;;  %1183 = vmatmul.mubr.bf16.gmra.mrb[108].mxu0 %v4075_v42  ;;  %v3237_v42 = vld [vmem:[%s5874_s10 + $0x20] sm:$0xff]  ;;  %v4079_v52 = vld [vmem:[%s5865_s1 + $0x1d4] ss:$8 sps:$4 sm:$0xff]  }
 0x131   :  { %3249 = vperm.xlu1 %3975, %v3233_v41   ;;  %1190 = vmatprep.mubr.bf16.mxu0 %v4076_v49  ;;  %v3236_v41 = vld [vmem:[%s5874_s10 + $0x18] sm:$0xff] }
 0x132   :  { %v5135_v22 = vpack.c.bf16 %v1216_v5, %v1215_v4  ;;  %v5153_v61 = vpop.permute.xlu0 %470 }
 0x133   :  { %v976_v31 = vpop.f32.mrb[4].mxu0 }
 0x134   :  { %3254 = vperm.xlu0 %3974, %v3234_v6   ;;  %v977_v32 = vadd.f32 %v976_v31, %v4756_v3  ;;  %v978_v35 = vpop.f32.mrb[5].mxu0  ;;  %v3238_v6 = vld [vmem:[%s5874_s10 + $0x28] sm:$0xff]  ;;  %v5161_v31 = vpop.permute.xlu1 %475 }
 0x135   :  { %3259 = vperm.xlu1 %3975, %v3235_v18   ;;  %v979_v49 = vpop.f32.mrb[6].mxu0  ;;  %v3239_v18 = vld [vmem:[%s5874_s10 + $0x30] sm:$0xff]  ;;  %5880 = vst [vmem:[#allocation9_spill] sm:$0xff] %v5161_v31 }
 0x136   :  { %v980_v3 = vadd.f32 %v979_v49, %v4767_v7  ;;  %v981_v56 = vpop.f32.mrb[7].mxu0  ;;  %v1217_v4 = vmax.f32 %v977_v32, 0.0  ;;  %v4081_v49 = vld [vmem:[%s5865_s1 + $0x1d0] ss:$8 sps:$4 sm:$0xff]  }
 0x137   :  { %v5178_v56 = vpop.permute.xlu0 %480 }
 0x138   :  { %3264 = vperm.xlu0 %3974, %v3236_v41   ;;  %v1218_v5 = vmax.f32 %v980_v3, 0.0  ;;  %1191 = vmatmul.mubr.bf16.gmra.mrb[112].mxu0 %v4078_v50  ;;  %v3241_v50 = vld [vmem:[%s5874_s10 + $0x40] sm:$0xff]  ;;  %5881 = vst [vmem:[#allocation10_spill] sm:$0xff] %v5178_v56 }
 0x139   :  { %3269 = vperm.xlu1 %3975, %v3237_v42   ;;  %1198 = vmatprep.mubr.bf16.mxu0 %v4079_v52  ;;  %v3240_v42 = vld [vmem:[%s5874_s10 + $0x38] sm:$0xff]  ;;  %v4082_v3 = vld [vmem:[%s5865_s1 + $0x1e4] ss:$8 sps:$4 sm:$0xff]  }
 0x13a   :  { %v5163_v7 = vpack.c.bf16 %v1218_v5, %v1217_v4  ;;  %v5181_v4 = vpop.permute.xlu1 %485 }
 0x13b   :  { %v984_v35 = vpop.f32.mrb[8].mxu0  ;;  %5882 = vst [vmem:[#allocation11_spill] sm:$0xff] %v5181_v4 }
 0x13c   :  { %3274 = vperm.xlu0 %3974, %v3238_v6   ;;  %v985_v32 = vadd.f32 %v984_v35, %v4794_v17  ;;  %v986_v41 = vpop.f32.mrb[9].mxu0  ;;  %v3242_v35 = vld [vmem:[%s5874_s10 + $0x48] sm:$0xff] }
 0x13d   :  { %3279 = vperm.xlu1 %3975, %v3239_v18   ;;  %v987_v52 = vpop.f32.mrb[10].mxu0  ;;  %v3243_v41 = vld [vmem:[%s5874_s10 + $0x50] sm:$0xff] }
 0x13e   :  { %v988_v17 = vadd.f32 %v987_v52, %v4802_v20  ;;  %v989_v5 = vpop.f32.mrb[11].mxu0  ;;  %v1219_v6 = vmax.f32 %v985_v32, 0.0  ;;  %v5191_v52 = vpop.permute.xlu0 %490 }
 0x13f   :  { %5883 = vst [vmem:[#allocation12_spill] sm:$0xff] %v5191_v52 }
 0x140   :  { %3284 = vperm.xlu0 %3974, %v3240_v42   ;;  %v1220_v18 = vmax.f32 %v988_v17, 0.0  ;;  %1199 = vmatmul.mubr.bf16.gmra.mrb[116].mxu0 %v4081_v49  ;;  %v3245_v49 = vld [vmem:[%s5874_s10 + $0x60] sm:$0xff]  ;;  %v5203_v17 = vpop.permute.xlu1 %495 }
 0x141   :  { %3289 = vperm.xlu1 %3975, %v3241_v50   ;;  %1206 = vmatprep.mubr.bf16.mxu0 %v4082_v3  ;;  %v3244_v50 = vld [vmem:[%s5874_s10 + $0x58] sm:$0xff]  ;;  %v4084_v3 = vld [vmem:[%s5865_s1 + $0x1e0] ss:$8 sps:$4 sm:$0xff]   ;;  %5884 = vst [vmem:[#allocation13_spill] sm:$0xff] %v5203_v17 }
 0x142   :  { %v5189_v1 = vpack.c.bf16 %v1220_v18, %v1219_v6 }
 0x143   :  { %v992_v20 = vpop.f32.mrb[12].mxu0 }
 0x144   :  { %3294 = vperm.xlu0 %3974, %v3242_v35   ;;  %v993_v32 = vadd.f32 %v992_v20, %v4826_v29  ;;  %v994_v42 = vpop.f32.mrb[13].mxu0  ;;  %v3513_v20 = vld [vmem:[#allocation2] sm:$0x1]  ;;  %v5213_v4 = vpop.permute.xlu1 %505 }
 0x145   :  { %3299 = vperm.xlu1 %3975, %v3243_v41   ;;  %v995_v5 = vpop.f32.mrb[14].mxu0  ;;  %v3246_v41 = vld [vmem:[%s5874_s10 + $0x68] sm:$0xf]  ;;  %v5209_v42 = vpop.permute.xlu0 %500  ;;  %5886 = vst [vmem:[#allocation15_spill] sm:$0xff] %v5213_v4 }
 0x146   :  { %v996_v6 = vadd.f32 %v995_v5, %v4837_v33  ;;  %v997_v18 = vpop.f32.mrb[15].mxu0  ;;  %v1221_v29 = vmax.f32 %v993_v32, 0.0  ;;  %5885 = vst [vmem:[#allocation14_spill] sm:$0xff] %v5209_v42 }
 0x148   :  { %3304 = vperm.xlu0 %3974, %v3244_v50   ;;  %v1222_v35 = vmax.f32 %v996_v6, 0.0  ;;  %1207 = vmatmul.mubr.bf16.gmra.mrb[120].mxu0 %v4084_v3 }
 0x149   :  { %3309 = vperm.xlu1 %3975, %v3245_v49  }
 0x14a   :  { %v5211_v52 = vpack.c.bf16 %v1222_v35, %v1221_v29 }
 0x14b   :  { %v1000_v33 = vpop.f32.mrb[16].mxu0 }
 0x14c   :  { %3314 = vperm.xlu0 %3974, %v3246_v41   ;;  %v1001_v50 = vadd.f32 %v1000_v33, %v4864_v43  ;;  %v1002_v49 = vpop.f32.mrb[17].mxu0 }
 0x14d   :  { %3516 = vperm.xlu1 %3975, %v3513_v20   ;;  %v1003_v32 = vpop.f32.mrb[18].mxu0 }
 0x14e   :  { %v1004_v3 = vadd.f32 %v1003_v32, %v4872_v46  ;;  %v1005_v5 = vpop.f32.mrb[19].mxu0  ;;  %v1223_v6 = vmax.f32 %v1001_v50, 0.0 }
 0x150   :  { %v1224_v18 = vmax.f32 %v1004_v3, 0.0 }
 0x152   :  { %v5217_v17 = vpack.c.bf16 %v1224_v18, %v1223_v6 }
 0x153   :  { %v1008_v56 = vpop.f32.mrb[20].mxu0 }
 0x154   :  { %v1009_v29 = vadd.f32 %v1008_v56, %v4896_v59  ;;  %v1010_v35 = vpop.f32.mrb[21].mxu0 }
 0x155   :  { %v1011_v42 = vpop.f32.mrb[22].mxu0 }
 0x156   :  { %v1012_v41 = vadd.f32 %v1011_v42, %v4907_v2  ;;  %v1013_v20 = vpop.f32.mrb[23].mxu0  ;;  %v1225_v4 = vmax.f32 %v1009_v29, 0.0 }
 0x158   :  { %v1226_v31 = vmax.f32 %v1012_v41, 0.0 }
 0x15a   :  { %v5221_v43 = vpack.c.bf16 %v1226_v31, %v1225_v4 }
 0x15b   :  { %v1016_v33 = vpop.f32.mrb[24].mxu0 }
 0x15c   :  { %v1017_v46 = vadd.f32 %v1016_v33, %v4934_v16  ;;  %v1018_v49 = vpop.f32.mrb[25].mxu0 }
 0x15d   :  { %v1019_v50 = vpop.f32.mrb[26].mxu0 }
 0x15e   :  { %v1020_v32 = vadd.f32 %v1019_v50, %v4942_v21  ;;  %v1021_v3 = vpop.f32.mrb[27].mxu0  ;;  %v1227_v5 = vmax.f32 %v1017_v46, 0.0 }
 0x160   :  { %v1228_v6 = vmax.f32 %v1020_v32, 0.0 }
 0x162   :  { %v5225_v59 = vpack.c.bf16 %v1228_v6, %v1227_v5 }
 0x163   :  { %v1024_v56 = vpop.f32.mrb[28].mxu0 }
 0x164   :  { %v1025_v2 = vadd.f32 %v1024_v56, %v4966_v34  ;;  %v1026_v42 = vpop.f32.mrb[29].mxu0 }
 0x165   :  { %v1027_v18 = vpop.f32.mrb[30].mxu0 }
 0x166   :  { %v1028_v31 = vadd.f32 %v1027_v18, %v4977_v40  ;;  %v1029_v4 = vpop.f32.mrb[31].mxu0  ;;  %v1229_v29 = vmax.f32 %v1025_v2, 0.0 }
 0x168   :  { %v1230_v35 = vmax.f32 %v1028_v31, 0.0 }
 0x16a   :  { %v5229_v16 = vpack.c.bf16 %v1230_v35, %v1229_v29 }
 0x16b   :  { %v1032_v41 = vpop.f32.mrb[32].mxu0 }
 0x16c   :  { %v1033_v21 = vadd.f32 %v1032_v41, %v4708_v48  ;;  %v1034_v20 = vpop.f32.mrb[33].mxu0 }
 0x16d   :  { %v1035_v33 = vpop.f32.mrb[34].mxu0 }
 0x16e   :  { %v1036_v46 = vadd.f32 %v1035_v33, %v4724_v54  ;;  %v1037_v49 = vpop.f32.mrb[35].mxu0  ;;  %v1231_v50 = vmax.f32 %v1033_v21, 0.0 }
 0x170   :  { %v1232_v32 = vmax.f32 %v1036_v46, 0.0 }
 0x172   :  { %v1285_v34 = vpack.c.bf16 %v1232_v32, %v1231_v50 }
 0x173   :  { %v1040_v3 = vpop.f32.mrb[36].mxu0 }
 0x174   :  { %v1041_v5 = vadd.f32 %v1040_v3, %v4746_v62  ;;  %v1042_v40 = vpop.f32.mrb[37].mxu0  ;;  %3835 = vmatprep.subr.bf16.mxu1 %v1285_v34 }
 0x175   :  { %v1043_v6 = vpop.f32.mrb[38].mxu0  ;;  %3836 = vmatpush3.bf16.msra.mxu1 %v5135_v22 }
 0x176   :  { %v1044_v56 = vadd.f32 %v1043_v6, %v4748_v63  ;;  %v1045_v2 = vpop.f32.mrb[39].mxu0  ;;  %v1233_v48 = vmax.f32 %v1041_v5, 0.0 }
 0x178   :  { %v1234_v42 = vmax.f32 %v1044_v56, 0.0 }
 0x17a   :  { %v1286_v18 = vpack.c.bf16 %v1234_v42, %v1233_v48 }
 0x17b   :  { %v1048_v31 = vpop.f32.mrb[40].mxu0 }
 0x17c   :  { %v1049_v54 = vadd.f32 %v1048_v31, %v4778_v11  ;;  %v1050_v4 = vpop.f32.mrb[41].mxu0  ;;  %3837 = vmatprep.subr.bf16.mxu1 %v1286_v18 }
 0x17d   :  { %v1051_v29 = vpop.f32.mrb[42].mxu0  ;;  %3838 = vmatpush3.bf16.msra.mxu1 %v5163_v7 }
 0x17e   :  { %v1052_v62 = vadd.f32 %v1051_v29, %v4780_v12  ;;  %v1053_v35 = vpop.f32.mrb[43].mxu0  ;;  %v1235_v41 = vmax.f32 %v1049_v54, 0.0 }
 0x180   :  { %v1236_v21 = vmax.f32 %v1052_v62, 0.0 }
 0x182   :  { %v1287_v22 = vpack.c.bf16 %v1236_v21, %v1235_v41 }
 0x183   :  { %v1056_v20 = vpop.f32.mrb[44].mxu0 }
 0x184   :  { %v1057_v63 = vadd.f32 %v1056_v20, %v4816_v25  ;;  %v1058_v33 = vpop.f32.mrb[45].mxu0  ;;  %3839 = vmatprep.subr.bf16.mxu1 %v1287_v22 }
 0x185   :  { %v1059_v46 = vpop.f32.mrb[46].mxu0  ;;  %3840 = vmatpush3.bf16.msra.mxu1 %v5189_v1 }
 0x186   :  { %v1060_v11 = vadd.f32 %v1059_v46, %v4818_v26  ;;  %v1061_v49 = vpop.f32.mrb[47].mxu0  ;;  %v1237_v50 = vmax.f32 %v1057_v63, 0.0 }
 0x188   :  { %v1238_v32 = vmax.f32 %v1060_v11, 0.0 }
 0x18a   :  { %v1288_v7 = vpack.c.bf16 %v1238_v32, %v1237_v50 }
 0x18b   :  { %v1064_v34 = vpop.f32.mrb[48].mxu0 }
 0x18c   :  { %v1065_v12 = vadd.f32 %v1064_v34, %v4848_v37  ;;  %v1066_v3 = vpop.f32.mrb[49].mxu0  ;;  %3841 = vmatprep.subr.bf16.mxu1 %v1288_v7  ;;  %v5887_v7 = vmov 0  }
 0x18d   :  { %v1067_v5 = vpop.f32.mrb[50].mxu0  ;;  %3842 = vmatpush3.bf16.msra.mxu1 %v5211_v52 }
 0x18e   :  { %v1068_v25 = vadd.f32 %v1067_v5, %v4850_v38  ;;  %v1069_v40 = vpop.f32.mrb[51].mxu0  ;;  %v1239_v6 = vmax.f32 %v1065_v12, 0.0 }
 0x190   :  { %v1240_v56 = vmax.f32 %v1068_v25, 0.0 }
 0x192   :  { %v1289_v1 = vpack.c.bf16 %v1240_v56, %v1239_v6 }
 0x193   :  { %v1072_v2 = vpop.f32.mrb[52].mxu0 }
 0x194   :  { %v1073_v26 = vadd.f32 %v1072_v2, %v4886_v53  ;;  %v1074_v48 = vpop.f32.mrb[53].mxu0  ;;  %3843 = vmatprep.subr.bf16.mxu1 %v1289_v1 }
 0x195   :  { %v1075_v42 = vpop.f32.mrb[54].mxu0  ;;  %3844 = vmatpush3.bf16.msra.mxu1 %v5217_v17 }
 0x196   :  { %v1076_v37 = vadd.f32 %v1075_v42, %v4888_v55  ;;  %v1077_v18 = vpop.f32.mrb[55].mxu0  ;;  %v1241_v31 = vmax.f32 %v1073_v26, 0.0 }
 0x197   :  { %v4093_v18 = vld [vmem:[%s5867_s3 + $0x40] ss:$16 sps:$4 sm:$0xff]  }
 0x198   :  { %v1242_v54 = vmax.f32 %v1076_v37, 0.0 }
 0x19a   :  { %v1290_v52 = vpack.c.bf16 %v1242_v54, %v1241_v31 }
 0x19b   :  { %v1080_v4 = vpop.f32.mrb[56].mxu0 }
 0x19c   :  { %v1081_v38 = vadd.f32 %v1080_v4, %v4918_v8  ;;  %v1082_v29 = vpop.f32.mrb[57].mxu0  ;;  %3845 = vmatprep.subr.bf16.mxu1 %v1290_v52 }
 0x19d   :  { %v1083_v62 = vpop.f32.mrb[58].mxu0  ;;  %3846 = vmatpush3.bf16.msra.mxu1 %v5221_v43 }
 0x19e   :  { %v1084_v53 = vadd.f32 %v1083_v62, %v4920_v9  ;;  %v1085_v35 = vpop.f32.mrb[59].mxu0  ;;  %v1243_v41 = vmax.f32 %v1081_v38, 0.0 }
 0x19f   :  { %v4096_v35 = vld [vmem:[%s5867_s3 + $0x60] ss:$16 sps:$4 sm:$0xff]  }
 0x1a0   :  { %v1244_v21 = vmax.f32 %v1084_v53, 0.0 }
 0x1a2   :  { %v1291_v17 = vpack.c.bf16 %v1244_v21, %v1243_v41 }
 0x1a3   :  { %v1088_v22 = vpop.f32.mrb[60].mxu0 }
 0x1a4   :  { %v1089_v55 = vadd.f32 %v1088_v22, %v4956_v28  ;;  %v1090_v20 = vpop.f32.mrb[61].mxu0  ;;  %3847 = vmatprep.subr.bf16.mxu1 %v1291_v17  ;;  %v4085_v28 = vld [vmem:[%s5867_s3] ss:$16 sps:$4 sm:$0xff]  }
 0x1a5   :  { %v1091_v63 = vpop.f32.mrb[62].mxu0  ;;  %3848 = vmatpush3.bf16.msra.mxu1 %v5225_v59 }
 0x1a6   :  { %v1092_v8 = vadd.f32 %v1091_v63, %v4958_v30  ;;  %v1093_v33 = vpop.f32.mrb[63].mxu0  ;;  %v1245_v46 = vmax.f32 %v1089_v55, 0.0  ;;  %v4088_v30 = vld [vmem:[%s5867_s3 + $0x24] ss:$16 sps:$4 sm:$0xff]  }
 0x1a7   :  { %v4099_v33 = vld [vmem:[%s5867_s3 + $0x80] ss:$16 sps:$4 sm:$0xff]  }
 0x1a8   :  { %v1246_v11 = vmax.f32 %v1092_v8, 0.0 }
 0x1aa   :  { %v1292_v43 = vpack.c.bf16 %v1246_v11, %v1245_v46 }
 0x1ab   :  { %v1096_v49 = vpop.f32.mrb[64].mxu0 }
 0x1ac   :  { %v1097_v9 = vadd.f32 %v1096_v49, %v4988_v45  ;;  %v1098_v50 = vpop.f32.mrb[65].mxu0  ;;  %3849 = vmatprep.subr.bf16.mxu1 %v1292_v43 }
 0x1ad   :  { %v1099_v32 = vpop.f32.mrb[66].mxu0  ;;  %3850 = vmatpush3.bf16.msra.mxu1 %v5229_v16  ;;  %v4090_v16 = vld [vmem:[%s5867_s3 + $0x20] ss:$16 sps:$4 sm:$0xff]  }
 0x1ae   :  { %v1100_v59 = vadd.f32 %v1099_v32, %v4990_v47  ;;  %2032 = vmatprep.subr.bf16.mxu1 %v5887_v7  ;;  %v1101_v34 = vpop.f32.mrb[67].mxu0  ;;  %v1247_v12 = vmax.f32 %v1097_v9, 0.0  ;;  %v4091_v47 = vld [vmem:[%s5867_s3 + $0x44] ss:$16 sps:$4 sm:$0xff]  }
 0x1b0   :  { %v1248_v45 = vmax.f32 %v1100_v59, 0.0  ;;  %1912 = vmatmul.mubr.bf16.vlgmr.msra.gmra.mrb[0].mxu1 %v4085_v28 }
 0x1b1   :  { %1919 = vmatprep.mubr.bf16.mxu1 %v4088_v30  ;;  %v4102_v30 = vld [vmem:[%s5867_s3 + $0xa0] ss:$16 sps:$4 sm:$0xff]  }
 0x1b2   :  { %v1293_v3 = vpack.c.bf16 %v1248_v45, %v1247_v12 }
 0x1b3   :  { %v1104_v5 = vpop.f32.mrb[68].mxu0 }
 0x1b4   :  { %v1105_v25 = vadd.f32 %v1104_v5, %v5004_v58  ;;  %v1106_v40 = vpop.f32.mrb[69].mxu0  ;;  %2033 = vmatpush1.bf16.msra.mxu1 %v1293_v3 }
 0x1b5   :  { %v1107_v6 = vpop.f32.mrb[70].mxu0  ;;  %2034 = vmatprep.subr.bf16.mxu1 %v5887_v7 }
 0x1b6   :  { %v1108_v56 = vadd.f32 %v1107_v6, %v5012_v0  ;;  %v1109_v1 = vpop.f32.mrb[71].mxu0  ;;  %v1249_v2 = vmax.f32 %v1105_v25, 0.0  ;;  %v4094_v0 = vld [vmem:[%s5867_s3 + $0x64] ss:$16 sps:$4 sm:$0xff]  }
 0x1b8   :  { %v1250_v26 = vmax.f32 %v1108_v56, 0.0  ;;  %1920 = vmatmul.mubr.bf16.gmra.mrb[4].mxu1 %v4090_v16  ;;  %v4105_v16 = vld [vmem:[%s5867_s3 + $0xc0] ss:$16 sps:$4 sm:$0xff]  }
 0x1b9   :  { %1927 = vmatprep.mubr.bf16.mxu1 %v4091_v47 }
 0x1ba   :  { %v1294_v58 = vpack.c.bf16 %v1250_v26, %v1249_v2 }
 0x1bb   :  { %v1112_v48 = vpop.f32.mrb[72].mxu0 }
 0x1bc   :  { %v1113_v42 = vadd.f32 %v1112_v48, %v5026_v13  ;;  %v1114_v37 = vpop.f32.mrb[73].mxu0  ;;  %2035 = vmatpush1.bf16.msra.mxu1 %v1294_v58 }
 0x1bd   :  { %v1115_v31 = vpop.f32.mrb[74].mxu0  ;;  %2036 = vmatprep.subr.bf16.mxu1 %v5887_v7 }
 0x1be   :  { %v1116_v54 = vadd.f32 %v1115_v31, %v5028_v14  ;;  %v1117_v52 = vpop.f32.mrb[75].mxu0  ;;  %v1251_v4 = vmax.f32 %v1113_v42, 0.0  ;;  %v4097_v14 = vld [vmem:[%s5867_s3 + $0x84] ss:$16 sps:$4 sm:$0xff]   ;;  %v4108_v42 = vld [vmem:[%s5867_s3 + $0xe0] ss:$16 sps:$4 sm:$0xff]  }
 0x1c0   :  { %v1252_v38 = vmax.f32 %v1116_v54, 0.0  ;;  %1928 = vmatmul.mubr.bf16.gmra.mrb[8].mxu1 %v4093_v18 }
 0x1c1   :  { %1935 = vmatprep.mubr.bf16.mxu1 %v4094_v0 }
 0x1c2   :  { %v1295_v13 = vpack.c.bf16 %v1252_v38, %v1251_v4 }
 0x1c3   :  { %v1120_v29 = vpop.f32.mrb[76].mxu0 }
 0x1c4   :  { %v1121_v62 = vadd.f32 %v1120_v29, %v5036_v19  ;;  %v1122_v53 = vpop.f32.mrb[77].mxu0  ;;  %2037 = vmatpush1.bf16.msra.mxu1 %v1295_v13  ;;  %v4111_v13 = vld [vmem:[%s5867_s3 + $0x100] ss:$16 sps:$4 sm:$0xff]  }
 0x1c5   :  { %v1123_v41 = vpop.f32.mrb[78].mxu0  ;;  %2038 = vmatprep.subr.bf16.mxu1 %v5887_v7 }
 0x1c6   :  { %v1124_v21 = vadd.f32 %v1123_v41, %v5047_v27  ;;  %v1125_v17 = vpop.f32.mrb[79].mxu0  ;;  %v1253_v22 = vmax.f32 %v1121_v62, 0.0  ;;  %v4100_v27 = vld [vmem:[%s5867_s3 + $0xa4] ss:$16 sps:$4 sm:$0xff]  }
 0x1c8   :  { %v1254_v55 = vmax.f32 %v1124_v21, 0.0  ;;  %1936 = vmatmul.mubr.bf16.gmra.mrb[12].mxu1 %v4096_v35 }
 0x1c9   :  { %1943 = vmatprep.mubr.bf16.mxu1 %v4097_v14 }
 0x1ca   :  { %v1296_v19 = vpack.c.bf16 %v1254_v55, %v1253_v22  ;;  %v4114_v22 = vld [vmem:[%s5867_s3 + $0x120] ss:$16 sps:$4 sm:$0xff]  }
 0x1cb   :  { %v1128_v20 = vpop.f32.mrb[80].mxu0 }
 0x1cc   :  { %v1129_v63 = vadd.f32 %v1128_v20, %v5058_v36  ;;  %v1130_v8 = vpop.f32.mrb[81].mxu0  ;;  %2039 = vmatpush1.bf16.msra.mxu1 %v1296_v19  ;;  %v5888_v19 = vld [vmem:[#allocation9_spill] sm:$0xff] }
 0x1cd   :  { %v1131_v46 = vpop.f32.mrb[82].mxu0  ;;  %2040 = vmatprep.subr.bf16.mxu1 %v5887_v7 }
 0x1ce   :  { %v1132_v11 = vadd.f32 %v1131_v46, %v5060_v39  ;;  %v1133_v43 = vpop.f32.mrb[83].mxu0  ;;  %v1255_v49 = vmax.f32 %v1129_v63, 0.0  ;;  %v4103_v39 = vld [vmem:[%s5867_s3 + $0xc4] ss:$16 sps:$4 sm:$0xff]  }
 0x1d0   :  { %v1256_v9 = vmax.f32 %v1132_v11, 0.0  ;;  %1944 = vmatmul.mubr.bf16.gmra.mrb[16].mxu1 %v4099_v33 }
 0x1d1   :  { %1951 = vmatprep.mubr.bf16.mxu1 %v4100_v27  ;;  %v5889_v27 = vld [vmem:[#allocation10_spill] sm:$0xff] }
 0x1d2   :  { %v1297_v36 = vpack.c.bf16 %v1256_v9, %v1255_v49  ;;  %v4117_v49 = vld [vmem:[%s5867_s3 + $0x140] ss:$16 sps:$4 sm:$0xff]  }
 0x1d3   :  { %v1136_v50 = vpop.f32.mrb[84].mxu0 }
 0x1d4   :  { %v1137_v28 = vadd.f32 %v1136_v50, %v5074_v51  ;;  %v1138_v32 = vpop.f32.mrb[85].mxu0  ;;  %2041 = vmatpush1.bf16.msra.mxu1 %v1297_v36  ;;  %v4118_v36 = vld [vmem:[%s5867_s3 + $0x164] ss:$16 sps:$4 sm:$0xff]  }
 0x1d5   :  { %v1139_v59 = vpop.f32.mrb[86].mxu0  ;;  %2042 = vmatprep.subr.bf16.mxu1 %v5887_v7  ;;  %v5890_v50 = vld [vmem:[#allocation11_spill] sm:$0xff] }
 0x1d6   :  { %v1140_v34 = vadd.f32 %v1139_v59, %v5082_v60  ;;  %v1141_v12 = vpop.f32.mrb[87].mxu0  ;;  %v1257_v45 = vmax.f32 %v1137_v28, 0.0  ;;  %v4106_v60 = vld [vmem:[%s5867_s3 + $0xe4] ss:$16 sps:$4 sm:$0xff]  }
 0x1d7   :  { %v5891_v12 = vld [vmem:[#allocation12_spill] sm:$0xff] }
 0x1d8   :  { %v1258_v3 = vmax.f32 %v1140_v34, 0.0  ;;  %1952 = vmatmul.mubr.bf16.gmra.mrb[20].mxu1 %v4102_v30 }
 0x1d9   :  { %1959 = vmatprep.mubr.bf16.mxu1 %v4103_v39 }
 0x1da   :  { %v1298_v51 = vpack.c.bf16 %v1258_v3, %v1257_v45 }
 0x1db   :  { %v1144_v5 = vpop.f32.mrb[88].mxu0 }
 0x1dc   :  { %v1145_v25 = vadd.f32 %v1144_v5, %v5096_v10  ;;  %v1146_v40 = vpop.f32.mrb[89].mxu0  ;;  %2043 = vmatpush1.bf16.msra.mxu1 %v1298_v51  ;;  %v4120_v51 = vld [vmem:[%s5867_s3 + $0x160] ss:$16 sps:$4 sm:$0xff]  }
 0x1dd   :  { %v1147_v6 = vpop.f32.mrb[90].mxu0  ;;  %2044 = vmatprep.subr.bf16.mxu1 %v5887_v7  ;;  %v5892_v40 = vld [vmem:[#allocation13_spill] sm:$0xff] }
 0x1de   :  { %v1148_v47 = vadd.f32 %v1147_v6, %v5098_v15  ;;  %v1149_v56 = vpop.f32.mrb[91].mxu0  ;;  %v1259_v1 = vmax.f32 %v1145_v25, 0.0  ;;  %v4109_v15 = vld [vmem:[%s5867_s3 + $0x104] ss:$16 sps:$4 sm:$0xff]  }
 0x1df   :  { %v4121_v25 = vld [vmem:[%s5867_s3 + $0x184] ss:$16 sps:$4 sm:$0xff]  }
 0x1e0   :  { %v1260_v2 = vmax.f32 %v1148_v47, 0.0  ;;  %1960 = vmatmul.mubr.bf16.gmra.mrb[24].mxu1 %v4105_v16 }
 0x1e1   :  { %1967 = vmatprep.mubr.bf16.mxu1 %v4106_v60 }
 0x1e2   :  { %v1299_v10 = vpack.c.bf16 %v1260_v2, %v1259_v1  ;;  %v5893_v2 = vld [vmem:[#allocation14_spill] sm:$0xff] }
 0x1e3   :  { %v1152_v26 = vpop.f32.mrb[92].mxu0 }
 0x1e4   :  { %v1153_v58 = vadd.f32 %v1152_v26, %v5106_v24  ;;  %v1154_v48 = vpop.f32.mrb[93].mxu0  ;;  %2045 = vmatpush1.bf16.msra.mxu1 %v1299_v10 }
 0x1e5   :  { %v1155_v37 = vpop.f32.mrb[94].mxu0  ;;  %2046 = vmatprep.subr.bf16.mxu1 %v5887_v7 }
 0x1e6   :  { %v1156_v18 = vadd.f32 %v1155_v37, %v5118_v44  ;;  %v1157_v31 = vpop.f32.mrb[95].mxu0  ;;  %v1261_v0 = vmax.f32 %v1153_v58, 0.0  ;;  %v4112_v44 = vld [vmem:[%s5867_s3 + $0x124] ss:$16 sps:$4 sm:$0xff]   ;;  %v4123_v58 = vld [vmem:[%s5867_s3 + $0x180] ss:$16 sps:$4 sm:$0xff]  }
 0x1e7   :  { %v5894_v37 = vld [vmem:[#allocation15_spill] sm:$0xff] }
 0x1e8   :  { %v1262_v54 = vmax.f32 %v1156_v18, 0.0  ;;  %1968 = vmatmul.mubr.bf16.gmra.mrb[28].mxu1 %v4108_v42  ;;  %v4124_v42 = vld [vmem:[%s5867_s3 + $0x1a4] ss:$16 sps:$4 sm:$0xff]  }
 0x1e9   :  { %1975 = vmatprep.mubr.bf16.mxu1 %v4109_v15 }
 0x1ea   :  { %v1300_v24 = vpack.c.bf16 %v1262_v54, %v1261_v0 }
 0x1eb   :  { %v1160_v52 = vpop.f32.mrb[96].mxu0 }
 0x1ec   :  { %v1161_v4 = vadd.f32 %v1160_v52, %v5133_v57  ;;  %v1162_v38 = vpop.f32.mrb[97].mxu0  ;;  %2047 = vmatpush1.bf16.msra.mxu1 %v1300_v24  ;;  %v511_v24 = vpop.permute.xlu0 %510 }
 0x1ed   :  { %v1163_v29 = vpop.f32.mrb[98].mxu0  ;;  %2048 = vmatprep.subr.bf16.mxu1 %v5887_v7 }
 0x1ee   :  { %v1164_v62 = vadd.f32 %v1163_v29, %v5137_v23  ;;  %v1165_v53 = vpop.f32.mrb[99].mxu0  ;;  %v1263_v35 = vmax.f32 %v1161_v4, 0.0  ;;  %v4115_v23 = vld [vmem:[%s5867_s3 + $0x144] ss:$16 sps:$4 sm:$0xff]   ;;  %v516_v29 = vpop.permute.xlu1 %515 }
 0x1f0   :  { %v1264_v41 = vmax.f32 %v1164_v62, 0.0  ;;  %1976 = vmatmul.mubr.bf16.gmra.mrb[32].mxu1 %v4111_v13  ;;  %v4126_v13 = vld [vmem:[%s5867_s3 + $0x1a0] ss:$16 sps:$4 sm:$0xff]   ;;  %v4127_v62 = vld [vmem:[%s5867_s3 + $0x1c4] ss:$16 sps:$4 sm:$0x3f]  }
 0x1f1   :  { %1983 = vmatprep.mubr.bf16.mxu1 %v4112_v44 }
 0x1f2   :  { %v1301_v57 = vpack.c.bf16 %v1264_v41, %v1263_v35 }
 0x1f3   :  { %v1168_v14 = vpop.f32.mrb[100].mxu0 }
 0x1f4   :  { %v1169_v21 = vadd.f32 %v1168_v14, %v5153_v61  ;;  %v1170_v17 = vpop.f32.mrb[101].mxu0  ;;  %2049 = vmatpush1.bf16.msra.mxu1 %v1301_v57 }
 0x1f5   :  { %v1171_v55 = vpop.f32.mrb[102].mxu0  ;;  %2050 = vmatprep.subr.bf16.mxu1 %v5887_v7 }
 0x1f6   :  { %v1172_v20 = vadd.f32 %v1171_v55, %v5888_v19  ;;  %v1173_v63 = vpop.f32.mrb[103].mxu0  ;;  %v1265_v8 = vmax.f32 %v1169_v21, 0.0  ;;  %v521_v21 = vpop.permute.xlu0 %520 }
 0x1f7   :  { %v526_v19 = vpop.permute.xlu1 %525  ;;  %v4132_v63 = vld [vmem:[%s5867_s3 + $0xc] ss:$16 sps:$4 sm:$0xff]  }
 0x1f8   :  { %v1266_v33 = vmax.f32 %v1172_v20, 0.0  ;;  %1984 = vmatmul.mubr.bf16.gmra.mrb[36].mxu1 %v4114_v22 }
 0x1f9   :  { %1991 = vmatprep.mubr.bf16.mxu1 %v4115_v23  ;;  %v4129_v23 = vld [vmem:[%s5867_s3 + $0x1c0] ss:$16 sps:$4 sm:$0x3f]  }
 0x1fa   :  { %v1302_v61 = vpack.c.bf16 %v1266_v33, %v1265_v8 }
 0x1fb   :  { %v1176_v46 = vpop.f32.mrb[104].mxu0 }
 0x1fc   :  { %v1177_v11 = vadd.f32 %v1176_v46, %v5889_v27  ;;  %v1178_v43 = vpop.f32.mrb[105].mxu0  ;;  %2051 = vmatpush1.bf16.msra.mxu1 %v1302_v61 }
 0x1fd   :  { %v1179_v9 = vpop.f32.mrb[106].mxu0  ;;  %2052 = vmatprep.subr.bf16.mxu1 %v5887_v7  ;;  %v4133_v43 = vld [vmem:[%s5867_s3 + $0x2c] ss:$16 sps:$4 sm:$0xff]  }
 0x1fe   :  { %v1180_v28 = vadd.f32 %v1179_v9, %v5890_v50  ;;  %v1181_v32 = vpop.f32.mrb[107].mxu0  ;;  %v1267_v30 = vmax.f32 %v1177_v11, 0.0  ;;  %v4130_v11 = vld [vmem:[%s5867_s3 + $0x8] ss:$16 sps:$4 sm:$0xff]   ;;  %v4136_v9 = vld [vmem:[%s5867_s3 + $0x4c] ss:$16 sps:$4 sm:$0xff]  }
 0x1ff   :  { %v4139_v50 = vld [vmem:[%s5867_s3 + $0x6c] ss:$16 sps:$4 sm:$0xff]  }
 0x200   :  { %v1268_v59 = vmax.f32 %v1180_v28, 0.0  ;;  %1992 = vmatmul.mubr.bf16.gmra.mrb[40].mxu1 %v4117_v49  ;;  %v4135_v49 = vld [vmem:[%s5867_s3 + $0x28] ss:$16 sps:$4 sm:$0xff]   ;;  %v4142_v32 = vld [vmem:[%s5867_s3 + $0x8c] ss:$16 sps:$4 sm:$0xff]  }
 0x201   :  { %1999 = vmatprep.mubr.bf16.mxu1 %v4118_v36  ;;  %v4138_v36 = vld [vmem:[%s5867_s3 + $0x48] ss:$16 sps:$4 sm:$0xff]  }
 0x202   :  { %v1303_v39 = vpack.c.bf16 %v1268_v59, %v1267_v30  ;;  %v4141_v28 = vld [vmem:[%s5867_s3 + $0x68] ss:$16 sps:$4 sm:$0xff]   ;;  %v4145_v59 = vld [vmem:[%s5867_s3 + $0xac] ss:$16 sps:$4 sm:$0xff]  }
 0x203   :  { %v1184_v34 = vpop.f32.mrb[108].mxu0  ;;  %v4144_v30 = vld [vmem:[%s5867_s3 + $0x88] ss:$16 sps:$4 sm:$0xff]  }
 0x204   :  { %v1185_v45 = vadd.f32 %v1184_v34, %v5891_v12  ;;  %v1186_v3 = vpop.f32.mrb[109].mxu0  ;;  %2053 = vmatpush1.bf16.msra.mxu1 %v1303_v39  ;;  %v4147_v39 = vld [vmem:[%s5867_s3 + $0xa8] ss:$16 sps:$4 sm:$0xff]   ;;  %v4148_v34 = vld [vmem:[%s5867_s3 + $0xcc] ss:$16 sps:$4 sm:$0xff]  }
 0x205   :  { %v1187_v5 = vpop.f32.mrb[110].mxu0  ;;  %2054 = vmatprep.subr.bf16.mxu1 %v5887_v7  ;;  %v4150_v12 = vld [vmem:[%s5867_s3 + $0xc8] ss:$16 sps:$4 sm:$0xff]  }
 0x206   :  { %v1188_v16 = vadd.f32 %v1187_v5, %v5892_v40  ;;  %v1189_v6 = vpop.f32.mrb[111].mxu0  ;;  %v1269_v60 = vmax.f32 %v1185_v45, 0.0  ;;  %v4151_v45 = vld [vmem:[%s5867_s3 + $0xec] ss:$16 sps:$4 sm:$0xff]   ;;  %v4153_v3 = vld [vmem:[%s5867_s3 + $0xe8] ss:$16 sps:$4 sm:$0xff]  }
 0x207   :  { %v4156_v5 = vld [vmem:[%s5867_s3 + $0x108] ss:$16 sps:$4 sm:$0xff]  }
 0x208   :  { %v1270_v47 = vmax.f32 %v1188_v16, 0.0  ;;  %2000 = vmatmul.mubr.bf16.gmra.mrb[44].mxu1 %v4120_v51  ;;  %v4154_v51 = vld [vmem:[%s5867_s3 + $0x10c] ss:$16 sps:$4 sm:$0xff]   ;;  %v4159_v40 = vld [vmem:[%s5867_s3 + $0x128] ss:$16 sps:$4 sm:$0xff]  }
 0x209   :  { %2007 = vmatprep.mubr.bf16.mxu1 %v4121_v25  ;;  %v4157_v25 = vld [vmem:[%s5867_s3 + $0x12c] ss:$16 sps:$4 sm:$0xff]   ;;  %v4162_v6 = vld [vmem:[%s5867_s3 + $0x148] ss:$16 sps:$4 sm:$0xff]  }
 0x20a   :  { %v1304_v56 = vpack.c.bf16 %v1270_v47, %v1269_v60  ;;  %v4160_v16 = vld [vmem:[%s5867_s3 + $0x14c] ss:$16 sps:$4 sm:$0xff]   ;;  %v4165_v47 = vld [vmem:[%s5867_s3 + $0x168] ss:$16 sps:$4 sm:$0xff]  }
 0x20b   :  { %v1192_v1 = vpop.f32.mrb[112].mxu0  ;;  %v4163_v60 = vld [vmem:[%s5867_s3 + $0x16c] ss:$16 sps:$4 sm:$0xff]  }
 0x20c   :  { %v1193_v10 = vadd.f32 %v1192_v1, %v5893_v2  ;;  %v1194_v26 = vpop.f32.mrb[113].mxu0  ;;  %2055 = vmatpush1.bf16.msra.mxu1 %v1304_v56  ;;  %v4166_v56 = vld [vmem:[%s5867_s3 + $0x18c] ss:$16 sps:$4 sm:$0xff]  }
 0x20d   :  { %v1195_v48 = vpop.f32.mrb[114].mxu0  ;;  %2056 = vmatprep.subr.bf16.mxu1 %v5887_v7 }
 0x20e   :  { %v1196_v15 = vadd.f32 %v1195_v48, %v5894_v37  ;;  %v1197_v18 = vpop.f32.mrb[115].mxu0  ;;  %v1271_v31 = vmax.f32 %v1193_v10, 0.0  ;;  %v4168_v10 = vld [vmem:[%s5867_s3 + $0x188] ss:$16 sps:$4 sm:$0xff]   ;;  %v4169_v48 = vld [vmem:[%s5867_s3 + $0x1ac] ss:$16 sps:$4 sm:$0xff]  }
 0x210   :  { %v1272_v0 = vmax.f32 %v1196_v15, 0.0  ;;  %2008 = vmatmul.mubr.bf16.gmra.mrb[48].mxu1 %v4123_v58 }
 0x211   :  { %2015 = vmatprep.mubr.bf16.mxu1 %v4124_v42 }
 0x212   :  { %v1305_v54 = vpack.c.bf16 %v1272_v0, %v1271_v31  ;;  %v4171_v31 = vld [vmem:[%s5867_s3 + $0x1a8] ss:$16 sps:$4 sm:$0xff]  }
 0x213   :  { %v1200_v52 = vpop.f32.mrb[116].mxu0 }
 0x214   :  { %v1201_v4 = vadd.f32 %v1200_v52, %v511_v24  ;;  %v1202_v38 = vpop.f32.mrb[117].mxu0  ;;  %2057 = vmatpush1.bf16.msra.mxu1 %v1305_v54  ;;  %v4172_v24 = vld [vmem:[%s5867_s3 + $0x1cc] ss:$16 sps:$4 sm:$0x3f]  }
 0x215   :  { %v1203_v44 = vpop.f32.mrb[118].mxu0  ;;  %2058 = vmatprep.subr.bf16.mxu1 %v5887_v7 }
 0x216   :  { %v1204_v53 = vadd.f32 %v1203_v44, %v516_v29  ;;  %v1205_v35 = vpop.f32.mrb[119].mxu0  ;;  %v1273_v41 = vmax.f32 %v1201_v4, 0.0  ;;  %v4174_v29 = vld [vmem:[%s5867_s3 + $0x1c8] ss:$16 sps:$4 sm:$0x3f]  }
 0x218   :  { %v1274_v57 = vmax.f32 %v1204_v53, 0.0  ;;  %2016 = vmatmul.mubr.bf16.gmra.mrb[52].mxu1 %v4126_v13 }
 0x219   :  { %2023 = vmatprep.mubr.bf16.mxu1 %v4127_v62 }
 0x21a   :  { %v1306_v14 = vpack.c.bf16 %v1274_v57, %v1273_v41 }
 0x21b   :  { %v1208_v17 = vpop.f32.mrb[120].mxu0 }
 0x21c   :  { %v1209_v22 = vadd.f32 %v1208_v17, %v521_v21  ;;  %v1210_v55 = vpop.f32.mrb[121].mxu0  ;;  %2059 = vmatpush1.bf16.msra.mxu1 %v1306_v14 }
 0x21d   :  { %v1211_v20 = vpop.f32.mrb[122].mxu0  ;;  %2060 = vmatprep.subr.bf16.mxu1 %v5887_v7 }
 0x21e   :  { %v1212_v8 = vadd.f32 %v1211_v20, %v526_v19  ;;  %v1213_v33 = vpop.f32.mrb[123].mxu0  ;;  %v1275_v61 = vmax.f32 %v1209_v22, 0.0 }
 0x220   :  { %v1276_v46 = vmax.f32 %v1212_v8, 0.0  ;;  %2024 = vmatmul.mubr.bf16.gmra.mrb[56].mxu1 %v4129_v23 }
 0x221   :  { %3723 = vmatprep.mubr.msk.bf16.mxu1 %vm1833_vm0, %v4132_v63 }
 0x222   :  { %v1307_v27 = vpack.c.bf16 %v1276_v46, %v1275_v61 }
 0x224   :  { %2061 = vmatpush1.bf16.msra.mxu1 %v1307_v27 }
 0x225   :  { %2589 = vmatprep.subr.bf16.mxu1 %v5887_v7 }
 0x228   :  { %2065 = vmatmul.mubr.bf16.vlgmr.msra.gmra.mrb[60].mxu1 %v4130_v11 }
 0x229   :  { %3724 = vmatprep.mubr.msk.bf16.mxu1 %vm1833_vm0, %v4133_v43 }
 0x230   :  { %2073 = vmatmul.mubr.bf16.gmra.mrb[64].mxu1 %v4135_v49 }
 0x231   :  { %3725 = vmatprep.mubr.msk.bf16.mxu1 %vm1833_vm0, %v4136_v9 }
 0x238   :  { %2081 = vmatmul.mubr.bf16.gmra.mrb[68].mxu1 %v4138_v36 }
 0x239   :  { %3726 = vmatprep.mubr.msk.bf16.mxu1 %vm1833_vm0, %v4139_v50 }
 0x240   :  { %2089 = vmatmul.mubr.bf16.gmra.mrb[72].mxu1 %v4141_v28 }
 0x241   :  { %3727 = vmatprep.mubr.msk.bf16.mxu1 %vm1833_vm0, %v4142_v32 }
 0x248   :  { %2097 = vmatmul.mubr.bf16.gmra.mrb[76].mxu1 %v4144_v30 }
 0x249   :  { %3728 = vmatprep.mubr.msk.bf16.mxu1 %vm1833_vm0, %v4145_v59 }
 0x250   :  { %2105 = vmatmul.mubr.bf16.gmra.mrb[80].mxu1 %v4147_v39 }
 0x251   :  { %3729 = vmatprep.mubr.msk.bf16.mxu1 %vm1833_vm0, %v4148_v34 }
 0x258   :  { %2113 = vmatmul.mubr.bf16.gmra.mrb[84].mxu1 %v4150_v12 }
 0x259   :  { %3730 = vmatprep.mubr.msk.bf16.mxu1 %vm1833_vm0, %v4151_v45 }
 0x260   :  { %2121 = vmatmul.mubr.bf16.gmra.mrb[88].mxu1 %v4153_v3 }
 0x261   :  { %3731 = vmatprep.mubr.msk.bf16.mxu1 %vm1833_vm0, %v4154_v51 }
 0x268   :  { %2129 = vmatmul.mubr.bf16.gmra.mrb[92].mxu1 %v4156_v5 }
 0x269   :  { %3732 = vmatprep.mubr.msk.bf16.mxu1 %vm1833_vm0, %v4157_v25 }
 0x270   :  { %2137 = vmatmul.mubr.bf16.gmra.mrb[96].mxu1 %v4159_v40 }
 0x271   :  { %3733 = vmatprep.mubr.msk.bf16.mxu1 %vm1833_vm0, %v4160_v16 }
 0x278   :  { %2145 = vmatmul.mubr.bf16.gmra.mrb[100].mxu1 %v4162_v6 }
 0x279   :  { %3734 = vmatprep.mubr.msk.bf16.mxu1 %vm1833_vm0, %v4163_v60 }
 0x280   :  { %2153 = vmatmul.mubr.bf16.gmra.mrb[104].mxu1 %v4165_v47 }
 0x281   :  { %3735 = vmatprep.mubr.msk.bf16.mxu1 %vm1833_vm0, %v4166_v56 }
 0x283   :  { %v3851_v1 = vpop.f32.mrb[0].mxu1 }
 0x284   :  { %v3852_v2 = vpop.f32.mrb[1].mxu1 }
 0x285   :  { %v5475_v26 = vadd.f32 %v3852_v2, %v3851_v1  ;;  %v3854_v58 = vpop.f32.mrb[2].mxu1 }
 0x286   :  { %v3855_v42 = vpop.f32.mrb[3].mxu1 }
 0x287   :  { %v5480_v37 = vadd.f32 %v3855_v42, %v3854_v58 }
 0x288   :  { %2161 = vmatmul.mubr.bf16.gmra.mrb[108].mxu1 %v4168_v10 }
 0x289   :  { %3736 = vmatprep.mubr.msk.bf16.mxu1 %vm1833_vm0, %v4169_v48 }
 0x28b   :  { %v3857_v15 = vpop.f32.mrb[4].mxu1 }
 0x28c   :  { %v3858_v18 = vpop.f32.mrb[5].mxu1 }
 0x28d   :  { %v5486_v0 = vadd.f32 %v3858_v18, %v3857_v15  ;;  %v3860_v54 = vpop.f32.mrb[6].mxu1 }
 0x28e   :  { %v3861_v52 = vpop.f32.mrb[7].mxu1 }
 0x28f   :  { %v5491_v4 = vadd.f32 %v3861_v52, %v3860_v54 }
 0x290   :  { %2169 = vmatmul.mubr.bf16.gmra.mrb[112].mxu1 %v4171_v31 }
 0x291   :  { %3737 = vmatprep.mubr.msk.bf16.mxu1 %vm1833_vm0, %v4172_v24 }
 0x293   :  { %v3863_v38 = vpop.f32.mrb[8].mxu1 }
 0x294   :  { %v3864_v13 = vpop.f32.mrb[9].mxu1 }
 0x295   :  { %v5497_v44 = vadd.f32 %v3864_v13, %v3863_v38  ;;  %v3866_v62 = vpop.f32.mrb[10].mxu1 }
 0x296   :  { %v3867_v53 = vpop.f32.mrb[11].mxu1 }
 0x297   :  { %v5499_v35 = vadd.f32 %v3867_v53, %v3866_v62 }
 0x298   :  { %2177 = vmatmul.mubr.bf16.gmra.mrb[116].mxu1 %v4174_v29 }
 0x29b   :  { %v3869_v41 = vpop.f32.mrb[12].mxu1 }
 0x29c   :  { %v3870_v57 = vpop.f32.mrb[13].mxu1 }
 0x29d   :  { %v5501_v14 = vadd.f32 %v3870_v57, %v3869_v41  ;;  %v3872_v21 = vpop.f32.mrb[14].mxu1 }
 0x29e   :  { %v3873_v17 = vpop.f32.mrb[15].mxu1 }
 0x29f   :  { %v5503_v22 = vadd.f32 %v3873_v17, %v3872_v21 }
 0x2a3   :  { %v3875_v55 = vpop.f32.mrb[16].mxu1 }
 0x2a4   :  { %v3876_v23 = vpop.f32.mrb[17].mxu1 }
 0x2a5   :  { %v5505_v19 = vadd.f32 %v3876_v23, %v3875_v55  ;;  %v3878_v20 = vpop.f32.mrb[18].mxu1 }
 0x2a6   :  { %v3879_v63 = vpop.f32.mrb[19].mxu1 }
 0x2a7   :  { %v5507_v8 = vadd.f32 %v3879_v63, %v3878_v20 }
 0x2ab   :  { %v3881_v33 = vpop.f32.mrb[20].mxu1 }
 0x2ac   :  { %v3882_v61 = vpop.f32.mrb[21].mxu1 }
 0x2ad   :  { %v5509_v46 = vadd.f32 %v3882_v61, %v3881_v33  ;;  %v3884_v27 = vpop.f32.mrb[22].mxu1 }
 0x2ae   :  { %v3885_v11 = vpop.f32.mrb[23].mxu1 }
 0x2af   :  { %v5511_v43 = vadd.f32 %v3885_v11, %v3884_v27 }
 0x2b3   :  { %v3887_v49 = vpop.f32.mrb[24].mxu1 }
 0x2b4   :  { %v3888_v9 = vpop.f32.mrb[25].mxu1 }
 0x2b5   :  { %v5513_v36 = vadd.f32 %v3888_v9, %v3887_v49  ;;  %v3890_v50 = vpop.f32.mrb[26].mxu1  ;;  %v4177_v9 = vld [vmem:[%s5869_s5 + $0x4] ss:$8 sps:$4 sm:$0xff]  }
 0x2b6   :  { %v3891_v28 = vpop.f32.mrb[27].mxu1  ;;  %3766 = vmatprep.mubr.msk.bf16.mxu1 %vm2542_vm1, %v4177_v9 }
 0x2b7   :  { %v5515_v32 = vadd.f32 %v3891_v28, %v3890_v50 }
 0x2bb   :  { %v3893_v30 = vpop.f32.mrb[28].mxu1 }
 0x2bc   :  { %v3894_v59 = vpop.f32.mrb[29].mxu1 }
 0x2bd   :  { %v5517_v39 = vadd.f32 %v3894_v59, %v3893_v30  ;;  %v3896_v34 = vpop.f32.mrb[30].mxu1  ;;  %v1401_v30 = vpop.permute.xlu0 %1400 }
 0x2be   :  { %v3897_v12 = vpop.f32.mrb[31].mxu1  ;;  %v1914_v59 = vadd.f32 %v5475_v26, %v1401_v30 }
 0x2bf   :  { %v5519_v45 = vadd.f32 %v3897_v12, %v3896_v34  ;;  %v1406_v34 = vpop.permute.xlu1 %1405 }
 0x2c3   :  { %v3899_v3 = vpop.f32.mrb[32].mxu1 }
 0x2c4   :  { %v3900_v51 = vpop.f32.mrb[33].mxu1 }
 0x2c5   :  { %v5521_v5 = vadd.f32 %v3900_v51, %v3899_v3  ;;  %v3902_v25 = vpop.f32.mrb[34].mxu1 }
 0x2c6   :  { %v3903_v40 = vpop.f32.mrb[35].mxu1 }
 0x2c7   :  { %v5523_v16 = vadd.f32 %v3903_v40, %v3902_v25  ;;  %v1917_v25 = vadd.f32 %v5480_v37, %v1406_v34 }
 0x2cb   :  { %v3905_v6 = vpop.f32.mrb[36].mxu1 }
 0x2cc   :  { %v3906_v60 = vpop.f32.mrb[37].mxu1 }
 0x2cd   :  { %v5525_v47 = vadd.f32 %v3906_v60, %v3905_v6  ;;  %v3908_v56 = vpop.f32.mrb[38].mxu1 }
 0x2ce   :  { %v3909_v1 = vpop.f32.mrb[39].mxu1 }
 0x2cf   :  { %v5527_v2 = vadd.f32 %v3909_v1, %v3908_v56 }
 0x2d3   :  { %v3911_v10 = vpop.f32.mrb[40].mxu1 }
 0x2d4   :  { %v3912_v58 = vpop.f32.mrb[41].mxu1 }
 0x2d5   :  { %v5529_v48 = vadd.f32 %v3912_v58, %v3911_v10  ;;  %v3914_v42 = vpop.f32.mrb[42].mxu1  ;;  %v1411_v10 = vpop.permute.xlu0 %1410 }
 0x2d6   :  { %v3915_v15 = vpop.f32.mrb[43].mxu1 }
 0x2d7   :  { %v5531_v18 = vadd.f32 %v3915_v15, %v3914_v42  ;;  %v1922_v42 = vadd.f32 %v5486_v0, %v1411_v10  ;;  %v1416_v15 = vpop.permute.xlu1 %1415 }
 0x2d8   :  { %v1925_v26 = vadd.f32 %v5491_v4, %v1416_v15 }
 0x2db   :  { %v3917_v31 = vpop.f32.mrb[44].mxu1 }
 0x2dc   :  { %v3918_v54 = vpop.f32.mrb[45].mxu1 }
 0x2dd   :  { %v5533_v24 = vadd.f32 %v3918_v54, %v3917_v31  ;;  %v3920_v52 = vpop.f32.mrb[46].mxu1 }
 0x2de   :  { %v3921_v38 = vpop.f32.mrb[47].mxu1 }
 0x2df   :  { %v5535_v13 = vadd.f32 %v3921_v38, %v3920_v52 }
 0x2e3   :  { %v3923_v29 = vpop.f32.mrb[48].mxu1 }
 0x2e4   :  { %v3924_v62 = vpop.f32.mrb[49].mxu1 }
 0x2e5   :  { %v5537_v53 = vadd.f32 %v3924_v62, %v3923_v29  ;;  %v3926_v41 = vpop.f32.mrb[50].mxu1 }
 0x2e6   :  { %v3927_v57 = vpop.f32.mrb[51].mxu1 }
 0x2e7   :  { %v5539_v21 = vadd.f32 %v3927_v57, %v3926_v41  ;;  %v1421_v57 = vpop.permute.xlu0 %1420 }
 0x2eb   :  { %v3929_v17 = vpop.f32.mrb[52].mxu1 }
 0x2ec   :  { %v3930_v55 = vpop.f32.mrb[53].mxu1 }
 0x2ed   :  { %v5541_v23 = vadd.f32 %v3930_v55, %v3929_v17  ;;  %v3932_v20 = vpop.f32.mrb[54].mxu1  ;;  %v1930_v55 = vadd.f32 %v5497_v44, %v1421_v57 }
 0x2ee   :  { %v3933_v63 = vpop.f32.mrb[55].mxu1 }
 0x2ef   :  { %v5543_v33 = vadd.f32 %v3933_v63, %v3932_v20  ;;  %v1426_v20 = vpop.permute.xlu1 %1425 }
 0x2f3   :  { %v3935_v61 = vpop.f32.mrb[56].mxu1 }
 0x2f4   :  { %v3936_v27 = vpop.f32.mrb[57].mxu1 }
 0x2f5   :  { %v5545_v11 = vadd.f32 %v3936_v27, %v3935_v61  ;;  %v3938_v49 = vpop.f32.mrb[58].mxu1  ;;  %v1933_v27 = vadd.f32 %v5499_v35, %v1426_v20 }
 0x2f6   :  { %v3939_v50 = vpop.f32.mrb[59].mxu1 }
 0x2f7   :  { %v5550_v28 = vadd.f32 %v3939_v50, %v3938_v49 }
 0x2fb   :  { %v2066_v12 = vpop.f32.mrb[60].mxu1 }
 0x2fc   :  { %v2067_v3 = vadd.f32 %v2066_v12, %v1914_v59  ;;  %v2068_v51 = vpop.f32.mrb[61].mxu1  ;;  %v1431_v59 = vpop.permute.xlu0 %1430 }
 0x2fd   :  { %v2069_v40 = vpop.f32.mrb[62].mxu1  ;;  %v1938_v12 = vadd.f32 %v5501_v14, %v1431_v59 }
 0x2fe   :  { %v2070_v6 = vadd.f32 %v2069_v40, %v1917_v25  ;;  %v2071_v60 = vpop.f32.mrb[63].mxu1  ;;  %v2185_v56 = vmax.f32 %v2067_v3, 0.0  ;;  %v1436_v3 = vpop.permute.xlu1 %1435 }
 0x2ff   :  { %v1941_v40 = vadd.f32 %v5503_v22, %v1436_v3 }
 0x300   :  { %v2186_v1 = vmax.f32 %v2070_v6, 0.0  ;;  %v1441_v10 = vpop.permute.xlu0 %1440 }
 0x302   :  { %v2215_v58 = vpack.c.bf16 %v2186_v1, %v2185_v56  ;;  %v1446_v15 = vpop.permute.xlu1 %1445 }
 0x303   :  { %v2074_v31 = vpop.f32.mrb[64].mxu1 }
 0x304   :  { %v2075_v54 = vadd.f32 %v2074_v31, %v1922_v42  ;;  %v2076_v52 = vpop.f32.mrb[65].mxu1  ;;  %2590 = vmatpush1.bf16.msra.mxu1 %v2215_v58  ;;  %v1946_v42 = vadd.f32 %v5505_v19, %v1441_v10 }
 0x305   :  { %v2077_v38 = vpop.f32.mrb[66].mxu1  ;;  %2591 = vmatprep.subr.bf16.mxu1 %v5887_v7  ;;  %v1949_v52 = vadd.f32 %v5507_v8, %v1446_v15 }
 0x306   :  { %v2078_v37 = vadd.f32 %v2077_v38, %v1925_v26  ;;  %v2079_v29 = vpop.f32.mrb[67].mxu1  ;;  %v2187_v62 = vmax.f32 %v2075_v54, 0.0 }
 0x308   :  { %v2188_v41 = vmax.f32 %v2078_v37, 0.0 }
 0x30a   :  { %v2216_v17 = vpack.c.bf16 %v2188_v41, %v2187_v62  ;;  %v1451_v62 = vpop.permute.xlu0 %1450 }
 0x30b   :  { %v2082_v0 = vpop.f32.mrb[68].mxu1  ;;  %v1954_v57 = vadd.f32 %v5509_v46, %v1451_v62 }
 0x30c   :  { %v2083_v63 = vadd.f32 %v2082_v0, %v1930_v55  ;;  %v2084_v61 = vpop.f32.mrb[69].mxu1  ;;  %2592 = vmatpush1.bf16.msra.mxu1 %v2216_v17  ;;  %v1456_v17 = vpop.permute.xlu1 %1455 }
 0x30d   :  { %v2085_v49 = vpop.f32.mrb[70].mxu1  ;;  %2593 = vmatprep.subr.bf16.mxu1 %v5887_v7  ;;  %v1957_v0 = vadd.f32 %v5511_v43, %v1456_v17 }
 0x30e   :  { %v2086_v4 = vadd.f32 %v2085_v49, %v1933_v27  ;;  %v2087_v9 = vpop.f32.mrb[71].mxu1  ;;  %v2189_v50 = vmax.f32 %v2083_v63, 0.0 }
 0x310   :  { %v2190_v30 = vmax.f32 %v2086_v4, 0.0  ;;  %v1461_v4 = vpop.permute.xlu0 %1460 }
 0x312   :  { %v2217_v34 = vpack.c.bf16 %v2190_v30, %v2189_v50  ;;  %v1962_v50 = vadd.f32 %v5513_v36, %v1461_v4  ;;  %v1466_v30 = vpop.permute.xlu1 %1465 }
 0x313   :  { %v2090_v44 = vpop.f32.mrb[72].mxu1 }
 0x314   :  { %v2091_v51 = vadd.f32 %v2090_v44, %v1938_v12  ;;  %v2092_v25 = vpop.f32.mrb[73].mxu1  ;;  %2594 = vmatpush1.bf16.msra.mxu1 %v2217_v34  ;;  %v1965_v12 = vadd.f32 %v5515_v32, %v1466_v30 }
 0x315   :  { %v2093_v6 = vpop.f32.mrb[74].mxu1  ;;  %2595 = vmatprep.subr.bf16.mxu1 %v5887_v7 }
 0x316   :  { %v2094_v35 = vadd.f32 %v2093_v6, %v1941_v40  ;;  %v2095_v60 = vpop.f32.mrb[75].mxu1  ;;  %v2191_v56 = vmax.f32 %v2091_v51, 0.0  ;;  %v1471_v40 = vpop.permute.xlu0 %1470 }
 0x317   :  { %v1476_v60 = vpop.permute.xlu1 %1475 }
 0x318   :  { %v2192_v1 = vmax.f32 %v2094_v35, 0.0  ;;  %v1970_v35 = vadd.f32 %v5517_v39, %v1471_v40  ;;  %v1973_v10 = vadd.f32 %v5519_v45, %v1476_v60 }
 0x31a   :  { %v2218_v58 = vpack.c.bf16 %v2192_v1, %v2191_v56 }
 0x31b   :  { %v2098_v14 = vpop.f32.mrb[76].mxu1 }
 0x31c   :  { %v2099_v31 = vadd.f32 %v2098_v14, %v1946_v42  ;;  %v2100_v54 = vpop.f32.mrb[77].mxu1  ;;  %2596 = vmatpush1.bf16.msra.mxu1 %v2218_v58 }
 0x31d   :  { %v2101_v26 = vpop.f32.mrb[78].mxu1  ;;  %2597 = vmatprep.subr.bf16.mxu1 %v5887_v7 }
 0x31e   :  { %v2102_v22 = vadd.f32 %v2101_v26, %v1949_v52  ;;  %v2103_v38 = vpop.f32.mrb[79].mxu1  ;;  %v2193_v37 = vmax.f32 %v2099_v31, 0.0  ;;  %v1481_v31 = vpop.permute.xlu0 %1480 }
 0x31f   :  { %v1978_v52 = vadd.f32 %v5521_v5, %v1481_v31  ;;  %v1486_v26 = vpop.permute.xlu1 %1485 }
 0x320   :  { %v2194_v29 = vmax.f32 %v2102_v22, 0.0 }
 0x322   :  { %v2219_v41 = vpack.c.bf16 %v2194_v29, %v2193_v37  ;;  %v1981_v37 = vadd.f32 %v5523_v16, %v1486_v26  ;;  %v1491_v17 = vpop.permute.xlu0 %1490 }
 0x323   :  { %v2106_v19 = vpop.f32.mrb[80].mxu1 }
 0x324   :  { %v2107_v55 = vadd.f32 %v2106_v19, %v1954_v57  ;;  %v2108_v20 = vpop.f32.mrb[81].mxu1  ;;  %2598 = vmatpush1.bf16.msra.mxu1 %v2219_v41 }
 0x325   :  { %v2109_v63 = vpop.f32.mrb[82].mxu1  ;;  %2599 = vmatprep.subr.bf16.mxu1 %v5887_v7  ;;  %v1496_v20 = vpop.permute.xlu1 %1495 }
 0x326   :  { %v2110_v8 = vadd.f32 %v2109_v63, %v1957_v0  ;;  %v2111_v61 = vpop.f32.mrb[83].mxu1  ;;  %v2195_v27 = vmax.f32 %v2107_v55, 0.0  ;;  %v1986_v55 = vadd.f32 %v5525_v47, %v1491_v17 }
 0x328   :  { %v2196_v49 = vmax.f32 %v2110_v8, 0.0  ;;  %v1989_v8 = vadd.f32 %v5527_v2, %v1496_v20 }
 0x32a   :  { %v2220_v9 = vpack.c.bf16 %v2196_v49, %v2195_v27 }
 0x32b   :  { %v2114_v46 = vpop.f32.mrb[84].mxu1 }
 0x32c   :  { %v2115_v59 = vadd.f32 %v2114_v46, %v1962_v50  ;;  %v2116_v34 = vpop.f32.mrb[85].mxu1  ;;  %2600 = vmatpush1.bf16.msra.mxu1 %v2220_v9  ;;  %v1501_v9 = vpop.permute.xlu0 %1500 }
 0x32d   :  { %v2117_v3 = vpop.f32.mrb[86].mxu1  ;;  %2601 = vmatprep.subr.bf16.mxu1 %v5887_v7  ;;  %v1994_v30 = vadd.f32 %v5529_v48, %v1501_v9  ;;  %v1506_v46 = vpop.permute.xlu1 %1505 }
 0x32e   :  { %v2118_v43 = vadd.f32 %v2117_v3, %v1965_v12  ;;  %v2119_v44 = vpop.f32.mrb[87].mxu1  ;;  %v2197_v51 = vmax.f32 %v2115_v59, 0.0  ;;  %v1997_v12 = vadd.f32 %v5531_v18, %v1506_v46 }
 0x330   :  { %v2198_v25 = vmax.f32 %v2118_v43, 0.0 }
 0x332   :  { %v2221_v6 = vpack.c.bf16 %v2198_v25, %v2197_v51  ;;  %v1511_v25 = vpop.permute.xlu0 %1510 }
 0x333   :  { %v2122_v36 = vpop.f32.mrb[88].mxu1 }
 0x334   :  { %v2123_v56 = vadd.f32 %v2122_v36, %v1970_v35  ;;  %v2124_v1 = vpop.f32.mrb[89].mxu1  ;;  %2602 = vmatpush1.bf16.msra.mxu1 %v2221_v6  ;;  %v2002_v6 = vadd.f32 %v5533_v24, %v1511_v25  ;;  %v1516_v35 = vpop.permute.xlu1 %1515  ;;  %v4190_v25 = vld [vmem:[%s5869_s5 + $0x54] ss:$8 sps:$4 sm:$0xff]  }
 0x335   :  { %v2125_v58 = vpop.f32.mrb[90].mxu1  ;;  %2603 = vmatprep.subr.bf16.mxu1 %v5887_v7 }
 0x336   :  { %v2126_v32 = vadd.f32 %v2125_v58, %v1973_v10  ;;  %v2127_v42 = vpop.f32.mrb[91].mxu1  ;;  %v2199_v15 = vmax.f32 %v2123_v56, 0.0  ;;  %v2005_v56 = vadd.f32 %v5535_v13, %v1516_v35  ;;  %v4195_v35 = vld [vmem:[%s5869_s5 + $0x60] ss:$8 sps:$4 sm:$0xff]  }
 0x337   :  { %v1521_v42 = vpop.permute.xlu0 %1520 }
 0x338   :  { %v2200_v14 = vmax.f32 %v2126_v32, 0.0  ;;  %v1526_v31 = vpop.permute.xlu1 %1525 }
 0x339   :  { %v2013_v26 = vadd.f32 %v5539_v21, %v1526_v31  ;;  %v4213_v31 = vld [vmem:[%s5869_s5 + $0xc0] ss:$8 sps:$4 sm:$0xff]  }
 0x33a   :  { %v2222_v54 = vpack.c.bf16 %v2200_v14, %v2199_v15  ;;  %v2010_v14 = vadd.f32 %v5537_v53, %v1521_v42  ;;  %v4210_v42 = vld [vmem:[%s5869_s5 + $0xb0] ss:$8 sps:$4 sm:$0xff]  }
 0x33b   :  { %v2130_v39 = vpop.f32.mrb[92].mxu1 }
 0x33c   :  { %v2131_v22 = vadd.f32 %v2130_v39, %v1978_v52  ;;  %v2132_v38 = vpop.f32.mrb[93].mxu1  ;;  %2604 = vmatpush1.bf16.msra.mxu1 %v2222_v54 }
 0x33d   :  { %v2133_v29 = vpop.f32.mrb[94].mxu1  ;;  %2605 = vmatprep.subr.bf16.mxu1 %v5887_v7 }
 0x33e   :  { %v2134_v45 = vadd.f32 %v2133_v29, %v1981_v37  ;;  %v2135_v62 = vpop.f32.mrb[95].mxu1  ;;  %v2201_v41 = vmax.f32 %v2131_v22, 0.0  ;;  %v1531_v29 = vpop.permute.xlu0 %1530 }
 0x33f   :  { %v2018_v62 = vadd.f32 %v5541_v23, %v1531_v29 }
 0x340   :  { %v2202_v57 = vmax.f32 %v2134_v45, 0.0 }
 0x342   :  { %v2223_v19 = vpack.c.bf16 %v2202_v57, %v2201_v41  ;;  %v1536_v41 = vpop.permute.xlu1 %1535 }
 0x343   :  { %v2138_v5 = vpop.f32.mrb[96].mxu1 }
 0x344   :  { %v2139_v0 = vadd.f32 %v2138_v5, %v1986_v55  ;;  %v2140_v63 = vpop.f32.mrb[97].mxu1  ;;  %2606 = vmatpush1.bf16.msra.mxu1 %v2223_v19  ;;  %v2021_v19 = vadd.f32 %v5543_v33, %v1536_v41 }
 0x345   :  { %v2141_v61 = vpop.f32.mrb[98].mxu1  ;;  %2607 = vmatprep.subr.bf16.mxu1 %v5887_v7  ;;  %v1541_v63 = vpop.permute.xlu0 %1540 }
 0x346   :  { %v2142_v16 = vadd.f32 %v2141_v61, %v1989_v8  ;;  %v2143_v27 = vpop.f32.mrb[99].mxu1  ;;  %v2203_v49 = vmax.f32 %v2139_v0, 0.0  ;;  %v2026_v61 = vadd.f32 %v5545_v11, %v1541_v63  ;;  %v4175_v11 = vld [vmem:[%s5869_s5] ss:$8 sps:$4 sm:$0xff]  }
 0x348   :  { %v2204_v4 = vmax.f32 %v2142_v16, 0.0  ;;  %v1546_v16 = vpop.permute.xlu1 %1545 }
 0x34a   :  { %v2224_v50 = vpack.c.bf16 %v2204_v4, %v2203_v49  ;;  %v2029_v4 = vadd.f32 %v5550_v28, %v1546_v16  ;;  %v4178_v28 = vld [vmem:[%s5869_s5 + $0x14] ss:$8 sps:$4 sm:$0xff]  }
 0x34b   :  { %v2146_v47 = vpop.f32.mrb[100].mxu1 }
 0x34c   :  { %v2147_v59 = vadd.f32 %v2146_v47, %v1994_v30  ;;  %v2148_v34 = vpop.f32.mrb[101].mxu1  ;;  %2608 = vmatpush1.bf16.msra.mxu1 %v2224_v50 }
 0x34d   :  { %v2149_v3 = vpop.f32.mrb[102].mxu1  ;;  %2609 = vmatprep.subr.bf16.mxu1 %v5887_v7  ;;  %v4180_v34 = vld [vmem:[%s5869_s5 + $0x10] ss:$8 sps:$4 sm:$0xff]  }
 0x34e   :  { %v2150_v2 = vadd.f32 %v2149_v3, %v1997_v12  ;;  %v2151_v43 = vpop.f32.mrb[103].mxu1  ;;  %v2205_v44 = vmax.f32 %v2147_v59, 0.0  ;;  %v4181_v12 = vld [vmem:[%s5869_s5 + $0x24] ss:$8 sps:$4 sm:$0xff]   ;;  %v4183_v3 = vld [vmem:[%s5869_s5 + $0x20] ss:$8 sps:$4 sm:$0xff]  }
 0x34f   :  { %v4186_v43 = vld [vmem:[%s5869_s5 + $0x30] ss:$8 sps:$4 sm:$0xff]  }
 0x350   :  { %v2206_v51 = vmax.f32 %v2150_v2, 0.0  ;;  %v4184_v2 = vld [vmem:[%s5869_s5 + $0x34] ss:$8 sps:$4 sm:$0xff]  }
 0x352   :  { %v2225_v40 = vpack.c.bf16 %v2206_v51, %v2205_v44  ;;  %v4187_v44 = vld [vmem:[%s5869_s5 + $0x44] ss:$8 sps:$4 sm:$0xff]   ;;  %v4189_v51 = vld [vmem:[%s5869_s5 + $0x40] ss:$8 sps:$4 sm:$0xff]  }
 0x353   :  { %v2154_v48 = vpop.f32.mrb[104].mxu1 }
 0x354   :  { %v2155_v60 = vadd.f32 %v2154_v48, %v2002_v6  ;;  %v2156_v36 = vpop.f32.mrb[105].mxu1  ;;  %2610 = vmatpush1.bf16.msra.mxu1 %v2225_v40  ;;  %v4192_v40 = vld [vmem:[%s5869_s5 + $0x50] ss:$8 sps:$4 sm:$0xff]   ;;  %v4193_v6 = vld [vmem:[%s5869_s5 + $0x64] ss:$8 sps:$4 sm:$0xff]  }
 0x355   :  { %v2157_v1 = vpop.f32.mrb[106].mxu1  ;;  %2611 = vmatprep.subr.bf16.mxu1 %v5887_v7  ;;  %v4196_v48 = vld [vmem:[%s5869_s5 + $0x74] ss:$8 sps:$4 sm:$0xff]   ;;  %v4199_v36 = vld [vmem:[%s5869_s5 + $0x84] ss:$8 sps:$4 sm:$0xff]  }
 0x356   :  { %v2158_v18 = vadd.f32 %v2157_v1, %v2005_v56  ;;  %v2159_v10 = vpop.f32.mrb[107].mxu1  ;;  %v2207_v58 = vmax.f32 %v2155_v60, 0.0  ;;  %v4198_v60 = vld [vmem:[%s5869_s5 + $0x70] ss:$8 sps:$4 sm:$0xff]   ;;  %v4201_v56 = vld [vmem:[%s5869_s5 + $0x80] ss:$8 sps:$4 sm:$0xff]  }
 0x357   :  { %v4202_v1 = vld [vmem:[%s5869_s5 + $0x94] ss:$8 sps:$4 sm:$0xff]   ;;  %v4205_v10 = vld [vmem:[%s5869_s5 + $0xa4] ss:$8 sps:$4 sm:$0xff]  }
 0x358   :  { %v2208_v32 = vmax.f32 %v2158_v18, 0.0  ;;  %v4204_v18 = vld [vmem:[%s5869_s5 + $0x90] ss:$8 sps:$4 sm:$0xff]  }
 0x35a   :  { %v2226_v15 = vpack.c.bf16 %v2208_v32, %v2207_v58  ;;  %v4207_v58 = vld [vmem:[%s5869_s5 + $0xa0] ss:$8 sps:$4 sm:$0xff]   ;;  %v4208_v32 = vld [vmem:[%s5869_s5 + $0xb4] ss:$8 sps:$4 sm:$0xff]  }
 0x35b   :  { %v2162_v24 = vpop.f32.mrb[108].mxu1 }
 0x35c   :  { %v2163_v54 = vadd.f32 %v2162_v24, %v2010_v14  ;;  %v2164_v52 = vpop.f32.mrb[109].mxu1  ;;  %2612 = vmatpush1.bf16.msra.mxu1 %v2226_v15  ;;  %v4211_v15 = vld [vmem:[%s5869_s5 + $0xc4] ss:$8 sps:$4 sm:$0xff]   ;;  %v2256_v14 = vld [vmem:[%s5869_s5 + $0xd0] sm:$0x33] }
 0x35d   :  { %v2165_v39 = vpop.f32.mrb[110].mxu1  ;;  %2613 = vmatprep.subr.bf16.mxu1 %v5887_v7  ;;  %v3765_v24 = vcombine.high %v2256_v14, %v2256_v14  ;;  %v4218_v52 = vld [vmem:[%s5871_s7 + $0x4] ss:$8 sps:$4 sm:$0xff]  }
 0x35e   :  { %v2166_v13 = vadd.f32 %v2165_v39, %v2013_v26  ;;  %v2167_v22 = vpop.f32.mrb[111].mxu1  ;;  %v2209_v38 = vmax.f32 %v2163_v54, 0.0  ;;  %v3764_v54 = vcombine.low %v2256_v14, %v2256_v14  ;;  %3802 = vmatprep.mubr.msk.bf16.mxu0 %vm3027_vm3, %v4218_v52  ;;  %v2287_v26 = vpop.permute.xlu0 %2286 }
 0x360   :  { %v2210_v37 = vmax.f32 %v2166_v13, 0.0 }
 0x362   :  { %v2227_v45 = vpack.c.bf16 %v2210_v37, %v2209_v38  ;;  %v2292_v38 = vpop.permute.xlu1 %2291 }
 0x363   :  { %v2170_v53 = vpop.f32.mrb[112].mxu1 }
 0x364   :  { %v2171_v57 = vadd.f32 %v2170_v53, %v2018_v62  ;;  %v2172_v17 = vpop.f32.mrb[113].mxu1  ;;  %2614 = vmatpush1.bf16.msra.mxu1 %v2227_v45 }
 0x365   :  { %v2173_v55 = vpop.f32.mrb[114].mxu1  ;;  %2615 = vmatprep.subr.bf16.mxu1 %v5887_v7 }
 0x366   :  { %v2174_v21 = vadd.f32 %v2173_v55, %v2021_v19  ;;  %v2175_v20 = vpop.f32.mrb[115].mxu1  ;;  %v2211_v5 = vmax.f32 %v2171_v57, 0.0  ;;  %v2297_v57 = vpop.permute.xlu0 %2296 }
 0x368   :  { %v2212_v0 = vmax.f32 %v2174_v21, 0.0  ;;  %v2302_v21 = vpop.permute.xlu1 %2301 }
 0x36a   :  { %v2228_v8 = vpack.c.bf16 %v2212_v0, %v2211_v5  ;;  %v2307_v16 = vpop.permute.xlu0 %2306 }
 0x36b   :  { %v2178_v23 = vpop.f32.mrb[116].mxu1 }
 0x36c   :  { %v2179_v27 = vadd.f32 %v2178_v23, %v2026_v61  ;;  %v2180_v49 = vpop.f32.mrb[117].mxu1  ;;  %2616 = vmatpush1.bf16.msra.mxu1 %v2228_v8 }
 0x36d   :  { %v2181_v9 = vpop.f32.mrb[118].mxu1  ;;  %2617 = vmatprep.subr.bf16.mxu1 %v5887_v7 }
 0x36e   :  { %v2182_v33 = vadd.f32 %v2181_v9, %v2029_v4  ;;  %v2183_v50 = vpop.f32.mrb[119].mxu1  ;;  %v2213_v30 = vmax.f32 %v2179_v27, 0.0  ;;  %v2312_v4 = vpop.permute.xlu1 %2311 }
 0x370   :  { %v2214_v46 = vmax.f32 %v2182_v33, 0.0 }
 0x372   :  { %v2229_v47 = vpack.c.bf16 %v2214_v46, %v2213_v30 }
 0x374   :  { %v2587_v59 = vsel %vm2585_vm2, %v2229_v47, 0 }
 0x375   :  { %2618 = vmatpush1.bf16.msra.mxu1 %v2587_v59  ;;  %v2317_v59 = vpop.permute.xlu0 %2316 }
 0x376   :  { %3402 = vmatprep.subr.bf16.mxu1 %v5887_v7 }
 0x378   :  { %2622 = vmatmul.mubr.bf16.vlgmr.msra.gmra.mrb[120].mxu1 %v4175_v11 }
 0x379   :  { %3767 = vmatprep.mubr.msk.bf16.mxu1 %vm2542_vm1, %v4178_v28 }
 0x380   :  { %2630 = vmatmul.mubr.bf16.gmra.mrb[124].mxu1 %v4180_v34 }
 0x381   :  { %3768 = vmatprep.mubr.msk.bf16.mxu1 %vm2542_vm1, %v4181_v12  ;;  %v2322_v12 = vpop.permute.xlu1 %2321 }
 0x388   :  { %2638 = vmatmul.mubr.bf16.gmra.mrb[128].mxu1 %v4183_v3 }
 0x389   :  { %3769 = vmatprep.mubr.msk.bf16.mxu1 %vm2542_vm1, %v4184_v2 }
 0x390   :  { %2646 = vmatmul.mubr.bf16.gmra.mrb[132].mxu1 %v4186_v43 }
 0x391   :  { %3770 = vmatprep.mubr.msk.bf16.mxu1 %vm2542_vm1, %v4187_v44 }
 0x398   :  { %2654 = vmatmul.mubr.bf16.gmra.mrb[136].mxu1 %v4189_v51 }
 0x399   :  { %3771 = vmatprep.mubr.msk.bf16.mxu1 %vm2542_vm1, %v4190_v25 }
 0x3a0   :  { %2662 = vmatmul.mubr.bf16.gmra.mrb[140].mxu1 %v4192_v40  ;;  %v2327_v40 = vpop.permute.xlu0 %2326 }
 0x3a1   :  { %3772 = vmatprep.mubr.msk.bf16.mxu1 %vm2542_vm1, %v4193_v6 }
 0x3a8   :  { %2670 = vmatmul.mubr.bf16.gmra.mrb[144].mxu1 %v4195_v35 }
 0x3a9   :  { %3773 = vmatprep.mubr.msk.bf16.mxu1 %vm2542_vm1, %v4196_v48 }
 0x3b0   :  { %2678 = vmatmul.mubr.bf16.gmra.mrb[148].mxu1 %v4198_v60  ;;  %v2332_v60 = vpop.permute.xlu1 %2331 }
 0x3b1   :  { %3774 = vmatprep.mubr.msk.bf16.mxu1 %vm2542_vm1, %v4199_v36 }
 0x3b8   :  { %2686 = vmatmul.mubr.bf16.gmra.mrb[152].mxu1 %v4201_v56 }
 0x3b9   :  { %3775 = vmatprep.mubr.msk.bf16.mxu1 %vm2542_vm1, %v4202_v1 }
 0x3c0   :  { %2694 = vmatmul.mubr.bf16.gmra.mrb[156].mxu1 %v4204_v18 }
 0x3c1   :  { %3776 = vmatprep.mubr.msk.bf16.mxu1 %vm2542_vm1, %v4205_v10 }
 0x3c8   :  { %2702 = vmatmul.mubr.bf16.gmra.mrb[160].mxu1 %v4207_v58 }
 0x3c9   :  { %3777 = vmatprep.mubr.msk.bf16.mxu1 %vm2542_vm1, %v4208_v32  ;;  %v2337_v32 = vpop.permute.xlu0 %2336 }
 0x3d0   :  { %2710 = vmatmul.mubr.bf16.gmra.mrb[164].mxu1 %v4210_v42 }
 0x3d1   :  { %3778 = vmatprep.mubr.msk.bf16.mxu1 %vm2542_vm1, %v4211_v15 }
 0x3d8   :  { %2718 = vmatmul.mubr.bf16.gmra.mrb[168].mxu1 %v4213_v31  ;;  %v2342_v31 = vpop.permute.xlu1 %2341 }
 0x3d9   :  { %3779 = vmatprep.mubr.msk.bf16.mxu1 %vm2542_vm1, %v3765_v24 }
 0x3e0   :  { %2726 = vmatmul.mubr.bf16.gmra.mrb[172].mxu1 %v3764_v54 }
 0x44b   :  { %v2623_v39 = vpop.f32.mrb[120].mxu1 }
 0x44c   :  { %v2624_v13 = vadd.f32 %v2623_v39, %v2287_v26  ;;  %v2625_v22 = vpop.f32.mrb[121].mxu1 }
 0x44d   :  { %v2626_v37 = vpop.f32.mrb[122].mxu1  ;;  %v2347_v22 = vpop.permute.xlu0 %2346 }
 0x44e   :  { %v2627_v29 = vadd.f32 %v2626_v37, %v2292_v38  ;;  %v2628_v45 = vpop.f32.mrb[123].mxu1  ;;  %v2733_v62 = vmax.f32 %v2624_v13, 0.0 }
 0x44f   :  { %v2352_v45 = vpop.permute.xlu1 %2351 }
 0x450   :  { %v2734_v41 = vmax.f32 %v2627_v29, 0.0 }
 0x452   :  { %v2760_v53 = vpack.c.bf16 %v2734_v41, %v2733_v62 }
 0x453   :  { %v2631_v17 = vpop.f32.mrb[124].mxu1 }
 0x454   :  { %v2632_v19 = vadd.f32 %v2631_v17, %v2297_v57  ;;  %v2633_v55 = vpop.f32.mrb[125].mxu1  ;;  %3066 = vmatpush1.bf16.msra.mxu0 %v2760_v53 }
 0x455   :  { %v2634_v20 = vpop.f32.mrb[126].mxu1  ;;  %3067 = vmatprep.subr.bf16.mxu0 %v5887_v7  ;;  %v2357_v55 = vpop.permute.xlu0 %2356 }
 0x456   :  { %v2635_v5 = vadd.f32 %v2634_v20, %v2302_v21  ;;  %v2636_v0 = vpop.f32.mrb[127].mxu1  ;;  %v2735_v63 = vmax.f32 %v2632_v19, 0.0 }
 0x457   :  { %v2362_v0 = vpop.permute.xlu1 %2361 }
 0x458   :  { %v2736_v8 = vmax.f32 %v2635_v5, 0.0 }
 0x45a   :  { %v2761_v61 = vpack.c.bf16 %v2736_v8, %v2735_v63 }
 0x45b   :  { %v2639_v23 = vpop.f32.mrb[128].mxu1 }
 0x45c   :  { %v2640_v27 = vadd.f32 %v2639_v23, %v2307_v16  ;;  %v2641_v49 = vpop.f32.mrb[129].mxu1  ;;  %3068 = vmatpush1.bf16.msra.mxu0 %v2761_v61 }
 0x45d   :  { %v2642_v9 = vpop.f32.mrb[130].mxu1  ;;  %3069 = vmatprep.subr.bf16.mxu0 %v5887_v7  ;;  %v2367_v49 = vpop.permute.xlu0 %2366 }
 0x45e   :  { %v2643_v33 = vadd.f32 %v2642_v9, %v2312_v4  ;;  %v2644_v50 = vpop.f32.mrb[131].mxu1  ;;  %v2737_v30 = vmax.f32 %v2640_v27, 0.0 }
 0x45f   :  { %v2372_v50 = vpop.permute.xlu1 %2371 }
 0x460   :  { %v2738_v46 = vmax.f32 %v2643_v33, 0.0 }
 0x462   :  { %v2762_v47 = vpack.c.bf16 %v2738_v46, %v2737_v30 }
 0x463   :  { %v2647_v11 = vpop.f32.mrb[132].mxu1 }
 0x464   :  { %v2648_v28 = vadd.f32 %v2647_v11, %v2317_v59  ;;  %v2649_v34 = vpop.f32.mrb[133].mxu1  ;;  %3070 = vmatpush1.bf16.msra.mxu0 %v2762_v47 }
 0x465   :  { %v2650_v3 = vpop.f32.mrb[134].mxu1  ;;  %3071 = vmatprep.subr.bf16.mxu0 %v5887_v7  ;;  %v2377_v34 = vpop.permute.xlu0 %2376 }
 0x466   :  { %v2651_v2 = vadd.f32 %v2650_v3, %v2322_v12  ;;  %v2652_v43 = vpop.f32.mrb[135].mxu1  ;;  %v2739_v44 = vmax.f32 %v2648_v28, 0.0 }
 0x467   :  { %v2382_v43 = vpop.permute.xlu1 %2381 }
 0x468   :  { %v2740_v51 = vmax.f32 %v2651_v2, 0.0 }
 0x46a   :  { %v2763_v25 = vpack.c.bf16 %v2740_v51, %v2739_v44 }
 0x46b   :  { %v2655_v6 = vpop.f32.mrb[136].mxu1 }
 0x46c   :  { %v2656_v35 = vadd.f32 %v2655_v6, %v2327_v40  ;;  %v2657_v48 = vpop.f32.mrb[137].mxu1  ;;  %3072 = vmatpush1.bf16.msra.mxu0 %v2763_v25 }
 0x46d   :  { %v2658_v36 = vpop.f32.mrb[138].mxu1  ;;  %3073 = vmatprep.subr.bf16.mxu0 %v5887_v7  ;;  %v2387_v48 = vpop.permute.xlu0 %2386 }
 0x46e   :  { %v2659_v56 = vadd.f32 %v2658_v36, %v2332_v60  ;;  %v2660_v1 = vpop.f32.mrb[139].mxu1  ;;  %v2741_v18 = vmax.f32 %v2656_v35, 0.0 }
 0x46f   :  { %v2392_v1 = vpop.permute.xlu1 %2391 }
 0x470   :  { %v2742_v10 = vmax.f32 %v2659_v56, 0.0 }
 0x472   :  { %v2764_v58 = vpack.c.bf16 %v2742_v10, %v2741_v18 }
 0x473   :  { %v2663_v42 = vpop.f32.mrb[140].mxu1 }
 0x474   :  { %v2664_v15 = vadd.f32 %v2663_v42, %v2337_v32  ;;  %v2665_v14 = vpop.f32.mrb[141].mxu1  ;;  %3074 = vmatpush1.bf16.msra.mxu0 %v2764_v58 }
 0x475   :  { %v2666_v24 = vpop.f32.mrb[142].mxu1  ;;  %3075 = vmatprep.subr.bf16.mxu0 %v5887_v7  ;;  %v2397_v14 = vpop.permute.xlu0 %2396 }
 0x476   :  { %v2667_v54 = vadd.f32 %v2666_v24, %v2342_v31  ;;  %v2668_v52 = vpop.f32.mrb[143].mxu1  ;;  %v2743_v26 = vmax.f32 %v2664_v15, 0.0 }
 0x477   :  { %v2402_v52 = vpop.permute.xlu1 %2401 }
 0x478   :  { %v2744_v39 = vmax.f32 %v2667_v54, 0.0 }
 0x47a   :  { %v2765_v13 = vpack.c.bf16 %v2744_v39, %v2743_v26 }
 0x47b   :  { %v2671_v38 = vpop.f32.mrb[144].mxu1 }
 0x47c   :  { %v2672_v37 = vadd.f32 %v2671_v38, %v2347_v22  ;;  %v2673_v29 = vpop.f32.mrb[145].mxu1  ;;  %3076 = vmatpush1.bf16.msra.mxu0 %v2765_v13 }
 0x47d   :  { %v2674_v62 = vpop.f32.mrb[146].mxu1  ;;  %3077 = vmatprep.subr.bf16.mxu0 %v5887_v7  ;;  %v2407_v29 = vpop.permute.xlu0 %2406 }
 0x47e   :  { %v2675_v41 = vadd.f32 %v2674_v62, %v2352_v45  ;;  %v2676_v53 = vpop.f32.mrb[147].mxu1  ;;  %v2745_v57 = vmax.f32 %v2672_v37, 0.0 }
 0x47f   :  { %v2412_v53 = vpop.permute.xlu1 %2411 }
 0x480   :  { %v2746_v17 = vmax.f32 %v2675_v41, 0.0 }
 0x482   :  { %v2766_v19 = vpack.c.bf16 %v2746_v17, %v2745_v57 }
 0x483   :  { %v2679_v21 = vpop.f32.mrb[148].mxu1 }
 0x484   :  { %v2680_v20 = vadd.f32 %v2679_v21, %v2357_v55  ;;  %v2681_v5 = vpop.f32.mrb[149].mxu1  ;;  %3078 = vmatpush1.bf16.msra.mxu0 %v2766_v19 }
 0x485   :  { %v2682_v63 = vpop.f32.mrb[150].mxu1  ;;  %3079 = vmatprep.subr.bf16.mxu0 %v5887_v7  ;;  %v2417_v5 = vpop.permute.xlu0 %2416 }
 0x486   :  { %v2683_v8 = vadd.f32 %v2682_v63, %v2362_v0  ;;  %v2684_v61 = vpop.f32.mrb[151].mxu1  ;;  %v2747_v16 = vmax.f32 %v2680_v20, 0.0 }
 0x488   :  { %v2748_v23 = vmax.f32 %v2683_v8, 0.0 }
 0x48a   :  { %v2767_v27 = vpack.c.bf16 %v2748_v23, %v2747_v16 }
 0x48b   :  { %v2687_v4 = vpop.f32.mrb[152].mxu1 }
 0x48c   :  { %v2688_v9 = vadd.f32 %v2687_v4, %v2367_v49  ;;  %v2689_v33 = vpop.f32.mrb[153].mxu1  ;;  %3080 = vmatpush1.bf16.msra.mxu0 %v2767_v27  ;;  %v4216_v4 = vld [vmem:[%s5871_s7] ss:$8 sps:$4 sm:$0xff]  }
 0x48d   :  { %v2690_v30 = vpop.f32.mrb[154].mxu1  ;;  %3081 = vmatprep.subr.bf16.mxu0 %v5887_v7  ;;  %v4221_v33 = vld [vmem:[%s5871_s7 + $0x10] ss:$8 sps:$4 sm:$0xff]  }
 0x48e   :  { %v2691_v46 = vadd.f32 %v2690_v30, %v2372_v50  ;;  %v2692_v47 = vpop.f32.mrb[155].mxu1  ;;  %v2749_v59 = vmax.f32 %v2688_v9, 0.0  ;;  %v4219_v9 = vld [vmem:[%s5871_s7 + $0x14] ss:$8 sps:$4 sm:$0xff]   ;;  %v4222_v50 = vld [vmem:[%s5871_s7 + $0x24] ss:$8 sps:$4 sm:$0xff]  }
 0x48f   :  { %v4224_v30 = vld [vmem:[%s5871_s7 + $0x20] ss:$8 sps:$4 sm:$0xff]   ;;  %v4227_v47 = vld [vmem:[%s5871_s7 + $0x30] ss:$8 sps:$4 sm:$0xff]  }
 0x490   :  { %v2750_v11 = vmax.f32 %v2691_v46, 0.0  ;;  %v4225_v46 = vld [vmem:[%s5871_s7 + $0x34] ss:$8 sps:$4 sm:$0xff]  }
 0x492   :  { %v2768_v28 = vpack.c.bf16 %v2750_v11, %v2749_v59  ;;  %v4228_v59 = vld [vmem:[%s5871_s7 + $0x44] ss:$8 sps:$4 sm:$0xff]   ;;  %v4230_v11 = vld [vmem:[%s5871_s7 + $0x40] ss:$8 sps:$4 sm:$0xff]  }
 0x493   :  { %v2695_v12 = vpop.f32.mrb[156].mxu1 }
 0x494   :  { %v2696_v3 = vadd.f32 %v2695_v12, %v2377_v34  ;;  %v2697_v2 = vpop.f32.mrb[157].mxu1  ;;  %3082 = vmatpush1.bf16.msra.mxu0 %v2768_v28  ;;  %v4231_v28 = vld [vmem:[%s5871_s7 + $0x54] ss:$8 sps:$4 sm:$0xff]   ;;  %v4233_v34 = vld [vmem:[%s5871_s7 + $0x50] ss:$8 sps:$4 sm:$0xff]  }
 0x495   :  { %v2698_v44 = vpop.f32.mrb[158].mxu1  ;;  %3083 = vmatprep.subr.bf16.mxu0 %v5887_v7  ;;  %v4234_v12 = vld [vmem:[%s5871_s7 + $0x64] ss:$8 sps:$4 sm:$0xff]   ;;  %v4237_v2 = vld [vmem:[%s5871_s7 + $0x74] ss:$8 sps:$4 sm:$0xff]  }
 0x496   :  { %v2699_v51 = vadd.f32 %v2698_v44, %v2382_v43  ;;  %v2700_v25 = vpop.f32.mrb[159].mxu1  ;;  %v2751_v40 = vmax.f32 %v2696_v3, 0.0  ;;  %v4236_v3 = vld [vmem:[%s5871_s7 + $0x60] ss:$8 sps:$4 sm:$0xff]   ;;  %v4239_v43 = vld [vmem:[%s5871_s7 + $0x70] ss:$8 sps:$4 sm:$0xff]  }
 0x497   :  { %v4240_v44 = vld [vmem:[%s5871_s7 + $0x84] ss:$8 sps:$4 sm:$0xff]   ;;  %v4243_v25 = vld [vmem:[%s5871_s7 + $0x94] ss:$8 sps:$4 sm:$0xff]  }
 0x498   :  { %v2752_v6 = vmax.f32 %v2699_v51, 0.0  ;;  %v4242_v51 = vld [vmem:[%s5871_s7 + $0x80] ss:$8 sps:$4 sm:$0xff]  }
 0x49a   :  { %v2769_v35 = vpack.c.bf16 %v2752_v6, %v2751_v40  ;;  %v4245_v40 = vld [vmem:[%s5871_s7 + $0x90] ss:$8 sps:$4 sm:$0xff]   ;;  %v4246_v6 = vld [vmem:[%s5871_s7 + $0xa4] ss:$8 sps:$4 sm:$0xff]  }
 0x49b   :  { %v2703_v60 = vpop.f32.mrb[160].mxu1 }
 0x49c   :  { %v2704_v36 = vadd.f32 %v2703_v60, %v2387_v48  ;;  %v2705_v56 = vpop.f32.mrb[161].mxu1  ;;  %3084 = vmatpush1.bf16.msra.mxu0 %v2769_v35  ;;  %v4248_v35 = vld [vmem:[%s5871_s7 + $0xa0] ss:$8 sps:$4 sm:$0xff]   ;;  %v4251_v48 = vld [vmem:[%s5873_s9 + $0x4] ss:$8 sps:$4 sm:$0xff]   ;;  %v2821_v60 = vpop.permute.xlu1 %2820  ;;  %s3576_s7 = sshll.u32 %s4324_s20, 4  ;;  %s3577_s7 = int_to_ptr.vmem [resolvable:$true] %s3576_s7 }
 0x49d   :  { %v2706_v18 = vpop.f32.mrb[162].mxu1  ;;  %3085 = vmatprep.subr.bf16.mxu0 %v5887_v7  ;;  %3827 = vmatprep.mubr.msk.bf16.mxu1 %vm3380_vm5, %v4251_v48  ;;  %s4292_s8 = scalar_lea.vmem %s3577_s7, 16  ;;  %s4296_s6 = scalar_lea.vmem %s3577_s7, 32 }
 0x49e   :  { %v2707_v10 = vadd.f32 %v2706_v18, %v2392_v1  ;;  %v2708_v58 = vpop.f32.mrb[163].mxu1  ;;  %v2753_v32 = vmax.f32 %v2704_v36, 0.0  ;;  %v2826_v18 = vpop.permute.xlu0 %2825  ;;  %p4293_p8 = scmp.ne.s32.totalorder %s3577_s7, %s4292_s8  ;;  %p4297_p9 = scmp.lt.s32.totalorder %s3577_s7, %s3577_s7 }
 0x49f   :  { %p4298_p10 = scmp.lt.s32.totalorder %s4296_s6, %s4292_s8 }
 0x4a0   :  { %v2754_v42 = vmax.f32 %v2707_v10, 0.0 }
 0x4a1   :  { %p4299_p11 = por %p4298_p10, %p4297_p9 }
 0x4a2   :  { %v2770_v15 = vpack.c.bf16 %v2754_v42, %v2753_v32 }
 0x4a3   :  { %v2711_v31 = vpop.f32.mrb[164].mxu1  ;;  %p4300_p12 = pnand %p4299_p11, %p4293_p8 }
 0x4a4   :  { %v2712_v24 = vadd.f32 %v2711_v31, %v2397_v14  ;;  %v2713_v54 = vpop.f32.mrb[165].mxu1  ;;  %3086 = vmatpush1.bf16.msra.mxu0 %v2770_v15  ;;  %v2831_v31 = vpop.permute.xlu1 %2830 }
 0x4a5   :  { %v2714_v26 = vpop.f32.mrb[166].mxu1  ;;  %3087 = vmatprep.subr.bf16.mxu0 %v5887_v7 }
 0x4a6   :  { %v2715_v39 = vadd.f32 %v2714_v26, %v2402_v52  ;;  %v2716_v13 = vpop.f32.mrb[167].mxu1  ;;  %v2755_v22 = vmax.f32 %v2712_v24, 0.0  ;;  %v2836_v26 = vpop.permute.xlu0 %2835 }
 0x4a8   :  { %v2756_v38 = vmax.f32 %v2715_v39, 0.0 }
 0x4aa   :  { %v2771_v37 = vpack.c.bf16 %v2756_v38, %v2755_v22 }
 0x4ab   :  { %v2719_v45 = vpop.f32.mrb[168].mxu1 }
 0x4ac   :  { %v2720_v62 = vadd.f32 %v2719_v45, %v2407_v29  ;;  %v2721_v41 = vpop.f32.mrb[169].mxu1  ;;  %3088 = vmatpush1.bf16.msra.mxu0 %v2771_v37  ;;  %v2841_v45 = vpop.permute.xlu1 %2840 }
 0x4ad   :  { %v2722_v57 = vpop.f32.mrb[170].mxu1  ;;  %3089 = vmatprep.subr.bf16.mxu0 %v5887_v7 }
 0x4ae   :  { %v2723_v17 = vadd.f32 %v2722_v57, %v2412_v53  ;;  %v2724_v19 = vpop.f32.mrb[171].mxu1  ;;  %v2757_v55 = vmax.f32 %v2720_v62, 0.0  ;;  %v2846_v57 = vpop.permute.xlu0 %2845 }
 0x4b0   :  { %v2758_v21 = vmax.f32 %v2723_v17, 0.0 }
 0x4b2   :  { %v2772_v20 = vpack.c.bf16 %v2758_v21, %v2757_v55 }
 0x4b3   :  { %v2727_v0 = vpop.f32.mrb[172].mxu1 }
 0x4b4   :  { %v2728_v63 = vadd.f32 %v2727_v0, %v2417_v5  ;;  %3090 = vmatpush1.bf16.msra.mxu0 %v2772_v20  ;;  %v2729_v8 = vpop.f32.mrb[173].mxu1  ;;  %v2851_v0 = vpop.permute.xlu1 %2850 }
 0x4b5   :  { %3091 = vmatprep.subr.bf16.mxu0 %v5887_v7  ;;  %v2730_v61 = vpop.f32.mrb[174].mxu1 }
 0x4b6   :  { %v2759_v16 = vmax.f32 %v2728_v63, 0.0  ;;  %v2731_v23 = vpop.f32.mrb[175].mxu1 }
 0x4b8   :  { %v2773_v27 = vpack.c.bf16 %v2759_v16, %v2759_v16  ;;  %v2856_v16 = vpop.permute.xlu0 %2855 }
 0x4ba   :  { %v3063_v49 = vsel %vm3061_vm4, %v2773_v27, 0 }
 0x4bb   :  { %3092 = vmatpush1.bf16.msra.mxu0 %v3063_v49 }
 0x4be   :  { %3098 = vmatmul.mubr.bf16.vlgmr.msra.gmra.mrb[124].mxu0 %v4216_v4 }
 0x4bf   :  { %3803 = vmatprep.mubr.msk.bf16.mxu0 %vm3027_vm3, %v4219_v9 }
 0x4c6   :  { %3106 = vmatmul.mubr.bf16.gmra.mrb[128].mxu0 %v4221_v33 }
 0x4c7   :  { %3804 = vmatprep.mubr.msk.bf16.mxu0 %vm3027_vm3, %v4222_v50  ;;  %v2861_v50 = vpop.permute.xlu1 %2860 }
 0x4ce   :  { %3114 = vmatmul.mubr.bf16.gmra.mrb[132].mxu0 %v4224_v30 }
 0x4cf   :  { %3805 = vmatprep.mubr.msk.bf16.mxu0 %vm3027_vm3, %v4225_v46 }
 0x4d6   :  { %3122 = vmatmul.mubr.bf16.gmra.mrb[136].mxu0 %v4227_v47 }
 0x4d7   :  { %3806 = vmatprep.mubr.msk.bf16.mxu0 %vm3027_vm3, %v4228_v59  ;;  %v2866_v59 = vpop.permute.xlu0 %2865 }
 0x4de   :  { %3130 = vmatmul.mubr.bf16.gmra.mrb[140].mxu0 %v4230_v11 }
 0x4df   :  { %3807 = vmatprep.mubr.msk.bf16.mxu0 %vm3027_vm3, %v4231_v28 }
 0x4e6   :  { %3138 = vmatmul.mubr.bf16.gmra.mrb[144].mxu0 %v4233_v34 }
 0x4e7   :  { %3808 = vmatprep.mubr.msk.bf16.mxu0 %vm3027_vm3, %v4234_v12 }
 0x4ee   :  { %3146 = vmatmul.mubr.bf16.gmra.mrb[148].mxu0 %v4236_v3 }
 0x4ef   :  { %3809 = vmatprep.mubr.msk.bf16.mxu0 %vm3027_vm3, %v4237_v2 }
 0x4f6   :  { %3154 = vmatmul.mubr.bf16.gmra.mrb[152].mxu0 %v4239_v43  ;;  %v2871_v43 = vpop.permute.xlu1 %2870 }
 0x4f7   :  { %3810 = vmatprep.mubr.msk.bf16.mxu0 %vm3027_vm3, %v4240_v44 }
 0x4fe   :  { %3162 = vmatmul.mubr.bf16.gmra.mrb[156].mxu0 %v4242_v51 }
 0x4ff   :  { %3811 = vmatprep.mubr.msk.bf16.mxu0 %vm3027_vm3, %v4243_v25 }
 0x506   :  { %3170 = vmatmul.mubr.bf16.gmra.mrb[160].mxu0 %v4245_v40  ;;  %v2876_v40 = vpop.permute.xlu0 %2875 }
 0x507   :  { %3812 = vmatprep.mubr.msk.bf16.mxu0 %vm3027_vm3, %v4246_v6 }
 0x50e   :  { %3178 = vmatmul.mubr.bf16.gmra.mrb[164].mxu0 %v4248_v35 }
 0x591   :  { %v3099_v36 = vpop.f32.mrb[124].mxu0 }
 0x592   :  { %v3100_v56 = vadd.f32 %v3099_v36, %v2821_v60  ;;  %v3101_v1 = vpop.f32.mrb[125].mxu0 }
 0x593   :  { %v3102_v10 = vpop.f32.mrb[126].mxu0  ;;  %v2881_v1 = vpop.permute.xlu1 %2880 }
 0x594   :  { %v3103_v58 = vadd.f32 %v3102_v10, %v2826_v18  ;;  %v3104_v32 = vpop.f32.mrb[127].mxu0  ;;  %v3186_v42 = vmax.f32 %v3100_v56, 0.0 }
 0x595   :  { %v2886_v32 = vpop.permute.xlu0 %2885 }
 0x596   :  { %v3187_v15 = vmax.f32 %v3103_v58, 0.0 }
 0x598   :  { %v3208_v14 = vpack.c.bf16 %v3187_v15, %v3186_v42 }
 0x599   :  { %v3107_v24 = vpop.f32.mrb[128].mxu0 }
 0x59a   :  { %v3108_v54 = vadd.f32 %v3107_v24, %v2831_v31  ;;  %v3109_v52 = vpop.f32.mrb[129].mxu0  ;;  %3403 = vmatpush1.bf16.msra.mxu1 %v3208_v14 }
 0x59b   :  { %v3110_v39 = vpop.f32.mrb[130].mxu0  ;;  %3404 = vmatprep.subr.bf16.mxu1 %v5887_v7  ;;  %v2891_v52 = vpop.permute.xlu1 %2890 }
 0x59c   :  { %v3111_v13 = vadd.f32 %v3110_v39, %v2836_v26  ;;  %v3112_v22 = vpop.f32.mrb[131].mxu0  ;;  %v3188_v38 = vmax.f32 %v3108_v54, 0.0 }
 0x59d   :  { %v2896_v22 = vpop.permute.xlu0 %2895 }
 0x59e   :  { %v3189_v37 = vmax.f32 %v3111_v13, 0.0 }
 0x5a0   :  { %v3209_v29 = vpack.c.bf16 %v3189_v37, %v3188_v38 }
 0x5a1   :  { %v3115_v62 = vpop.f32.mrb[132].mxu0 }
 0x5a2   :  { %v3116_v41 = vadd.f32 %v3115_v62, %v2841_v45  ;;  %v3117_v53 = vpop.f32.mrb[133].mxu0  ;;  %3405 = vmatpush1.bf16.msra.mxu1 %v3209_v29 }
 0x5a3   :  { %v3118_v17 = vpop.f32.mrb[134].mxu0  ;;  %3406 = vmatprep.subr.bf16.mxu1 %v5887_v7  ;;  %v2901_v53 = vpop.permute.xlu1 %2900 }
 0x5a4   :  { %v3119_v19 = vadd.f32 %v3118_v17, %v2846_v57  ;;  %v3120_v55 = vpop.f32.mrb[135].mxu0  ;;  %v3190_v21 = vmax.f32 %v3116_v41, 0.0 }
 0x5a5   :  { %v2906_v55 = vpop.permute.xlu0 %2905 }
 0x5a6   :  { %v3191_v20 = vmax.f32 %v3119_v19, 0.0 }
 0x5a8   :  { %v3210_v5 = vpack.c.bf16 %v3191_v20, %v3190_v21 }
 0x5a9   :  { %v3123_v63 = vpop.f32.mrb[136].mxu0 }
 0x5aa   :  { %v3124_v8 = vadd.f32 %v3123_v63, %v2851_v0  ;;  %v3125_v61 = vpop.f32.mrb[137].mxu0  ;;  %3407 = vmatpush1.bf16.msra.mxu1 %v3210_v5 }
 0x5ab   :  { %v3126_v23 = vpop.f32.mrb[138].mxu0  ;;  %3408 = vmatprep.subr.bf16.mxu1 %v5887_v7  ;;  %v2911_v61 = vpop.permute.xlu1 %2910 }
 0x5ac   :  { %v3127_v27 = vadd.f32 %v3126_v23, %v2856_v16  ;;  %v3128_v49 = vpop.f32.mrb[139].mxu0  ;;  %v3192_v4 = vmax.f32 %v3124_v8, 0.0 }
 0x5ad   :  { %v2916_v49 = vpop.permute.xlu0 %2915 }
 0x5ae   :  { %v3193_v9 = vmax.f32 %v3127_v27, 0.0 }
 0x5b0   :  { %v3211_v33 = vpack.c.bf16 %v3193_v9, %v3192_v4 }
 0x5b1   :  { %v3131_v30 = vpop.f32.mrb[140].mxu0 }
 0x5b2   :  { %v3132_v46 = vadd.f32 %v3131_v30, %v2861_v50  ;;  %v3133_v47 = vpop.f32.mrb[141].mxu0  ;;  %3409 = vmatpush1.bf16.msra.mxu1 %v3211_v33 }
 0x5b3   :  { %v3134_v11 = vpop.f32.mrb[142].mxu0  ;;  %3410 = vmatprep.subr.bf16.mxu1 %v5887_v7  ;;  %v2921_v47 = vpop.permute.xlu1 %2920 }
 0x5b4   :  { %v3135_v28 = vadd.f32 %v3134_v11, %v2866_v59  ;;  %v3136_v34 = vpop.f32.mrb[143].mxu0  ;;  %v3194_v12 = vmax.f32 %v3132_v46, 0.0 }
 0x5b5   :  { %v2926_v34 = vpop.permute.xlu0 %2925 }
 0x5b6   :  { %v3195_v3 = vmax.f32 %v3135_v28, 0.0 }
 0x5b8   :  { %v3212_v2 = vpack.c.bf16 %v3195_v3, %v3194_v12 }
 0x5b9   :  { %v3139_v44 = vpop.f32.mrb[144].mxu0 }
 0x5ba   :  { %v3140_v51 = vadd.f32 %v3139_v44, %v2871_v43  ;;  %v3141_v25 = vpop.f32.mrb[145].mxu0  ;;  %3411 = vmatpush1.bf16.msra.mxu1 %v3212_v2 }
 0x5bb   :  { %v3142_v6 = vpop.f32.mrb[146].mxu0  ;;  %3412 = vmatprep.subr.bf16.mxu1 %v5887_v7  ;;  %v4249_v25 = vld [vmem:[%s5873_s9] ss:$8 sps:$4 sm:$0xff]  }
 0x5bc   :  { %v3143_v35 = vadd.f32 %v3142_v6, %v2876_v40  ;;  %v3144_v48 = vpop.f32.mrb[147].mxu0  ;;  %v3196_v60 = vmax.f32 %v3140_v51, 0.0  ;;  %v4252_v40 = vld [vmem:[%s5873_s9 + $0x14] ss:$8 sps:$4 sm:$0xff]   ;;  %v4255_v6 = vld [vmem:[%s5873_s9 + $0x24] ss:$8 sps:$4 sm:$0xff]  }
 0x5bd   :  { %v4258_v48 = vld [vmem:[%s5873_s9 + $0x34] ss:$8 sps:$4 sm:$0xff]  }
 0x5be   :  { %v3197_v36 = vmax.f32 %v3143_v35, 0.0  ;;  %v4257_v35 = vld [vmem:[%s5873_s9 + $0x20] ss:$8 sps:$4 sm:$0xff]  }
 0x5c0   :  { %v3213_v56 = vpack.c.bf16 %v3197_v36, %v3196_v60  ;;  %v4260_v60 = vld [vmem:[%s5873_s9 + $0x30] ss:$8 sps:$4 sm:$0xff]   ;;  %v4261_v36 = vld [vmem:[%s5873_s9 + $0x44] ss:$8 sps:$4 sm:$0xff]  }
 0x5c1   :  { %v3147_v18 = vpop.f32.mrb[148].mxu0 }
 0x5c2   :  { %v3148_v10 = vadd.f32 %v3147_v18, %v2881_v1  ;;  %v3149_v58 = vpop.f32.mrb[149].mxu0  ;;  %3413 = vmatpush1.bf16.msra.mxu1 %v3213_v56  ;;  %v4263_v56 = vld [vmem:[%s5873_s9 + $0x40] ss:$8 sps:$4 sm:$0xff]   ;;  %v4264_v1 = vld [vmem:[%s5873_s9 + $0x54] ss:$8 sps:$4 sm:$0xff]  }
 0x5c3   :  { %v3150_v42 = vpop.f32.mrb[150].mxu0  ;;  %3414 = vmatprep.subr.bf16.mxu1 %v5887_v7  ;;  %v4266_v18 = vld [vmem:[%s5873_s9 + $0x50] ss:$8 sps:$4 sm:$0xff]   ;;  %v4269_v58 = vld [vmem:[%s5873_s9 + $0x60] ss:$8 sps:$4 sm:$0x3f]  }
 0x5c4   :  { %v3151_v15 = vadd.f32 %v3150_v42, %v2886_v32  ;;  %v3152_v14 = vpop.f32.mrb[151].mxu0  ;;  %v3198_v31 = vmax.f32 %v3148_v10, 0.0  ;;  %v4267_v10 = vld [vmem:[%s5873_s9 + $0x64] ss:$8 sps:$4 sm:$0x3f]   ;;  %v4322_v32 = vmov 0.0   ;;  %v3250_v42 = vpop.permute.xlu1 %3249 }
 0x5c5   :  { %3949 = vmatprep.subr.bf16.mxu0 %v4322_v32  ;;  %3963 = vmatprep.mubr.msk.bf16.mxu0 %vm4323_vm6, %v4322_v32 }
 0x5c6   :  { %v3199_v24 = vmax.f32 %v3151_v15, 0.0 }
 0x5c8   :  { %v3214_v54 = vpack.c.bf16 %v3199_v24, %v3198_v31  ;;  %v3255_v24 = vpop.permute.xlu0 %3254 }
 0x5c9   :  { %v3155_v26 = vpop.f32.mrb[152].mxu0 }
 0x5ca   :  { %v3156_v39 = vadd.f32 %v3155_v26, %v2891_v52  ;;  %v3157_v13 = vpop.f32.mrb[153].mxu0  ;;  %3415 = vmatpush1.bf16.msra.mxu1 %v3214_v54 }
 0x5cb   :  { %v3158_v38 = vpop.f32.mrb[154].mxu0  ;;  %3416 = vmatprep.subr.bf16.mxu1 %v5887_v7 }
 0x5cc   :  { %v3159_v37 = vadd.f32 %v3158_v38, %v2896_v22  ;;  %v3160_v29 = vpop.f32.mrb[155].mxu0  ;;  %v3200_v45 = vmax.f32 %v3156_v39, 0.0  ;;  %v3260_v38 = vpop.permute.xlu1 %3259 }
 0x5ce   :  { %v3201_v62 = vmax.f32 %v3159_v37, 0.0 }
 0x5d0   :  { %v3215_v41 = vpack.c.bf16 %v3201_v62, %v3200_v45  ;;  %v3265_v62 = vpop.permute.xlu0 %3264 }
 0x5d1   :  { %v3163_v57 = vpop.f32.mrb[156].mxu0 }
 0x5d2   :  { %v3164_v17 = vadd.f32 %v3163_v57, %v2901_v53  ;;  %v3165_v19 = vpop.f32.mrb[157].mxu0  ;;  %3417 = vmatpush1.bf16.msra.mxu1 %v3215_v41 }
 0x5d3   :  { %v3166_v21 = vpop.f32.mrb[158].mxu0  ;;  %3418 = vmatprep.subr.bf16.mxu1 %v5887_v7 }
 0x5d4   :  { %v3167_v20 = vadd.f32 %v3166_v21, %v2906_v55  ;;  %v3168_v5 = vpop.f32.mrb[159].mxu0  ;;  %v3202_v0 = vmax.f32 %v3164_v17, 0.0  ;;  %v3270_v21 = vpop.permute.xlu1 %3269 }
 0x5d6   :  { %v3203_v63 = vmax.f32 %v3167_v20, 0.0 }
 0x5d8   :  { %v3216_v8 = vpack.c.bf16 %v3203_v63, %v3202_v0  ;;  %v3275_v63 = vpop.permute.xlu0 %3274 }
 0x5d9   :  { %v3171_v16 = vpop.f32.mrb[160].mxu0 }
 0x5da   :  { %v3172_v23 = vadd.f32 %v3171_v16, %v2911_v61  ;;  %v3173_v27 = vpop.f32.mrb[161].mxu0  ;;  %3419 = vmatpush1.bf16.msra.mxu1 %v3216_v8 }
 0x5db   :  { %v3174_v4 = vpop.f32.mrb[162].mxu0  ;;  %3420 = vmatprep.subr.bf16.mxu1 %v5887_v7 }
 0x5dc   :  { %v3175_v9 = vadd.f32 %v3174_v4, %v2916_v49  ;;  %v3176_v33 = vpop.f32.mrb[163].mxu0  ;;  %v3204_v50 = vmax.f32 %v3172_v23, 0.0  ;;  %v3280_v4 = vpop.permute.xlu1 %3279 }
 0x5de   :  { %v3205_v30 = vmax.f32 %v3175_v9, 0.0 }
 0x5e0   :  { %v3217_v46 = vpack.c.bf16 %v3205_v30, %v3204_v50  ;;  %v3285_v30 = vpop.permute.xlu0 %3284 }
 0x5e1   :  { %v3179_v59 = vpop.f32.mrb[164].mxu0 }
 0x5e2   :  { %v3180_v11 = vadd.f32 %v3179_v59, %v2921_v47  ;;  %v3181_v28 = vpop.f32.mrb[165].mxu0  ;;  %3421 = vmatpush1.bf16.msra.mxu1 %v3217_v46 }
 0x5e3   :  { %v3182_v12 = vpop.f32.mrb[166].mxu0  ;;  %3422 = vmatprep.subr.bf16.mxu1 %v5887_v7  ;;  %v4254_v7 = vld [vmem:[%s5873_s9 + $0x10] ss:$8 sps:$4 sm:$0xff]  }
 0x5e4   :  { %v3183_v3 = vadd.f32 %v3182_v12, %v2926_v34  ;;  %v3184_v2 = vpop.f32.mrb[167].mxu0  ;;  %v3206_v43 = vmax.f32 %v3180_v11, 0.0  ;;  %v3290_v12 = vpop.permute.xlu1 %3289 }
 0x5e6   :  { %v3207_v44 = vmax.f32 %v3183_v3, 0.0 }
 0x5e8   :  { %v3218_v51 = vpack.c.bf16 %v3207_v44, %v3206_v43  ;;  %v3295_v44 = vpop.permute.xlu0 %3294 }
 0x5ea   :  { %3423 = vmatpush1.bf16.msra.mxu1 %v3218_v51 }
 0x5ed   :  { %3435 = vmatmul.mubr.bf16.vlgmr.msra.gmra.mrb[176].mxu1 %v4249_v25 }
 0x5ee   :  { %3828 = vmatprep.mubr.msk.bf16.mxu1 %vm3380_vm5, %v4252_v40 }
 0x5f5   :  { %3443 = vmatmul.mubr.bf16.gmra.mrb[180].mxu1 %v4254_v7 }
 0x5f6   :  { %3829 = vmatprep.mubr.msk.bf16.mxu1 %vm3380_vm5, %v4255_v6 }
 0x5fd   :  { %3451 = vmatmul.mubr.bf16.gmra.mrb[184].mxu1 %v4257_v35 }
 0x5fe   :  { %3830 = vmatprep.mubr.msk.bf16.mxu1 %vm3380_vm5, %v4258_v48  ;;  %v3300_v48 = vpop.permute.xlu1 %3299 }
 0x605   :  { %3459 = vmatmul.mubr.bf16.gmra.mrb[188].mxu1 %v4260_v60 }
 0x606   :  { %3831 = vmatprep.mubr.msk.bf16.mxu1 %vm3380_vm5, %v4261_v36 }
 0x60d   :  { %3467 = vmatmul.mubr.bf16.gmra.mrb[192].mxu1 %v4263_v56 }
 0x60e   :  { %3832 = vmatprep.mubr.msk.bf16.mxu1 %vm3380_vm5, %v4264_v1  ;;  %v3305_v1 = vpop.permute.xlu0 %3304 }
 0x615   :  { %3475 = vmatmul.mubr.bf16.gmra.mrb[196].mxu1 %v4266_v18 }
 0x616   :  { %3833 = vmatprep.mubr.msk.bf16.mxu1 %vm3380_vm5, %v4267_v10 }
 0x61d   :  { %3483 = vmatmul.mubr.bf16.gmra.mrb[200].mxu1 %v4269_v58 }
 0x6c0   :  { %v3436_v15 = vpop.f32.mrb[176].mxu1 }
 0x6c1   :  { %v3437_v14 = vadd.f32 %v3436_v15, %v3250_v42  ;;  %v3438_v31 = vpop.f32.mrb[177].mxu1 }
 0x6c2   :  { %v3439_v54 = vpop.f32.mrb[178].mxu1  ;;  %v3310_v31 = vpop.permute.xlu1 %3309 }
 0x6c3   :  { %v3440_v52 = vadd.f32 %v3439_v54, %v3255_v24  ;;  %v3441_v26 = vpop.f32.mrb[179].mxu1  ;;  %v3491_v39 = vmax.f32 %v3437_v14, 0.0 }
 0x6c4   :  { %v3315_v26 = vpop.permute.xlu0 %3314 }
 0x6c5   :  { %v3492_v13 = vmax.f32 %v3440_v52, 0.0 }
 0x6c7   :  { %v3505_v22 = vpack.c.bf16 %v3492_v13, %v3491_v39 }
 0x6c8   :  { %v3444_v37 = vpop.f32.mrb[180].mxu1 }
 0x6c9   :  { %v3445_v29 = vadd.f32 %v3444_v37, %v3260_v38  ;;  %v3446_v45 = vpop.f32.mrb[181].mxu1  ;;  %3950 = vmatpush3.bf16.msra.mxu0 %v3505_v22 }
 0x6ca   :  { %v3447_v41 = vpop.f32.mrb[182].mxu1  ;;  %3951 = vmatprep.subr.bf16.mxu0 %v4322_v32 }
 0x6cb   :  { %v3448_v53 = vadd.f32 %v3447_v41, %v3265_v62  ;;  %v3449_v57 = vpop.f32.mrb[183].mxu1  ;;  %v3493_v17 = vmax.f32 %v3445_v29, 0.0  ;;  %v3512_v62 = vld [vmem:[%s5875_s11] sm:$0x1]  ;;  %v3519_v41 = vlaneseq }
 0x6cd   :  { %v3494_v19 = vmax.f32 %v3448_v53, 0.0  ;;  %v3520_v53 = vshrl.u32 %v3519_v41, 7 }
 0x6cf   :  { %v3506_v55 = vpack.c.bf16 %v3494_v19, %v3493_v17  ;;  %v3521_v57 = vsub.s32 0, %v3520_v53  ;;  %v3517_v17 = vpop.permute.xlu1 %3516 }
 0x6d0   :  { %v3452_v20 = vpop.f32.mrb[184].mxu1 }
 0x6d1   :  { %v3453_v5 = vadd.f32 %v3452_v20, %v3270_v21  ;;  %v3454_v0 = vpop.f32.mrb[185].mxu1  ;;  %3952 = vmatpush3.bf16.msra.mxu0 %v3506_v55 }
 0x6d2   :  { %v3455_v8 = vpop.f32.mrb[186].mxu1  ;;  %3953 = vmatprep.subr.bf16.mxu0 %v4322_v32 }
 0x6d3   :  { %v3456_v61 = vadd.f32 %v3455_v8, %v3275_v63  ;;  %v3457_v16 = vpop.f32.mrb[187].mxu1  ;;  %v3495_v23 = vmax.f32 %v3453_v5, 0.0 }
 0x6d5   :  { %v3496_v27 = vmax.f32 %v3456_v61, 0.0 }
 0x6d7   :  { %v3507_v49 = vpack.c.bf16 %v3496_v27, %v3495_v23 }
 0x6d8   :  { %v3460_v9 = vpop.f32.mrb[188].mxu1 }
 0x6d9   :  { %v3461_v33 = vadd.f32 %v3460_v9, %v3280_v4  ;;  %v3462_v50 = vpop.f32.mrb[189].mxu1  ;;  %3954 = vmatpush3.bf16.msra.mxu0 %v3507_v49 }
 0x6da   :  { %v3463_v46 = vpop.f32.mrb[190].mxu1  ;;  %3955 = vmatprep.subr.bf16.mxu0 %v4322_v32 }
 0x6db   :  { %v3464_v47 = vadd.f32 %v3463_v46, %v3285_v30  ;;  %v3465_v59 = vpop.f32.mrb[191].mxu1  ;;  %v3497_v11 = vmax.f32 %v3461_v33, 0.0 }
 0x6dd   :  { %v3498_v28 = vmax.f32 %v3464_v47, 0.0 }
 0x6df   :  { %v3508_v34 = vpack.c.bf16 %v3498_v28, %v3497_v11 }
 0x6e0   :  { %v3468_v3 = vpop.f32.mrb[192].mxu1 }
 0x6e1   :  { %v3469_v2 = vadd.f32 %v3468_v3, %v3290_v12  ;;  %v3470_v43 = vpop.f32.mrb[193].mxu1  ;;  %3956 = vmatpush3.bf16.msra.mxu0 %v3508_v34 }
 0x6e2   :  { %v3471_v51 = vpop.f32.mrb[194].mxu1  ;;  %3957 = vmatprep.subr.bf16.mxu0 %v4322_v32 }
 0x6e3   :  { %v3472_v25 = vadd.f32 %v3471_v51, %v3295_v44  ;;  %v3473_v40 = vpop.f32.mrb[195].mxu1  ;;  %v3499_v7 = vmax.f32 %v3469_v2, 0.0 }
 0x6e5   :  { %v3500_v6 = vmax.f32 %v3472_v25, 0.0 }
 0x6e7   :  { %v3509_v35 = vpack.c.bf16 %v3500_v6, %v3499_v7 }
 0x6e8   :  { %v3476_v60 = vpop.f32.mrb[196].mxu1 }
 0x6e9   :  { %v3477_v36 = vadd.f32 %v3476_v60, %v3300_v48  ;;  %v3478_v56 = vpop.f32.mrb[197].mxu1  ;;  %3958 = vmatpush3.bf16.msra.mxu0 %v3509_v35 }
 0x6ea   :  { %v3479_v18 = vpop.f32.mrb[198].mxu1  ;;  %3959 = vmatprep.subr.bf16.mxu0 %v4322_v32 }
 0x6eb   :  { %v3480_v10 = vadd.f32 %v3479_v18, %v3305_v1  ;;  %v3481_v58 = vpop.f32.mrb[199].mxu1  ;;  %v3501_v42 = vmax.f32 %v3477_v36, 0.0 }
 0x6ed   :  { %v3502_v15 = vmax.f32 %v3480_v10, 0.0 }
 0x6ef   :  { %v3510_v14 = vpack.c.bf16 %v3502_v15, %v3501_v42 }
 0x6f0   :  { %v3484_v24 = vpop.f32.mrb[200].mxu1 }
 0x6f1   :  { %v3485_v54 = vadd.f32 %v3484_v24, %v3310_v31  ;;  %v3486_v52 = vpop.f32.mrb[201].mxu1  ;;  %3960 = vmatpush3.bf16.msra.mxu0 %v3510_v14 }
 0x6f2   :  { %v3487_v39 = vpop.f32.mrb[202].mxu1  ;;  %3961 = vmatprep.subr.bf16.mxu0 %v4322_v32  ;;  %v3522_v32 = vrot.slane %v3517_v17, %v3521_v57 }
 0x6f3   :  { %v3488_v13 = vadd.f32 %v3487_v39, %v3315_v26  ;;  %v3489_v22 = vpop.f32.mrb[203].mxu1  ;;  %v3503_v38 = vmax.f32 %v3485_v54, 0.0 }
 0x6f5   :  { %v3504_v37 = vmax.f32 %v3488_v13, 0.0 }
 0x6f7   :  { %v3511_v29 = vpack.c.bf16 %v3504_v37, %v3503_v38 }
 0x6f9   :  { %v3527_v45 = vsel %vm2585_vm2, %v3511_v29, 0 }
 0x6fa   :  { %3962 = vmatpush3.bf16.msra.mxu0 %v3527_v45 }
 0x6fd   :  { %3964 = vmatmul.mubr.msk.bf16.vlgmr.msra.gmra.mrb[168].mxu0 %vm2542_vm1, %v3512_v62 }
 0x7d0   :  { %v3563_v19 = vpop.f32.mrb[168].mxu0 }
 0x7d1   :  { %v3564_v55 = vadd.f32 %v3563_v19, %v3522_v32  ;;  %v3965_v21 = vpop.f32.mrb[169].mxu0 }
 0x7d2   :  { %v3566_v20 = vpop.f32.mrb[170].mxu0 }
 0x7d3   :  { %3569 = vst [vmem:[#allocation6] sm:$0x1] %v3564_v55  ;;  %v3966_v5 = vpop.f32.mrb[171].mxu0 }
 0x7d4   :  { %4303 = shalt.err (!%p4300_p12)
}
 0x7d5   :  { %s4304_s22 = scalar_lea.hbm %s5877_s13, 16 }
 0x7d6   :  { %p4305_p13 = scmp.ne.s32.totalorder %s5877_s13, %s4304_s22  ;;  %p4308_p0 = scmp.lt.u32.totalorder %s4304_s22, %s5877_s13 }
 0x7d8   :  { %p4310_p1 = pnand %p4308_p0, %p4305_p13 }
 0x7da   :  { %4313 = shalt.err (!%p4310_p1)
}
 0x7db   :  { %3579 = dma.vmem_to_hbm [thread:$0]  %s3577_s7, 16, %s5877_s13, [#allocation5]  }
 0x7dc   :  { %4316 = dma.done.wait [#allocation5], 16  }
 0x7dd   :  { %4317 = vsyncadd [#allocation5], 4294967280 }
 0x7de   :  { %3583 = vsyncpa [#allocation4], 1 }
 0x7df   :  { %3584 = vsyncpa [#allocation5], 1 }

// kernel: tpu_custom_call.1
= control target key start
LH: loop header
LB: loop body
LE: loop exit
PB: predicated region body
PF: predicated region fallthrough
CT: control target
= control target key end

     0   :  { %s5864_s0 = inlined_call_operand.hbm [shape: bf16[256,128], index: 0, kind: input, shape index: {}]   ;;  %s5865_s1 = inlined_call_operand.vmem [shape: bf16[496,256], index: 1, kind: input, shape index: {}]   ;;  %s5866_s2 = inlined_call_operand.vmem [shape: f32[496,1], index: 2, kind: input, shape index: {}]   ;;  %s5867_s3 = inlined_call_operand.vmem [shape: bf16[236,496], index: 3, kind: input, shape index: {}]   ;;  %s5868_s4 = inlined_call_operand.vmem [shape: f32[236,1], index: 4, kind: input, shape index: {}]   ;;  %s5869_s5 = inlined_call_operand.vmem [shape: bf16[212,236], index: 5, kind: input, shape index: {}]   ;;  %s5870_s6 = inlined_call_operand.vmem [shape: f32[212,1], index: 6, kind: input, shape index: {}]   ;;  %s5871_s7 = inlined_call_operand.vmem [shape: bf16[176,212], index: 7, kind: input, shape index: {}]   ;;  %s5872_s8 = inlined_call_operand.vmem [shape: f32[176,1], index: 8, kind: input, shape index: {}]   ;;  %s5873_s9 = inlined_call_operand.vmem [shape: bf16[108,176], index: 9, kind: input, shape index: {}]   ;;  %s5874_s10 = inlined_call_operand.vmem [shape: f32[108,1], index: 10, kind: input, shape index: {}]   ;;  %s5875_s11 = inlined_call_operand.vmem [shape: bf16[1,108], index: 11, kind: input, shape index: {}]   ;;  %s5876_s12 = inlined_call_operand.<no memory space> [shape: f32[1,1], index: 12, kind: input, shape index: {}]   ;;  %s5877_s13 = inlined_call_operand.hbm [shape: f32[1,128], index: 13, kind: output, shape index: {}]  }
   0x1   :  { %v18_v0 = vstv %s5876_s12 }
   0x2   :  { %19 = vst [vmem:[#allocation2] sm:$0x1] %v18_v0 }
   0x3   :  { %20 = vsyncpa [#allocation4], 0 }
   0x4   :  { %21 = vsyncpa [#allocation5], 0  ;;  %s4318_s27 = smov [#allocation3]   ;;  %s4270_s14 = scalar_lea.hbm %s5864_s0, 2048 }
   0x5   :  { %s27_s28 = sshll.u32 %s4318_s27, 4  ;;  %p4271_p0 = scmp.ne.s32.totalorder %s5864_s0, %s4270_s14  ;;  %s28_s28 = int_to_ptr.vmem [resolvable:$true] %s27_s28 }
   0x6   :  { %p4274_p1 = scmp.lt.u32.totalorder %s4270_s14, %s5864_s0 }
   0x8   :  { %p4276_p2 = pnand %p4274_p1, %p4271_p0 }
   0xa   :  { %4279 = shalt.err (!%p4276_p2)
}
   0xb   :  { %s4280_s12 = scalar_lea.vmem %s28_s28, 2048  ;;  %p4285_p4 = scmp.lt.s32.totalorder %s28_s28, %s28_s28 }
   0xc   :  { %p4281_p3 = scmp.ne.s32.totalorder %s28_s28, %s4280_s12  ;;  %p4286_p5 = scmp.lt.s32.totalorder %s4280_s12, %s4280_s12 }
   0xe   :  { %p4287_p6 = por %p4286_p5, %p4285_p4 }
  0x10   :  { %p4288_p7 = pnand %p4287_p6, %p4281_p3 }
  0x12   :  { %4291 = shalt.err (!%p4288_p7)
}
  0x13   :  { %s4319_s19 = smov 64   ;;  %s4320_s20 = smov 4  }
  0x14   :  { %33 = dma.hbm_to_vmem [thread:$0]  %s5864_s0, 2048, %s28_s28, [#allocation4], %s4319_s19, %s4319_s19, %s4320_s20  }
  0x15   :  { %4314 = dma.done.wait [#allocation4], 2048  }
  0x16   :  { %4315 = vsyncadd [#allocation4], 4294965248  ;;  %v5878_v1 = vmov 0   ;;  %v172_v2 = vld [vmem:[%s5866_s2 + $0x80] sm:$0xff]  ;;  %v173_v5 = vld [vmem:[%s5866_s2 + $0x88] sm:$0xff]  ;;  %vm1833_vm0 = vcmask 916480  }
  0x17   :  { %3975 = vset.pattern.permute.xlu1 %v5878_v1  ;;  %3974 = vset.pattern.permute.xlu0 %v5878_v1  ;;  %v156_v3 = vld [vmem:[%s5866_s2] sm:$0xff]  ;;  %v157_v6 = vld [vmem:[%s5866_s2 + $0x8] sm:$0xff]  ;;  %v174_v8 = vld [vmem:[%s5866_s2 + $0x90] sm:$0xff]  ;;  %vm2542_vm1 = vcmask 883712   ;;  %vm2585_vm2 = vcmask 1045504   ;;  %vm3027_vm3 = vcmask 687104  }
  0x18   :  { %934 = vmatprep.subr.bf16.mxu0 %v5878_v1  ;;  %300 = vperm.xlu0 %3974, %v172_v2   ;;  %v3976_v4 = vld [vmem:[#allocation3] sm:$0xff]   ;;  %v3977_v7 = vld [vmem:[#allocation3 + $0x8] sm:$0xff]   ;;  %v175_v9 = vld [vmem:[%s5866_s2 + $0x98] sm:$0xff]  ;;  %vm3061_vm4 = vcmask 1041408   ;;  %vm3380_vm5 = vcmask 392192   ;;  %vm4323_vm6 = vmmov 0  }
  0x19   :  { %220 = vperm.xlu1 %3975, %v156_v3   ;;  %935 = vmatpush1.bf16.msra.mxu0 %v3976_v4  ;;  %v3978_v10 = vld [vmem:[#allocation3 + $0x10] sm:$0xff]   ;;  %v3979_v13 = vld [vmem:[#allocation3 + $0x18] sm:$0xff]   ;;  %v177_v15 = vld [vmem:[%s5866_s2 + $0xa8] sm:$0xff]  ;;  %s4324_s20 = smov [#allocation6]  }
  0x1a   :  { %936 = vmatprep.subr.bf16.mxu0 %v5878_v1  ;;  %v158_v11 = vld [vmem:[%s5866_s2 + $0x10] sm:$0xff]  ;;  %v159_v12 = vld [vmem:[%s5866_s2 + $0x18] sm:$0xff]  ;;  %v176_v14 = vld [vmem:[%s5866_s2 + $0xa0] sm:$0xff] }
  0x1b   :  { %v3980_v16 = vld [vmem:[#allocation3 + $0x20] sm:$0xff]   ;;  %v3981_v19 = vld [vmem:[#allocation3 + $0x28] sm:$0xff]   ;;  %v179_v21 = vld [vmem:[%s5866_s2 + $0xb8] sm:$0xff] }
  0x1c   :  { %305 = vperm.xlu0 %3974, %v173_v5   ;;  %v160_v17 = vld [vmem:[%s5866_s2 + $0x20] sm:$0xff]  ;;  %v161_v18 = vld [vmem:[%s5866_s2 + $0x28] sm:$0xff]  ;;  %v178_v20 = vld [vmem:[%s5866_s2 + $0xb0] sm:$0xff] }
  0x1d   :  { %225 = vperm.xlu1 %3975, %v157_v6   ;;  %937 = vmatpush1.bf16.msra.mxu0 %v3977_v7  ;;  %v3982_v22 = vld [vmem:[#allocation3 + $0x30] sm:$0xff]   ;;  %v3983_v25 = vld [vmem:[#allocation3 + $0x38] sm:$0xff]   ;;  %v3994_v26 = vld [vmem:[%s5865_s1 + $0x4] ss:$8 sps:$4 sm:$0xff]  }
  0x1e   :  { %938 = vmatprep.subr.bf16.mxu0 %v5878_v1  ;;  %v162_v23 = vld [vmem:[%s5866_s2 + $0x30] sm:$0xff]  ;;  %v163_v24 = vld [vmem:[%s5866_s2 + $0x38] sm:$0xff]  ;;  %v180_v27 = vld [vmem:[%s5866_s2 + $0xc0] sm:$0xff]  ;;  %966 = vmatprep.mubr.bf16.mxu0 %v3994_v26 }
  0x1f   :  { %v181_v28 = vld [vmem:[%s5866_s2 + $0xc8] sm:$0xff]  ;;  %v164_v30 = vld [vmem:[%s5866_s2 + $0x40] sm:$0xff]  ;;  %v182_v33 = vld [vmem:[%s5866_s2 + $0xd0] sm:$0xff] }
  0x20   :  { %310 = vperm.xlu0 %3974, %v174_v8   ;;  %v3984_v29 = vld [vmem:[#allocation3 + $0x40] sm:$0xff]   ;;  %v3985_v32 = vld [vmem:[#allocation3 + $0x48] sm:$0xff]   ;;  %v183_v34 = vld [vmem:[%s5866_s2 + $0xd8] sm:$0xff] }
  0x21   :  { %315 = vperm.xlu1 %3975, %v175_v9   ;;  %939 = vmatpush1.bf16.msra.mxu0 %v3978_v10  ;;  %v165_v31 = vld [vmem:[%s5866_s2 + $0x48] sm:$0xff]  ;;  %v3986_v35 = vld [vmem:[#allocation3 + $0x50] sm:$0xff]   ;;  %v3987_v38 = vld [vmem:[#allocation3 + $0x58] sm:$0xff]  }
  0x22   :  { %940 = vmatprep.subr.bf16.mxu0 %v5878_v1  ;;  %v166_v36 = vld [vmem:[%s5866_s2 + $0x50] sm:$0xff]  ;;  %v167_v37 = vld [vmem:[%s5866_s2 + $0x58] sm:$0xff]  ;;  %v184_v39 = vld [vmem:[%s5866_s2 + $0xe0] sm:$0xff] }
  0x23   :  { %v185_v40 = vld [vmem:[%s5866_s2 + $0xe8] sm:$0xff]  ;;  %v168_v42 = vld [vmem:[%s5866_s2 + $0x60] sm:$0xff]  ;;  %v186_v45 = vld [vmem:[%s5866_s2 + $0xf0] sm:$0xff] }
  0x24   :  { %230 = vperm.xlu0 %3974, %v158_v11   ;;  %v3988_v41 = vld [vmem:[#allocation3 + $0x60] sm:$0xff]   ;;  %v3989_v44 = vld [vmem:[#allocation3 + $0x68] sm:$0xff]   ;;  %v187_v46 = vld [vmem:[%s5866_s2 + $0xf8] sm:$0xff] }
  0x25   :  { %235 = vperm.xlu1 %3975, %v159_v12   ;;  %941 = vmatpush1.bf16.msra.mxu0 %v3979_v13  ;;  %v169_v43 = vld [vmem:[%s5866_s2 + $0x68] sm:$0xff]  ;;  %v3990_v47 = vld [vmem:[#allocation3 + $0x70] sm:$0xff]   ;;  %v3991_v50 = vld [vmem:[#allocation3 + $0x78] sm:$0xff]  }
  0x26   :  { %942 = vmatprep.subr.bf16.mxu0 %v5878_v1  ;;  %v170_v48 = vld [vmem:[%s5866_s2 + $0x70] sm:$0xff]  ;;  %v171_v49 = vld [vmem:[%s5866_s2 + $0x78] sm:$0xff]  ;;  %v188_v51 = vld [vmem:[%s5866_s2 + $0x100] sm:$0xff] }
  0x27   :  { %v189_v52 = vld [vmem:[%s5866_s2 + $0x108] sm:$0xff]  ;;  %v3995_v54 = vld [vmem:[%s5865_s1 + $0x14] ss:$8 sps:$4 sm:$0xff]   ;;  %v192_v57 = vld [vmem:[%s5866_s2 + $0x120] sm:$0xff] }
  0x28   :  { %320 = vperm.xlu0 %3974, %v176_v14   ;;  %v3992_v53 = vld [vmem:[%s5865_s1] ss:$8 sps:$4 sm:$0xff]   ;;  %v190_v55 = vld [vmem:[%s5866_s2 + $0x110] sm:$0xff]  ;;  %v191_v56 = vld [vmem:[%s5866_s2 + $0x118] sm:$0xff] }
  0x29   :  { %325 = vperm.xlu1 %3975, %v177_v15   ;;  %943 = vmatpush1.bf16.msra.mxu0 %v3980_v16  ;;  %v193_v58 = vld [vmem:[%s5866_s2 + $0x128] sm:$0xff]  ;;  %v3997_v59 = vld [vmem:[%s5865_s1 + $0x10] ss:$8 sps:$4 sm:$0xff]   ;;  %v196_v63 = vld [vmem:[%s5866_s2 + $0x140] sm:$0xff] }
  0x2a   :  { %944 = vmatprep.subr.bf16.mxu0 %v5878_v1  ;;  %v3998_v60 = vld [vmem:[%s5865_s1 + $0x24] ss:$8 sps:$4 sm:$0xff]   ;;  %v194_v61 = vld [vmem:[%s5866_s2 + $0x130] sm:$0xff]  ;;  %v195_v62 = vld [vmem:[%s5866_s2 + $0x138] sm:$0xff] }
  0x2b   :  { %v197_v0 = vld [vmem:[%s5866_s2 + $0x148] sm:$0xff]  ;;  %v4001_v3 = vld [vmem:[%s5865_s1 + $0x34] ss:$8 sps:$4 sm:$0xff]   ;;  %v200_v6 = vld [vmem:[%s5866_s2 + $0x160] sm:$0xff] }
  0x2c   :  { %240 = vperm.xlu0 %3974, %v160_v17   ;;  %v4000_v2 = vld [vmem:[%s5865_s1 + $0x20] ss:$8 sps:$4 sm:$0xff]   ;;  %v198_v4 = vld [vmem:[%s5866_s2 + $0x150] sm:$0xff]  ;;  %v199_v5 = vld [vmem:[%s5866_s2 + $0x158] sm:$0xff] }
  0x2d   :  { %245 = vperm.xlu1 %3975, %v161_v18   ;;  %945 = vmatpush1.bf16.msra.mxu0 %v3981_v19  ;;  %v201_v7 = vld [vmem:[%s5866_s2 + $0x168] sm:$0xff]  ;;  %v4003_v8 = vld [vmem:[%s5865_s1 + $0x30] ss:$8 sps:$4 sm:$0xff]   ;;  %v204_v12 = vld [vmem:[%s5866_s2 + $0x180] sm:$0xff] }
  0x2e   :  { %946 = vmatprep.subr.bf16.mxu0 %v5878_v1  ;;  %v4004_v9 = vld [vmem:[%s5865_s1 + $0x44] ss:$8 sps:$4 sm:$0xff]   ;;  %v202_v10 = vld [vmem:[%s5866_s2 + $0x170] sm:$0xff]  ;;  %v203_v11 = vld [vmem:[%s5866_s2 + $0x178] sm:$0xff] }
  0x2f   :  { %v205_v13 = vld [vmem:[%s5866_s2 + $0x188] sm:$0xff]  ;;  %v4007_v15 = vld [vmem:[%s5865_s1 + $0x54] ss:$8 sps:$4 sm:$0xff]   ;;  %v208_v18 = vld [vmem:[%s5866_s2 + $0x1a0] sm:$0xff] }
  0x30   :  { %330 = vperm.xlu0 %3974, %v178_v20   ;;  %v4006_v14 = vld [vmem:[%s5865_s1 + $0x40] ss:$8 sps:$4 sm:$0xff]   ;;  %v206_v16 = vld [vmem:[%s5866_s2 + $0x190] sm:$0xff]  ;;  %v207_v17 = vld [vmem:[%s5866_s2 + $0x198] sm:$0xff] }
  0x31   :  { %335 = vperm.xlu1 %3975, %v179_v21   ;;  %947 = vmatpush1.bf16.msra.mxu0 %v3982_v22  ;;  %v209_v19 = vld [vmem:[%s5866_s2 + $0x1a8] sm:$0xff]  ;;  %v4009_v20 = vld [vmem:[%s5865_s1 + $0x50] ss:$8 sps:$4 sm:$0xff]  }
  0x32   :  { %948 = vmatprep.subr.bf16.mxu0 %v5878_v1  ;;  %v4010_v21 = vld [vmem:[%s5865_s1 + $0x64] ss:$8 sps:$4 sm:$0xff]   ;;  %v210_v22 = vld [vmem:[%s5866_s2 + $0x1b0] sm:$0xff]  ;;  %v4012_v26 = vld [vmem:[%s5865_s1 + $0x60] ss:$8 sps:$4 sm:$0xff]  }
  0x34   :  { %250 = vperm.xlu0 %3974, %v162_v23   ;;  %v211_v23 = vld [vmem:[%s5866_s2 + $0x1b8] sm:$0xff] }
  0x35   :  { %255 = vperm.xlu1 %3975, %v163_v24   ;;  %949 = vmatpush1.bf16.msra.mxu0 %v3983_v25  ;;  %v212_v24 = vld [vmem:[%s5866_s2 + $0x1c0] sm:$0xff]  ;;  %v213_v25 = vld [vmem:[%s5866_s2 + $0x1c8] sm:$0xff] }
  0x36   :  { %950 = vmatprep.subr.bf16.mxu0 %v5878_v1 }
  0x38   :  { %340 = vperm.xlu0 %3974, %v180_v27   ;;  %v4013_v27 = vld [vmem:[%s5865_s1 + $0x74] ss:$8 sps:$4 sm:$0xff]  }
  0x39   :  { %345 = vperm.xlu1 %3975, %v181_v28   ;;  %951 = vmatpush1.bf16.msra.mxu0 %v3984_v29  ;;  %v214_v28 = vld [vmem:[%s5866_s2 + $0x1d0] sm:$0xff]  ;;  %v215_v29 = vld [vmem:[%s5866_s2 + $0x1d8] sm:$0xff] }
  0x3a   :  { %952 = vmatprep.subr.bf16.mxu0 %v5878_v1 }
  0x3c   :  { %260 = vperm.xlu0 %3974, %v164_v30   ;;  %v216_v30 = vld [vmem:[%s5866_s2 + $0x1e0] sm:$0xff] }
  0x3d   :  { %265 = vperm.xlu1 %3975, %v165_v31   ;;  %953 = vmatpush1.bf16.msra.mxu0 %v3985_v32  ;;  %v217_v31 = vld [vmem:[%s5866_s2 + $0x1e8] sm:$0xff]  ;;  %v4015_v32 = vld [vmem:[%s5865_s1 + $0x70] ss:$8 sps:$4 sm:$0xff]  }
  0x3e   :  { %954 = vmatprep.subr.bf16.mxu0 %v5878_v1 }
  0x40   :  { %350 = vperm.xlu0 %3974, %v182_v33   ;;  %v4016_v33 = vld [vmem:[%s5865_s1 + $0x84] ss:$8 sps:$4 sm:$0xff]  }
  0x41   :  { %355 = vperm.xlu1 %3975, %v183_v34   ;;  %955 = vmatpush1.bf16.msra.mxu0 %v3986_v35  ;;  %v1368_v34 = vld [vmem:[%s5868_s4] sm:$0xff]  ;;  %v1369_v35 = vld [vmem:[%s5868_s4 + $0x8] sm:$0xff] }
  0x42   :  { %956 = vmatprep.subr.bf16.mxu0 %v5878_v1 }
  0x44   :  { %270 = vperm.xlu0 %3974, %v166_v36   ;;  %v1370_v36 = vld [vmem:[%s5868_s4 + $0x10] sm:$0xff] }
  0x45   :  { %275 = vperm.xlu1 %3975, %v167_v37   ;;  %957 = vmatpush1.bf16.msra.mxu0 %v3987_v38  ;;  %v1371_v37 = vld [vmem:[%s5868_s4 + $0x18] sm:$0xff]  ;;  %v4018_v38 = vld [vmem:[%s5865_s1 + $0x80] ss:$8 sps:$4 sm:$0xff]  }
  0x46   :  { %958 = vmatprep.subr.bf16.mxu0 %v5878_v1 }
  0x48   :  { %360 = vperm.xlu0 %3974, %v184_v39   ;;  %v4019_v39 = vld [vmem:[%s5865_s1 + $0x94] ss:$8 sps:$4 sm:$0xff]  }
  0x49   :  { %365 = vperm.xlu1 %3975, %v185_v40   ;;  %959 = vmatpush1.bf16.msra.mxu0 %v3988_v41  ;;  %v1372_v40 = vld [vmem:[%s5868_s4 + $0x20] sm:$0xff]  ;;  %v1373_v41 = vld [vmem:[%s5868_s4 + $0x28] sm:$0xff] }
  0x4a   :  { %960 = vmatprep.subr.bf16.mxu0 %v5878_v1 }
  0x4c   :  { %280 = vperm.xlu0 %3974, %v168_v42   ;;  %v1374_v42 = vld [vmem:[%s5868_s4 + $0x30] sm:$0xff] }
  0x4d   :  { %285 = vperm.xlu1 %3975, %v169_v43   ;;  %961 = vmatpush1.bf16.msra.mxu0 %v3989_v44  ;;  %v1375_v43 = vld [vmem:[%s5868_s4 + $0x38] sm:$0xff] }
  0x4e   :  { %962 = vmatprep.subr.bf16.mxu0 %v5878_v1  ;;  %v4021_v44 = vld [vmem:[%s5865_s1 + $0x90] ss:$8 sps:$4 sm:$0xff]  }
  0x50   :  { %370 = vperm.xlu0 %3974, %v186_v45   ;;  %v4022_v45 = vld [vmem:[%s5865_s1 + $0xa4] ss:$8 sps:$4 sm:$0xff]  }
  0x51   :  { %375 = vperm.xlu1 %3975, %v187_v46   ;;  %963 = vmatpush1.bf16.msra.mxu0 %v3990_v47  ;;  %v1376_v46 = vld [vmem:[%s5868_s4 + $0x40] sm:$0xff]  ;;  %v1377_v47 = vld [vmem:[%s5868_s4 + $0x48] sm:$0xff] }
  0x52   :  { %964 = vmatprep.subr.bf16.mxu0 %v5878_v1 }
  0x54   :  { %290 = vperm.xlu0 %3974, %v170_v48  }
  0x55   :  { %295 = vperm.xlu1 %3975, %v171_v49   ;;  %965 = vmatpush1.bf16.msra.mxu0 %v3991_v50  ;;  %v1378_v50 = vld [vmem:[%s5868_s4 + $0x50] sm:$0xff] }
  0x56   :  { %3065 = vmatprep.subr.bf16.mxu0 %v5878_v1 }
  0x58   :  { %380 = vperm.xlu0 %3974, %v188_v51   ;;  %967 = vmatmul.mubr.bf16.vlgmr.msra.gmra.mrb[0].mxu0 %v3992_v53  ;;  %v1379_v51 = vld [vmem:[%s5868_s4 + $0x58] sm:$0xff] }
  0x59   :  { %385 = vperm.xlu1 %3975, %v189_v52   ;;  %974 = vmatprep.mubr.bf16.mxu0 %v3995_v54  ;;  %v4024_v52 = vld [vmem:[%s5865_s1 + $0xa0] ss:$8 sps:$4 sm:$0xff]   ;;  %v4025_v53 = vld [vmem:[%s5865_s1 + $0xb4] ss:$8 sps:$4 sm:$0xff]  }
  0x5c   :  { %390 = vperm.xlu0 %3974, %v190_v55   ;;  %v1380_v55 = vld [vmem:[%s5868_s4 + $0x60] sm:$0xff] }
  0x5d   :  { %395 = vperm.xlu1 %3975, %v191_v56   ;;  %v1381_v56 = vld [vmem:[%s5868_s4 + $0x68] sm:$0xff] }
  0x60   :  { %400 = vperm.xlu0 %3974, %v192_v57   ;;  %975 = vmatmul.mubr.bf16.gmra.mrb[4].mxu0 %v3997_v59  ;;  %v1383_v59 = vld [vmem:[%s5868_s4 + $0x78] sm:$0xff] }
  0x61   :  { %405 = vperm.xlu1 %3975, %v193_v58   ;;  %982 = vmatprep.mubr.bf16.mxu0 %v3998_v60  ;;  %v1382_v58 = vld [vmem:[%s5868_s4 + $0x70] sm:$0xff] }
  0x62   :  { %v4027_v60 = vld [vmem:[%s5865_s1 + $0xb0] ss:$8 sps:$4 sm:$0xff]  }
  0x64   :  { %410 = vperm.xlu0 %3974, %v194_v61   ;;  %v4028_v61 = vld [vmem:[%s5865_s1 + $0xc4] ss:$8 sps:$4 sm:$0xff]  }
  0x65   :  { %415 = vperm.xlu1 %3975, %v195_v62  }
  0x68   :  { %420 = vperm.xlu0 %3974, %v196_v63   ;;  %983 = vmatmul.mubr.bf16.gmra.mrb[8].mxu0 %v4000_v2  ;;  %v1385_v2 = vld [vmem:[%s5868_s4 + $0x88] sm:$0xff] }
  0x69   :  { %425 = vperm.xlu1 %3975, %v197_v0   ;;  %990 = vmatprep.mubr.bf16.mxu0 %v4001_v3  ;;  %v1384_v0 = vld [vmem:[%s5868_s4 + $0x80] sm:$0xff] }
  0x6c   :  { %430 = vperm.xlu0 %3974, %v198_v4   ;;  %v1386_v4 = vld [vmem:[%s5868_s4 + $0x90] sm:$0xff] }
  0x6d   :  { %435 = vperm.xlu1 %3975, %v199_v5   ;;  %v1387_v5 = vld [vmem:[%s5868_s4 + $0x98] sm:$0xff] }
  0x70   :  { %440 = vperm.xlu0 %3974, %v200_v6   ;;  %991 = vmatmul.mubr.bf16.gmra.mrb[12].mxu0 %v4003_v8  ;;  %v4030_v6 = vld [vmem:[%s5865_s1 + $0xc0] ss:$8 sps:$4 sm:$0xff]   ;;  %v4031_v8 = vld [vmem:[%s5865_s1 + $0xd4] ss:$8 sps:$4 sm:$0xff]  }
  0x71   :  { %445 = vperm.xlu1 %3975, %v201_v7   ;;  %998 = vmatprep.mubr.bf16.mxu0 %v4004_v9  ;;  %v1388_v9 = vld [vmem:[%s5868_s4 + $0xa0] sm:$0xff] }
  0x74   :  { %450 = vperm.xlu0 %3974, %v202_v10   ;;  %v1389_v10 = vld [vmem:[%s5868_s4 + $0xa8] sm:$0xff] }
  0x75   :  { %455 = vperm.xlu1 %3975, %v203_v11  }
  0x78   :  { %460 = vperm.xlu0 %3974, %v204_v12   ;;  %999 = vmatmul.mubr.bf16.gmra.mrb[16].mxu0 %v4006_v14  ;;  %v1391_v14 = vld [vmem:[%s5868_s4 + $0xb8] sm:$0xff] }
  0x79   :  { %465 = vperm.xlu1 %3975, %v205_v13   ;;  %1006 = vmatprep.mubr.bf16.mxu0 %v4007_v15  ;;  %v1390_v13 = vld [vmem:[%s5868_s4 + $0xb0] sm:$0xff] }
  0x7a   :  { %v4033_v15 = vld [vmem:[%s5865_s1 + $0xd0] ss:$8 sps:$4 sm:$0xff]  }
  0x7c   :  { %470 = vperm.xlu0 %3974, %v206_v16   ;;  %v4034_v16 = vld [vmem:[%s5865_s1 + $0xe4] ss:$8 sps:$4 sm:$0xff]  }
  0x7d   :  { %475 = vperm.xlu1 %3975, %v207_v17  }
  0x80   :  { %480 = vperm.xlu0 %3974, %v208_v18   ;;  %1007 = vmatmul.mubr.bf16.gmra.mrb[20].mxu0 %v4009_v20  ;;  %v1392_v18 = vld [vmem:[%s5868_s4 + $0xc0] sm:$0xff] }
  0x81   :  { %485 = vperm.xlu1 %3975, %v209_v19   ;;  %1014 = vmatprep.mubr.bf16.mxu0 %v4010_v21  ;;  %v1393_v19 = vld [vmem:[%s5868_s4 + $0xc8] sm:$0xff]  ;;  %v1394_v21 = vld [vmem:[%s5868_s4 + $0xd0] sm:$0xff] }
  0x84   :  { %490 = vperm.xlu0 %3974, %v210_v22   ;;  %v1395_v22 = vld [vmem:[%s5868_s4 + $0xd8] sm:$0xff] }
  0x85   :  { %495 = vperm.xlu1 %3975, %v211_v23   ;;  %v4036_v23 = vld [vmem:[%s5865_s1 + $0xe0] ss:$8 sps:$4 sm:$0xff]  }
  0x88   :  { %500 = vperm.xlu0 %3974, %v212_v24   ;;  %1015 = vmatmul.mubr.bf16.gmra.mrb[24].mxu0 %v4012_v26  ;;  %v4037_v24 = vld [vmem:[%s5865_s1 + $0xf4] ss:$8 sps:$4 sm:$0xff]  }
  0x89   :  { %505 = vperm.xlu1 %3975, %v213_v25   ;;  %1022 = vmatprep.mubr.bf16.mxu0 %v4013_v27  ;;  %v1396_v27 = vld [vmem:[%s5868_s4 + $0xe0] sm:$0xff] }
  0x8c   :  { %510 = vperm.xlu0 %3974, %v214_v28   ;;  %v1397_v28 = vld [vmem:[%s5868_s4 + $0xe8] sm:$0xf] }
  0x8d   :  { %515 = vperm.xlu1 %3975, %v215_v29  }
  0x90   :  { %520 = vperm.xlu0 %3974, %v216_v30   ;;  %1023 = vmatmul.mubr.bf16.gmra.mrb[28].mxu0 %v4015_v32  ;;  %v2257_v30 = vld [vmem:[%s5870_s6] sm:$0xff]  ;;  %v4039_v32 = vld [vmem:[%s5865_s1 + $0xf0] ss:$8 sps:$4 sm:$0xff]  }
  0x91   :  { %525 = vperm.xlu1 %3975, %v217_v31   ;;  %1030 = vmatprep.mubr.bf16.mxu0 %v4016_v33  ;;  %v2258_v31 = vld [vmem:[%s5870_s6 + $0x8] sm:$0xff] }
  0x94   :  { %1400 = vperm.xlu0 %3974, %v1368_v34   ;;  %v4040_v34 = vld [vmem:[%s5865_s1 + $0x104] ss:$8 sps:$4 sm:$0xff]  }
  0x95   :  { %1405 = vperm.xlu1 %3975, %v1369_v35   ;;  %v2259_v35 = vld [vmem:[%s5870_s6 + $0x10] sm:$0xff] }
  0x97   :  { %v4708_v48 = vpop.permute.xlu0 %300 }
  0x98   :  { %1410 = vperm.xlu0 %3974, %v1370_v36   ;;  %1031 = vmatmul.mubr.bf16.gmra.mrb[32].mxu0 %v4018_v38  ;;  %v4710_v49 = vpop.permute.xlu1 %220  ;;  %v2260_v36 = vld [vmem:[%s5870_s6 + $0x18] sm:$0xff] }
  0x99   :  { %1415 = vperm.xlu1 %3975, %v1371_v37   ;;  %1038 = vmatprep.mubr.bf16.mxu0 %v4019_v39  ;;  %v2261_v39 = vld [vmem:[%s5870_s6 + $0x20] sm:$0xff] }
  0x9b   :  { %v4724_v54 = vpop.permute.xlu0 %305 }
  0x9c   :  { %1420 = vperm.xlu0 %3974, %v1372_v40   ;;  %v4732_v57 = vpop.permute.xlu1 %225  ;;  %v2262_v40 = vld [vmem:[%s5870_s6 + $0x28] sm:$0xff] }
  0x9d   :  { %1425 = vperm.xlu1 %3975, %v1373_v41   ;;  %v4042_v41 = vld [vmem:[%s5865_s1 + $0x100] ss:$8 sps:$4 sm:$0xff]  }
  0x9f   :  { %v4746_v62 = vpop.permute.xlu0 %310 }
  0xa0   :  { %1430 = vperm.xlu0 %3974, %v1374_v42   ;;  %1039 = vmatmul.mubr.bf16.gmra.mrb[36].mxu0 %v4021_v44  ;;  %v4748_v63 = vpop.permute.xlu1 %315  ;;  %v4043_v42 = vld [vmem:[%s5865_s1 + $0x114] ss:$8 sps:$4 sm:$0xff]  }
  0xa1   :  { %1435 = vperm.xlu1 %3975, %v1375_v43   ;;  %1046 = vmatprep.mubr.bf16.mxu0 %v4022_v45  ;;  %v2263_v44 = vld [vmem:[%s5870_s6 + $0x30] sm:$0xff]  ;;  %v2264_v45 = vld [vmem:[%s5870_s6 + $0x38] sm:$0xff] }
  0xa3   :  { %v4756_v3 = vpop.permute.xlu0 %230 }
  0xa4   :  { %1440 = vperm.xlu0 %3974, %v1376_v46   ;;  %v4767_v7 = vpop.permute.xlu1 %235 }
  0xa5   :  { %1445 = vperm.xlu1 %3975, %v1377_v47   ;;  %v2265_v47 = vld [vmem:[%s5870_s6 + $0x40] sm:$0xff] }
  0xa7   :  { %v4778_v11 = vpop.permute.xlu0 %320 }
  0xa8   :  { %1450 = vperm.xlu0 %3974, %v1378_v50   ;;  %1047 = vmatmul.mubr.bf16.gmra.mrb[40].mxu0 %v4024_v52  ;;  %v4780_v12 = vpop.permute.xlu1 %325  ;;  %v2266_v50 = vld [vmem:[%s5870_s6 + $0x48] sm:$0xff] }
  0xa9   :  { %1455 = vperm.xlu1 %3975, %v1379_v51   ;;  %1054 = vmatprep.mubr.bf16.mxu0 %v4025_v53  ;;  %v4045_v51 = vld [vmem:[%s5865_s1 + $0x110] ss:$8 sps:$4 sm:$0xff]   ;;  %v4046_v52 = vld [vmem:[%s5865_s1 + $0x124] ss:$8 sps:$4 sm:$0xff]  }
  0xab   :  { %v4794_v17 = vpop.permute.xlu0 %240 }
  0xac   :  { %1460 = vperm.xlu0 %3974, %v1380_v55   ;;  %v4802_v20 = vpop.permute.xlu1 %245 }
  0xad   :  { %1465 = vperm.xlu1 %3975, %v1381_v56   ;;  %v2267_v56 = vld [vmem:[%s5870_s6 + $0x50] sm:$0xff] }
  0xaf   :  { %v4816_v25 = vpop.permute.xlu0 %330 }
  0xb0   :  { %1470 = vperm.xlu0 %3974, %v1382_v58   ;;  %1055 = vmatmul.mubr.bf16.gmra.mrb[44].mxu0 %v4027_v60  ;;  %v4818_v26 = vpop.permute.xlu1 %335  ;;  %v2268_v58 = vld [vmem:[%s5870_s6 + $0x58] sm:$0xff]  ;;  %v2269_v60 = vld [vmem:[%s5870_s6 + $0x60] sm:$0xff] }
  0xb1   :  { %1475 = vperm.xlu1 %3975, %v1383_v59   ;;  %1062 = vmatprep.mubr.bf16.mxu0 %v4028_v61  ;;  %v2270_v61 = vld [vmem:[%s5870_s6 + $0x68] sm:$0xff] }
  0xb3   :  { %v4826_v29 = vpop.permute.xlu0 %250 }
  0xb4   :  { %1480 = vperm.xlu0 %3974, %v1384_v0   ;;  %v4837_v33 = vpop.permute.xlu1 %255  ;;  %v4048_v0 = vld [vmem:[%s5865_s1 + $0x120] ss:$8 sps:$4 sm:$0xff]  }
  0xb5   :  { %1485 = vperm.xlu1 %3975, %v1385_v2  }
  0xb7   :  { %v4848_v37 = vpop.permute.xlu0 %340 }
  0xb8   :  { %1490 = vperm.xlu0 %3974, %v1386_v4   ;;  %1063 = vmatmul.mubr.bf16.gmra.mrb[48].mxu0 %v4030_v6  ;;  %v4850_v38 = vpop.permute.xlu1 %345  ;;  %v4049_v4 = vld [vmem:[%s5865_s1 + $0x134] ss:$8 sps:$4 sm:$0xff]  }
  0xb9   :  { %1495 = vperm.xlu1 %3975, %v1387_v5   ;;  %1070 = vmatprep.mubr.bf16.mxu0 %v4031_v8  ;;  %v2271_v5 = vld [vmem:[%s5870_s6 + $0x70] sm:$0xff]  ;;  %v2272_v6 = vld [vmem:[%s5870_s6 + $0x78] sm:$0xff] }
  0xbb   :  { %v4864_v43 = vpop.permute.xlu0 %260 }
  0xbc   :  { %1500 = vperm.xlu0 %3974, %v1388_v9   ;;  %v4872_v46 = vpop.permute.xlu1 %265 }
  0xbd   :  { %1505 = vperm.xlu1 %3975, %v1389_v10   ;;  %v2273_v10 = vld [vmem:[%s5870_s6 + $0x80] sm:$0xff] }
  0xbf   :  { %v4886_v53 = vpop.permute.xlu0 %350 }
  0xc0   :  { %1510 = vperm.xlu0 %3974, %v1390_v13   ;;  %1071 = vmatmul.mubr.bf16.gmra.mrb[52].mxu0 %v4033_v15  ;;  %v4888_v55 = vpop.permute.xlu1 %355  ;;  %v2274_v13 = vld [vmem:[%s5870_s6 + $0x88] sm:$0xff] }
  0xc1   :  { %1515 = vperm.xlu1 %3975, %v1391_v14   ;;  %1078 = vmatprep.mubr.bf16.mxu0 %v4034_v16  ;;  %v4051_v14 = vld [vmem:[%s5865_s1 + $0x130] ss:$8 sps:$4 sm:$0xff]   ;;  %v4052_v15 = vld [vmem:[%s5865_s1 + $0x144] ss:$8 sps:$4 sm:$0xff]  }
  0xc3   :  { %v4896_v59 = vpop.permute.xlu0 %270 }
  0xc4   :  { %1520 = vperm.xlu0 %3974, %v1392_v18   ;;  %v4907_v2 = vpop.permute.xlu1 %275  ;;  %v2275_v18 = vld [vmem:[%s5870_s6 + $0x90] sm:$0xff] }
  0xc5   :  { %1525 = vperm.xlu1 %3975, %v1393_v19   ;;  %v2276_v19 = vld [vmem:[%s5870_s6 + $0x98] sm:$0xff] }
  0xc7   :  { %v4918_v8 = vpop.permute.xlu0 %360 }
  0xc8   :  { %1530 = vperm.xlu0 %3974, %v1394_v21   ;;  %1079 = vmatmul.mubr.bf16.gmra.mrb[56].mxu0 %v4036_v23  ;;  %v4920_v9 = vpop.permute.xlu1 %365  ;;  %v2278_v23 = vld [vmem:[%s5870_s6 + $0xa8] sm:$0xff] }
  0xc9   :  { %1535 = vperm.xlu1 %3975, %v1395_v22   ;;  %1086 = vmatprep.mubr.bf16.mxu0 %v4037_v24  ;;  %v2277_v22 = vld [vmem:[%s5870_s6 + $0xa0] sm:$0xff] }
  0xca   :  { %v4054_v24 = vld [vmem:[%s5865_s1 + $0x140] ss:$8 sps:$4 sm:$0xff]  }
  0xcb   :  { %v4934_v16 = vpop.permute.xlu0 %280 }
  0xcc   :  { %1540 = vperm.xlu0 %3974, %v1396_v27   ;;  %v4942_v21 = vpop.permute.xlu1 %285  ;;  %v4055_v27 = vld [vmem:[%s5865_s1 + $0x154] ss:$8 sps:$4 sm:$0xff]  }
  0xcd   :  { %1545 = vperm.xlu1 %3975, %v1397_v28  }
  0xcf   :  { %v4956_v28 = vpop.permute.xlu0 %370 }
  0xd0   :  { %2286 = vperm.xlu0 %3974, %v2257_v30   ;;  %1087 = vmatmul.mubr.bf16.gmra.mrb[60].mxu0 %v4039_v32  ;;  %v4958_v30 = vpop.permute.xlu1 %375  ;;  %v2280_v32 = vld [vmem:[%s5870_s6 + $0xb8] sm:$0xff] }
  0xd1   :  { %2291 = vperm.xlu1 %3975, %v2258_v31   ;;  %1094 = vmatprep.mubr.bf16.mxu0 %v4040_v34  ;;  %v2279_v31 = vld [vmem:[%s5870_s6 + $0xb0] sm:$0xff] }
  0xd3   :  { %v4966_v34 = vpop.permute.xlu0 %290 }
  0xd4   :  { %2296 = vperm.xlu0 %3974, %v2259_v35   ;;  %v2281_v35 = vld [vmem:[%s5870_s6 + $0xc0] sm:$0xff] }
  0xd5   :  { %2301 = vperm.xlu1 %3975, %v2260_v36   ;;  %v2282_v36 = vld [vmem:[%s5870_s6 + $0xc8] sm:$0xff] }
  0xd8   :  { %2306 = vperm.xlu0 %3974, %v2261_v39   ;;  %1095 = vmatmul.mubr.bf16.gmra.mrb[64].mxu0 %v4042_v41  ;;  %v4057_v39 = vld [vmem:[%s5865_s1 + $0x150] ss:$8 sps:$4 sm:$0xff]   ;;  %v4058_v41 = vld [vmem:[%s5865_s1 + $0x164] ss:$8 sps:$4 sm:$0xff]  }
  0xd9   :  { %2311 = vperm.xlu1 %3975, %v2262_v40   ;;  %1102 = vmatprep.mubr.bf16.mxu0 %v4043_v42  ;;  %v4977_v40 = vpop.permute.xlu1 %295  ;;  %v2283_v42 = vld [vmem:[%s5870_s6 + $0xd0] sm:$0xf] }
  0xdc   :  { %2316 = vperm.xlu0 %3974, %v2263_v44   ;;  %v2796_v44 = vld [vmem:[%s5872_s8] sm:$0xff] }
  0xdd   :  { %2321 = vperm.xlu1 %3975, %v2264_v45   ;;  %v4988_v45 = vpop.permute.xlu0 %380 }
  0xe0   :  { %2326 = vperm.xlu0 %3974, %v2265_v47   ;;  %1103 = vmatmul.mubr.bf16.gmra.mrb[68].mxu0 %v4045_v51  ;;  %v4990_v47 = vpop.permute.xlu1 %385  ;;  %v2798_v51 = vld [vmem:[%s5872_s8 + $0x10] sm:$0xff] }
  0xe1   :  { %2331 = vperm.xlu1 %3975, %v2266_v50   ;;  %1110 = vmatprep.mubr.bf16.mxu0 %v4046_v52  ;;  %v2797_v50 = vld [vmem:[%s5872_s8 + $0x8] sm:$0xff] }
  0xe2   :  { %v4060_v52 = vld [vmem:[%s5865_s1 + $0x160] ss:$8 sps:$4 sm:$0xff]  }
  0xe4   :  { %2336 = vperm.xlu0 %3974, %v2267_v56   ;;  %v4061_v56 = vld [vmem:[%s5865_s1 + $0x174] ss:$8 sps:$4 sm:$0xff]  }
  0xe5   :  { %2341 = vperm.xlu1 %3975, %v2268_v58   ;;  %v5004_v58 = vpop.permute.xlu0 %390 }
  0xe8   :  { %2346 = vperm.xlu0 %3974, %v2269_v60   ;;  %1111 = vmatmul.mubr.bf16.gmra.mrb[72].mxu0 %v4048_v0  ;;  %v2799_v60 = vld [vmem:[%s5872_s8 + $0x18] sm:$0xff]  ;;  %v5012_v0 = vpop.permute.xlu1 %395 }
  0xe9   :  { %2351 = vperm.xlu1 %3975, %v2270_v61   ;;  %1118 = vmatprep.mubr.bf16.mxu0 %v4049_v4  ;;  %v2800_v61 = vld [vmem:[%s5872_s8 + $0x20] sm:$0xff]  ;;  %v2801_v4 = vld [vmem:[%s5872_s8 + $0x28] sm:$0xff] }
  0xec   :  { %2356 = vperm.xlu0 %3974, %v2271_v5   ;;  %v2802_v5 = vld [vmem:[%s5872_s8 + $0x30] sm:$0xff] }
  0xed   :  { %2361 = vperm.xlu1 %3975, %v2272_v6   ;;  %v4063_v6 = vld [vmem:[%s5865_s1 + $0x170] ss:$8 sps:$4 sm:$0xff]  }
  0xf0   :  { %2366 = vperm.xlu0 %3974, %v2273_v10   ;;  %1119 = vmatmul.mubr.bf16.gmra.mrb[76].mxu0 %v4051_v14  ;;  %v4064_v10 = vld [vmem:[%s5865_s1 + $0x184] ss:$8 sps:$4 sm:$0xff]   ;;  %v5028_v14 = vpop.permute.xlu1 %405 }
  0xf1   :  { %2371 = vperm.xlu1 %3975, %v2274_v13   ;;  %1126 = vmatprep.mubr.bf16.mxu0 %v4052_v15  ;;  %v5026_v13 = vpop.permute.xlu0 %400  ;;  %v2803_v15 = vld [vmem:[%s5872_s8 + $0x38] sm:$0xff] }
  0xf4   :  { %2376 = vperm.xlu0 %3974, %v2275_v18   ;;  %v2804_v18 = vld [vmem:[%s5872_s8 + $0x40] sm:$0xff] }
  0xf5   :  { %2381 = vperm.xlu1 %3975, %v2276_v19   ;;  %v5036_v19 = vpop.permute.xlu0 %410 }
  0xf8   :  { %2386 = vperm.xlu0 %3974, %v2277_v22   ;;  %1127 = vmatmul.mubr.bf16.gmra.mrb[80].mxu0 %v4054_v24  ;;  %v2805_v22 = vld [vmem:[%s5872_s8 + $0x48] sm:$0xff] }
  0xf9   :  { %2391 = vperm.xlu1 %3975, %v2278_v23   ;;  %1134 = vmatprep.mubr.bf16.mxu0 %v4055_v27  ;;  %v2806_v23 = vld [vmem:[%s5872_s8 + $0x50] sm:$0xff]  ;;  %v4066_v24 = vld [vmem:[%s5865_s1 + $0x180] ss:$8 sps:$4 sm:$0xff]   ;;  %v5047_v27 = vpop.permute.xlu1 %415 }
  0xfc   :  { %2396 = vperm.xlu0 %3974, %v2279_v31   ;;  %v4067_v31 = vld [vmem:[%s5865_s1 + $0x194] ss:$8 sps:$4 sm:$0xff]  }
  0xfd   :  { %2401 = vperm.xlu1 %3975, %v2280_v32   ;;  %v2807_v32 = vld [vmem:[%s5872_s8 + $0x58] sm:$0xff] }
 0x100   :  { %2406 = vperm.xlu0 %3974, %v2281_v35   ;;  %1135 = vmatmul.mubr.bf16.gmra.mrb[84].mxu0 %v4057_v39  ;;  %v2808_v35 = vld [vmem:[%s5872_s8 + $0x60] sm:$0xff]  ;;  %v5060_v39 = vpop.permute.xlu1 %425 }
 0x101   :  { %2411 = vperm.xlu1 %3975, %v2282_v36   ;;  %1142 = vmatprep.mubr.bf16.mxu0 %v4058_v41  ;;  %v5058_v36 = vpop.permute.xlu0 %420  ;;  %v2809_v41 = vld [vmem:[%s5872_s8 + $0x68] sm:$0xff] }
 0x104   :  { %2416 = vperm.xlu0 %3974, %v2283_v42   ;;  %v2810_v42 = vld [vmem:[%s5872_s8 + $0x70] sm:$0xff] }
 0x105   :  { %2820 = vperm.xlu1 %3975, %v2796_v44   ;;  %v4069_v44 = vld [vmem:[%s5865_s1 + $0x190] ss:$8 sps:$4 sm:$0xff]  }
 0x108   :  { %2825 = vperm.xlu0 %3974, %v2797_v50   ;;  %1143 = vmatmul.mubr.bf16.gmra.mrb[88].mxu0 %v4060_v52  ;;  %v4070_v50 = vld [vmem:[%s5865_s1 + $0x1a4] ss:$8 sps:$4 sm:$0xff]   ;;  %v2811_v52 = vld [vmem:[%s5872_s8 + $0x78] sm:$0xff] }
 0x109   :  { %2830 = vperm.xlu1 %3975, %v2798_v51   ;;  %1150 = vmatprep.mubr.bf16.mxu0 %v4061_v56  ;;  %v5074_v51 = vpop.permute.xlu0 %430  ;;  %v2812_v56 = vld [vmem:[%s5872_s8 + $0x80] sm:$0xff] }
 0x10c   :  { %2835 = vperm.xlu0 %3974, %v2799_v60   ;;  %v5082_v60 = vpop.permute.xlu1 %435 }
 0x10d   :  { %2840 = vperm.xlu1 %3975, %v2800_v61   ;;  %v2813_v61 = vld [vmem:[%s5872_s8 + $0x88] sm:$0xff] }
 0x110   :  { %2845 = vperm.xlu0 %3974, %v2801_v4   ;;  %1151 = vmatmul.mubr.bf16.gmra.mrb[92].mxu0 %v4063_v6  ;;  %v2814_v4 = vld [vmem:[%s5872_s8 + $0x90] sm:$0xff] }
 0x111   :  { %2850 = vperm.xlu1 %3975, %v2802_v5   ;;  %1158 = vmatprep.mubr.bf16.mxu0 %v4064_v10  ;;  %v4072_v5 = vld [vmem:[%s5865_s1 + $0x1a0] ss:$8 sps:$4 sm:$0xff]   ;;  %v4073_v6 = vld [vmem:[%s5865_s1 + $0x1b4] ss:$8 sps:$4 sm:$0xff]   ;;  %v5096_v10 = vpop.permute.xlu0 %440 }
 0x114   :  { %2855 = vperm.xlu0 %3974, %v2803_v15   ;;  %v5098_v15 = vpop.permute.xlu1 %445 }
 0x115   :  { %2860 = vperm.xlu1 %3975, %v2804_v18   ;;  %v2815_v18 = vld [vmem:[%s5872_s8 + $0x98] sm:$0xff] }
 0x118   :  { %2865 = vperm.xlu0 %3974, %v2805_v22   ;;  %1159 = vmatmul.mubr.bf16.gmra.mrb[96].mxu0 %v4066_v24  ;;  %v2816_v22 = vld [vmem:[%s5872_s8 + $0xa0] sm:$0xff]  ;;  %v5106_v24 = vpop.permute.xlu0 %450 }
 0x119   :  { %2870 = vperm.xlu1 %3975, %v2806_v23   ;;  %1166 = vmatprep.mubr.bf16.mxu0 %v4067_v31 }
 0x11c   :  { %2875 = vperm.xlu0 %3974, %v2807_v32  }
 0x11d   :  { %2880 = vperm.xlu1 %3975, %v2808_v35   ;;  %v2817_v35 = vld [vmem:[%s5872_s8 + $0xa8] sm:$0xff] }
 0x120   :  { %2885 = vperm.xlu0 %3974, %v2809_v41   ;;  %1167 = vmatmul.mubr.bf16.gmra.mrb[100].mxu0 %v4069_v44  ;;  %v3233_v41 = vld [vmem:[%s5874_s10] sm:$0xff]  ;;  %v5118_v44 = vpop.permute.xlu1 %455 }
 0x121   :  { %2890 = vperm.xlu1 %3975, %v2810_v42   ;;  %1174 = vmatprep.mubr.bf16.mxu0 %v4070_v50  ;;  %v4075_v42 = vld [vmem:[%s5865_s1 + $0x1b0] ss:$8 sps:$4 sm:$0xff]  }
 0x124   :  { %2895 = vperm.xlu0 %3974, %v2811_v52  }
 0x125   :  { %2900 = vperm.xlu1 %3975, %v2812_v56   ;;  %v4087_v56 = vld [vmem:[%s5867_s3 + $0x4] ss:$16 sps:$4 sm:$0xff]  }
 0x126   :  { %1911 = vmatprep.mubr.bf16.mxu1 %v4087_v56 }
 0x128   :  { %2905 = vperm.xlu0 %3974, %v2813_v61   ;;  %1175 = vmatmul.mubr.bf16.gmra.mrb[104].mxu0 %v4072_v5 }
 0x129   :  { %2910 = vperm.xlu1 %3975, %v2814_v4   ;;  %1182 = vmatprep.mubr.bf16.mxu0 %v4073_v6  ;;  %v3234_v6 = vld [vmem:[%s5874_s10 + $0x8] sm:$0xff] }
 0x12b   :  { %v968_v23 = vpop.f32.mrb[0].mxu0 }
 0x12c   :  { %2915 = vperm.xlu0 %3974, %v2815_v18   ;;  %v969_v31 = vadd.f32 %v968_v23, %v4710_v49  ;;  %v970_v32 = vpop.f32.mrb[1].mxu0  ;;  %v4076_v49 = vld [vmem:[%s5865_s1 + $0x1c4] ss:$8 sps:$4 sm:$0xff]   ;;  %v3235_v18 = vld [vmem:[%s5874_s10 + $0x10] sm:$0xff]  ;;  %v5137_v23 = vpop.permute.xlu1 %465 }
 0x12d   :  { %2920 = vperm.xlu1 %3975, %v2816_v22   ;;  %v971_v50 = vpop.f32.mrb[2].mxu0 }
 0x12e   :  { %v972_v52 = vadd.f32 %v971_v50, %v4732_v57  ;;  %v973_v61 = vpop.f32.mrb[3].mxu0  ;;  %v1215_v4 = vmax.f32 %v969_v31, 0.0  ;;  %v5133_v57 = vpop.permute.xlu0 %460  ;;  %v4078_v50 = vld [vmem:[%s5865_s1 + $0x1c0] ss:$8 sps:$4 sm:$0xff]  }
 0x130   :  { %2925 = vperm.xlu0 %3974, %v2817_v35   ;;  %v1216_v5 = vmax.f32 %v972_v52, 0.0  ;;  %1183 = vmatmul.mubr.bf16.gmra.mrb[108].mxu0 %v4075_v42  ;;  %v3237_v42 = vld [vmem:[%s5874_s10 + $0x20] sm:$0xff]  ;;  %v4079_v52 = vld [vmem:[%s5865_s1 + $0x1d4] ss:$8 sps:$4 sm:$0xff]  }
 0x131   :  { %3249 = vperm.xlu1 %3975, %v3233_v41   ;;  %1190 = vmatprep.mubr.bf16.mxu0 %v4076_v49  ;;  %v3236_v41 = vld [vmem:[%s5874_s10 + $0x18] sm:$0xff] }
 0x132   :  { %v5135_v22 = vpack.c.bf16 %v1216_v5, %v1215_v4  ;;  %v5153_v61 = vpop.permute.xlu0 %470 }
 0x133   :  { %v976_v31 = vpop.f32.mrb[4].mxu0 }
 0x134   :  { %3254 = vperm.xlu0 %3974, %v3234_v6   ;;  %v977_v32 = vadd.f32 %v976_v31, %v4756_v3  ;;  %v978_v35 = vpop.f32.mrb[5].mxu0  ;;  %v3238_v6 = vld [vmem:[%s5874_s10 + $0x28] sm:$0xff]  ;;  %v5161_v31 = vpop.permute.xlu1 %475 }
 0x135   :  { %3259 = vperm.xlu1 %3975, %v3235_v18   ;;  %v979_v49 = vpop.f32.mrb[6].mxu0  ;;  %v3239_v18 = vld [vmem:[%s5874_s10 + $0x30] sm:$0xff]  ;;  %5880 = vst [vmem:[#allocation9_spill] sm:$0xff] %v5161_v31 }
 0x136   :  { %v980_v3 = vadd.f32 %v979_v49, %v4767_v7  ;;  %v981_v56 = vpop.f32.mrb[7].mxu0  ;;  %v1217_v4 = vmax.f32 %v977_v32, 0.0  ;;  %v4081_v49 = vld [vmem:[%s5865_s1 + $0x1d0] ss:$8 sps:$4 sm:$0xff]  }
 0x137   :  { %v5178_v56 = vpop.permute.xlu0 %480 }
 0x138   :  { %3264 = vperm.xlu0 %3974, %v3236_v41   ;;  %v1218_v5 = vmax.f32 %v980_v3, 0.0  ;;  %1191 = vmatmul.mubr.bf16.gmra.mrb[112].mxu0 %v4078_v50  ;;  %v3241_v50 = vld [vmem:[%s5874_s10 + $0x40] sm:$0xff]  ;;  %5881 = vst [vmem:[#allocation10_spill] sm:$0xff] %v5178_v56 }
 0x139   :  { %3269 = vperm.xlu1 %3975, %v3237_v42   ;;  %1198 = vmatprep.mubr.bf16.mxu0 %v4079_v52  ;;  %v3240_v42 = vld [vmem:[%s5874_s10 + $0x38] sm:$0xff]  ;;  %v4082_v3 = vld [vmem:[%s5865_s1 + $0x1e4] ss:$8 sps:$4 sm:$0xff]  }
 0x13a   :  { %v5163_v7 = vpack.c.bf16 %v1218_v5, %v1217_v4  ;;  %v5181_v4 = vpop.permute.xlu1 %485 }
 0x13b   :  { %v984_v35 = vpop.f32.mrb[8].mxu0  ;;  %5882 = vst [vmem:[#allocation11_spill] sm:$0xff] %v5181_v4 }
 0x13c   :  { %3274 = vperm.xlu0 %3974, %v3238_v6   ;;  %v985_v32 = vadd.f32 %v984_v35, %v4794_v17  ;;  %v986_v41 = vpop.f32.mrb[9].mxu0  ;;  %v3242_v35 = vld [vmem:[%s5874_s10 + $0x48] sm:$0xff] }
 0x13d   :  { %3279 = vperm.xlu1 %3975, %v3239_v18   ;;  %v987_v52 = vpop.f32.mrb[10].mxu0  ;;  %v3243_v41 = vld [vmem:[%s5874_s10 + $0x50] sm:$0xff] }
 0x13e   :  { %v988_v17 = vadd.f32 %v987_v52, %v4802_v20  ;;  %v989_v5 = vpop.f32.mrb[11].mxu0  ;;  %v1219_v6 = vmax.f32 %v985_v32, 0.0  ;;  %v5191_v52 = vpop.permute.xlu0 %490 }
 0x13f   :  { %5883 = vst [vmem:[#allocation12_spill] sm:$0xff] %v5191_v52 }
 0x140   :  { %3284 = vperm.xlu0 %3974, %v3240_v42   ;;  %v1220_v18 = vmax.f32 %v988_v17, 0.0  ;;  %1199 = vmatmul.mubr.bf16.gmra.mrb[116].mxu0 %v4081_v49  ;;  %v3245_v49 = vld [vmem:[%s5874_s10 + $0x60] sm:$0xff]  ;;  %v5203_v17 = vpop.permute.xlu1 %495 }
 0x141   :  { %3289 = vperm.xlu1 %3975, %v3241_v50   ;;  %1206 = vmatprep.mubr.bf16.mxu0 %v4082_v3  ;;  %v3244_v50 = vld [vmem:[%s5874_s10 + $0x58] sm:$0xff]  ;;  %v4084_v3 = vld [vmem:[%s5865_s1 + $0x1e0] ss:$8 sps:$4 sm:$0xff]   ;;  %5884 = vst [vmem:[#allocation13_spill] sm:$0xff] %v5203_v17 }
 0x142   :  { %v5189_v1 = vpack.c.bf16 %v1220_v18, %v1219_v6 }
 0x143   :  { %v992_v20 = vpop.f32.mrb[12].mxu0 }
 0x144   :  { %3294 = vperm.xlu0 %3974, %v3242_v35   ;;  %v993_v32 = vadd.f32 %v992_v20, %v4826_v29  ;;  %v994_v42 = vpop.f32.mrb[13].mxu0  ;;  %v3513_v20 = vld [vmem:[#allocation2] sm:$0x1]  ;;  %v5213_v4 = vpop.permute.xlu1 %505 }
 0x145   :  { %3299 = vperm.xlu1 %3975, %v3243_v41   ;;  %v995_v5 = vpop.f32.mrb[14].mxu0  ;;  %v3246_v41 = vld [vmem:[%s5874_s10 + $0x68] sm:$0xf]  ;;  %v5209_v42 = vpop.permute.xlu0 %500  ;;  %5886 = vst [vmem:[#allocation15_spill] sm:$0xff] %v5213_v4 }
 0x146   :  { %v996_v6 = vadd.f32 %v995_v5, %v4837_v33  ;;  %v997_v18 = vpop.f32.mrb[15].mxu0  ;;  %v1221_v29 = vmax.f32 %v993_v32, 0.0  ;;  %5885 = vst [vmem:[#allocation14_spill] sm:$0xff] %v5209_v42 }
 0x148   :  { %3304 = vperm.xlu0 %3974, %v3244_v50   ;;  %v1222_v35 = vmax.f32 %v996_v6, 0.0  ;;  %1207 = vmatmul.mubr.bf16.gmra.mrb[120].mxu0 %v4084_v3 }
 0x149   :  { %3309 = vperm.xlu1 %3975, %v3245_v49  }
 0x14a   :  { %v5211_v52 = vpack.c.bf16 %v1222_v35, %v1221_v29 }
 0x14b   :  { %v1000_v33 = vpop.f32.mrb[16].mxu0 }
 0x14c   :  { %3314 = vperm.xlu0 %3974, %v3246_v41   ;;  %v1001_v50 = vadd.f32 %v1000_v33, %v4864_v43  ;;  %v1002_v49 = vpop.f32.mrb[17].mxu0 }
 0x14d   :  { %3516 = vperm.xlu1 %3975, %v3513_v20   ;;  %v1003_v32 = vpop.f32.mrb[18].mxu0 }
 0x14e   :  { %v1004_v3 = vadd.f32 %v1003_v32, %v4872_v46  ;;  %v1005_v5 = vpop.f32.mrb[19].mxu0  ;;  %v1223_v6 = vmax.f32 %v1001_v50, 0.0 }
 0x150   :  { %v1224_v18 = vmax.f32 %v1004_v3, 0.0 }
 0x152   :  { %v5217_v17 = vpack.c.bf16 %v1224_v18, %v1223_v6 }
 0x153   :  { %v1008_v56 = vpop.f32.mrb[20].mxu0 }
 0x154   :  { %v1009_v29 = vadd.f32 %v1008_v56, %v4896_v59  ;;  %v1010_v35 = vpop.f32.mrb[21].mxu0 }
 0x155   :  { %v1011_v42 = vpop.f32.mrb[22].mxu0 }
 0x156   :  { %v1012_v41 = vadd.f32 %v1011_v42, %v4907_v2  ;;  %v1013_v20 = vpop.f32.mrb[23].mxu0  ;;  %v1225_v4 = vmax.f32 %v1009_v29, 0.0 }
 0x158   :  { %v1226_v31 = vmax.f32 %v1012_v41, 0.0 }
 0x15a   :  { %v5221_v43 = vpack.c.bf16 %v1226_v31, %v1225_v4 }
 0x15b   :  { %v1016_v33 = vpop.f32.mrb[24].mxu0 }
 0x15c   :  { %v1017_v46 = vadd.f32 %v1016_v33, %v4934_v16  ;;  %v1018_v49 = vpop.f32.mrb[25].mxu0 }
 0x15d   :  { %v1019_v50 = vpop.f32.mrb[26].mxu0 }
 0x15e   :  { %v1020_v32 = vadd.f32 %v1019_v50, %v4942_v21  ;;  %v1021_v3 = vpop.f32.mrb[27].mxu0  ;;  %v1227_v5 = vmax.f32 %v1017_v46, 0.0 }
 0x160   :  { %v1228_v6 = vmax.f32 %v1020_v32, 0.0 }
 0x162   :  { %v5225_v59 = vpack.c.bf16 %v1228_v6, %v1227_v5 }
 0x163   :  { %v1024_v56 = vpop.f32.mrb[28].mxu0 }
 0x164   :  { %v1025_v2 = vadd.f32 %v1024_v56, %v4966_v34  ;;  %v1026_v42 = vpop.f32.mrb[29].mxu0 }
 0x165   :  { %v1027_v18 = vpop.f32.mrb[30].mxu0 }
 0x166   :  { %v1028_v31 = vadd.f32 %v1027_v18, %v4977_v40  ;;  %v1029_v4 = vpop.f32.mrb[31].mxu0  ;;  %v1229_v29 = vmax.f32 %v1025_v2, 0.0 }
 0x168   :  { %v1230_v35 = vmax.f32 %v1028_v31, 0.0 }
 0x16a   :  { %v5229_v16 = vpack.c.bf16 %v1230_v35, %v1229_v29 }
 0x16b   :  { %v1032_v41 = vpop.f32.mrb[32].mxu0 }
 0x16c   :  { %v1033_v21 = vadd.f32 %v1032_v41, %v4708_v48  ;;  %v1034_v20 = vpop.f32.mrb[33].mxu0 }
 0x16d   :  { %v1035_v33 = vpop.f32.mrb[34].mxu0 }
 0x16e   :  { %v1036_v46 = vadd.f32 %v1035_v33, %v4724_v54  ;;  %v1037_v49 = vpop.f32.mrb[35].mxu0  ;;  %v1231_v50 = vmax.f32 %v1033_v21, 0.0 }
 0x170   :  { %v1232_v32 = vmax.f32 %v1036_v46, 0.0 }
 0x172   :  { %v1285_v34 = vpack.c.bf16 %v1232_v32, %v1231_v50 }
 0x173   :  { %v1040_v3 = vpop.f32.mrb[36].mxu0 }
 0x174   :  { %v1041_v5 = vadd.f32 %v1040_v3, %v4746_v62  ;;  %v1042_v40 = vpop.f32.mrb[37].mxu0  ;;  %3835 = vmatprep.subr.bf16.mxu1 %v1285_v34 }
 0x175   :  { %v1043_v6 = vpop.f32.mrb[38].mxu0  ;;  %3836 = vmatpush3.bf16.msra.mxu1 %v5135_v22 }
 0x176   :  { %v1044_v56 = vadd.f32 %v1043_v6, %v4748_v63  ;;  %v1045_v2 = vpop.f32.mrb[39].mxu0  ;;  %v1233_v48 = vmax.f32 %v1041_v5, 0.0 }
 0x178   :  { %v1234_v42 = vmax.f32 %v1044_v56, 0.0 }
 0x17a   :  { %v1286_v18 = vpack.c.bf16 %v1234_v42, %v1233_v48 }
 0x17b   :  { %v1048_v31 = vpop.f32.mrb[40].mxu0 }
 0x17c   :  { %v1049_v54 = vadd.f32 %v1048_v31, %v4778_v11  ;;  %v1050_v4 = vpop.f32.mrb[41].mxu0  ;;  %3837 = vmatprep.subr.bf16.mxu1 %v1286_v18 }
 0x17d   :  { %v1051_v29 = vpop.f32.mrb[42].mxu0  ;;  %3838 = vmatpush3.bf16.msra.mxu1 %v5163_v7 }
 0x17e   :  { %v1052_v62 = vadd.f32 %v1051_v29, %v4780_v12  ;;  %v1053_v35 = vpop.f32.mrb[43].mxu0  ;;  %v1235_v41 = vmax.f32 %v1049_v54, 0.0 }
 0x180   :  { %v1236_v21 = vmax.f32 %v1052_v62, 0.0 }
 0x182   :  { %v1287_v22 = vpack.c.bf16 %v1236_v21, %v1235_v41 }
 0x183   :  { %v1056_v20 = vpop.f32.mrb[44].mxu0 }
 0x184   :  { %v1057_v63 = vadd.f32 %v1056_v20, %v4816_v25  ;;  %v1058_v33 = vpop.f32.mrb[45].mxu0  ;;  %3839 = vmatprep.subr.bf16.mxu1 %v1287_v22 }
 0x185   :  { %v1059_v46 = vpop.f32.mrb[46].mxu0  ;;  %3840 = vmatpush3.bf16.msra.mxu1 %v5189_v1 }
 0x186   :  { %v1060_v11 = vadd.f32 %v1059_v46, %v4818_v26  ;;  %v1061_v49 = vpop.f32.mrb[47].mxu0  ;;  %v1237_v50 = vmax.f32 %v1057_v63, 0.0 }
 0x188   :  { %v1238_v32 = vmax.f32 %v1060_v11, 0.0 }
 0x18a   :  { %v1288_v7 = vpack.c.bf16 %v1238_v32, %v1237_v50 }
 0x18b   :  { %v1064_v34 = vpop.f32.mrb[48].mxu0 }
 0x18c   :  { %v1065_v12 = vadd.f32 %v1064_v34, %v4848_v37  ;;  %v1066_v3 = vpop.f32.mrb[49].mxu0  ;;  %3841 = vmatprep.subr.bf16.mxu1 %v1288_v7  ;;  %v5887_v7 = vmov 0  }
 0x18d   :  { %v1067_v5 = vpop.f32.mrb[50].mxu0  ;;  %3842 = vmatpush3.bf16.msra.mxu1 %v5211_v52 }
 0x18e   :  { %v1068_v25 = vadd.f32 %v1067_v5, %v4850_v38  ;;  %v1069_v40 = vpop.f32.mrb[51].mxu0  ;;  %v1239_v6 = vmax.f32 %v1065_v12, 0.0 }
 0x190   :  { %v1240_v56 = vmax.f32 %v1068_v25, 0.0 }
 0x192   :  { %v1289_v1 = vpack.c.bf16 %v1240_v56, %v1239_v6 }
 0x193   :  { %v1072_v2 = vpop.f32.mrb[52].mxu0 }
 0x194   :  { %v1073_v26 = vadd.f32 %v1072_v2, %v4886_v53  ;;  %v1074_v48 = vpop.f32.mrb[53].mxu0  ;;  %3843 = vmatprep.subr.bf16.mxu1 %v1289_v1 }
 0x195   :  { %v1075_v42 = vpop.f32.mrb[54].mxu0  ;;  %3844 = vmatpush3.bf16.msra.mxu1 %v5217_v17 }
 0x196   :  { %v1076_v37 = vadd.f32 %v1075_v42, %v4888_v55  ;;  %v1077_v18 = vpop.f32.mrb[55].mxu0  ;;  %v1241_v31 = vmax.f32 %v1073_v26, 0.0 }
 0x197   :  { %v4093_v18 = vld [vmem:[%s5867_s3 + $0x40] ss:$16 sps:$4 sm:$0xff]  }
 0x198   :  { %v1242_v54 = vmax.f32 %v1076_v37, 0.0 }
 0x19a   :  { %v1290_v52 = vpack.c.bf16 %v1242_v54, %v1241_v31 }
 0x19b   :  { %v1080_v4 = vpop.f32.mrb[56].mxu0 }
 0x19c   :  { %v1081_v38 = vadd.f32 %v1080_v4, %v4918_v8  ;;  %v1082_v29 = vpop.f32.mrb[57].mxu0  ;;  %3845 = vmatprep.subr.bf16.mxu1 %v1290_v52 }
 0x19d   :  { %v1083_v62 = vpop.f32.mrb[58].mxu0  ;;  %3846 = vmatpush3.bf16.msra.mxu1 %v5221_v43 }
 0x19e   :  { %v1084_v53 = vadd.f32 %v1083_v62, %v4920_v9  ;;  %v1085_v35 = vpop.f32.mrb[59].mxu0  ;;  %v1243_v41 = vmax.f32 %v1081_v38, 0.0 }
 0x19f   :  { %v4096_v35 = vld [vmem:[%s5867_s3 + $0x60] ss:$16 sps:$4 sm:$0xff]  }
 0x1a0   :  { %v1244_v21 = vmax.f32 %v1084_v53, 0.0 }
 0x1a2   :  { %v1291_v17 = vpack.c.bf16 %v1244_v21, %v1243_v41 }
 0x1a3   :  { %v1088_v22 = vpop.f32.mrb[60].mxu0 }
 0x1a4   :  { %v1089_v55 = vadd.f32 %v1088_v22, %v4956_v28  ;;  %v1090_v20 = vpop.f32.mrb[61].mxu0  ;;  %3847 = vmatprep.subr.bf16.mxu1 %v1291_v17  ;;  %v4085_v28 = vld [vmem:[%s5867_s3] ss:$16 sps:$4 sm:$0xff]  }
 0x1a5   :  { %v1091_v63 = vpop.f32.mrb[62].mxu0  ;;  %3848 = vmatpush3.bf16.msra.mxu1 %v5225_v59 }
 0x1a6   :  { %v1092_v8 = vadd.f32 %v1091_v63, %v4958_v30  ;;  %v1093_v33 = vpop.f32.mrb[63].mxu0  ;;  %v1245_v46 = vmax.f32 %v1089_v55, 0.0  ;;  %v4088_v30 = vld [vmem:[%s5867_s3 + $0x24] ss:$16 sps:$4 sm:$0xff]  }
 0x1a7   :  { %v4099_v33 = vld [vmem:[%s5867_s3 + $0x80] ss:$16 sps:$4 sm:$0xff]  }
 0x1a8   :  { %v1246_v11 = vmax.f32 %v1092_v8, 0.0 }
 0x1aa   :  { %v1292_v43 = vpack.c.bf16 %v1246_v11, %v1245_v46 }
 0x1ab   :  { %v1096_v49 = vpop.f32.mrb[64].mxu0 }
 0x1ac   :  { %v1097_v9 = vadd.f32 %v1096_v49, %v4988_v45  ;;  %v1098_v50 = vpop.f32.mrb[65].mxu0  ;;  %3849 = vmatprep.subr.bf16.mxu1 %v1292_v43 }
 0x1ad   :  { %v1099_v32 = vpop.f32.mrb[66].mxu0  ;;  %3850 = vmatpush3.bf16.msra.mxu1 %v5229_v16  ;;  %v4090_v16 = vld [vmem:[%s5867_s3 + $0x20] ss:$16 sps:$4 sm:$0xff]  }
 0x1ae   :  { %v1100_v59 = vadd.f32 %v1099_v32, %v4990_v47  ;;  %2032 = vmatprep.subr.bf16.mxu1 %v5887_v7  ;;  %v1101_v34 = vpop.f32.mrb[67].mxu0  ;;  %v1247_v12 = vmax.f32 %v1097_v9, 0.0  ;;  %v4091_v47 = vld [vmem:[%s5867_s3 + $0x44] ss:$16 sps:$4 sm:$0xff]  }
 0x1b0   :  { %v1248_v45 = vmax.f32 %v1100_v59, 0.0  ;;  %1912 = vmatmul.mubr.bf16.vlgmr.msra.gmra.mrb[0].mxu1 %v4085_v28 }
 0x1b1   :  { %1919 = vmatprep.mubr.bf16.mxu1 %v4088_v30  ;;  %v4102_v30 = vld [vmem:[%s5867_s3 + $0xa0] ss:$16 sps:$4 sm:$0xff]  }
 0x1b2   :  { %v1293_v3 = vpack.c.bf16 %v1248_v45, %v1247_v12 }
 0x1b3   :  { %v1104_v5 = vpop.f32.mrb[68].mxu0 }
 0x1b4   :  { %v1105_v25 = vadd.f32 %v1104_v5, %v5004_v58  ;;  %v1106_v40 = vpop.f32.mrb[69].mxu0  ;;  %2033 = vmatpush1.bf16.msra.mxu1 %v1293_v3 }
 0x1b5   :  { %v1107_v6 = vpop.f32.mrb[70].mxu0  ;;  %2034 = vmatprep.subr.bf16.mxu1 %v5887_v7 }
 0x1b6   :  { %v1108_v56 = vadd.f32 %v1107_v6, %v5012_v0  ;;  %v1109_v1 = vpop.f32.mrb[71].mxu0  ;;  %v1249_v2 = vmax.f32 %v1105_v25, 0.0  ;;  %v4094_v0 = vld [vmem:[%s5867_s3 + $0x64] ss:$16 sps:$4 sm:$0xff]  }
 0x1b8   :  { %v1250_v26 = vmax.f32 %v1108_v56, 0.0  ;;  %1920 = vmatmul.mubr.bf16.gmra.mrb[4].mxu1 %v4090_v16  ;;  %v4105_v16 = vld [vmem:[%s5867_s3 + $0xc0] ss:$16 sps:$4 sm:$0xff]  }
 0x1b9   :  { %1927 = vmatprep.mubr.bf16.mxu1 %v4091_v47 }
 0x1ba   :  { %v1294_v58 = vpack.c.bf16 %v1250_v26, %v1249_v2 }
 0x1bb   :  { %v1112_v48 = vpop.f32.mrb[72].mxu0 }
 0x1bc   :  { %v1113_v42 = vadd.f32 %v1112_v48, %v5026_v13  ;;  %v1114_v37 = vpop.f32.mrb[73].mxu0  ;;  %2035 = vmatpush1.bf16.msra.mxu1 %v1294_v58 }
 0x1bd   :  { %v1115_v31 = vpop.f32.mrb[74].mxu0  ;;  %2036 = vmatprep.subr.bf16.mxu1 %v5887_v7 }
 0x1be   :  { %v1116_v54 = vadd.f32 %v1115_v31, %v5028_v14  ;;  %v1117_v52 = vpop.f32.mrb[75].mxu0  ;;  %v1251_v4 = vmax.f32 %v1113_v42, 0.0  ;;  %v4097_v14 = vld [vmem:[%s5867_s3 + $0x84] ss:$16 sps:$4 sm:$0xff]   ;;  %v4108_v42 = vld [vmem:[%s5867_s3 + $0xe0] ss:$16 sps:$4 sm:$0xff]  }
 0x1c0   :  { %v1252_v38 = vmax.f32 %v1116_v54, 0.0  ;;  %1928 = vmatmul.mubr.bf16.gmra.mrb[8].mxu1 %v4093_v18 }
 0x1c1   :  { %1935 = vmatprep.mubr.bf16.mxu1 %v4094_v0 }
 0x1c2   :  { %v1295_v13 = vpack.c.bf16 %v1252_v38, %v1251_v4 }
 0x1c3   :  { %v1120_v29 = vpop.f32.mrb[76].mxu0 }
 0x1c4   :  { %v1121_v62 = vadd.f32 %v1120_v29, %v5036_v19  ;;  %v1122_v53 = vpop.f32.mrb[77].mxu0  ;;  %2037 = vmatpush1.bf16.msra.mxu1 %v1295_v13  ;;  %v4111_v13 = vld [vmem:[%s5867_s3 + $0x100] ss:$16 sps:$4 sm:$0xff]  }
 0x1c5   :  { %v1123_v41 = vpop.f32.mrb[78].mxu0  ;;  %2038 = vmatprep.subr.bf16.mxu1 %v5887_v7 }
 0x1c6   :  { %v1124_v21 = vadd.f32 %v1123_v41, %v5047_v27  ;;  %v1125_v17 = vpop.f32.mrb[79].mxu0  ;;  %v1253_v22 = vmax.f32 %v1121_v62, 0.0  ;;  %v4100_v27 = vld [vmem:[%s5867_s3 + $0xa4] ss:$16 sps:$4 sm:$0xff]  }
 0x1c8   :  { %v1254_v55 = vmax.f32 %v1124_v21, 0.0  ;;  %1936 = vmatmul.mubr.bf16.gmra.mrb[12].mxu1 %v4096_v35 }
 0x1c9   :  { %1943 = vmatprep.mubr.bf16.mxu1 %v4097_v14 }
 0x1ca   :  { %v1296_v19 = vpack.c.bf16 %v1254_v55, %v1253_v22  ;;  %v4114_v22 = vld [vmem:[%s5867_s3 + $0x120] ss:$16 sps:$4 sm:$0xff]  }
 0x1cb   :  { %v1128_v20 = vpop.f32.mrb[80].mxu0 }
 0x1cc   :  { %v1129_v63 = vadd.f32 %v1128_v20, %v5058_v36  ;;  %v1130_v8 = vpop.f32.mrb[81].mxu0  ;;  %2039 = vmatpush1.bf16.msra.mxu1 %v1296_v19  ;;  %v5888_v19 = vld [vmem:[#allocation9_spill] sm:$0xff] }
 0x1cd   :  { %v1131_v46 = vpop.f32.mrb[82].mxu0  ;;  %2040 = vmatprep.subr.bf16.mxu1 %v5887_v7 }
 0x1ce   :  { %v1132_v11 = vadd.f32 %v1131_v46, %v5060_v39  ;;  %v1133_v43 = vpop.f32.mrb[83].mxu0  ;;  %v1255_v49 = vmax.f32 %v1129_v63, 0.0  ;;  %v4103_v39 = vld [vmem:[%s5867_s3 + $0xc4] ss:$16 sps:$4 sm:$0xff]  }
 0x1d0   :  { %v1256_v9 = vmax.f32 %v1132_v11, 0.0  ;;  %1944 = vmatmul.mubr.bf16.gmra.mrb[16].mxu1 %v4099_v33 }
 0x1d1   :  { %1951 = vmatprep.mubr.bf16.mxu1 %v4100_v27  ;;  %v5889_v27 = vld [vmem:[#allocation10_spill] sm:$0xff] }
 0x1d2   :  { %v1297_v36 = vpack.c.bf16 %v1256_v9, %v1255_v49  ;;  %v4117_v49 = vld [vmem:[%s5867_s3 + $0x140] ss:$16 sps:$4 sm:$0xff]  }
 0x1d3   :  { %v1136_v50 = vpop.f32.mrb[84].mxu0 }
 0x1d4   :  { %v1137_v28 = vadd.f32 %v1136_v50, %v5074_v51  ;;  %v1138_v32 = vpop.f32.mrb[85].mxu0  ;;  %2041 = vmatpush1.bf16.msra.mxu1 %v1297_v36  ;;  %v4118_v36 = vld [vmem:[%s5867_s3 + $0x164] ss:$16 sps:$4 sm:$0xff]  }
 0x1d5   :  { %v1139_v59 = vpop.f32.mrb[86].mxu0  ;;  %2042 = vmatprep.subr.bf16.mxu1 %v5887_v7  ;;  %v5890_v50 = vld [vmem:[#allocation11_spill] sm:$0xff] }
 0x1d6   :  { %v1140_v34 = vadd.f32 %v1139_v59, %v5082_v60  ;;  %v1141_v12 = vpop.f32.mrb[87].mxu0  ;;  %v1257_v45 = vmax.f32 %v1137_v28, 0.0  ;;  %v4106_v60 = vld [vmem:[%s5867_s3 + $0xe4] ss:$16 sps:$4 sm:$0xff]  }
 0x1d7   :  { %v5891_v12 = vld [vmem:[#allocation12_spill] sm:$0xff] }
 0x1d8   :  { %v1258_v3 = vmax.f32 %v1140_v34, 0.0  ;;  %1952 = vmatmul.mubr.bf16.gmra.mrb[20].mxu1 %v4102_v30 }
 0x1d9   :  { %1959 = vmatprep.mubr.bf16.mxu1 %v4103_v39 }
 0x1da   :  { %v1298_v51 = vpack.c.bf16 %v1258_v3, %v1257_v45 }
 0x1db   :  { %v1144_v5 = vpop.f32.mrb[88].mxu0 }
 0x1dc   :  { %v1145_v25 = vadd.f32 %v1144_v5, %v5096_v10  ;;  %v1146_v40 = vpop.f32.mrb[89].mxu0  ;;  %2043 = vmatpush1.bf16.msra.mxu1 %v1298_v51  ;;  %v4120_v51 = vld [vmem:[%s5867_s3 + $0x160] ss:$16 sps:$4 sm:$0xff]  }
 0x1dd   :  { %v1147_v6 = vpop.f32.mrb[90].mxu0  ;;  %2044 = vmatprep.subr.bf16.mxu1 %v5887_v7  ;;  %v5892_v40 = vld [vmem:[#allocation13_spill] sm:$0xff] }
 0x1de   :  { %v1148_v47 = vadd.f32 %v1147_v6, %v5098_v15  ;;  %v1149_v56 = vpop.f32.mrb[91].mxu0  ;;  %v1259_v1 = vmax.f32 %v1145_v25, 0.0  ;;  %v4109_v15 = vld [vmem:[%s5867_s3 + $0x104] ss:$16 sps:$4 sm:$0xff]  }
 0x1df   :  { %v4121_v25 = vld [vmem:[%s5867_s3 + $0x184] ss:$16 sps:$4 sm:$0xff]  }
 0x1e0   :  { %v1260_v2 = vmax.f32 %v1148_v47, 0.0  ;;  %1960 = vmatmul.mubr.bf16.gmra.mrb[24].mxu1 %v4105_v16 }
 0x1e1   :  { %1967 = vmatprep.mubr.bf16.mxu1 %v4106_v60 }
 0x1e2   :  { %v1299_v10 = vpack.c.bf16 %v1260_v2, %v1259_v1  ;;  %v5893_v2 = vld [vmem:[#allocation14_spill] sm:$0xff] }
 0x1e3   :  { %v1152_v26 = vpop.f32.mrb[92].mxu0 }
 0x1e4   :  { %v1153_v58 = vadd.f32 %v1152_v26, %v5106_v24  ;;  %v1154_v48 = vpop.f32.mrb[93].mxu0  ;;  %2045 = vmatpush1.bf16.msra.mxu1 %v1299_v10 }
 0x1e5   :  { %v1155_v37 = vpop.f32.mrb[94].mxu0  ;;  %2046 = vmatprep.subr.bf16.mxu1 %v5887_v7 }
 0x1e6   :  { %v1156_v18 = vadd.f32 %v1155_v37, %v5118_v44  ;;  %v1157_v31 = vpop.f32.mrb[95].mxu0  ;;  %v1261_v0 = vmax.f32 %v1153_v58, 0.0  ;;  %v4112_v44 = vld [vmem:[%s5867_s3 + $0x124] ss:$16 sps:$4 sm:$0xff]   ;;  %v4123_v58 = vld [vmem:[%s5867_s3 + $0x180] ss:$16 sps:$4 sm:$0xff]  }
 0x1e7   :  { %v5894_v37 = vld [vmem:[#allocation15_spill] sm:$0xff] }
 0x1e8   :  { %v1262_v54 = vmax.f32 %v1156_v18, 0.0  ;;  %1968 = vmatmul.mubr.bf16.gmra.mrb[28].mxu1 %v4108_v42  ;;  %v4124_v42 = vld [vmem:[%s5867_s3 + $0x1a4] ss:$16 sps:$4 sm:$0xff]  }
 0x1e9   :  { %1975 = vmatprep.mubr.bf16.mxu1 %v4109_v15 }
 0x1ea   :  { %v1300_v24 = vpack.c.bf16 %v1262_v54, %v1261_v0 }
 0x1eb   :  { %v1160_v52 = vpop.f32.mrb[96].mxu0 }
 0x1ec   :  { %v1161_v4 = vadd.f32 %v1160_v52, %v5133_v57  ;;  %v1162_v38 = vpop.f32.mrb[97].mxu0  ;;  %2047 = vmatpush1.bf16.msra.mxu1 %v1300_v24  ;;  %v511_v24 = vpop.permute.xlu0 %510 }
 0x1ed   :  { %v1163_v29 = vpop.f32.mrb[98].mxu0  ;;  %2048 = vmatprep.subr.bf16.mxu1 %v5887_v7 }
 0x1ee   :  { %v1164_v62 = vadd.f32 %v1163_v29, %v5137_v23  ;;  %v1165_v53 = vpop.f32.mrb[99].mxu0  ;;  %v1263_v35 = vmax.f32 %v1161_v4, 0.0  ;;  %v4115_v23 = vld [vmem:[%s5867_s3 + $0x144] ss:$16 sps:$4 sm:$0xff]   ;;  %v516_v29 = vpop.permute.xlu1 %515 }
 0x1f0   :  { %v1264_v41 = vmax.f32 %v1164_v62, 0.0  ;;  %1976 = vmatmul.mubr.bf16.gmra.mrb[32].mxu1 %v4111_v13  ;;  %v4126_v13 = vld [vmem:[%s5867_s3 + $0x1a0] ss:$16 sps:$4 sm:$0xff]   ;;  %v4127_v62 = vld [vmem:[%s5867_s3 + $0x1c4] ss:$16 sps:$4 sm:$0x3f]  }
 0x1f1   :  { %1983 = vmatprep.mubr.bf16.mxu1 %v4112_v44 }
 0x1f2   :  { %v1301_v57 = vpack.c.bf16 %v1264_v41, %v1263_v35 }
 0x1f3   :  { %v1168_v14 = vpop.f32.mrb[100].mxu0 }
 0x1f4   :  { %v1169_v21 = vadd.f32 %v1168_v14, %v5153_v61  ;;  %v1170_v17 = vpop.f32.mrb[101].mxu0  ;;  %2049 = vmatpush1.bf16.msra.mxu1 %v1301_v57 }
 0x1f5   :  { %v1171_v55 = vpop.f32.mrb[102].mxu0  ;;  %2050 = vmatprep.subr.bf16.mxu1 %v5887_v7 }
 0x1f6   :  { %v1172_v20 = vadd.f32 %v1171_v55, %v5888_v19  ;;  %v1173_v63 = vpop.f32.mrb[103].mxu0  ;;  %v1265_v8 = vmax.f32 %v1169_v21, 0.0  ;;  %v521_v21 = vpop.permute.xlu0 %520 }
 0x1f7   :  { %v526_v19 = vpop.permute.xlu1 %525  ;;  %v4132_v63 = vld [vmem:[%s5867_s3 + $0xc] ss:$16 sps:$4 sm:$0xff]  }
 0x1f8   :  { %v1266_v33 = vmax.f32 %v1172_v20, 0.0  ;;  %1984 = vmatmul.mubr.bf16.gmra.mrb[36].mxu1 %v4114_v22 }
 0x1f9   :  { %1991 = vmatprep.mubr.bf16.mxu1 %v4115_v23  ;;  %v4129_v23 = vld [vmem:[%s5867_s3 + $0x1c0] ss:$16 sps:$4 sm:$0x3f]  }
 0x1fa   :  { %v1302_v61 = vpack.c.bf16 %v1266_v33, %v1265_v8 }
 0x1fb   :  { %v1176_v46 = vpop.f32.mrb[104].mxu0 }
 0x1fc   :  { %v1177_v11 = vadd.f32 %v1176_v46, %v5889_v27  ;;  %v1178_v43 = vpop.f32.mrb[105].mxu0  ;;  %2051 = vmatpush1.bf16.msra.mxu1 %v1302_v61 }
 0x1fd   :  { %v1179_v9 = vpop.f32.mrb[106].mxu0  ;;  %2052 = vmatprep.subr.bf16.mxu1 %v5887_v7  ;;  %v4133_v43 = vld [vmem:[%s5867_s3 + $0x2c] ss:$16 sps:$4 sm:$0xff]  }
 0x1fe   :  { %v1180_v28 = vadd.f32 %v1179_v9, %v5890_v50  ;;  %v1181_v32 = vpop.f32.mrb[107].mxu0  ;;  %v1267_v30 = vmax.f32 %v1177_v11, 0.0  ;;  %v4130_v11 = vld [vmem:[%s5867_s3 + $0x8] ss:$16 sps:$4 sm:$0xff]   ;;  %v4136_v9 = vld [vmem:[%s5867_s3 + $0x4c] ss:$16 sps:$4 sm:$0xff]  }
 0x1ff   :  { %v4139_v50 = vld [vmem:[%s5867_s3 + $0x6c] ss:$16 sps:$4 sm:$0xff]  }
 0x200   :  { %v1268_v59 = vmax.f32 %v1180_v28, 0.0  ;;  %1992 = vmatmul.mubr.bf16.gmra.mrb[40].mxu1 %v4117_v49  ;;  %v4135_v49 = vld [vmem:[%s5867_s3 + $0x28] ss:$16 sps:$4 sm:$0xff]   ;;  %v4142_v32 = vld [vmem:[%s5867_s3 + $0x8c] ss:$16 sps:$4 sm:$0xff]  }
 0x201   :  { %1999 = vmatprep.mubr.bf16.mxu1 %v4118_v36  ;;  %v4138_v36 = vld [vmem:[%s5867_s3 + $0x48] ss:$16 sps:$4 sm:$0xff]  }
 0x202   :  { %v1303_v39 = vpack.c.bf16 %v1268_v59, %v1267_v30  ;;  %v4141_v28 = vld [vmem:[%s5867_s3 + $0x68] ss:$16 sps:$4 sm:$0xff]   ;;  %v4145_v59 = vld [vmem:[%s5867_s3 + $0xac] ss:$16 sps:$4 sm:$0xff]  }
 0x203   :  { %v1184_v34 = vpop.f32.mrb[108].mxu0  ;;  %v4144_v30 = vld [vmem:[%s5867_s3 + $0x88] ss:$16 sps:$4 sm:$0xff]  }
 0x204   :  { %v1185_v45 = vadd.f32 %v1184_v34, %v5891_v12  ;;  %v1186_v3 = vpop.f32.mrb[109].mxu0  ;;  %2053 = vmatpush1.bf16.msra.mxu1 %v1303_v39  ;;  %v4147_v39 = vld [vmem:[%s5867_s3 + $0xa8] ss:$16 sps:$4 sm:$0xff]   ;;  %v4148_v34 = vld [vmem:[%s5867_s3 + $0xcc] ss:$16 sps:$4 sm:$0xff]  }
 0x205   :  { %v1187_v5 = vpop.f32.mrb[110].mxu0  ;;  %2054 = vmatprep.subr.bf16.mxu1 %v5887_v7  ;;  %v4150_v12 = vld [vmem:[%s5867_s3 + $0xc8] ss:$16 sps:$4 sm:$0xff]  }
 0x206   :  { %v1188_v16 = vadd.f32 %v1187_v5, %v5892_v40  ;;  %v1189_v6 = vpop.f32.mrb[111].mxu0  ;;  %v1269_v60 = vmax.f32 %v1185_v45, 0.0  ;;  %v4151_v45 = vld [vmem:[%s5867_s3 + $0xec] ss:$16 sps:$4 sm:$0xff]   ;;  %v4153_v3 = vld [vmem:[%s5867_s3 + $0xe8] ss:$16 sps:$4 sm:$0xff]  }
 0x207   :  { %v4156_v5 = vld [vmem:[%s5867_s3 + $0x108] ss:$16 sps:$4 sm:$0xff]  }
 0x208   :  { %v1270_v47 = vmax.f32 %v1188_v16, 0.0  ;;  %2000 = vmatmul.mubr.bf16.gmra.mrb[44].mxu1 %v4120_v51  ;;  %v4154_v51 = vld [vmem:[%s5867_s3 + $0x10c] ss:$16 sps:$4 sm:$0xff]   ;;  %v4159_v40 = vld [vmem:[%s5867_s3 + $0x128] ss:$16 sps:$4 sm:$0xff]  }
 0x209   :  { %2007 = vmatprep.mubr.bf16.mxu1 %v4121_v25  ;;  %v4157_v25 = vld [vmem:[%s5867_s3 + $0x12c] ss:$16 sps:$4 sm:$0xff]   ;;  %v4162_v6 = vld [vmem:[%s5867_s3 + $0x148] ss:$16 sps:$4 sm:$0xff]  }
 0x20a   :  { %v1304_v56 = vpack.c.bf16 %v1270_v47, %v1269_v60  ;;  %v4160_v16 = vld [vmem:[%s5867_s3 + $0x14c] ss:$16 sps:$4 sm:$0xff]   ;;  %v4165_v47 = vld [vmem:[%s5867_s3 + $0x168] ss:$16 sps:$4 sm:$0xff]  }
 0x20b   :  { %v1192_v1 = vpop.f32.mrb[112].mxu0  ;;  %v4163_v60 = vld [vmem:[%s5867_s3 + $0x16c] ss:$16 sps:$4 sm:$0xff]  }
 0x20c   :  { %v1193_v10 = vadd.f32 %v1192_v1, %v5893_v2  ;;  %v1194_v26 = vpop.f32.mrb[113].mxu0  ;;  %2055 = vmatpush1.bf16.msra.mxu1 %v1304_v56  ;;  %v4166_v56 = vld [vmem:[%s5867_s3 + $0x18c] ss:$16 sps:$4 sm:$0xff]  }
 0x20d   :  { %v1195_v48 = vpop.f32.mrb[114].mxu0  ;;  %2056 = vmatprep.subr.bf16.mxu1 %v5887_v7 }
 0x20e   :  { %v1196_v15 = vadd.f32 %v1195_v48, %v5894_v37  ;;  %v1197_v18 = vpop.f32.mrb[115].mxu0  ;;  %v1271_v31 = vmax.f32 %v1193_v10, 0.0  ;;  %v4168_v10 = vld [vmem:[%s5867_s3 + $0x188] ss:$16 sps:$4 sm:$0xff]   ;;  %v4169_v48 = vld [vmem:[%s5867_s3 + $0x1ac] ss:$16 sps:$4 sm:$0xff]  }
 0x210   :  { %v1272_v0 = vmax.f32 %v1196_v15, 0.0  ;;  %2008 = vmatmul.mubr.bf16.gmra.mrb[48].mxu1 %v4123_v58 }
 0x211   :  { %2015 = vmatprep.mubr.bf16.mxu1 %v4124_v42 }
 0x212   :  { %v1305_v54 = vpack.c.bf16 %v1272_v0, %v1271_v31  ;;  %v4171_v31 = vld [vmem:[%s5867_s3 + $0x1a8] ss:$16 sps:$4 sm:$0xff]  }
 0x213   :  { %v1200_v52 = vpop.f32.mrb[116].mxu0 }
 0x214   :  { %v1201_v4 = vadd.f32 %v1200_v52, %v511_v24  ;;  %v1202_v38 = vpop.f32.mrb[117].mxu0  ;;  %2057 = vmatpush1.bf16.msra.mxu1 %v1305_v54  ;;  %v4172_v24 = vld [vmem:[%s5867_s3 + $0x1cc] ss:$16 sps:$4 sm:$0x3f]  }
 0x215   :  { %v1203_v44 = vpop.f32.mrb[118].mxu0  ;;  %2058 = vmatprep.subr.bf16.mxu1 %v5887_v7 }
 0x216   :  { %v1204_v53 = vadd.f32 %v1203_v44, %v516_v29  ;;  %v1205_v35 = vpop.f32.mrb[119].mxu0  ;;  %v1273_v41 = vmax.f32 %v1201_v4, 0.0  ;;  %v4174_v29 = vld [vmem:[%s5867_s3 + $0x1c8] ss:$16 sps:$4 sm:$0x3f]  }
 0x218   :  { %v1274_v57 = vmax.f32 %v1204_v53, 0.0  ;;  %2016 = vmatmul.mubr.bf16.gmra.mrb[52].mxu1 %v4126_v13 }
 0x219   :  { %2023 = vmatprep.mubr.bf16.mxu1 %v4127_v62 }
 0x21a   :  { %v1306_v14 = vpack.c.bf16 %v1274_v57, %v1273_v41 }
 0x21b   :  { %v1208_v17 = vpop.f32.mrb[120].mxu0 }
 0x21c   :  { %v1209_v22 = vadd.f32 %v1208_v17, %v521_v21  ;;  %v1210_v55 = vpop.f32.mrb[121].mxu0  ;;  %2059 = vmatpush1.bf16.msra.mxu1 %v1306_v14 }
 0x21d   :  { %v1211_v20 = vpop.f32.mrb[122].mxu0  ;;  %2060 = vmatprep.subr.bf16.mxu1 %v5887_v7 }
 0x21e   :  { %v1212_v8 = vadd.f32 %v1211_v20, %v526_v19  ;;  %v1213_v33 = vpop.f32.mrb[123].mxu0  ;;  %v1275_v61 = vmax.f32 %v1209_v22, 0.0 }
 0x220   :  { %v1276_v46 = vmax.f32 %v1212_v8, 0.0  ;;  %2024 = vmatmul.mubr.bf16.gmra.mrb[56].mxu1 %v4129_v23 }
 0x221   :  { %3723 = vmatprep.mubr.msk.bf16.mxu1 %vm1833_vm0, %v4132_v63 }
 0x222   :  { %v1307_v27 = vpack.c.bf16 %v1276_v46, %v1275_v61 }
 0x224   :  { %2061 = vmatpush1.bf16.msra.mxu1 %v1307_v27 }
 0x225   :  { %2589 = vmatprep.subr.bf16.mxu1 %v5887_v7 }
 0x228   :  { %2065 = vmatmul.mubr.bf16.vlgmr.msra.gmra.mrb[60].mxu1 %v4130_v11 }
 0x229   :  { %3724 = vmatprep.mubr.msk.bf16.mxu1 %vm1833_vm0, %v4133_v43 }
 0x230   :  { %2073 = vmatmul.mubr.bf16.gmra.mrb[64].mxu1 %v4135_v49 }
 0x231   :  { %3725 = vmatprep.mubr.msk.bf16.mxu1 %vm1833_vm0, %v4136_v9 }
 0x238   :  { %2081 = vmatmul.mubr.bf16.gmra.mrb[68].mxu1 %v4138_v36 }
 0x239   :  { %3726 = vmatprep.mubr.msk.bf16.mxu1 %vm1833_vm0, %v4139_v50 }
 0x240   :  { %2089 = vmatmul.mubr.bf16.gmra.mrb[72].mxu1 %v4141_v28 }
 0x241   :  { %3727 = vmatprep.mubr.msk.bf16.mxu1 %vm1833_vm0, %v4142_v32 }
 0x248   :  { %2097 = vmatmul.mubr.bf16.gmra.mrb[76].mxu1 %v4144_v30 }
 0x249   :  { %3728 = vmatprep.mubr.msk.bf16.mxu1 %vm1833_vm0, %v4145_v59 }
 0x250   :  { %2105 = vmatmul.mubr.bf16.gmra.mrb[80].mxu1 %v4147_v39 }
 0x251   :  { %3729 = vmatprep.mubr.msk.bf16.mxu1 %vm1833_vm0, %v4148_v34 }
 0x258   :  { %2113 = vmatmul.mubr.bf16.gmra.mrb[84].mxu1 %v4150_v12 }
 0x259   :  { %3730 = vmatprep.mubr.msk.bf16.mxu1 %vm1833_vm0, %v4151_v45 }
 0x260   :  { %2121 = vmatmul.mubr.bf16.gmra.mrb[88].mxu1 %v4153_v3 }
 0x261   :  { %3731 = vmatprep.mubr.msk.bf16.mxu1 %vm1833_vm0, %v4154_v51 }
 0x268   :  { %2129 = vmatmul.mubr.bf16.gmra.mrb[92].mxu1 %v4156_v5 }
 0x269   :  { %3732 = vmatprep.mubr.msk.bf16.mxu1 %vm1833_vm0, %v4157_v25 }
 0x270   :  { %2137 = vmatmul.mubr.bf16.gmra.mrb[96].mxu1 %v4159_v40 }
 0x271   :  { %3733 = vmatprep.mubr.msk.bf16.mxu1 %vm1833_vm0, %v4160_v16 }
 0x278   :  { %2145 = vmatmul.mubr.bf16.gmra.mrb[100].mxu1 %v4162_v6 }
 0x279   :  { %3734 = vmatprep.mubr.msk.bf16.mxu1 %vm1833_vm0, %v4163_v60 }
 0x280   :  { %2153 = vmatmul.mubr.bf16.gmra.mrb[104].mxu1 %v4165_v47 }
 0x281   :  { %3735 = vmatprep.mubr.msk.bf16.mxu1 %vm1833_vm0, %v4166_v56 }
 0x283   :  { %v3851_v1 = vpop.f32.mrb[0].mxu1 }
 0x284   :  { %v3852_v2 = vpop.f32.mrb[1].mxu1 }
 0x285   :  { %v5475_v26 = vadd.f32 %v3852_v2, %v3851_v1  ;;  %v3854_v58 = vpop.f32.mrb[2].mxu1 }
 0x286   :  { %v3855_v42 = vpop.f32.mrb[3].mxu1 }
 0x287   :  { %v5480_v37 = vadd.f32 %v3855_v42, %v3854_v58 }
 0x288   :  { %2161 = vmatmul.mubr.bf16.gmra.mrb[108].mxu1 %v4168_v10 }
 0x289   :  { %3736 = vmatprep.mubr.msk.bf16.mxu1 %vm1833_vm0, %v4169_v48 }
 0x28b   :  { %v3857_v15 = vpop.f32.mrb[4].mxu1 }
 0x28c   :  { %v3858_v18 = vpop.f32.mrb[5].mxu1 }
 0x28d   :  { %v5486_v0 = vadd.f32 %v3858_v18, %v3857_v15  ;;  %v3860_v54 = vpop.f32.mrb[6].mxu1 }
 0x28e   :  { %v3861_v52 = vpop.f32.mrb[7].mxu1 }
 0x28f   :  { %v5491_v4 = vadd.f32 %v3861_v52, %v3860_v54 }
 0x290   :  { %2169 = vmatmul.mubr.bf16.gmra.mrb[112].mxu1 %v4171_v31 }
 0x291   :  { %3737 = vmatprep.mubr.msk.bf16.mxu1 %vm1833_vm0, %v4172_v24 }
 0x293   :  { %v3863_v38 = vpop.f32.mrb[8].mxu1 }
 0x294   :  { %v3864_v13 = vpop.f32.mrb[9].mxu1 }
 0x295   :  { %v5497_v44 = vadd.f32 %v3864_v13, %v3863_v38  ;;  %v3866_v62 = vpop.f32.mrb[10].mxu1 }
 0x296   :  { %v3867_v53 = vpop.f32.mrb[11].mxu1 }
 0x297   :  { %v5499_v35 = vadd.f32 %v3867_v53, %v3866_v62 }
 0x298   :  { %2177 = vmatmul.mubr.bf16.gmra.mrb[116].mxu1 %v4174_v29 }
 0x29b   :  { %v3869_v41 = vpop.f32.mrb[12].mxu1 }
 0x29c   :  { %v3870_v57 = vpop.f32.mrb[13].mxu1 }
 0x29d   :  { %v5501_v14 = vadd.f32 %v3870_v57, %v3869_v41  ;;  %v3872_v21 = vpop.f32.mrb[14].mxu1 }
 0x29e   :  { %v3873_v17 = vpop.f32.mrb[15].mxu1 }
 0x29f   :  { %v5503_v22 = vadd.f32 %v3873_v17, %v3872_v21 }
 0x2a3   :  { %v3875_v55 = vpop.f32.mrb[16].mxu1 }
 0x2a4   :  { %v3876_v23 = vpop.f32.mrb[17].mxu1 }
 0x2a5   :  { %v5505_v19 = vadd.f32 %v3876_v23, %v3875_v55  ;;  %v3878_v20 = vpop.f32.mrb[18].mxu1 }
 0x2a6   :  { %v3879_v63 = vpop.f32.mrb[19].mxu1 }
 0x2a7   :  { %v5507_v8 = vadd.f32 %v3879_v63, %v3878_v20 }
 0x2ab   :  { %v3881_v33 = vpop.f32.mrb[20].mxu1 }
 0x2ac   :  { %v3882_v61 = vpop.f32.mrb[21].mxu1 }
 0x2ad   :  { %v5509_v46 = vadd.f32 %v3882_v61, %v3881_v33  ;;  %v3884_v27 = vpop.f32.mrb[22].mxu1 }
 0x2ae   :  { %v3885_v11 = vpop.f32.mrb[23].mxu1 }
 0x2af   :  { %v5511_v43 = vadd.f32 %v3885_v11, %v3884_v27 }
 0x2b3   :  { %v3887_v49 = vpop.f32.mrb[24].mxu1 }
 0x2b4   :  { %v3888_v9 = vpop.f32.mrb[25].mxu1 }
 0x2b5   :  { %v5513_v36 = vadd.f32 %v3888_v9, %v3887_v49  ;;  %v3890_v50 = vpop.f32.mrb[26].mxu1  ;;  %v4177_v9 = vld [vmem:[%s5869_s5 + $0x4] ss:$8 sps:$4 sm:$0xff]  }
 0x2b6   :  { %v3891_v28 = vpop.f32.mrb[27].mxu1  ;;  %3766 = vmatprep.mubr.msk.bf16.mxu1 %vm2542_vm1, %v4177_v9 }
 0x2b7   :  { %v5515_v32 = vadd.f32 %v3891_v28, %v3890_v50 }
 0x2bb   :  { %v3893_v30 = vpop.f32.mrb[28].mxu1 }
 0x2bc   :  { %v3894_v59 = vpop.f32.mrb[29].mxu1 }
 0x2bd   :  { %v5517_v39 = vadd.f32 %v3894_v59, %v3893_v30  ;;  %v3896_v34 = vpop.f32.mrb[30].mxu1  ;;  %v1401_v30 = vpop.permute.xlu0 %1400 }
 0x2be   :  { %v3897_v12 = vpop.f32.mrb[31].mxu1  ;;  %v1914_v59 = vadd.f32 %v5475_v26, %v1401_v30 }
 0x2bf   :  { %v5519_v45 = vadd.f32 %v3897_v12, %v3896_v34  ;;  %v1406_v34 = vpop.permute.xlu1 %1405 }
 0x2c3   :  { %v3899_v3 = vpop.f32.mrb[32].mxu1 }
 0x2c4   :  { %v3900_v51 = vpop.f32.mrb[33].mxu1 }
 0x2c5   :  { %v5521_v5 = vadd.f32 %v3900_v51, %v3899_v3  ;;  %v3902_v25 = vpop.f32.mrb[34].mxu1 }
 0x2c6   :  { %v3903_v40 = vpop.f32.mrb[35].mxu1 }
 0x2c7   :  { %v5523_v16 = vadd.f32 %v3903_v40, %v3902_v25  ;;  %v1917_v25 = vadd.f32 %v5480_v37, %v1406_v34 }
 0x2cb   :  { %v3905_v6 = vpop.f32.mrb[36].mxu1 }
 0x2cc   :  { %v3906_v60 = vpop.f32.mrb[37].mxu1 }
 0x2cd   :  { %v5525_v47 = vadd.f32 %v3906_v60, %v3905_v6  ;;  %v3908_v56 = vpop.f32.mrb[38].mxu1 }
 0x2ce   :  { %v3909_v1 = vpop.f32.mrb[39].mxu1 }
 0x2cf   :  { %v5527_v2 = vadd.f32 %v3909_v1, %v3908_v56 }
 0x2d3   :  { %v3911_v10 = vpop.f32.mrb[40].mxu1 }
 0x2d4   :  { %v3912_v58 = vpop.f32.mrb[41].mxu1 }
 0x2d5   :  { %v5529_v48 = vadd.f32 %v3912_v58, %v3911_v10  ;;  %v3914_v42 = vpop.f32.mrb[42].mxu1  ;;  %v1411_v10 = vpop.permute.xlu0 %1410 }
 0x2d6   :  { %v3915_v15 = vpop.f32.mrb[43].mxu1 }
 0x2d7   :  { %v5531_v18 = vadd.f32 %v3915_v15, %v3914_v42  ;;  %v1922_v42 = vadd.f32 %v5486_v0, %v1411_v10  ;;  %v1416_v15 = vpop.permute.xlu1 %1415 }
 0x2d8   :  { %v1925_v26 = vadd.f32 %v5491_v4, %v1416_v15 }
 0x2db   :  { %v3917_v31 = vpop.f32.mrb[44].mxu1 }
 0x2dc   :  { %v3918_v54 = vpop.f32.mrb[45].mxu1 }
 0x2dd   :  { %v5533_v24 = vadd.f32 %v3918_v54, %v3917_v31  ;;  %v3920_v52 = vpop.f32.mrb[46].mxu1 }
 0x2de   :  { %v3921_v38 = vpop.f32.mrb[47].mxu1 }
 0x2df   :  { %v5535_v13 = vadd.f32 %v3921_v38, %v3920_v52 }
 0x2e3   :  { %v3923_v29 = vpop.f32.mrb[48].mxu1 }
 0x2e4   :  { %v3924_v62 = vpop.f32.mrb[49].mxu1 }
 0x2e5   :  { %v5537_v53 = vadd.f32 %v3924_v62, %v3923_v29  ;;  %v3926_v41 = vpop.f32.mrb[50].mxu1 }
 0x2e6   :  { %v3927_v57 = vpop.f32.mrb[51].mxu1 }
 0x2e7   :  { %v5539_v21 = vadd.f32 %v3927_v57, %v3926_v41  ;;  %v1421_v57 = vpop.permute.xlu0 %1420 }
 0x2eb   :  { %v3929_v17 = vpop.f32.mrb[52].mxu1 }
 0x2ec   :  { %v3930_v55 = vpop.f32.mrb[53].mxu1 }
 0x2ed   :  { %v5541_v23 = vadd.f32 %v3930_v55, %v3929_v17  ;;  %v3932_v20 = vpop.f32.mrb[54].mxu1  ;;  %v1930_v55 = vadd.f32 %v5497_v44, %v1421_v57 }
 0x2ee   :  { %v3933_v63 = vpop.f32.mrb[55].mxu1 }
 0x2ef   :  { %v5543_v33 = vadd.f32 %v3933_v63, %v3932_v20  ;;  %v1426_v20 = vpop.permute.xlu1 %1425 }
 0x2f3   :  { %v3935_v61 = vpop.f32.mrb[56].mxu1 }
 0x2f4   :  { %v3936_v27 = vpop.f32.mrb[57].mxu1 }
 0x2f5   :  { %v5545_v11 = vadd.f32 %v3936_v27, %v3935_v61  ;;  %v3938_v49 = vpop.f32.mrb[58].mxu1  ;;  %v1933_v27 = vadd.f32 %v5499_v35, %v1426_v20 }
 0x2f6   :  { %v3939_v50 = vpop.f32.mrb[59].mxu1 }
 0x2f7   :  { %v5550_v28 = vadd.f32 %v3939_v50, %v3938_v49 }
 0x2fb   :  { %v2066_v12 = vpop.f32.mrb[60].mxu1 }
 0x2fc   :  { %v2067_v3 = vadd.f32 %v2066_v12, %v1914_v59  ;;  %v2068_v51 = vpop.f32.mrb[61].mxu1  ;;  %v1431_v59 = vpop.permute.xlu0 %1430 }
 0x2fd   :  { %v2069_v40 = vpop.f32.mrb[62].mxu1  ;;  %v1938_v12 = vadd.f32 %v5501_v14, %v1431_v59 }
 0x2fe   :  { %v2070_v6 = vadd.f32 %v2069_v40, %v1917_v25  ;;  %v2071_v60 = vpop.f32.mrb[63].mxu1  ;;  %v2185_v56 = vmax.f32 %v2067_v3, 0.0  ;;  %v1436_v3 = vpop.permute.xlu1 %1435 }
 0x2ff   :  { %v1941_v40 = vadd.f32 %v5503_v22, %v1436_v3 }
 0x300   :  { %v2186_v1 = vmax.f32 %v2070_v6, 0.0  ;;  %v1441_v10 = vpop.permute.xlu0 %1440 }
 0x302   :  { %v2215_v58 = vpack.c.bf16 %v2186_v1, %v2185_v56  ;;  %v1446_v15 = vpop.permute.xlu1 %1445 }
 0x303   :  { %v2074_v31 = vpop.f32.mrb[64].mxu1 }
 0x304   :  { %v2075_v54 = vadd.f32 %v2074_v31, %v1922_v42  ;;  %v2076_v52 = vpop.f32.mrb[65].mxu1  ;;  %2590 = vmatpush1.bf16.msra.mxu1 %v2215_v58  ;;  %v1946_v42 = vadd.f32 %v5505_v19, %v1441_v10 }
 0x305   :  { %v2077_v38 = vpop.f32.mrb[66].mxu1  ;;  %2591 = vmatprep.subr.bf16.mxu1 %v5887_v7  ;;  %v1949_v52 = vadd.f32 %v5507_v8, %v1446_v15 }
 0x306   :  { %v2078_v37 = vadd.f32 %v2077_v38, %v1925_v26  ;;  %v2079_v29 = vpop.f32.mrb[67].mxu1  ;;  %v2187_v62 = vmax.f32 %v2075_v54, 0.0 }
 0x308   :  { %v2188_v41 = vmax.f32 %v2078_v37, 0.0 }
 0x30a   :  { %v2216_v17 = vpack.c.bf16 %v2188_v41, %v2187_v62  ;;  %v1451_v62 = vpop.permute.xlu0 %1450 }
 0x30b   :  { %v2082_v0 = vpop.f32.mrb[68].mxu1  ;;  %v1954_v57 = vadd.f32 %v5509_v46, %v1451_v62 }
 0x30c   :  { %v2083_v63 = vadd.f32 %v2082_v0, %v1930_v55  ;;  %v2084_v61 = vpop.f32.mrb[69].mxu1  ;;  %2592 = vmatpush1.bf16.msra.mxu1 %v2216_v17  ;;  %v1456_v17 = vpop.permute.xlu1 %1455 }
 0x30d   :  { %v2085_v49 = vpop.f32.mrb[70].mxu1  ;;  %2593 = vmatprep.subr.bf16.mxu1 %v5887_v7  ;;  %v1957_v0 = vadd.f32 %v5511_v43, %v1456_v17 }
 0x30e   :  { %v2086_v4 = vadd.f32 %v2085_v49, %v1933_v27  ;;  %v2087_v9 = vpop.f32.mrb[71].mxu1  ;;  %v2189_v50 = vmax.f32 %v2083_v63, 0.0 }
 0x310   :  { %v2190_v30 = vmax.f32 %v2086_v4, 0.0  ;;  %v1461_v4 = vpop.permute.xlu0 %1460 }
 0x312   :  { %v2217_v34 = vpack.c.bf16 %v2190_v30, %v2189_v50  ;;  %v1962_v50 = vadd.f32 %v5513_v36, %v1461_v4  ;;  %v1466_v30 = vpop.permute.xlu1 %1465 }
 0x313   :  { %v2090_v44 = vpop.f32.mrb[72].mxu1 }
 0x314   :  { %v2091_v51 = vadd.f32 %v2090_v44, %v1938_v12  ;;  %v2092_v25 = vpop.f32.mrb[73].mxu1  ;;  %2594 = vmatpush1.bf16.msra.mxu1 %v2217_v34  ;;  %v1965_v12 = vadd.f32 %v5515_v32, %v1466_v30 }
 0x315   :  { %v2093_v6 = vpop.f32.mrb[74].mxu1  ;;  %2595 = vmatprep.subr.bf16.mxu1 %v5887_v7 }
 0x316   :  { %v2094_v35 = vadd.f32 %v2093_v6, %v1941_v40  ;;  %v2095_v60 = vpop.f32.mrb[75].mxu1  ;;  %v2191_v56 = vmax.f32 %v2091_v51, 0.0  ;;  %v1471_v40 = vpop.permute.xlu0 %1470 }
 0x317   :  { %v1476_v60 = vpop.permute.xlu1 %1475 }
 0x318   :  { %v2192_v1 = vmax.f32 %v2094_v35, 0.0  ;;  %v1970_v35 = vadd.f32 %v5517_v39, %v1471_v40  ;;  %v1973_v10 = vadd.f32 %v5519_v45, %v1476_v60 }
 0x31a   :  { %v2218_v58 = vpack.c.bf16 %v2192_v1, %v2191_v56 }
 0x31b   :  { %v2098_v14 = vpop.f32.mrb[76].mxu1 }
 0x31c   :  { %v2099_v31 = vadd.f32 %v2098_v14, %v1946_v42  ;;  %v2100_v54 = vpop.f32.mrb[77].mxu1  ;;  %2596 = vmatpush1.bf16.msra.mxu1 %v2218_v58 }
 0x31d   :  { %v2101_v26 = vpop.f32.mrb[78].mxu1  ;;  %2597 = vmatprep.subr.bf16.mxu1 %v5887_v7 }
 0x31e   :  { %v2102_v22 = vadd.f32 %v2101_v26, %v1949_v52  ;;  %v2103_v38 = vpop.f32.mrb[79].mxu1  ;;  %v2193_v37 = vmax.f32 %v2099_v31, 0.0  ;;  %v1481_v31 = vpop.permute.xlu0 %1480 }
 0x31f   :  { %v1978_v52 = vadd.f32 %v5521_v5, %v1481_v31  ;;  %v1486_v26 = vpop.permute.xlu1 %1485 }
 0x320   :  { %v2194_v29 = vmax.f32 %v2102_v22, 0.0 }
 0x322   :  { %v2219_v41 = vpack.c.bf16 %v2194_v29, %v2193_v37  ;;  %v1981_v37 = vadd.f32 %v5523_v16, %v1486_v26  ;;  %v1491_v17 = vpop.permute.xlu0 %1490 }
 0x323   :  { %v2106_v19 = vpop.f32.mrb[80].mxu1 }
 0x324   :  { %v2107_v55 = vadd.f32 %v2106_v19, %v1954_v57  ;;  %v2108_v20 = vpop.f32.mrb[81].mxu1  ;;  %2598 = vmatpush1.bf16.msra.mxu1 %v2219_v41 }
 0x325   :  { %v2109_v63 = vpop.f32.mrb[82].mxu1  ;;  %2599 = vmatprep.subr.bf16.mxu1 %v5887_v7  ;;  %v1496_v20 = vpop.permute.xlu1 %1495 }
 0x326   :  { %v2110_v8 = vadd.f32 %v2109_v63, %v1957_v0  ;;  %v2111_v61 = vpop.f32.mrb[83].mxu1  ;;  %v2195_v27 = vmax.f32 %v2107_v55, 0.0  ;;  %v1986_v55 = vadd.f32 %v5525_v47, %v1491_v17 }
 0x328   :  { %v2196_v49 = vmax.f32 %v2110_v8, 0.0  ;;  %v1989_v8 = vadd.f32 %v5527_v2, %v1496_v20 }
 0x32a   :  { %v2220_v9 = vpack.c.bf16 %v2196_v49, %v2195_v27 }
 0x32b   :  { %v2114_v46 = vpop.f32.mrb[84].mxu1 }
 0x32c   :  { %v2115_v59 = vadd.f32 %v2114_v46, %v1962_v50  ;;  %v2116_v34 = vpop.f32.mrb[85].mxu1  ;;  %2600 = vmatpush1.bf16.msra.mxu1 %v2220_v9  ;;  %v1501_v9 = vpop.permute.xlu0 %1500 }
 0x32d   :  { %v2117_v3 = vpop.f32.mrb[86].mxu1  ;;  %2601 = vmatprep.subr.bf16.mxu1 %v5887_v7  ;;  %v1994_v30 = vadd.f32 %v5529_v48, %v1501_v9  ;;  %v1506_v46 = vpop.permute.xlu1 %1505 }
 0x32e   :  { %v2118_v43 = vadd.f32 %v2117_v3, %v1965_v12  ;;  %v2119_v44 = vpop.f32.mrb[87].mxu1  ;;  %v2197_v51 = vmax.f32 %v2115_v59, 0.0  ;;  %v1997_v12 = vadd.f32 %v5531_v18, %v1506_v46 }
 0x330   :  { %v2198_v25 = vmax.f32 %v2118_v43, 0.0 }
 0x332   :  { %v2221_v6 = vpack.c.bf16 %v2198_v25, %v2197_v51  ;;  %v1511_v25 = vpop.permute.xlu0 %1510 }
 0x333   :  { %v2122_v36 = vpop.f32.mrb[88].mxu1 }
 0x334   :  { %v2123_v56 = vadd.f32 %v2122_v36, %v1970_v35  ;;  %v2124_v1 = vpop.f32.mrb[89].mxu1  ;;  %2602 = vmatpush1.bf16.msra.mxu1 %v2221_v6  ;;  %v2002_v6 = vadd.f32 %v5533_v24, %v1511_v25  ;;  %v1516_v35 = vpop.permute.xlu1 %1515  ;;  %v4190_v25 = vld [vmem:[%s5869_s5 + $0x54] ss:$8 sps:$4 sm:$0xff]  }
 0x335   :  { %v2125_v58 = vpop.f32.mrb[90].mxu1  ;;  %2603 = vmatprep.subr.bf16.mxu1 %v5887_v7 }
 0x336   :  { %v2126_v32 = vadd.f32 %v2125_v58, %v1973_v10  ;;  %v2127_v42 = vpop.f32.mrb[91].mxu1  ;;  %v2199_v15 = vmax.f32 %v2123_v56, 0.0  ;;  %v2005_v56 = vadd.f32 %v5535_v13, %v1516_v35  ;;  %v4195_v35 = vld [vmem:[%s5869_s5 + $0x60] ss:$8 sps:$4 sm:$0xff]  }
 0x337   :  { %v1521_v42 = vpop.permute.xlu0 %1520 }
 0x338   :  { %v2200_v14 = vmax.f32 %v2126_v32, 0.0  ;;  %v1526_v31 = vpop.permute.xlu1 %1525 }
 0x339   :  { %v2013_v26 = vadd.f32 %v5539_v21, %v1526_v31  ;;  %v4213_v31 = vld [vmem:[%s5869_s5 + $0xc0] ss:$8 sps:$4 sm:$0xff]  }
 0x33a   :  { %v2222_v54 = vpack.c.bf16 %v2200_v14, %v2199_v15  ;;  %v2010_v14 = vadd.f32 %v5537_v53, %v1521_v42  ;;  %v4210_v42 = vld [vmem:[%s5869_s5 + $0xb0] ss:$8 sps:$4 sm:$0xff]  }
 0x33b   :  { %v2130_v39 = vpop.f32.mrb[92].mxu1 }
 0x33c   :  { %v2131_v22 = vadd.f32 %v2130_v39, %v1978_v52  ;;  %v2132_v38 = vpop.f32.mrb[93].mxu1  ;;  %2604 = vmatpush1.bf16.msra.mxu1 %v2222_v54 }
 0x33d   :  { %v2133_v29 = vpop.f32.mrb[94].mxu1  ;;  %2605 = vmatprep.subr.bf16.mxu1 %v5887_v7 }
 0x33e   :  { %v2134_v45 = vadd.f32 %v2133_v29, %v1981_v37  ;;  %v2135_v62 = vpop.f32.mrb[95].mxu1  ;;  %v2201_v41 = vmax.f32 %v2131_v22, 0.0  ;;  %v1531_v29 = vpop.permute.xlu0 %1530 }
 0x33f   :  { %v2018_v62 = vadd.f32 %v5541_v23, %v1531_v29 }
 0x340   :  { %v2202_v57 = vmax.f32 %v2134_v45, 0.0 }
 0x342   :  { %v2223_v19 = vpack.c.bf16 %v2202_v57, %v2201_v41  ;;  %v1536_v41 = vpop.permute.xlu1 %1535 }
 0x343   :  { %v2138_v5 = vpop.f32.mrb[96].mxu1 }
 0x344   :  { %v2139_v0 = vadd.f32 %v2138_v5, %v1986_v55  ;;  %v2140_v63 = vpop.f32.mrb[97].mxu1  ;;  %2606 = vmatpush1.bf16.msra.mxu1 %v2223_v19  ;;  %v2021_v19 = vadd.f32 %v5543_v33, %v1536_v41 }
 0x345   :  { %v2141_v61 = vpop.f32.mrb[98].mxu1  ;;  %2607 = vmatprep.subr.bf16.mxu1 %v5887_v7  ;;  %v1541_v63 = vpop.permute.xlu0 %1540 }
 0x346   :  { %v2142_v16 = vadd.f32 %v2141_v61, %v1989_v8  ;;  %v2143_v27 = vpop.f32.mrb[99].mxu1  ;;  %v2203_v49 = vmax.f32 %v2139_v0, 0.0  ;;  %v2026_v61 = vadd.f32 %v5545_v11, %v1541_v63  ;;  %v4175_v11 = vld [vmem:[%s5869_s5] ss:$8 sps:$4 sm:$0xff]  }
 0x348   :  { %v2204_v4 = vmax.f32 %v2142_v16, 0.0  ;;  %v1546_v16 = vpop.permute.xlu1 %1545 }
 0x34a   :  { %v2224_v50 = vpack.c.bf16 %v2204_v4, %v2203_v49  ;;  %v2029_v4 = vadd.f32 %v5550_v28, %v1546_v16  ;;  %v4178_v28 = vld [vmem:[%s5869_s5 + $0x14] ss:$8 sps:$4 sm:$0xff]  }
 0x34b   :  { %v2146_v47 = vpop.f32.mrb[100].mxu1 }
 0x34c   :  { %v2147_v59 = vadd.f32 %v2146_v47, %v1994_v30  ;;  %v2148_v34 = vpop.f32.mrb[101].mxu1  ;;  %2608 = vmatpush1.bf16.msra.mxu1 %v2224_v50 }
 0x34d   :  { %v2149_v3 = vpop.f32.mrb[102].mxu1  ;;  %2609 = vmatprep.subr.bf16.mxu1 %v5887_v7  ;;  %v4180_v34 = vld [vmem:[%s5869_s5 + $0x10] ss:$8 sps:$4 sm:$0xff]  }
 0x34e   :  { %v2150_v2 = vadd.f32 %v2149_v3, %v1997_v12  ;;  %v2151_v43 = vpop.f32.mrb[103].mxu1  ;;  %v2205_v44 = vmax.f32 %v2147_v59, 0.0  ;;  %v4181_v12 = vld [vmem:[%s5869_s5 + $0x24] ss:$8 sps:$4 sm:$0xff]   ;;  %v4183_v3 = vld [vmem:[%s5869_s5 + $0x20] ss:$8 sps:$4 sm:$0xff]  }
 0x34f   :  { %v4186_v43 = vld [vmem:[%s5869_s5 + $0x30] ss:$8 sps:$4 sm:$0xff]  }
 0x350   :  { %v2206_v51 = vmax.f32 %v2150_v2, 0.0  ;;  %v4184_v2 = vld [vmem:[%s5869_s5 + $0x34] ss:$8 sps:$4 sm:$0xff]  }
 0x352   :  { %v2225_v40 = vpack.c.bf16 %v2206_v51, %v2205_v44  ;;  %v4187_v44 = vld [vmem:[%s5869_s5 + $0x44] ss:$8 sps:$4 sm:$0xff]   ;;  %v4189_v51 = vld [vmem:[%s5869_s5 + $0x40] ss:$8 sps:$4 sm:$0xff]  }
 0x353   :  { %v2154_v48 = vpop.f32.mrb[104].mxu1 }
 0x354   :  { %v2155_v60 = vadd.f32 %v2154_v48, %v2002_v6  ;;  %v2156_v36 = vpop.f32.mrb[105].mxu1  ;;  %2610 = vmatpush1.bf16.msra.mxu1 %v2225_v40  ;;  %v4192_v40 = vld [vmem:[%s5869_s5 + $0x50] ss:$8 sps:$4 sm:$0xff]   ;;  %v4193_v6 = vld [vmem:[%s5869_s5 + $0x64] ss:$8 sps:$4 sm:$0xff]  }
 0x355   :  { %v2157_v1 = vpop.f32.mrb[106].mxu1  ;;  %2611 = vmatprep.subr.bf16.mxu1 %v5887_v7  ;;  %v4196_v48 = vld [vmem:[%s5869_s5 + $0x74] ss:$8 sps:$4 sm:$0xff]   ;;  %v4199_v36 = vld [vmem:[%s5869_s5 + $0x84] ss:$8 sps:$4 sm:$0xff]  }
 0x356   :  { %v2158_v18 = vadd.f32 %v2157_v1, %v2005_v56  ;;  %v2159_v10 = vpop.f32.mrb[107].mxu1  ;;  %v2207_v58 = vmax.f32 %v2155_v60, 0.0  ;;  %v4198_v60 = vld [vmem:[%s5869_s5 + $0x70] ss:$8 sps:$4 sm:$0xff]   ;;  %v4201_v56 = vld [vmem:[%s5869_s5 + $0x80] ss:$8 sps:$4 sm:$0xff]  }
 0x357   :  { %v4202_v1 = vld [vmem:[%s5869_s5 + $0x94] ss:$8 sps:$4 sm:$0xff]   ;;  %v4205_v10 = vld [vmem:[%s5869_s5 + $0xa4] ss:$8 sps:$4 sm:$0xff]  }
 0x358   :  { %v2208_v32 = vmax.f32 %v2158_v18, 0.0  ;;  %v4204_v18 = vld [vmem:[%s5869_s5 + $0x90] ss:$8 sps:$4 sm:$0xff]  }
 0x35a   :  { %v2226_v15 = vpack.c.bf16 %v2208_v32, %v2207_v58  ;;  %v4207_v58 = vld [vmem:[%s5869_s5 + $0xa0] ss:$8 sps:$4 sm:$0xff]   ;;  %v4208_v32 = vld [vmem:[%s5869_s5 + $0xb4] ss:$8 sps:$4 sm:$0xff]  }
 0x35b   :  { %v2162_v24 = vpop.f32.mrb[108].mxu1 }
 0x35c   :  { %v2163_v54 = vadd.f32 %v2162_v24, %v2010_v14  ;;  %v2164_v52 = vpop.f32.mrb[109].mxu1  ;;  %2612 = vmatpush1.bf16.msra.mxu1 %v2226_v15  ;;  %v4211_v15 = vld [vmem:[%s5869_s5 + $0xc4] ss:$8 sps:$4 sm:$0xff]   ;;  %v2256_v14 = vld [vmem:[%s5869_s5 + $0xd0] sm:$0x33] }
 0x35d   :  { %v2165_v39 = vpop.f32.mrb[110].mxu1  ;;  %2613 = vmatprep.subr.bf16.mxu1 %v5887_v7  ;;  %v3765_v24 = vcombine.high %v2256_v14, %v2256_v14  ;;  %v4218_v52 = vld [vmem:[%s5871_s7 + $0x4] ss:$8 sps:$4 sm:$0xff]  }
 0x35e   :  { %v2166_v13 = vadd.f32 %v2165_v39, %v2013_v26  ;;  %v2167_v22 = vpop.f32.mrb[111].mxu1  ;;  %v2209_v38 = vmax.f32 %v2163_v54, 0.0  ;;  %v3764_v54 = vcombine.low %v2256_v14, %v2256_v14  ;;  %3802 = vmatprep.mubr.msk.bf16.mxu0 %vm3027_vm3, %v4218_v52  ;;  %v2287_v26 = vpop.permute.xlu0 %2286 }
 0x360   :  { %v2210_v37 = vmax.f32 %v2166_v13, 0.0 }
 0x362   :  { %v2227_v45 = vpack.c.bf16 %v2210_v37, %v2209_v38  ;;  %v2292_v38 = vpop.permute.xlu1 %2291 }
 0x363   :  { %v2170_v53 = vpop.f32.mrb[112].mxu1 }
 0x364   :  { %v2171_v57 = vadd.f32 %v2170_v53, %v2018_v62  ;;  %v2172_v17 = vpop.f32.mrb[113].mxu1  ;;  %2614 = vmatpush1.bf16.msra.mxu1 %v2227_v45 }
 0x365   :  { %v2173_v55 = vpop.f32.mrb[114].mxu1  ;;  %2615 = vmatprep.subr.bf16.mxu1 %v5887_v7 }
 0x366   :  { %v2174_v21 = vadd.f32 %v2173_v55, %v2021_v19  ;;  %v2175_v20 = vpop.f32.mrb[115].mxu1  ;;  %v2211_v5 = vmax.f32 %v2171_v57, 0.0  ;;  %v2297_v57 = vpop.permute.xlu0 %2296 }
 0x368   :  { %v2212_v0 = vmax.f32 %v2174_v21, 0.0  ;;  %v2302_v21 = vpop.permute.xlu1 %2301 }
 0x36a   :  { %v2228_v8 = vpack.c.bf16 %v2212_v0, %v2211_v5  ;;  %v2307_v16 = vpop.permute.xlu0 %2306 }
 0x36b   :  { %v2178_v23 = vpop.f32.mrb[116].mxu1 }
 0x36c   :  { %v2179_v27 = vadd.f32 %v2178_v23, %v2026_v61  ;;  %v2180_v49 = vpop.f32.mrb[117].mxu1  ;;  %2616 = vmatpush1.bf16.msra.mxu1 %v2228_v8 }
 0x36d   :  { %v2181_v9 = vpop.f32.mrb[118].mxu1  ;;  %2617 = vmatprep.subr.bf16.mxu1 %v5887_v7 }
 0x36e   :  { %v2182_v33 = vadd.f32 %v2181_v9, %v2029_v4  ;;  %v2183_v50 = vpop.f32.mrb[119].mxu1  ;;  %v2213_v30 = vmax.f32 %v2179_v27, 0.0  ;;  %v2312_v4 = vpop.permute.xlu1 %2311 }
 0x370   :  { %v2214_v46 = vmax.f32 %v2182_v33, 0.0 }
 0x372   :  { %v2229_v47 = vpack.c.bf16 %v2214_v46, %v2213_v30 }
 0x374   :  { %v2587_v59 = vsel %vm2585_vm2, %v2229_v47, 0 }
 0x375   :  { %2618 = vmatpush1.bf16.msra.mxu1 %v2587_v59  ;;  %v2317_v59 = vpop.permute.xlu0 %2316 }
 0x376   :  { %3402 = vmatprep.subr.bf16.mxu1 %v5887_v7 }
 0x378   :  { %2622 = vmatmul.mubr.bf16.vlgmr.msra.gmra.mrb[120].mxu1 %v4175_v11 }
 0x379   :  { %3767 = vmatprep.mubr.msk.bf16.mxu1 %vm2542_vm1, %v4178_v28 }
 0x380   :  { %2630 = vmatmul.mubr.bf16.gmra.mrb[124].mxu1 %v4180_v34 }
 0x381   :  { %3768 = vmatprep.mubr.msk.bf16.mxu1 %vm2542_vm1, %v4181_v12  ;;  %v2322_v12 = vpop.permute.xlu1 %2321 }
 0x388   :  { %2638 = vmatmul.mubr.bf16.gmra.mrb[128].mxu1 %v4183_v3 }
 0x389   :  { %3769 = vmatprep.mubr.msk.bf16.mxu1 %vm2542_vm1, %v4184_v2 }
 0x390   :  { %2646 = vmatmul.mubr.bf16.gmra.mrb[132].mxu1 %v4186_v43 }
 0x391   :  { %3770 = vmatprep.mubr.msk.bf16.mxu1 %vm2542_vm1, %v4187_v44 }
 0x398   :  { %2654 = vmatmul.mubr.bf16.gmra.mrb[136].mxu1 %v4189_v51 }
 0x399   :  { %3771 = vmatprep.mubr.msk.bf16.mxu1 %vm2542_vm1, %v4190_v25 }
 0x3a0   :  { %2662 = vmatmul.mubr.bf16.gmra.mrb[140].mxu1 %v4192_v40  ;;  %v2327_v40 = vpop.permute.xlu0 %2326 }
 0x3a1   :  { %3772 = vmatprep.mubr.msk.bf16.mxu1 %vm2542_vm1, %v4193_v6 }
 0x3a8   :  { %2670 = vmatmul.mubr.bf16.gmra.mrb[144].mxu1 %v4195_v35 }
 0x3a9   :  { %3773 = vmatprep.mubr.msk.bf16.mxu1 %vm2542_vm1, %v4196_v48 }
 0x3b0   :  { %2678 = vmatmul.mubr.bf16.gmra.mrb[148].mxu1 %v4198_v60  ;;  %v2332_v60 = vpop.permute.xlu1 %2331 }
 0x3b1   :  { %3774 = vmatprep.mubr.msk.bf16.mxu1 %vm2542_vm1, %v4199_v36 }
 0x3b8   :  { %2686 = vmatmul.mubr.bf16.gmra.mrb[152].mxu1 %v4201_v56 }
 0x3b9   :  { %3775 = vmatprep.mubr.msk.bf16.mxu1 %vm2542_vm1, %v4202_v1 }
 0x3c0   :  { %2694 = vmatmul.mubr.bf16.gmra.mrb[156].mxu1 %v4204_v18 }
 0x3c1   :  { %3776 = vmatprep.mubr.msk.bf16.mxu1 %vm2542_vm1, %v4205_v10 }
 0x3c8   :  { %2702 = vmatmul.mubr.bf16.gmra.mrb[160].mxu1 %v4207_v58 }
 0x3c9   :  { %3777 = vmatprep.mubr.msk.bf16.mxu1 %vm2542_vm1, %v4208_v32  ;;  %v2337_v32 = vpop.permute.xlu0 %2336 }
 0x3d0   :  { %2710 = vmatmul.mubr.bf16.gmra.mrb[164].mxu1 %v4210_v42 }
 0x3d1   :  { %3778 = vmatprep.mubr.msk.bf16.mxu1 %vm2542_vm1, %v4211_v15 }
 0x3d8   :  { %2718 = vmatmul.mubr.bf16.gmra.mrb[168].mxu1 %v4213_v31  ;;  %v2342_v31 = vpop.permute.xlu1 %2341 }
 0x3d9   :  { %3779 = vmatprep.mubr.msk.bf16.mxu1 %vm2542_vm1, %v3765_v24 }
 0x3e0   :  { %2726 = vmatmul.mubr.bf16.gmra.mrb[172].mxu1 %v3764_v54 }
 0x44b   :  { %v2623_v39 = vpop.f32.mrb[120].mxu1 }
 0x44c   :  { %v2624_v13 = vadd.f32 %v2623_v39, %v2287_v26  ;;  %v2625_v22 = vpop.f32.mrb[121].mxu1 }
 0x44d   :  { %v2626_v37 = vpop.f32.mrb[122].mxu1  ;;  %v2347_v22 = vpop.permute.xlu0 %2346 }
 0x44e   :  { %v2627_v29 = vadd.f32 %v2626_v37, %v2292_v38  ;;  %v2628_v45 = vpop.f32.mrb[123].mxu1  ;;  %v2733_v62 = vmax.f32 %v2624_v13, 0.0 }
 0x44f   :  { %v2352_v45 = vpop.permute.xlu1 %2351 }
 0x450   :  { %v2734_v41 = vmax.f32 %v2627_v29, 0.0 }
 0x452   :  { %v2760_v53 = vpack.c.bf16 %v2734_v41, %v2733_v62 }
 0x453   :  { %v2631_v17 = vpop.f32.mrb[124].mxu1 }
 0x454   :  { %v2632_v19 = vadd.f32 %v2631_v17, %v2297_v57  ;;  %v2633_v55 = vpop.f32.mrb[125].mxu1  ;;  %3066 = vmatpush1.bf16.msra.mxu0 %v2760_v53 }
 0x455   :  { %v2634_v20 = vpop.f32.mrb[126].mxu1  ;;  %3067 = vmatprep.subr.bf16.mxu0 %v5887_v7  ;;  %v2357_v55 = vpop.permute.xlu0 %2356 }
 0x456   :  { %v2635_v5 = vadd.f32 %v2634_v20, %v2302_v21  ;;  %v2636_v0 = vpop.f32.mrb[127].mxu1  ;;  %v2735_v63 = vmax.f32 %v2632_v19, 0.0 }
 0x457   :  { %v2362_v0 = vpop.permute.xlu1 %2361 }
 0x458   :  { %v2736_v8 = vmax.f32 %v2635_v5, 0.0 }
 0x45a   :  { %v2761_v61 = vpack.c.bf16 %v2736_v8, %v2735_v63 }
 0x45b   :  { %v2639_v23 = vpop.f32.mrb[128].mxu1 }
 0x45c   :  { %v2640_v27 = vadd.f32 %v2639_v23, %v2307_v16  ;;  %v2641_v49 = vpop.f32.mrb[129].mxu1  ;;  %3068 = vmatpush1.bf16.msra.mxu0 %v2761_v61 }
 0x45d   :  { %v2642_v9 = vpop.f32.mrb[130].mxu1  ;;  %3069 = vmatprep.subr.bf16.mxu0 %v5887_v7  ;;  %v2367_v49 = vpop.permute.xlu0 %2366 }
 0x45e   :  { %v2643_v33 = vadd.f32 %v2642_v9, %v2312_v4  ;;  %v2644_v50 = vpop.f32.mrb[131].mxu1  ;;  %v2737_v30 = vmax.f32 %v2640_v27, 0.0 }
 0x45f   :  { %v2372_v50 = vpop.permute.xlu1 %2371 }
 0x460   :  { %v2738_v46 = vmax.f32 %v2643_v33, 0.0 }
 0x462   :  { %v2762_v47 = vpack.c.bf16 %v2738_v46, %v2737_v30 }
 0x463   :  { %v2647_v11 = vpop.f32.mrb[132].mxu1 }
 0x464   :  { %v2648_v28 = vadd.f32 %v2647_v11, %v2317_v59  ;;  %v2649_v34 = vpop.f32.mrb[133].mxu1  ;;  %3070 = vmatpush1.bf16.msra.mxu0 %v2762_v47 }
 0x465   :  { %v2650_v3 = vpop.f32.mrb[134].mxu1  ;;  %3071 = vmatprep.subr.bf16.mxu0 %v5887_v7  ;;  %v2377_v34 = vpop.permute.xlu0 %2376 }
 0x466   :  { %v2651_v2 = vadd.f32 %v2650_v3, %v2322_v12  ;;  %v2652_v43 = vpop.f32.mrb[135].mxu1  ;;  %v2739_v44 = vmax.f32 %v2648_v28, 0.0 }
 0x467   :  { %v2382_v43 = vpop.permute.xlu1 %2381 }
 0x468   :  { %v2740_v51 = vmax.f32 %v2651_v2, 0.0 }
 0x46a   :  { %v2763_v25 = vpack.c.bf16 %v2740_v51, %v2739_v44 }
 0x46b   :  { %v2655_v6 = vpop.f32.mrb[136].mxu1 }
 0x46c   :  { %v2656_v35 = vadd.f32 %v2655_v6, %v2327_v40  ;;  %v2657_v48 = vpop.f32.mrb[137].mxu1  ;;  %3072 = vmatpush1.bf16.msra.mxu0 %v2763_v25 }
 0x46d   :  { %v2658_v36 = vpop.f32.mrb[138].mxu1  ;;  %3073 = vmatprep.subr.bf16.mxu0 %v5887_v7  ;;  %v2387_v48 = vpop.permute.xlu0 %2386 }
 0x46e   :  { %v2659_v56 = vadd.f32 %v2658_v36, %v2332_v60  ;;  %v2660_v1 = vpop.f32.mrb[139].mxu1  ;;  %v2741_v18 = vmax.f32 %v2656_v35, 0.0 }
 0x46f   :  { %v2392_v1 = vpop.permute.xlu1 %2391 }
 0x470   :  { %v2742_v10 = vmax.f32 %v2659_v56, 0.0 }
 0x472   :  { %v2764_v58 = vpack.c.bf16 %v2742_v10, %v2741_v18 }
 0x473   :  { %v2663_v42 = vpop.f32.mrb[140].mxu1 }
 0x474   :  { %v2664_v15 = vadd.f32 %v2663_v42, %v2337_v32  ;;  %v2665_v14 = vpop.f32.mrb[141].mxu1  ;;  %3074 = vmatpush1.bf16.msra.mxu0 %v2764_v58 }
 0x475   :  { %v2666_v24 = vpop.f32.mrb[142].mxu1  ;;  %3075 = vmatprep.subr.bf16.mxu0 %v5887_v7  ;;  %v2397_v14 = vpop.permute.xlu0 %2396 }
 0x476   :  { %v2667_v54 = vadd.f32 %v2666_v24, %v2342_v31  ;;  %v2668_v52 = vpop.f32.mrb[143].mxu1  ;;  %v2743_v26 = vmax.f32 %v2664_v15, 0.0 }
 0x477   :  { %v2402_v52 = vpop.permute.xlu1 %2401 }
 0x478   :  { %v2744_v39 = vmax.f32 %v2667_v54, 0.0 }
 0x47a   :  { %v2765_v13 = vpack.c.bf16 %v2744_v39, %v2743_v26 }
 0x47b   :  { %v2671_v38 = vpop.f32.mrb[144].mxu1 }
 0x47c   :  { %v2672_v37 = vadd.f32 %v2671_v38, %v2347_v22  ;;  %v2673_v29 = vpop.f32.mrb[145].mxu1  ;;  %3076 = vmatpush1.bf16.msra.mxu0 %v2765_v13 }
 0x47d   :  { %v2674_v62 = vpop.f32.mrb[146].mxu1  ;;  %3077 = vmatprep.subr.bf16.mxu0 %v5887_v7  ;;  %v2407_v29 = vpop.permute.xlu0 %2406 }
 0x47e   :  { %v2675_v41 = vadd.f32 %v2674_v62, %v2352_v45  ;;  %v2676_v53 = vpop.f32.mrb[147].mxu1  ;;  %v2745_v57 = vmax.f32 %v2672_v37, 0.0 }
 0x47f   :  { %v2412_v53 = vpop.permute.xlu1 %2411 }
 0x480   :  { %v2746_v17 = vmax.f32 %v2675_v41, 0.0 }
 0x482   :  { %v2766_v19 = vpack.c.bf16 %v2746_v17, %v2745_v57 }
 0x483   :  { %v2679_v21 = vpop.f32.mrb[148].mxu1 }
 0x484   :  { %v2680_v20 = vadd.f32 %v2679_v21, %v2357_v55  ;;  %v2681_v5 = vpop.f32.mrb[149].mxu1  ;;  %3078 = vmatpush1.bf16.msra.mxu0 %v2766_v19 }
 0x485   :  { %v2682_v63 = vpop.f32.mrb[150].mxu1  ;;  %3079 = vmatprep.subr.bf16.mxu0 %v5887_v7  ;;  %v2417_v5 = vpop.permute.xlu0 %2416 }
 0x486   :  { %v2683_v8 = vadd.f32 %v2682_v63, %v2362_v0  ;;  %v2684_v61 = vpop.f32.mrb[151].mxu1  ;;  %v2747_v16 = vmax.f32 %v2680_v20, 0.0 }
 0x488   :  { %v2748_v23 = vmax.f32 %v2683_v8, 0.0 }
 0x48a   :  { %v2767_v27 = vpack.c.bf16 %v2748_v23, %v2747_v16 }
 0x48b   :  { %v2687_v4 = vpop.f32.mrb[152].mxu1 }
 0x48c   :  { %v2688_v9 = vadd.f32 %v2687_v4, %v2367_v49  ;;  %v2689_v33 = vpop.f32.mrb[153].mxu1  ;;  %3080 = vmatpush1.bf16.msra.mxu0 %v2767_v27  ;;  %v4216_v4 = vld [vmem:[%s5871_s7] ss:$8 sps:$4 sm:$0xff]  }
 0x48d   :  { %v2690_v30 = vpop.f32.mrb[154].mxu1  ;;  %3081 = vmatprep.subr.bf16.mxu0 %v5887_v7  ;;  %v4221_v33 = vld [vmem:[%s5871_s7 + $0x10] ss:$8 sps:$4 sm:$0xff]  }
 0x48e   :  { %v2691_v46 = vadd.f32 %v2690_v30, %v2372_v50  ;;  %v2692_v47 = vpop.f32.mrb[155].mxu1  ;;  %v2749_v59 = vmax.f32 %v2688_v9, 0.0  ;;  %v4219_v9 = vld [vmem:[%s5871_s7 + $0x14] ss:$8 sps:$4 sm:$0xff]   ;;  %v4222_v50 = vld [vmem:[%s5871_s7 + $0x24] ss:$8 sps:$4 sm:$0xff]  }
 0x48f   :  { %v4224_v30 = vld [vmem:[%s5871_s7 + $0x20] ss:$8 sps:$4 sm:$0xff]   ;;  %v4227_v47 = vld [vmem:[%s5871_s7 + $0x30] ss:$8 sps:$4 sm:$0xff]  }
 0x490   :  { %v2750_v11 = vmax.f32 %v2691_v46, 0.0  ;;  %v4225_v46 = vld [vmem:[%s5871_s7 + $0x34] ss:$8 sps:$4 sm:$0xff]  }
 0x492   :  { %v2768_v28 = vpack.c.bf16 %v2750_v11, %v2749_v59  ;;  %v4228_v59 = vld [vmem:[%s5871_s7 + $0x44] ss:$8 sps:$4 sm:$0xff]   ;;  %v4230_v11 = vld [vmem:[%s5871_s7 + $0x40] ss:$8 sps:$4 sm:$0xff]  }
 0x493   :  { %v2695_v12 = vpop.f32.mrb[156].mxu1 }
 0x494   :  { %v2696_v3 = vadd.f32 %v2695_v12, %v2377_v34  ;;  %v2697_v2 = vpop.f32.mrb[157].mxu1  ;;  %3082 = vmatpush1.bf16.msra.mxu0 %v2768_v28  ;;  %v4231_v28 = vld [vmem:[%s5871_s7 + $0x54] ss:$8 sps:$4 sm:$0xff]   ;;  %v4233_v34 = vld [vmem:[%s5871_s7 + $0x50] ss:$8 sps:$4 sm:$0xff]  }
 0x495   :  { %v2698_v44 = vpop.f32.mrb[158].mxu1  ;;  %3083 = vmatprep.subr.bf16.mxu0 %v5887_v7  ;;  %v4234_v12 = vld [vmem:[%s5871_s7 + $0x64] ss:$8 sps:$4 sm:$0xff]   ;;  %v4237_v2 = vld [vmem:[%s5871_s7 + $0x74] ss:$8 sps:$4 sm:$0xff]  }
 0x496   :  { %v2699_v51 = vadd.f32 %v2698_v44, %v2382_v43  ;;  %v2700_v25 = vpop.f32.mrb[159].mxu1  ;;  %v2751_v40 = vmax.f32 %v2696_v3, 0.0  ;;  %v4236_v3 = vld [vmem:[%s5871_s7 + $0x60] ss:$8 sps:$4 sm:$0xff]   ;;  %v4239_v43 = vld [vmem:[%s5871_s7 + $0x70] ss:$8 sps:$4 sm:$0xff]  }
 0x497   :  { %v4240_v44 = vld [vmem:[%s5871_s7 + $0x84] ss:$8 sps:$4 sm:$0xff]   ;;  %v4243_v25 = vld [vmem:[%s5871_s7 + $0x94] ss:$8 sps:$4 sm:$0xff]  }
 0x498   :  { %v2752_v6 = vmax.f32 %v2699_v51, 0.0  ;;  %v4242_v51 = vld [vmem:[%s5871_s7 + $0x80] ss:$8 sps:$4 sm:$0xff]  }
 0x49a   :  { %v2769_v35 = vpack.c.bf16 %v2752_v6, %v2751_v40  ;;  %v4245_v40 = vld [vmem:[%s5871_s7 + $0x90] ss:$8 sps:$4 sm:$0xff]   ;;  %v4246_v6 = vld [vmem:[%s5871_s7 + $0xa4] ss:$8 sps:$4 sm:$0xff]  }
 0x49b   :  { %v2703_v60 = vpop.f32.mrb[160].mxu1 }
 0x49c   :  { %v2704_v36 = vadd.f32 %v2703_v60, %v2387_v48  ;;  %v2705_v56 = vpop.f32.mrb[161].mxu1  ;;  %3084 = vmatpush1.bf16.msra.mxu0 %v2769_v35  ;;  %v4248_v35 = vld [vmem:[%s5871_s7 + $0xa0] ss:$8 sps:$4 sm:$0xff]   ;;  %v4251_v48 = vld [vmem:[%s5873_s9 + $0x4] ss:$8 sps:$4 sm:$0xff]   ;;  %v2821_v60 = vpop.permute.xlu1 %2820  ;;  %s3576_s7 = sshll.u32 %s4324_s20, 4  ;;  %s3577_s7 = int_to_ptr.vmem [resolvable:$true] %s3576_s7 }
 0x49d   :  { %v2706_v18 = vpop.f32.mrb[162].mxu1  ;;  %3085 = vmatprep.subr.bf16.mxu0 %v5887_v7  ;;  %3827 = vmatprep.mubr.msk.bf16.mxu1 %vm3380_vm5, %v4251_v48  ;;  %s4292_s8 = scalar_lea.vmem %s3577_s7, 16  ;;  %s4296_s6 = scalar_lea.vmem %s3577_s7, 32 }
 0x49e   :  { %v2707_v10 = vadd.f32 %v2706_v18, %v2392_v1  ;;  %v2708_v58 = vpop.f32.mrb[163].mxu1  ;;  %v2753_v32 = vmax.f32 %v2704_v36, 0.0  ;;  %v2826_v18 = vpop.permute.xlu0 %2825  ;;  %p4293_p8 = scmp.ne.s32.totalorder %s3577_s7, %s4292_s8  ;;  %p4297_p9 = scmp.lt.s32.totalorder %s3577_s7, %s3577_s7 }
 0x49f   :  { %p4298_p10 = scmp.lt.s32.totalorder %s4296_s6, %s4292_s8 }
 0x4a0   :  { %v2754_v42 = vmax.f32 %v2707_v10, 0.0 }
 0x4a1   :  { %p4299_p11 = por %p4298_p10, %p4297_p9 }
 0x4a2   :  { %v2770_v15 = vpack.c.bf16 %v2754_v42, %v2753_v32 }
 0x4a3   :  { %v2711_v31 = vpop.f32.mrb[164].mxu1  ;;  %p4300_p12 = pnand %p4299_p11, %p4293_p8 }
 0x4a4   :  { %v2712_v24 = vadd.f32 %v2711_v31, %v2397_v14  ;;  %v2713_v54 = vpop.f32.mrb[165].mxu1  ;;  %3086 = vmatpush1.bf16.msra.mxu0 %v2770_v15  ;;  %v2831_v31 = vpop.permute.xlu1 %2830 }
 0x4a5   :  { %v2714_v26 = vpop.f32.mrb[166].mxu1  ;;  %3087 = vmatprep.subr.bf16.mxu0 %v5887_v7 }
 0x4a6   :  { %v2715_v39 = vadd.f32 %v2714_v26, %v2402_v52  ;;  %v2716_v13 = vpop.f32.mrb[167].mxu1  ;;  %v2755_v22 = vmax.f32 %v2712_v24, 0.0  ;;  %v2836_v26 = vpop.permute.xlu0 %2835 }
 0x4a8   :  { %v2756_v38 = vmax.f32 %v2715_v39, 0.0 }
 0x4aa   :  { %v2771_v37 = vpack.c.bf16 %v2756_v38, %v2755_v22 }
 0x4ab   :  { %v2719_v45 = vpop.f32.mrb[168].mxu1 }
 0x4ac   :  { %v2720_v62 = vadd.f32 %v2719_v45, %v2407_v29  ;;  %v2721_v41 = vpop.f32.mrb[169].mxu1  ;;  %3088 = vmatpush1.bf16.msra.mxu0 %v2771_v37  ;;  %v2841_v45 = vpop.permute.xlu1 %2840 }
 0x4ad   :  { %v2722_v57 = vpop.f32.mrb[170].mxu1  ;;  %3089 = vmatprep.subr.bf16.mxu0 %v5887_v7 }
 0x4ae   :  { %v2723_v17 = vadd.f32 %v2722_v57, %v2412_v53  ;;  %v2724_v19 = vpop.f32.mrb[171].mxu1  ;;  %v2757_v55 = vmax.f32 %v2720_v62, 0.0  ;;  %v2846_v57 = vpop.permute.xlu0 %2845 }
 0x4b0   :  { %v2758_v21 = vmax.f32 %v2723_v17, 0.0 }
 0x4b2   :  { %v2772_v20 = vpack.c.bf16 %v2758_v21, %v2757_v55 }
 0x4b3   :  { %v2727_v0 = vpop.f32.mrb[172].mxu1 }
 0x4b4   :  { %v2728_v63 = vadd.f32 %v2727_v0, %v2417_v5  ;;  %3090 = vmatpush1.bf16.msra.mxu0 %v2772_v20  ;;  %v2729_v8 = vpop.f32.mrb[173].mxu1  ;;  %v2851_v0 = vpop.permute.xlu1 %2850 }
 0x4b5   :  { %3091 = vmatprep.subr.bf16.mxu0 %v5887_v7  ;;  %v2730_v61 = vpop.f32.mrb[174].mxu1 }
 0x4b6   :  { %v2759_v16 = vmax.f32 %v2728_v63, 0.0  ;;  %v2731_v23 = vpop.f32.mrb[175].mxu1 }
 0x4b8   :  { %v2773_v27 = vpack.c.bf16 %v2759_v16, %v2759_v16  ;;  %v2856_v16 = vpop.permute.xlu0 %2855 }
 0x4ba   :  { %v3063_v49 = vsel %vm3061_vm4, %v2773_v27, 0 }
 0x4bb   :  { %3092 = vmatpush1.bf16.msra.mxu0 %v3063_v49 }
 0x4be   :  { %3098 = vmatmul.mubr.bf16.vlgmr.msra.gmra.mrb[124].mxu0 %v4216_v4 }
 0x4bf   :  { %3803 = vmatprep.mubr.msk.bf16.mxu0 %vm3027_vm3, %v4219_v9 }
 0x4c6   :  { %3106 = vmatmul.mubr.bf16.gmra.mrb[128].mxu0 %v4221_v33 }
 0x4c7   :  { %3804 = vmatprep.mubr.msk.bf16.mxu0 %vm3027_vm3, %v4222_v50  ;;  %v2861_v50 = vpop.permute.xlu1 %2860 }
 0x4ce   :  { %3114 = vmatmul.mubr.bf16.gmra.mrb[132].mxu0 %v4224_v30 }
 0x4cf   :  { %3805 = vmatprep.mubr.msk.bf16.mxu0 %vm3027_vm3, %v4225_v46 }
 0x4d6   :  { %3122 = vmatmul.mubr.bf16.gmra.mrb[136].mxu0 %v4227_v47 }
 0x4d7   :  { %3806 = vmatprep.mubr.msk.bf16.mxu0 %vm3027_vm3, %v4228_v59  ;;  %v2866_v59 = vpop.permute.xlu0 %2865 }
 0x4de   :  { %3130 = vmatmul.mubr.bf16.gmra.mrb[140].mxu0 %v4230_v11 }
 0x4df   :  { %3807 = vmatprep.mubr.msk.bf16.mxu0 %vm3027_vm3, %v4231_v28 }
 0x4e6   :  { %3138 = vmatmul.mubr.bf16.gmra.mrb[144].mxu0 %v4233_v34 }
 0x4e7   :  { %3808 = vmatprep.mubr.msk.bf16.mxu0 %vm3027_vm3, %v4234_v12 }
 0x4ee   :  { %3146 = vmatmul.mubr.bf16.gmra.mrb[148].mxu0 %v4236_v3 }
 0x4ef   :  { %3809 = vmatprep.mubr.msk.bf16.mxu0 %vm3027_vm3, %v4237_v2 }
 0x4f6   :  { %3154 = vmatmul.mubr.bf16.gmra.mrb[152].mxu0 %v4239_v43  ;;  %v2871_v43 = vpop.permute.xlu1 %2870 }
 0x4f7   :  { %3810 = vmatprep.mubr.msk.bf16.mxu0 %vm3027_vm3, %v4240_v44 }
 0x4fe   :  { %3162 = vmatmul.mubr.bf16.gmra.mrb[156].mxu0 %v4242_v51 }
 0x4ff   :  { %3811 = vmatprep.mubr.msk.bf16.mxu0 %vm3027_vm3, %v4243_v25 }
 0x506   :  { %3170 = vmatmul.mubr.bf16.gmra.mrb[160].mxu0 %v4245_v40  ;;  %v2876_v40 = vpop.permute.xlu0 %2875 }
 0x507   :  { %3812 = vmatprep.mubr.msk.bf16.mxu0 %vm3027_vm3, %v4246_v6 }
 0x50e   :  { %3178 = vmatmul.mubr.bf16.gmra.mrb[164].mxu0 %v4248_v35 }
 0x591   :  { %v3099_v36 = vpop.f32.mrb[124].mxu0 }
 0x592   :  { %v3100_v56 = vadd.f32 %v3099_v36, %v2821_v60  ;;  %v3101_v1 = vpop.f32.mrb[125].mxu0 }
 0x593   :  { %v3102_v10 = vpop.f32.mrb[126].mxu0  ;;  %v2881_v1 = vpop.permute.xlu1 %2880 }
 0x594   :  { %v3103_v58 = vadd.f32 %v3102_v10, %v2826_v18  ;;  %v3104_v32 = vpop.f32.mrb[127].mxu0  ;;  %v3186_v42 = vmax.f32 %v3100_v56, 0.0 }
 0x595   :  { %v2886_v32 = vpop.permute.xlu0 %2885 }
 0x596   :  { %v3187_v15 = vmax.f32 %v3103_v58, 0.0 }
 0x598   :  { %v3208_v14 = vpack.c.bf16 %v3187_v15, %v3186_v42 }
 0x599   :  { %v3107_v24 = vpop.f32.mrb[128].mxu0 }
 0x59a   :  { %v3108_v54 = vadd.f32 %v3107_v24, %v2831_v31  ;;  %v3109_v52 = vpop.f32.mrb[129].mxu0  ;;  %3403 = vmatpush1.bf16.msra.mxu1 %v3208_v14 }
 0x59b   :  { %v3110_v39 = vpop.f32.mrb[130].mxu0  ;;  %3404 = vmatprep.subr.bf16.mxu1 %v5887_v7  ;;  %v2891_v52 = vpop.permute.xlu1 %2890 }
 0x59c   :  { %v3111_v13 = vadd.f32 %v3110_v39, %v2836_v26  ;;  %v3112_v22 = vpop.f32.mrb[131].mxu0  ;;  %v3188_v38 = vmax.f32 %v3108_v54, 0.0 }
 0x59d   :  { %v2896_v22 = vpop.permute.xlu0 %2895 }
 0x59e   :  { %v3189_v37 = vmax.f32 %v3111_v13, 0.0 }
 0x5a0   :  { %v3209_v29 = vpack.c.bf16 %v3189_v37, %v3188_v38 }
 0x5a1   :  { %v3115_v62 = vpop.f32.mrb[132].mxu0 }
 0x5a2   :  { %v3116_v41 = vadd.f32 %v3115_v62, %v2841_v45  ;;  %v3117_v53 = vpop.f32.mrb[133].mxu0  ;;  %3405 = vmatpush1.bf16.msra.mxu1 %v3209_v29 }
 0x5a3   :  { %v3118_v17 = vpop.f32.mrb[134].mxu0  ;;  %3406 = vmatprep.subr.bf16.mxu1 %v5887_v7  ;;  %v2901_v53 = vpop.permute.xlu1 %2900 }
 0x5a4   :  { %v3119_v19 = vadd.f32 %v3118_v17, %v2846_v57  ;;  %v3120_v55 = vpop.f32.mrb[135].mxu0  ;;  %v3190_v21 = vmax.f32 %v3116_v41, 0.0 }
 0x5a5   :  { %v2906_v55 = vpop.permute.xlu0 %2905 }
 0x5a6   :  { %v3191_v20 = vmax.f32 %v3119_v19, 0.0 }
 0x5a8   :  { %v3210_v5 = vpack.c.bf16 %v3191_v20, %v3190_v21 }
 0x5a9   :  { %v3123_v63 = vpop.f32.mrb[136].mxu0 }
 0x5aa   :  { %v3124_v8 = vadd.f32 %v3123_v63, %v2851_v0  ;;  %v3125_v61 = vpop.f32.mrb[137].mxu0  ;;  %3407 = vmatpush1.bf16.msra.mxu1 %v3210_v5 }
 0x5ab   :  { %v3126_v23 = vpop.f32.mrb[138].mxu0  ;;  %3408 = vmatprep.subr.bf16.mxu1 %v5887_v7  ;;  %v2911_v61 = vpop.permute.xlu1 %2910 }
 0x5ac   :  { %v3127_v27 = vadd.f32 %v3126_v23, %v2856_v16  ;;  %v3128_v49 = vpop.f32.mrb[139].mxu0  ;;  %v3192_v4 = vmax.f32 %v3124_v8, 0.0 }
 0x5ad   :  { %v2916_v49 = vpop.permute.xlu0 %2915 }
 0x5ae   :  { %v3193_v9 = vmax.f32 %v3127_v27, 0.0 }
 0x5b0   :  { %v3211_v33 = vpack.c.bf16 %v3193_v9, %v3192_v4 }
 0x5b1   :  { %v3131_v30 = vpop.f32.mrb[140].mxu0 }
 0x5b2   :  { %v3132_v46 = vadd.f32 %v3131_v30, %v2861_v50  ;;  %v3133_v47 = vpop.f32.mrb[141].mxu0  ;;  %3409 = vmatpush1.bf16.msra.mxu1 %v3211_v33 }
 0x5b3   :  { %v3134_v11 = vpop.f32.mrb[142].mxu0  ;;  %3410 = vmatprep.subr.bf16.mxu1 %v5887_v7  ;;  %v2921_v47 = vpop.permute.xlu1 %2920 }
 0x5b4   :  { %v3135_v28 = vadd.f32 %v3134_v11, %v2866_v59  ;;  %v3136_v34 = vpop.f32.mrb[143].mxu0  ;;  %v3194_v12 = vmax.f32 %v3132_v46, 0.0 }
 0x5b5   :  { %v2926_v34 = vpop.permute.xlu0 %2925 }
 0x5b6   :  { %v3195_v3 = vmax.f32 %v3135_v28, 0.0 }
 0x5b8   :  { %v3212_v2 = vpack.c.bf16 %v3195_v3, %v3194_v12 }
 0x5b9   :  { %v3139_v44 = vpop.f32.mrb[144].mxu0 }
 0x5ba   :  { %v3140_v51 = vadd.f32 %v3139_v44, %v2871_v43  ;;  %v3141_v25 = vpop.f32.mrb[145].mxu0  ;;  %3411 = vmatpush1.bf16.msra.mxu1 %v3212_v2 }
 0x5bb   :  { %v3142_v6 = vpop.f32.mrb[146].mxu0  ;;  %3412 = vmatprep.subr.bf16.mxu1 %v5887_v7  ;;  %v4249_v25 = vld [vmem:[%s5873_s9] ss:$8 sps:$4 sm:$0xff]  }
 0x5bc   :  { %v3143_v35 = vadd.f32 %v3142_v6, %v2876_v40  ;;  %v3144_v48 = vpop.f32.mrb[147].mxu0  ;;  %v3196_v60 = vmax.f32 %v3140_v51, 0.0  ;;  %v4252_v40 = vld [vmem:[%s5873_s9 + $0x14] ss:$8 sps:$4 sm:$0xff]   ;;  %v4255_v6 = vld [vmem:[%s5873_s9 + $0x24] ss:$8 sps:$4 sm:$0xff]  }
 0x5bd   :  { %v4258_v48 = vld [vmem:[%s5873_s9 + $0x34] ss:$8 sps:$4 sm:$0xff]  }
 0x5be   :  { %v3197_v36 = vmax.f32 %v3143_v35, 0.0  ;;  %v4257_v35 = vld [vmem:[%s5873_s9 + $0x20] ss:$8 sps:$4 sm:$0xff]  }
 0x5c0   :  { %v3213_v56 = vpack.c.bf16 %v3197_v36, %v3196_v60  ;;  %v4260_v60 = vld [vmem:[%s5873_s9 + $0x30] ss:$8 sps:$4 sm:$0xff]   ;;  %v4261_v36 = vld [vmem:[%s5873_s9 + $0x44] ss:$8 sps:$4 sm:$0xff]  }
 0x5c1   :  { %v3147_v18 = vpop.f32.mrb[148].mxu0 }
 0x5c2   :  { %v3148_v10 = vadd.f32 %v3147_v18, %v2881_v1  ;;  %v3149_v58 = vpop.f32.mrb[149].mxu0  ;;  %3413 = vmatpush1.bf16.msra.mxu1 %v3213_v56  ;;  %v4263_v56 = vld [vmem:[%s5873_s9 + $0x40] ss:$8 sps:$4 sm:$0xff]   ;;  %v4264_v1 = vld [vmem:[%s5873_s9 + $0x54] ss:$8 sps:$4 sm:$0xff]  }
 0x5c3   :  { %v3150_v42 = vpop.f32.mrb[150].mxu0  ;;  %3414 = vmatprep.subr.bf16.mxu1 %v5887_v7  ;;  %v4266_v18 = vld [vmem:[%s5873_s9 + $0x50] ss:$8 sps:$4 sm:$0xff]   ;;  %v4269_v58 = vld [vmem:[%s5873_s9 + $0x60] ss:$8 sps:$4 sm:$0x3f]  }
 0x5c4   :  { %v3151_v15 = vadd.f32 %v3150_v42, %v2886_v32  ;;  %v3152_v14 = vpop.f32.mrb[151].mxu0  ;;  %v3198_v31 = vmax.f32 %v3148_v10, 0.0  ;;  %v4267_v10 = vld [vmem:[%s5873_s9 + $0x64] ss:$8 sps:$4 sm:$0x3f]   ;;  %v4322_v32 = vmov 0.0   ;;  %v3250_v42 = vpop.permute.xlu1 %3249 }
 0x5c5   :  { %3949 = vmatprep.subr.bf16.mxu0 %v4322_v32  ;;  %3963 = vmatprep.mubr.msk.bf16.mxu0 %vm4323_vm6, %v4322_v32 }
 0x5c6   :  { %v3199_v24 = vmax.f32 %v3151_v15, 0.0 }
 0x5c8   :  { %v3214_v54 = vpack.c.bf16 %v3199_v24, %v3198_v31  ;;  %v3255_v24 = vpop.permute.xlu0 %3254 }
 0x5c9   :  { %v3155_v26 = vpop.f32.mrb[152].mxu0 }
 0x5ca   :  { %v3156_v39 = vadd.f32 %v3155_v26, %v2891_v52  ;;  %v3157_v13 = vpop.f32.mrb[153].mxu0  ;;  %3415 = vmatpush1.bf16.msra.mxu1 %v3214_v54 }
 0x5cb   :  { %v3158_v38 = vpop.f32.mrb[154].mxu0  ;;  %3416 = vmatprep.subr.bf16.mxu1 %v5887_v7 }
 0x5cc   :  { %v3159_v37 = vadd.f32 %v3158_v38, %v2896_v22  ;;  %v3160_v29 = vpop.f32.mrb[155].mxu0  ;;  %v3200_v45 = vmax.f32 %v3156_v39, 0.0  ;;  %v3260_v38 = vpop.permute.xlu1 %3259 }
 0x5ce   :  { %v3201_v62 = vmax.f32 %v3159_v37, 0.0 }
 0x5d0   :  { %v3215_v41 = vpack.c.bf16 %v3201_v62, %v3200_v45  ;;  %v3265_v62 = vpop.permute.xlu0 %3264 }
 0x5d1   :  { %v3163_v57 = vpop.f32.mrb[156].mxu0 }
 0x5d2   :  { %v3164_v17 = vadd.f32 %v3163_v57, %v2901_v53  ;;  %v3165_v19 = vpop.f32.mrb[157].mxu0  ;;  %3417 = vmatpush1.bf16.msra.mxu1 %v3215_v41 }
 0x5d3   :  { %v3166_v21 = vpop.f32.mrb[158].mxu0  ;;  %3418 = vmatprep.subr.bf16.mxu1 %v5887_v7 }
 0x5d4   :  { %v3167_v20 = vadd.f32 %v3166_v21, %v2906_v55  ;;  %v3168_v5 = vpop.f32.mrb[159].mxu0  ;;  %v3202_v0 = vmax.f32 %v3164_v17, 0.0  ;;  %v3270_v21 = vpop.permute.xlu1 %3269 }
 0x5d6   :  { %v3203_v63 = vmax.f32 %v3167_v20, 0.0 }
 0x5d8   :  { %v3216_v8 = vpack.c.bf16 %v3203_v63, %v3202_v0  ;;  %v3275_v63 = vpop.permute.xlu0 %3274 }
 0x5d9   :  { %v3171_v16 = vpop.f32.mrb[160].mxu0 }
 0x5da   :  { %v3172_v23 = vadd.f32 %v3171_v16, %v2911_v61  ;;  %v3173_v27 = vpop.f32.mrb[161].mxu0  ;;  %3419 = vmatpush1.bf16.msra.mxu1 %v3216_v8 }
 0x5db   :  { %v3174_v4 = vpop.f32.mrb[162].mxu0  ;;  %3420 = vmatprep.subr.bf16.mxu1 %v5887_v7 }
 0x5dc   :  { %v3175_v9 = vadd.f32 %v3174_v4, %v2916_v49  ;;  %v3176_v33 = vpop.f32.mrb[163].mxu0  ;;  %v3204_v50 = vmax.f32 %v3172_v23, 0.0  ;;  %v3280_v4 = vpop.permute.xlu1 %3279 }
 0x5de   :  { %v3205_v30 = vmax.f32 %v3175_v9, 0.0 }
 0x5e0   :  { %v3217_v46 = vpack.c.bf16 %v3205_v30, %v3204_v50  ;;  %v3285_v30 = vpop.permute.xlu0 %3284 }
 0x5e1   :  { %v3179_v59 = vpop.f32.mrb[164].mxu0 }
 0x5e2   :  { %v3180_v11 = vadd.f32 %v3179_v59, %v2921_v47  ;;  %v3181_v28 = vpop.f32.mrb[165].mxu0  ;;  %3421 = vmatpush1.bf16.msra.mxu1 %v3217_v46 }
 0x5e3   :  { %v3182_v12 = vpop.f32.mrb[166].mxu0  ;;  %3422 = vmatprep.subr.bf16.mxu1 %v5887_v7  ;;  %v4254_v7 = vld [vmem:[%s5873_s9 + $0x10] ss:$8 sps:$4 sm:$0xff]  }
 0x5e4   :  { %v3183_v3 = vadd.f32 %v3182_v12, %v2926_v34  ;;  %v3184_v2 = vpop.f32.mrb[167].mxu0  ;;  %v3206_v43 = vmax.f32 %v3180_v11, 0.0  ;;  %v3290_v12 = vpop.permute.xlu1 %3289 }
 0x5e6   :  { %v3207_v44 = vmax.f32 %v3183_v3, 0.0 }
 0x5e8   :  { %v3218_v51 = vpack.c.bf16 %v3207_v44, %v3206_v43  ;;  %v3295_v44 = vpop.permute.xlu0 %3294 }
 0x5ea   :  { %3423 = vmatpush1.bf16.msra.mxu1 %v3218_v51 }
 0x5ed   :  { %3435 = vmatmul.mubr.bf16.vlgmr.msra.gmra.mrb[176].mxu1 %v4249_v25 }
 0x5ee   :  { %3828 = vmatprep.mubr.msk.bf16.mxu1 %vm3380_vm5, %v4252_v40 }
 0x5f5   :  { %3443 = vmatmul.mubr.bf16.gmra.mrb[180].mxu1 %v4254_v7 }
 0x5f6   :  { %3829 = vmatprep.mubr.msk.bf16.mxu1 %vm3380_vm5, %v4255_v6 }
 0x5fd   :  { %3451 = vmatmul.mubr.bf16.gmra.mrb[184].mxu1 %v4257_v35 }
 0x5fe   :  { %3830 = vmatprep.mubr.msk.bf16.mxu1 %vm3380_vm5, %v4258_v48  ;;  %v3300_v48 = vpop.permute.xlu1 %3299 }
 0x605   :  { %3459 = vmatmul.mubr.bf16.gmra.mrb[188].mxu1 %v4260_v60 }
 0x606   :  { %3831 = vmatprep.mubr.msk.bf16.mxu1 %vm3380_vm5, %v4261_v36 }
 0x60d   :  { %3467 = vmatmul.mubr.bf16.gmra.mrb[192].mxu1 %v4263_v56 }
 0x60e   :  { %3832 = vmatprep.mubr.msk.bf16.mxu1 %vm3380_vm5, %v4264_v1  ;;  %v3305_v1 = vpop.permute.xlu0 %3304 }
 0x615   :  { %3475 = vmatmul.mubr.bf16.gmra.mrb[196].mxu1 %v4266_v18 }
 0x616   :  { %3833 = vmatprep.mubr.msk.bf16.mxu1 %vm3380_vm5, %v4267_v10 }
 0x61d   :  { %3483 = vmatmul.mubr.bf16.gmra.mrb[200].mxu1 %v4269_v58 }
 0x6c0   :  { %v3436_v15 = vpop.f32.mrb[176].mxu1 }
 0x6c1   :  { %v3437_v14 = vadd.f32 %v3436_v15, %v3250_v42  ;;  %v3438_v31 = vpop.f32.mrb[177].mxu1 }
 0x6c2   :  { %v3439_v54 = vpop.f32.mrb[178].mxu1  ;;  %v3310_v31 = vpop.permute.xlu1 %3309 }
 0x6c3   :  { %v3440_v52 = vadd.f32 %v3439_v54, %v3255_v24  ;;  %v3441_v26 = vpop.f32.mrb[179].mxu1  ;;  %v3491_v39 = vmax.f32 %v3437_v14, 0.0 }
 0x6c4   :  { %v3315_v26 = vpop.permute.xlu0 %3314 }
 0x6c5   :  { %v3492_v13 = vmax.f32 %v3440_v52, 0.0 }
 0x6c7   :  { %v3505_v22 = vpack.c.bf16 %v3492_v13, %v3491_v39 }
 0x6c8   :  { %v3444_v37 = vpop.f32.mrb[180].mxu1 }
 0x6c9   :  { %v3445_v29 = vadd.f32 %v3444_v37, %v3260_v38  ;;  %v3446_v45 = vpop.f32.mrb[181].mxu1  ;;  %3950 = vmatpush3.bf16.msra.mxu0 %v3505_v22 }
 0x6ca   :  { %v3447_v41 = vpop.f32.mrb[182].mxu1  ;;  %3951 = vmatprep.subr.bf16.mxu0 %v4322_v32 }
 0x6cb   :  { %v3448_v53 = vadd.f32 %v3447_v41, %v3265_v62  ;;  %v3449_v57 = vpop.f32.mrb[183].mxu1  ;;  %v3493_v17 = vmax.f32 %v3445_v29, 0.0  ;;  %v3512_v62 = vld [vmem:[%s5875_s11] sm:$0x1]  ;;  %v3519_v41 = vlaneseq }
 0x6cd   :  { %v3494_v19 = vmax.f32 %v3448_v53, 0.0  ;;  %v3520_v53 = vshrl.u32 %v3519_v41, 7 }
 0x6cf   :  { %v3506_v55 = vpack.c.bf16 %v3494_v19, %v3493_v17  ;;  %v3521_v57 = vsub.s32 0, %v3520_v53  ;;  %v3517_v17 = vpop.permute.xlu1 %3516 }
 0x6d0   :  { %v3452_v20 = vpop.f32.mrb[184].mxu1 }
 0x6d1   :  { %v3453_v5 = vadd.f32 %v3452_v20, %v3270_v21  ;;  %v3454_v0 = vpop.f32.mrb[185].mxu1  ;;  %3952 = vmatpush3.bf16.msra.mxu0 %v3506_v55 }
 0x6d2   :  { %v3455_v8 = vpop.f32.mrb[186].mxu1  ;;  %3953 = vmatprep.subr.bf16.mxu0 %v4322_v32 }
 0x6d3   :  { %v3456_v61 = vadd.f32 %v3455_v8, %v3275_v63  ;;  %v3457_v16 = vpop.f32.mrb[187].mxu1  ;;  %v3495_v23 = vmax.f32 %v3453_v5, 0.0 }
 0x6d5   :  { %v3496_v27 = vmax.f32 %v3456_v61, 0.0 }
 0x6d7   :  { %v3507_v49 = vpack.c.bf16 %v3496_v27, %v3495_v23 }
 0x6d8   :  { %v3460_v9 = vpop.f32.mrb[188].mxu1 }
 0x6d9   :  { %v3461_v33 = vadd.f32 %v3460_v9, %v3280_v4  ;;  %v3462_v50 = vpop.f32.mrb[189].mxu1  ;;  %3954 = vmatpush3.bf16.msra.mxu0 %v3507_v49 }
 0x6da   :  { %v3463_v46 = vpop.f32.mrb[190].mxu1  ;;  %3955 = vmatprep.subr.bf16.mxu0 %v4322_v32 }
 0x6db   :  { %v3464_v47 = vadd.f32 %v3463_v46, %v3285_v30  ;;  %v3465_v59 = vpop.f32.mrb[191].mxu1  ;;  %v3497_v11 = vmax.f32 %v3461_v33, 0.0 }
 0x6dd   :  { %v3498_v28 = vmax.f32 %v3464_v47, 0.0 }
 0x6df   :  { %v3508_v34 = vpack.c.bf16 %v3498_v28, %v3497_v11 }
 0x6e0   :  { %v3468_v3 = vpop.f32.mrb[192].mxu1 }
 0x6e1   :  { %v3469_v2 = vadd.f32 %v3468_v3, %v3290_v12  ;;  %v3470_v43 = vpop.f32.mrb[193].mxu1  ;;  %3956 = vmatpush3.bf16.msra.mxu0 %v3508_v34 }
 0x6e2   :  { %v3471_v51 = vpop.f32.mrb[194].mxu1  ;;  %3957 = vmatprep.subr.bf16.mxu0 %v4322_v32 }
 0x6e3   :  { %v3472_v25 = vadd.f32 %v3471_v51, %v3295_v44  ;;  %v3473_v40 = vpop.f32.mrb[195].mxu1  ;;  %v3499_v7 = vmax.f32 %v3469_v2, 0.0 }
 0x6e5   :  { %v3500_v6 = vmax.f32 %v3472_v25, 0.0 }
 0x6e7   :  { %v3509_v35 = vpack.c.bf16 %v3500_v6, %v3499_v7 }
 0x6e8   :  { %v3476_v60 = vpop.f32.mrb[196].mxu1 }
 0x6e9   :  { %v3477_v36 = vadd.f32 %v3476_v60, %v3300_v48  ;;  %v3478_v56 = vpop.f32.mrb[197].mxu1  ;;  %3958 = vmatpush3.bf16.msra.mxu0 %v3509_v35 }
 0x6ea   :  { %v3479_v18 = vpop.f32.mrb[198].mxu1  ;;  %3959 = vmatprep.subr.bf16.mxu0 %v4322_v32 }
 0x6eb   :  { %v3480_v10 = vadd.f32 %v3479_v18, %v3305_v1  ;;  %v3481_v58 = vpop.f32.mrb[199].mxu1  ;;  %v3501_v42 = vmax.f32 %v3477_v36, 0.0 }
 0x6ed   :  { %v3502_v15 = vmax.f32 %v3480_v10, 0.0 }
 0x6ef   :  { %v3510_v14 = vpack.c.bf16 %v3502_v15, %v3501_v42 }
 0x6f0   :  { %v3484_v24 = vpop.f32.mrb[200].mxu1 }
 0x6f1   :  { %v3485_v54 = vadd.f32 %v3484_v24, %v3310_v31  ;;  %v3486_v52 = vpop.f32.mrb[201].mxu1  ;;  %3960 = vmatpush3.bf16.msra.mxu0 %v3510_v14 }
 0x6f2   :  { %v3487_v39 = vpop.f32.mrb[202].mxu1  ;;  %3961 = vmatprep.subr.bf16.mxu0 %v4322_v32  ;;  %v3522_v32 = vrot.slane %v3517_v17, %v3521_v57 }
 0x6f3   :  { %v3488_v13 = vadd.f32 %v3487_v39, %v3315_v26  ;;  %v3489_v22 = vpop.f32.mrb[203].mxu1  ;;  %v3503_v38 = vmax.f32 %v3485_v54, 0.0 }
 0x6f5   :  { %v3504_v37 = vmax.f32 %v3488_v13, 0.0 }
 0x6f7   :  { %v3511_v29 = vpack.c.bf16 %v3504_v37, %v3503_v38 }
 0x6f9   :  { %v3527_v45 = vsel %vm2585_vm2, %v3511_v29, 0 }
 0x6fa   :  { %3962 = vmatpush3.bf16.msra.mxu0 %v3527_v45 }
 0x6fd   :  { %3964 = vmatmul.mubr.msk.bf16.vlgmr.msra.gmra.mrb[168].mxu0 %vm2542_vm1, %v3512_v62 }
 0x7d0   :  { %v3563_v19 = vpop.f32.mrb[168].mxu0 }
 0x7d1   :  { %v3564_v55 = vadd.f32 %v3563_v19, %v3522_v32  ;;  %v3965_v21 = vpop.f32.mrb[169].mxu0 }
 0x7d2   :  { %v3566_v20 = vpop.f32.mrb[170].mxu0 }
 0x7d3   :  { %3569 = vst [vmem:[#allocation6] sm:$0x1] %v3564_v55  ;;  %v3966_v5 = vpop.f32.mrb[171].mxu0 }
 0x7d4   :  { %4303 = shalt.err (!%p4300_p12)
}
 0x7d5   :  { %s4304_s22 = scalar_lea.hbm %s5877_s13, 16 }
 0x7d6   :  { %p4305_p13 = scmp.ne.s32.totalorder %s5877_s13, %s4304_s22  ;;  %p4308_p0 = scmp.lt.u32.totalorder %s4304_s22, %s5877_s13 }
 0x7d8   :  { %p4310_p1 = pnand %p4308_p0, %p4305_p13 }
 0x7da   :  { %4313 = shalt.err (!%p4310_p1)
}
 0x7db   :  { %3579 = dma.vmem_to_hbm [thread:$0]  %s3577_s7, 16, %s5877_s13, [#allocation5]  }
 0x7dc   :  { %4316 = dma.done.wait [#allocation5], 16  }
 0x7dd   :  { %4317 = vsyncadd [#allocation5], 4294967280 }
 0x7de   :  { %3583 = vsyncpa [#allocation4], 1 }
 0x7df   :  { %3584 = vsyncpa [#allocation5], 1 }

</bundles_post_ra>
